<compile_context>
chip_gen: v6e
topology: v6e:2x2x1
jax: 0.10.0
libtpu: 0.0.40
codegen_flags: <defaults>
</compile_context>

<pallas_src>
import functools

import jax
import jax.numpy as jnp
import numpy as np
from jax.experimental import pallas as pl
from jax.experimental.pallas import tpu as pltpu


# -----------------------------------------------------------------------------
# Small helpers
# -----------------------------------------------------------------------------
def _round_up(x, m):
    return ((x + m - 1) // m) * m


def _bn_silu(y, sc, b):
    """Folded-BN scale/bias + SiLU in f32 (VPU/EUP).  sc/b: (1, C)."""
    y = y * sc + b
    return y * jax.nn.sigmoid(y)


def _pw_mxu(y3d, w_bf16, sc, b):
    """Pointwise (1x1) conv as ONE 2-D MXU matmul (bf16 in, f32 acc).

    y3d: (B, Wp, Cin) f32 with Wp a multiple of 8, so the (B, Wp) -> B*Wp collapse
    and the inverse expand are layout-trivial (sublane tiles unchanged).
    """
    nb, wp, cin = y3d.shape
    lhs = y3d.reshape(nb * wp, cin).astype(jnp.bfloat16)
    out = jnp.dot(lhs, w_bf16, preferred_element_type=jnp.float32)
    out = _bn_silu(out, sc, b)
    return out.reshape(nb, wp, out.shape[-1])


# -----------------------------------------------------------------------------
# Fused CIB kernel: dw3 -> pw -> dw(K3) -> pw -> dw3 (+ residual)
# -----------------------------------------------------------------------------
def _cib_kernel(x_ref,
                w1_ref, sc1_ref, b1_ref,
                w2_ref, sc2_ref, b2_ref,
                w3_ref, sc3_ref, b3_ref,
                w4_ref, sc4_ref, b4_ref,
                w5_ref, sc5_ref, b5_ref,
                o_ref, buf2_ref, buf4_ref,
                *, H, W, TH, K3, add, band):
    h3 = K3 // 2
    T = h3 + 2                    # total halo (global input pad)
    E = h3 + 1                    # halo remaining after layers 1/2
    R1 = TH + 2 * E               # rows of the layer-1/2 extended region
    R3 = TH + 2                   # rows of the layer-3/4 extended region
    W1p = buf2_ref.shape[1]       # padded (multiple-of-8) region widths
    W3p = buf4_ref.shape[1]
    c1 = x_ref.shape[-1]
    ch = buf2_ref.shape[-1]
    c2 = buf4_ref.shape[-1]

    t = pl.program_id(1)
    r0 = t * TH                   # first output image row of this tile
    if TH % 8 == 0:
        r0 = pl.multiple_of(r0, 8)

    # Grid-invariant parameters (pre-cast on the host): load once per grid step.
    w1 = w1_ref[...]; sc1 = sc1_ref[...]; b1 = b1_ref[...]
    w2 = w2_ref[...]; sc2 = sc2_ref[...]; b2 = b2_ref[...]
    w3 = w3_ref[...]; sc3 = sc3_ref[...]; b3 = b3_ref[...]
    w4 = w4_ref[...]; sc4 = sc4_ref[...]; b4 = b4_ref[...]
    w5 = w5_ref[...]; sc5 = sc5_ref[...]; b5 = b5_ref[...]

    # ---- layers 1+2 fused (dw3x3 -> BN/SiLU -> pw1x1 -> BN/SiLU), row bands ----
    # Banding (static unrolled loop, band ~8 rows) bounds the live f32 accumulator so
    # the tap loop stays in vregs instead of spilling a full (R1, W1p, c1) region.
    # TODO(synk): width taps could use pltpu.roll (XLU) on a per-ki slab instead of
    # K separate column-offset loads; loads currently co-issue with the VALU MACs.
    for rb in range(0, R1, band):
        nb = min(band, R1 - rb)
        acc = jnp.zeros((nb, W1p, c1), jnp.float32)
        for ki in range(3):
            for kj in range(3):
                tap = x_ref[pl.ds(r0 + rb + ki, nb), pl.ds(kj, W1p), :]
                acc = acc + tap.astype(jnp.float32) * w1[ki * 3 + kj]
        y = _bn_silu(acc, sc1, b1)
        y = _pw_mxu(y, w2, sc2, b2)
        buf2_ref[rb:rb + nb, :, :] = y.astype(buf2_ref.dtype)

    # ---- reproduce layer-3's zero padding: zero the out-of-image strips of buf2 ----
    # (replaces the old full-tile iota/compare/select mask with tiny border stores)
    buf2_ref[:, 0:E, :] = jnp.zeros((R1, E, ch), buf2_ref.dtype)
    buf2_ref[:, W + E:W1p, :] = jnp.zeros((R1, W1p - W - E, ch), buf2_ref.dtype)
    zrow2 = jnp.zeros((1, W1p, ch), buf2_ref.dtype)
    for r in range(E):
        @pl.when(r0 < E - r)                       # image row (r0 - E + r) < 0
        def _(r=r):
            buf2_ref[r:r + 1, :, :] = zrow2

        @pl.when(r0 + (TH + E - 1 - r) >= H)       # image row >= H
        def _(r=r):
            buf2_ref[R1 - 1 - r:R1 - r, :, :] = zrow2

    # ---- layers 3+4 fused (dw K3xK3 -> BN/SiLU -> pw1x1 -> BN/SiLU), row bands ----
    for rb in range(0, R3, band):
        nb = min(band, R3 - rb)
        acc = jnp.zeros((nb, W3p, ch), jnp.float32)
        for ki in range(K3):
            for kj in range(K3):
                tap = buf2_ref[rb + ki:rb + ki + nb, kj:kj + W3p, :]
                acc = acc + tap.astype(jnp.float32) * w3[ki * K3 + kj]
        y = _bn_silu(acc, sc3, b3)
        y = _pw_mxu(y, w4, sc4, b4)
        buf4_ref[rb:rb + nb, :, :] = y.astype(buf4_ref.dtype)

    # ---- zero padding for layer 5 ----
    buf4_ref[:, 0:1, :] = jnp.zeros((R3, 1, c2), buf4_ref.dtype)
    buf4_ref[:, W + 1:W3p, :] = jnp.zeros((R3, W3p - W - 1, c2), buf4_ref.dtype)
    zrow4 = jnp.zeros((1, W3p, c2), buf4_ref.dtype)

    @pl.when(r0 < 1)
    def _():
        buf4_ref[0:1, :, :] = zrow4

    @pl.when(r0 + TH >= H)
    def _():
        buf4_ref[R3 - 1:R3, :, :] = zrow4

    # ---- layer 5: dw3x3 -> BN/SiLU (+ fused residual), row bands ----
    for rb in range(0, TH, band):
        nb = min(band, TH - rb)
        acc = jnp.zeros((nb, W, c2), jnp.float32)
        for ki in range(3):
            for kj in range(3):
                tap = buf4_ref[rb + ki:rb + ki + nb, kj:kj + W, :]
                acc = acc + tap.astype(jnp.float32) * w5[ki * 3 + kj]
        y = _bn_silu(acc, sc5, b5)
        if add:
            res = x_ref[pl.ds(r0 + T + rb, nb), pl.ds(T, W), :]
            y = y + res.astype(jnp.float32)
        o_ref[rb:rb + nb, :, :] = y.astype(o_ref.dtype)


# -----------------------------------------------------------------------------
# Wrapper
# -----------------------------------------------------------------------------
def _vmem_budget_bytes():
    """Generation-aware VMEM budget (bytes): ~70% of physical VMEM."""
    cap = 64 * 1024 * 1024                        # conservative default (v7x physical)
    try:
        info = pltpu.get_tpu_info()
        cap = int(getattr(info, "vmem_capacity_bytes", cap))
    except Exception:
        pass
    return int(cap * 0.7)


def _pick_tile_h(H, budget, footprint):
    """Largest divisor of H under the VMEM budget; prefer multiples of 8 / >=2 tiles."""
    divisors = [d for d in range(H, 0, -1) if H % d == 0]
    fitting = [d for d in divisors if footprint(d) <= budget]
    if not fitting:
        return 1
    for pred in (lambda d: d % 8 == 0 and d < H,   # sublane-aligned, >=2 row tiles
                 lambda d: d % 8 == 0,
                 lambda d: d < H,
                 lambda d: True):
        cand = [d for d in fitting if pred(d)]
        if cand:
            return cand[0]
    return fitting[0]


def cib_forward(x_nchw, params, shortcut=True, band=8):
    """Forward of ultralytics CIB.  x_nchw: (N, c1, H, W) float32 (NCHW)."""
    N, c1, H, W = x_nchw.shape
    K3 = int(params["k3"])
    ch = params["w2"].shape[1]
    c2 = params["w4"].shape[1]
    add = bool(shortcut and c1 == c2)

    h3 = K3 // 2
    T = h3 + 2                                   # total halo of the fused chain
    E = h3 + 1                                   # halo left after layers 1/2
    # Region widths padded to multiples of 8 so every (rows, width) -> rows*width
    # collapse feeding the pointwise MXU matmul is sublane-tile aligned.
    W3p = _round_up(W + 2, 8)                    # layer-3/4 (and layer-5 input) width
    W1p = _round_up(W3p + K3 - 1, 8)             # layer-1/2 (and layer-3 input) width
    Wpad = W1p + 2                               # padded input width
    Hp = H + 2 * T

    in_bytes = jnp.dtype(x_nchw.dtype).itemsize
    out_bytes = in_bytes

    def footprint(th):
        r1, r3 = th + 2 * E, th + 2
        scratch = 2 * (r1 * W1p * ch + r3 * W3p * c2)         # bf16 inter-layer buffers
        resident_in = 2 * Hp * Wpad * c1 * in_bytes           # whole padded image, dbl-buffered
        out_blk = 2 * th * W * c2 * out_bytes                 # output block, dbl-buffered
        weights = 4 * (c1 * ch + ch * c2 + (18 + K3 * K3 + 10) * max(c1, ch, c2))
        return scratch + resident_in + out_blk + weights

    budget = _vmem_budget_bytes()
    TH = _pick_tile_h(H, budget, footprint)
    R1, R3 = TH + 2 * E, TH + 2

    # NCHW -> NHWC (channels on lanes) + ONE global zero pad by the total halo.
    # TODO(synk): for very large images switch the input to memory_space=pl.ANY and
    # manually double-buffer only the (TH + 2T)-row window per tile (P4) instead of
    # keeping the whole padded image resident (and optionally cast it to bf16).
    x = jnp.transpose(x_nchw, (0, 2, 3, 1))
    xp = jnp.pad(x, ((0, 0), (T, T), (T, Wpad - W - T), (0, 0)))

    # Pre-cast weights on the host: pointwise weights -> bf16 (MXU operands),
    # depthwise taps / folded-BN params stay f32 (VPU compute dtype).
    f32 = jnp.float32
    args = (xp,
            params["w1"].astype(f32), params["s1"].astype(f32), params["b1"].astype(f32),
            params["w2"].astype(jnp.bfloat16), params["s2"].astype(f32), params["b2"].astype(f32),
            params["w3"].astype(f32), params["s3"].astype(f32), params["b3"].astype(f32),
            params["w4"].astype(jnp.bfloat16), params["s4"].astype(f32), params["b4"].astype(f32),
            params["w5"].astype(f32), params["s5"].astype(f32), params["b5"].astype(f32))

    def full(shape):
        nd = len(shape)
        return pl.BlockSpec(shape, lambda n, t: (0,) * nd)

    in_specs = [
        # Whole padded image of batch element n resident in VMEM; the kernel slices
        # the (TH + 2T)-row window for tile t with pl.ds (halo rows overlap tiles).
        pl.BlockSpec((None, Hp, Wpad, c1), lambda n, t: (n, 0, 0, 0)),
        full(args[1].shape), full(args[2].shape), full(args[3].shape),
        full(args[4].shape), full(args[5].shape), full(args[6].shape),
        full(args[7].shape), full(args[8].shape), full(args[9].shape),
        full(args[10].shape), full(args[11].shape), full(args[12].shape),
        full(args[13].shape), full(args[14].shape), full(args[15].shape),
    ]

    kernel = functools.partial(_cib_kernel, H=H, W=W, TH=TH, K3=K3, add=add, band=band)
    y = pl.pallas_call(
        kernel,
        out_shape=jax.ShapeDtypeStruct((N, H, W, c2), x.dtype),
        grid=(N, H // TH),
        in_specs=in_specs,
        # TODO(synk): for c2 < 128 a lane-dense output layout (e.g. (N, H, W*c2) or
        # spatial-on-lanes) would avoid masked partial stores; production CIB channel
        # counts are >= 128 so channels-last is kept for generality.
        out_specs=pl.BlockSpec((None, TH, W, c2), lambda n, t: (n, t, 0, 0)),
        scratch_shapes=[pltpu.VMEM((R1, W1p, ch), jnp.bfloat16),
                        pltpu.VMEM((R3, W3p, c2), jnp.bfloat16)],
        compiler_params=pltpu.CompilerParams(
            # Row tiles are fully independent -> both axes parallel (v7x 2-TC sharding).
            dimension_semantics=("parallel", "parallel"),
            vmem_limit_bytes=budget),
    )(*args)
    return jnp.transpose(y, (0, 3, 1, 2))


# -----------------------------------------------------------------------------
# Parameter construction (deterministic, synthetic — BN folded at init)
# -----------------------------------------------------------------------------
def _fold_bn(gamma, beta, mean, var, eps=1e-3):
    scale = gamma / jnp.sqrt(var + eps)
    return scale, beta - mean * scale


def _bn_params(key, c):
    kg, kb, km, kv = jax.random.split(key, 4)
    gamma = 1.0 + 0.1 * jax.random.normal(kg, (c,), jnp.float32)
    beta = 0.1 * jax.random.normal(kb, (c,), jnp.float32)
    mean = 0.1 * jax.random.normal(km, (c,), jnp.float32)
    var = jnp.abs(jax.random.normal(kv, (c,), jnp.float32)) + 0.5
    return _fold_bn(gamma, beta, mean, var)


def _dw_layer(key, c, k):
    kw, kbn = jax.random.split(key)
    w = 0.1 * jax.random.normal(kw, (k, k, c), jnp.float32)
    s, b = _bn_params(kbn, c)
    return w, s, b


def _pw_layer(key, cin, cout):
    kw, kbn = jax.random.split(key)
    w = 0.1 * jax.random.normal(kw, (cin, cout), jnp.float32)
    s, b = _bn_params(kbn, cout)
    return w, s, b


def init_cib_params(key, c1, c2, e=0.5, lk=False):
    """Synthetic CIB parameters with BatchNorm folded (inference semantics)."""
    c_ = int(c2 * e)
    ch = 2 * c_
    keys = jax.random.split(key, 6)
    w1, s1, b1 = _dw_layer(keys[0], c1, 3)            # Conv(c1, c1, 3, g=c1)
    w2, s2, b2 = _pw_layer(keys[1], c1, ch)           # Conv(c1, 2c_, 1)
    extra = {}
    if lk:
        # RepVGGDW(2c_): dw7x7(BN) + dw3x3(BN), then SiLU — fused (inference-
        # equivalent) into a single depthwise 7x7 with folded BN.  The raw branch
        # parameters are kept so the reference checks the fusion itself.
        w7, s7, b7 = _dw_layer(keys[2], ch, 7)
        w3s, s3s, b3s = _dw_layer(keys[5], ch, 3)
        w3 = w7 * s7 + jnp.pad(w3s * s3s, ((2, 2), (2, 2), (0, 0)))
        s3 = jnp.ones((ch,), jnp.float32)
        b3 = b7 + b3s
        k3 = 7
        extra = {"rep_w7": w7, "rep_s7": s7, "rep_b7": b7,
                 "rep_w3": w3s, "rep_s3": s3s, "rep_b3": b3s}
    else:
        w3, s3, b3 = _dw_layer(keys[2], ch, 3)        # Conv(2c_, 2c_, 3, g=2c_)
        k3 = 3
    w4, s4, b4 = _pw_layer(keys[3], ch, c2)           # Conv(2c_, c2, 1)
    w5, s5, b5 = _dw_layer(keys[4], c2, 3)            # Conv(c2, c2, 3, g=c2)
    params = {
        "w1": w1.reshape(9, 1, c1), "s1": s1[None, :], "b1": b1[None, :],
        "w2": w2, "s2": s2[None, :], "b2": b2[None, :],
        "w3": w3.reshape(k3 * k3, 1, ch), "s3": s3[None, :], "b3": b3[None, :],
        "w4": w4, "s4": s4[None, :], "b4": b4[None, :],
        "w5": w5.reshape(9, 1, c2), "s5": s5[None, :], "b5": b5[None, :],
        "k3": k3,
    }
    params.update(extra)
    return params


# -----------------------------------------------------------------------------
# Pure-JAX reference (correctness check only)
# -----------------------------------------------------------------------------
def _ref_dw_conv(x, w_flat, k):
    C = x.shape[-1]
    w = w_flat.reshape(k, k, C)[:, :, None, :]         # HWIO depthwise (I = 1)
    return jax.lax.conv_general_dilated(
        x, w, (1, 1), "SAME",
        dimension_numbers=("NHWC", "HWIO", "NHWC"), feature_group_count=C)


def _ref_dw(x, w_flat, s, b, k):
    y = _ref_dw_conv(x, w_flat, k) * s + b
    return y * jax.nn.sigmoid(y)


def _ref_pw(x, w, s, b):
    y = jnp.einsum("nhwc,cd->nhwd", x, w) * s + b
    return y * jax.nn.sigmoid(y)


def ref_forward(x_nchw, params, shortcut=True):
    c1 = x_nchw.shape[1]
    c2 = params["w4"].shape[1]
    k3 = int(params["k3"])
    x = jnp.transpose(x_nchw, (0, 2, 3, 1)).astype(jnp.float32)
    y = _ref_dw(x, params["w1"], params["s1"], params["b1"], 3)
    y = _ref_pw(y, params["w2"], params["s2"], params["b2"])
    if "rep_w7" in params:
        # Original two-branch RepVGGDW (validates the kernel-side 7x7 fusion).
        y7 = _ref_dw_conv(y, params["rep_w7"], 7) * params["rep_s7"] + params["rep_b7"]
        y3 = _ref_dw_conv(y, params["rep_w3"], 3) * params["rep_s3"] + params["rep_b3"]
        y = y7 + y3
        y = y * jax.nn.sigmoid(y)
    else:
        y = _ref_dw(y, params["w3"], params["s3"], params["b3"], k3)
    y = _ref_pw(y, params["w4"], params["s4"], params["b4"])
    y = _ref_dw(y, params["w5"], params["s5"], params["b5"], 3)
    if shortcut and c1 == c2:
        y = y + x
    return jnp.transpose(y, (0, 3, 1, 2))


# -----------------------------------------------------------------------------
if __name__ == "__main__":
    key = jax.random.PRNGKey(0)
    kx, kp1, kp2 = jax.random.split(key, 3)

    N, c1, H, W = 2, 8, 16, 16
    x = jax.random.normal(kx, (N, c1, H, W), jnp.float32)

    # CIB(c1=8, c2=8, shortcut=True, e=0.5, lk=False)  -> residual active
    params1 = init_cib_params(kp1, c1, 8, e=0.5, lk=False)
    out1 = jax.block_until_ready(cib_forward(x, params1, shortcut=True))
    assert out1.shape == (N, 8, H, W)
    ref1 = jax.block_until_ready(ref_forward(x, params1, shortcut=True))
    np.testing.assert_allclose(np.asarray(out1), np.asarray(ref1), rtol=2e-2, atol=2e-2)

    # CIB(c1=8, c2=16, shortcut=True, e=0.5, lk=True)  -> RepVGGDW (7x7), no residual
    params2 = init_cib_params(kp2, c1, 16, e=0.5, lk=True)
    out2 = jax.block_until_ready(cib_forward(x, params2, shortcut=True))
    assert out2.shape == (N, 16, H, W)
    ref2 = jax.block_until_ready(ref_forward(x, params2, shortcut=True))
    np.testing.assert_allclose(np.asarray(out2), np.asarray(ref2), rtol=2e-2, atol=2e-2)

    print("KERNEL_OK")
</pallas_src>

<mosaic_0001>
module attributes {stable_mosaic.version = 11 : i64} {
  func.func @_cib_kernel(%arg0: i32, %arg1: i32, %arg2: memref<1x22x34x8xf32, #tpu.memory_space<vmem>>, %arg3: memref<9x1x8xf32, #tpu.memory_space<vmem>>, %arg4: memref<1x8xf32, #tpu.memory_space<vmem>>, %arg5: memref<1x8xf32, #tpu.memory_space<vmem>>, %arg6: memref<8x8xbf16, #tpu.memory_space<vmem>>, %arg7: memref<1x8xf32, #tpu.memory_space<vmem>>, %arg8: memref<1x8xf32, #tpu.memory_space<vmem>>, %arg9: memref<9x1x8xf32, #tpu.memory_space<vmem>>, %arg10: memref<1x8xf32, #tpu.memory_space<vmem>>, %arg11: memref<1x8xf32, #tpu.memory_space<vmem>>, %arg12: memref<8x8xbf16, #tpu.memory_space<vmem>>, %arg13: memref<1x8xf32, #tpu.memory_space<vmem>>, %arg14: memref<1x8xf32, #tpu.memory_space<vmem>>, %arg15: memref<9x1x8xf32, #tpu.memory_space<vmem>>, %arg16: memref<1x8xf32, #tpu.memory_space<vmem>>, %arg17: memref<1x8xf32, #tpu.memory_space<vmem>>, %arg18: memref<1x8x16x8xf32, #tpu.memory_space<vmem>>, %arg19: memref<12x32x8xbf16, #tpu.memory_space<vmem>>, %arg20: memref<10x24x8xbf16, #tpu.memory_space<vmem>>) attributes {dimension_semantics = [#tpu.dimension_semantics<parallel>, #tpu.dimension_semantics<parallel>], iteration_bounds = array<i64: 2, 2>, scalar_prefetch = 0 : i64, scratch_operands = 2 : i64, tpu.core_type = #tpu.core_type<tc>, window_params = [{transform_indices = @transform_0, window_bounds = array<i64: 1, 22, 34, 8>}, {pipeline_mode = #tpu.pipeline_mode<synchronous>, transform_indices = @transform_1, window_bounds = array<i64: 9, 1, 8>}, {pipeline_mode = #tpu.pipeline_mode<synchronous>, transform_indices = @transform_2, window_bounds = array<i64: 1, 8>}, {pipeline_mode = #tpu.pipeline_mode<synchronous>, transform_indices = @transform_3, window_bounds = array<i64: 1, 8>}, {pipeline_mode = #tpu.pipeline_mode<synchronous>, transform_indices = @transform_4, window_bounds = array<i64: 8, 8>}, {pipeline_mode = #tpu.pipeline_mode<synchronous>, transform_indices = @transform_5, window_bounds = array<i64: 1, 8>}, {pipeline_mode = #tpu.pipeline_mode<synchronous>, transform_indices = @transform_6, window_bounds = array<i64: 1, 8>}, {pipeline_mode = #tpu.pipeline_mode<synchronous>, transform_indices = @transform_7, window_bounds = array<i64: 9, 1, 8>}, {pipeline_mode = #tpu.pipeline_mode<synchronous>, transform_indices = @transform_8, window_bounds = array<i64: 1, 8>}, {pipeline_mode = #tpu.pipeline_mode<synchronous>, transform_indices = @transform_9, window_bounds = array<i64: 1, 8>}, {pipeline_mode = #tpu.pipeline_mode<synchronous>, transform_indices = @transform_10, window_bounds = array<i64: 8, 8>}, {pipeline_mode = #tpu.pipeline_mode<synchronous>, transform_indices = @transform_11, window_bounds = array<i64: 1, 8>}, {pipeline_mode = #tpu.pipeline_mode<synchronous>, transform_indices = @transform_12, window_bounds = array<i64: 1, 8>}, {pipeline_mode = #tpu.pipeline_mode<synchronous>, transform_indices = @transform_13, window_bounds = array<i64: 9, 1, 8>}, {pipeline_mode = #tpu.pipeline_mode<synchronous>, transform_indices = @transform_14, window_bounds = array<i64: 1, 8>}, {pipeline_mode = #tpu.pipeline_mode<synchronous>, transform_indices = @transform_15, window_bounds = array<i64: 1, 8>}, {transform_indices = @transform_16, window_bounds = array<i64: 1, 8, 16, 8>}]} {
    %c8_i32 = arith.constant 8 : i32
    %0 = arith.muli %arg1, %c8_i32 : i32
    %1 = tpu.assume_multiple %0, 8 : i32
    %c0 = arith.constant 0 : index
    %c0_0 = arith.constant 0 : index
    %c0_1 = arith.constant 0 : index
    %2 = vector.load %arg3[%c0, %c0_0, %c0_1] : memref<9x1x8xf32, #tpu.memory_space<vmem>>, vector<9x1x8xf32>
    %c0_2 = arith.constant 0 : index
    %c0_3 = arith.constant 0 : index
    %3 = vector.load %arg4[%c0_2, %c0_3] : memref<1x8xf32, #tpu.memory_space<vmem>>, vector<1x8xf32>
    %c0_4 = arith.constant 0 : index
    %c0_5 = arith.constant 0 : index
    %4 = vector.load %arg5[%c0_4, %c0_5] : memref<1x8xf32, #tpu.memory_space<vmem>>, vector<1x8xf32>
    %c0_6 = arith.constant 0 : index
    %c0_7 = arith.constant 0 : index
    %5 = vector.load %arg6[%c0_6, %c0_7] : memref<8x8xbf16, #tpu.memory_space<vmem>>, vector<8x8xbf16>
    %c0_8 = arith.constant 0 : index
    %c0_9 = arith.constant 0 : index
    %6 = vector.load %arg7[%c0_8, %c0_9] : memref<1x8xf32, #tpu.memory_space<vmem>>, vector<1x8xf32>
    %c0_10 = arith.constant 0 : index
    %c0_11 = arith.constant 0 : index
    %7 = vector.load %arg8[%c0_10, %c0_11] : memref<1x8xf32, #tpu.memory_space<vmem>>, vector<1x8xf32>
    %c0_12 = arith.constant 0 : index
    %c0_13 = arith.constant 0 : index
    %c0_14 = arith.constant 0 : index
    %8 = vector.load %arg9[%c0_12, %c0_13, %c0_14] : memref<9x1x8xf32, #tpu.memory_space<vmem>>, vector<9x1x8xf32>
    %c0_15 = arith.constant 0 : index
    %c0_16 = arith.constant 0 : index
    %9 = vector.load %arg10[%c0_15, %c0_16] : memref<1x8xf32, #tpu.memory_space<vmem>>, vector<1x8xf32>
    %c0_17 = arith.constant 0 : index
    %c0_18 = arith.constant 0 : index
    %10 = vector.load %arg11[%c0_17, %c0_18] : memref<1x8xf32, #tpu.memory_space<vmem>>, vector<1x8xf32>
    %c0_19 = arith.constant 0 : index
    %c0_20 = arith.constant 0 : index
    %11 = vector.load %arg12[%c0_19, %c0_20] : memref<8x8xbf16, #tpu.memory_space<vmem>>, vector<8x8xbf16>
    %c0_21 = arith.constant 0 : index
    %c0_22 = arith.constant 0 : index
    %12 = vector.load %arg13[%c0_21, %c0_22] : memref<1x8xf32, #tpu.memory_space<vmem>>, vector<1x8xf32>
    %c0_23 = arith.constant 0 : index
    %c0_24 = arith.constant 0 : index
    %13 = vector.load %arg14[%c0_23, %c0_24] : memref<1x8xf32, #tpu.memory_space<vmem>>, vector<1x8xf32>
    %c0_25 = arith.constant 0 : index
    %c0_26 = arith.constant 0 : index
    %c0_27 = arith.constant 0 : index
    %14 = vector.load %arg15[%c0_25, %c0_26, %c0_27] : memref<9x1x8xf32, #tpu.memory_space<vmem>>, vector<9x1x8xf32>
    %c0_28 = arith.constant 0 : index
    %c0_29 = arith.constant 0 : index
    %15 = vector.load %arg16[%c0_28, %c0_29] : memref<1x8xf32, #tpu.memory_space<vmem>>, vector<1x8xf32>
    %c0_30 = arith.constant 0 : index
    %c0_31 = arith.constant 0 : index
    %16 = vector.load %arg17[%c0_30, %c0_31] : memref<1x8xf32, #tpu.memory_space<vmem>>, vector<1x8xf32>
    %cst = arith.constant 0.000000e+00 : f32
    %17 = vector.broadcast %cst : f32 to vector<8x32x8xf32>
    %c0_i32 = arith.constant 0 : i32
    %18 = arith.addi %1, %c0_i32 : i32
    %c0_i32_32 = arith.constant 0 : i32
    %19 = arith.addi %18, %c0_i32_32 : i32
    %c0_33 = arith.constant 0 : index
    %20 = arith.index_cast %19 : i32 to index
    %c0_34 = arith.constant 0 : index
    %c0_35 = arith.constant 0 : index
    %21 = vector.load %arg2[%c0_33, %20, %c0_34, %c0_35] : memref<1x22x34x8xf32, #tpu.memory_space<vmem>>, vector<1x8x32x8xf32>
    %22 = vector.shape_cast %21 : vector<1x8x32x8xf32> to vector<8x32x8xf32>
    %23 = vector.extract_strided_slice %2 {offsets = [0, 0, 0], sizes = [1, 1, 8], strides = [1, 1, 1]} : vector<9x1x8xf32> to vector<1x1x8xf32>
    %24 = vector.shape_cast %23 : vector<1x1x8xf32> to vector<1x8xf32>
    %25 = vector.shape_cast %24 : vector<1x8xf32> to vector<1x1x8xf32>
    %26 = vector.broadcast %25 : vector<1x1x8xf32> to vector<8x32x8xf32>
    %27 = arith.mulf %22, %26 : vector<8x32x8xf32>
    %28 = arith.addf %17, %27 : vector<8x32x8xf32>
    %c0_i32_36 = arith.constant 0 : i32
    %29 = arith.addi %1, %c0_i32_36 : i32
    %c0_i32_37 = arith.constant 0 : i32
    %30 = arith.addi %29, %c0_i32_37 : i32
    %c0_38 = arith.constant 0 : index
    %31 = arith.index_cast %30 : i32 to index
    %c1 = arith.constant 1 : index
    %c0_39 = arith.constant 0 : index
    %32 = vector.load %arg2[%c0_38, %31, %c1, %c0_39] : memref<1x22x34x8xf32, #tpu.memory_space<vmem>>, vector<1x8x32x8xf32>
    %33 = vector.shape_cast %32 : vector<1x8x32x8xf32> to vector<8x32x8xf32>
    %34 = vector.extract_strided_slice %2 {offsets = [1, 0, 0], sizes = [1, 1, 8], strides = [1, 1, 1]} : vector<9x1x8xf32> to vector<1x1x8xf32>
    %35 = vector.shape_cast %34 : vector<1x1x8xf32> to vector<1x8xf32>
    %36 = vector.shape_cast %35 : vector<1x8xf32> to vector<1x1x8xf32>
    %37 = vector.broadcast %36 : vector<1x1x8xf32> to vector<8x32x8xf32>
    %38 = arith.mulf %33, %37 : vector<8x32x8xf32>
    %39 = arith.addf %28, %38 : vector<8x32x8xf32>
    %c0_i32_40 = arith.constant 0 : i32
    %40 = arith.addi %1, %c0_i32_40 : i32
    %c0_i32_41 = arith.constant 0 : i32
    %41 = arith.addi %40, %c0_i32_41 : i32
    %c0_42 = arith.constant 0 : index
    %42 = arith.index_cast %41 : i32 to index
    %c2 = arith.constant 2 : index
    %c0_43 = arith.constant 0 : index
    %43 = vector.load %arg2[%c0_42, %42, %c2, %c0_43] : memref<1x22x34x8xf32, #tpu.memory_space<vmem>>, vector<1x8x32x8xf32>
    %44 = vector.shape_cast %43 : vector<1x8x32x8xf32> to vector<8x32x8xf32>
    %45 = vector.extract_strided_slice %2 {offsets = [2, 0, 0], sizes = [1, 1, 8], strides = [1, 1, 1]} : vector<9x1x8xf32> to vector<1x1x8xf32>
    %46 = vector.shape_cast %45 : vector<1x1x8xf32> to vector<1x8xf32>
    %47 = vector.shape_cast %46 : vector<1x8xf32> to vector<1x1x8xf32>
    %48 = vector.broadcast %47 : vector<1x1x8xf32> to vector<8x32x8xf32>
    %49 = arith.mulf %44, %48 : vector<8x32x8xf32>
    %50 = arith.addf %39, %49 : vector<8x32x8xf32>
    %c0_i32_44 = arith.constant 0 : i32
    %51 = arith.addi %1, %c0_i32_44 : i32
    %c1_i32 = arith.constant 1 : i32
    %52 = arith.addi %51, %c1_i32 : i32
    %c0_45 = arith.constant 0 : index
    %53 = arith.index_cast %52 : i32 to index
    %c0_46 = arith.constant 0 : index
    %c0_47 = arith.constant 0 : index
    %54 = vector.load %arg2[%c0_45, %53, %c0_46, %c0_47] : memref<1x22x34x8xf32, #tpu.memory_space<vmem>>, vector<1x8x32x8xf32>
    %55 = vector.shape_cast %54 : vector<1x8x32x8xf32> to vector<8x32x8xf32>
    %56 = vector.extract_strided_slice %2 {offsets = [3, 0, 0], sizes = [1, 1, 8], strides = [1, 1, 1]} : vector<9x1x8xf32> to vector<1x1x8xf32>
    %57 = vector.shape_cast %56 : vector<1x1x8xf32> to vector<1x8xf32>
    %58 = vector.shape_cast %57 : vector<1x8xf32> to vector<1x1x8xf32>
    %59 = vector.broadcast %58 : vector<1x1x8xf32> to vector<8x32x8xf32>
    %60 = arith.mulf %55, %59 : vector<8x32x8xf32>
    %61 = arith.addf %50, %60 : vector<8x32x8xf32>
    %c0_i32_48 = arith.constant 0 : i32
    %62 = arith.addi %1, %c0_i32_48 : i32
    %c1_i32_49 = arith.constant 1 : i32
    %63 = arith.addi %62, %c1_i32_49 : i32
    %c0_50 = arith.constant 0 : index
    %64 = arith.index_cast %63 : i32 to index
    %c1_51 = arith.constant 1 : index
    %c0_52 = arith.constant 0 : index
    %65 = vector.load %arg2[%c0_50, %64, %c1_51, %c0_52] : memref<1x22x34x8xf32, #tpu.memory_space<vmem>>, vector<1x8x32x8xf32>
    %66 = vector.shape_cast %65 : vector<1x8x32x8xf32> to vector<8x32x8xf32>
    %67 = vector.extract_strided_slice %2 {offsets = [4, 0, 0], sizes = [1, 1, 8], strides = [1, 1, 1]} : vector<9x1x8xf32> to vector<1x1x8xf32>
    %68 = vector.shape_cast %67 : vector<1x1x8xf32> to vector<1x8xf32>
    %69 = vector.shape_cast %68 : vector<1x8xf32> to vector<1x1x8xf32>
    %70 = vector.broadcast %69 : vector<1x1x8xf32> to vector<8x32x8xf32>
    %71 = arith.mulf %66, %70 : vector<8x32x8xf32>
    %72 = arith.addf %61, %71 : vector<8x32x8xf32>
    %c0_i32_53 = arith.constant 0 : i32
    %73 = arith.addi %1, %c0_i32_53 : i32
    %c1_i32_54 = arith.constant 1 : i32
    %74 = arith.addi %73, %c1_i32_54 : i32
    %c0_55 = arith.constant 0 : index
    %75 = arith.index_cast %74 : i32 to index
    %c2_56 = arith.constant 2 : index
    %c0_57 = arith.constant 0 : index
    %76 = vector.load %arg2[%c0_55, %75, %c2_56, %c0_57] : memref<1x22x34x8xf32, #tpu.memory_space<vmem>>, vector<1x8x32x8xf32>
    %77 = vector.shape_cast %76 : vector<1x8x32x8xf32> to vector<8x32x8xf32>
    %78 = vector.extract_strided_slice %2 {offsets = [5, 0, 0], sizes = [1, 1, 8], strides = [1, 1, 1]} : vector<9x1x8xf32> to vector<1x1x8xf32>
    %79 = vector.shape_cast %78 : vector<1x1x8xf32> to vector<1x8xf32>
    %80 = vector.shape_cast %79 : vector<1x8xf32> to vector<1x1x8xf32>
    %81 = vector.broadcast %80 : vector<1x1x8xf32> to vector<8x32x8xf32>
    %82 = arith.mulf %77, %81 : vector<8x32x8xf32>
    %83 = arith.addf %72, %82 : vector<8x32x8xf32>
    %c0_i32_58 = arith.constant 0 : i32
    %84 = arith.addi %1, %c0_i32_58 : i32
    %c2_i32 = arith.constant 2 : i32
    %85 = arith.addi %84, %c2_i32 : i32
    %c0_59 = arith.constant 0 : index
    %86 = arith.index_cast %85 : i32 to index
    %c0_60 = arith.constant 0 : index
    %c0_61 = arith.constant 0 : index
    %87 = vector.load %arg2[%c0_59, %86, %c0_60, %c0_61] : memref<1x22x34x8xf32, #tpu.memory_space<vmem>>, vector<1x8x32x8xf32>
    %88 = vector.shape_cast %87 : vector<1x8x32x8xf32> to vector<8x32x8xf32>
    %89 = vector.extract_strided_slice %2 {offsets = [6, 0, 0], sizes = [1, 1, 8], strides = [1, 1, 1]} : vector<9x1x8xf32> to vector<1x1x8xf32>
    %90 = vector.shape_cast %89 : vector<1x1x8xf32> to vector<1x8xf32>
    %91 = vector.shape_cast %90 : vector<1x8xf32> to vector<1x1x8xf32>
    %92 = vector.broadcast %91 : vector<1x1x8xf32> to vector<8x32x8xf32>
    %93 = arith.mulf %88, %92 : vector<8x32x8xf32>
    %94 = arith.addf %83, %93 : vector<8x32x8xf32>
    %c0_i32_62 = arith.constant 0 : i32
    %95 = arith.addi %1, %c0_i32_62 : i32
    %c2_i32_63 = arith.constant 2 : i32
    %96 = arith.addi %95, %c2_i32_63 : i32
    %c0_64 = arith.constant 0 : index
    %97 = arith.index_cast %96 : i32 to index
    %c1_65 = arith.constant 1 : index
    %c0_66 = arith.constant 0 : index
    %98 = vector.load %arg2[%c0_64, %97, %c1_65, %c0_66] : memref<1x22x34x8xf32, #tpu.memory_space<vmem>>, vector<1x8x32x8xf32>
    %99 = vector.shape_cast %98 : vector<1x8x32x8xf32> to vector<8x32x8xf32>
    %100 = vector.extract_strided_slice %2 {offsets = [7, 0, 0], sizes = [1, 1, 8], strides = [1, 1, 1]} : vector<9x1x8xf32> to vector<1x1x8xf32>
    %101 = vector.shape_cast %100 : vector<1x1x8xf32> to vector<1x8xf32>
    %102 = vector.shape_cast %101 : vector<1x8xf32> to vector<1x1x8xf32>
    %103 = vector.broadcast %102 : vector<1x1x8xf32> to vector<8x32x8xf32>
    %104 = arith.mulf %99, %103 : vector<8x32x8xf32>
    %105 = arith.addf %94, %104 : vector<8x32x8xf32>
    %c0_i32_67 = arith.constant 0 : i32
    %106 = arith.addi %1, %c0_i32_67 : i32
    %c2_i32_68 = arith.constant 2 : i32
    %107 = arith.addi %106, %c2_i32_68 : i32
    %c0_69 = arith.constant 0 : index
    %108 = arith.index_cast %107 : i32 to index
    %c2_70 = arith.constant 2 : index
    %c0_71 = arith.constant 0 : index
    %109 = vector.load %arg2[%c0_69, %108, %c2_70, %c0_71] : memref<1x22x34x8xf32, #tpu.memory_space<vmem>>, vector<1x8x32x8xf32>
    %110 = vector.shape_cast %109 : vector<1x8x32x8xf32> to vector<8x32x8xf32>
    %111 = vector.extract_strided_slice %2 {offsets = [8, 0, 0], sizes = [1, 1, 8], strides = [1, 1, 1]} : vector<9x1x8xf32> to vector<1x1x8xf32>
    %112 = vector.shape_cast %111 : vector<1x1x8xf32> to vector<1x8xf32>
    %113 = vector.shape_cast %112 : vector<1x8xf32> to vector<1x1x8xf32>
    %114 = vector.broadcast %113 : vector<1x1x8xf32> to vector<8x32x8xf32>
    %115 = arith.mulf %110, %114 : vector<8x32x8xf32>
    %116 = arith.addf %105, %115 : vector<8x32x8xf32>
    %117 = vector.shape_cast %3 : vector<1x8xf32> to vector<1x1x8xf32>
    %118 = vector.broadcast %117 : vector<1x1x8xf32> to vector<8x32x8xf32>
    %119 = arith.mulf %116, %118 : vector<8x32x8xf32>
    %120 = vector.shape_cast %4 : vector<1x8xf32> to vector<1x1x8xf32>
    %121 = vector.broadcast %120 : vector<1x1x8xf32> to vector<8x32x8xf32>
    %122 = arith.addf %119, %121 : vector<8x32x8xf32>
    %123 = arith.negf %122 : vector<8x32x8xf32>
    %124 = math.exp %123 : vector<8x32x8xf32>
    %cst_72 = arith.constant 1.000000e+00 : f32
    %125 = vector.broadcast %cst_72 : f32 to vector<8x32x8xf32>
    %126 = arith.addf %125, %124 : vector<8x32x8xf32>
    %127 = arith.divf %125, %126 : vector<8x32x8xf32>
    %128 = arith.mulf %122, %127 : vector<8x32x8xf32>
    %129 = vector.shape_cast %128 : vector<8x32x8xf32> to vector<256x8xf32>
    %130 = arith.truncf %129 : vector<256x8xf32> to vector<256x8xbf16>
    %cst_73 = arith.constant dense<0.000000e+00> : vector<256x8xf32>
    %131 = tpu.matmul %130, %5, %cst_73 {dimension_numbers = #tpu.dot_dimension_numbers<[1], [0], [0], [1], [0, 0, 1, 1], [], []>} : vector<256x8xbf16>, vector<8x8xbf16>, vector<256x8xf32> -> vector<256x8xf32>
    %132 = vector.broadcast %6 : vector<1x8xf32> to vector<256x8xf32>
    %133 = arith.mulf %131, %132 : vector<256x8xf32>
    %134 = vector.broadcast %7 : vector<1x8xf32> to vector<256x8xf32>
    %135 = arith.addf %133, %134 : vector<256x8xf32>
    %136 = arith.negf %135 : vector<256x8xf32>
    %137 = math.exp %136 : vector<256x8xf32>
    %cst_74 = arith.constant 1.000000e+00 : f32
    %138 = vector.broadcast %cst_74 : f32 to vector<256x8xf32>
    %139 = arith.addf %138, %137 : vector<256x8xf32>
    %140 = arith.divf %138, %139 : vector<256x8xf32>
    %141 = arith.mulf %135, %140 : vector<256x8xf32>
    %142 = vector.shape_cast %141 : vector<256x8xf32> to vector<8x32x8xf32>
    %143 = arith.truncf %142 : vector<8x32x8xf32> to vector<8x32x8xbf16>
    %c0_75 = arith.constant 0 : index
    %c0_76 = arith.constant 0 : index
    %c0_77 = arith.constant 0 : index
    %144 = vector.load %arg19[%c0_75, %c0_76, %c0_77] : memref<12x32x8xbf16, #tpu.memory_space<vmem>>, vector<8x32x8xbf16>
    tpu.vector_store %arg19[%c0_75, %c0_76, %c0_77], %143 {strides = array<i32>} : memref<12x32x8xbf16, #tpu.memory_space<vmem>>, vector<8x32x8xbf16>,
    %cst_78 = arith.constant 0.000000e+00 : f32
    %145 = vector.broadcast %cst_78 : f32 to vector<4x32x8xf32>
    %c8_i32_79 = arith.constant 8 : i32
    %146 = arith.addi %1, %c8_i32_79 : i32
    %c0_i32_80 = arith.constant 0 : i32
    %147 = arith.addi %146, %c0_i32_80 : i32
    %c0_81 = arith.constant 0 : index
    %148 = arith.index_cast %147 : i32 to index
    %c0_82 = arith.constant 0 : index
    %c0_83 = arith.constant 0 : index
    %149 = vector.load %arg2[%c0_81, %148, %c0_82, %c0_83] : memref<1x22x34x8xf32, #tpu.memory_space<vmem>>, vector<1x4x32x8xf32>
    %150 = vector.shape_cast %149 : vector<1x4x32x8xf32> to vector<4x32x8xf32>
    %151 = vector.extract_strided_slice %2 {offsets = [0, 0, 0], sizes = [1, 1, 8], strides = [1, 1, 1]} : vector<9x1x8xf32> to vector<1x1x8xf32>
    %152 = vector.shape_cast %151 : vector<1x1x8xf32> to vector<1x8xf32>
    %153 = vector.shape_cast %152 : vector<1x8xf32> to vector<1x1x8xf32>
    %154 = vector.broadcast %153 : vector<1x1x8xf32> to vector<4x32x8xf32>
    %155 = arith.mulf %150, %154 : vector<4x32x8xf32>
    %156 = arith.addf %145, %155 : vector<4x32x8xf32>
    %c8_i32_84 = arith.constant 8 : i32
    %157 = arith.addi %1, %c8_i32_84 : i32
    %c0_i32_85 = arith.constant 0 : i32
    %158 = arith.addi %157, %c0_i32_85 : i32
    %c0_86 = arith.constant 0 : index
    %159 = arith.index_cast %158 : i32 to index
    %c1_87 = arith.constant 1 : index
    %c0_88 = arith.constant 0 : index
    %160 = vector.load %arg2[%c0_86, %159, %c1_87, %c0_88] : memref<1x22x34x8xf32, #tpu.memory_space<vmem>>, vector<1x4x32x8xf32>
    %161 = vector.shape_cast %160 : vector<1x4x32x8xf32> to vector<4x32x8xf32>
    %162 = vector.extract_strided_slice %2 {offsets = [1, 0, 0], sizes = [1, 1, 8], strides = [1, 1, 1]} : vector<9x1x8xf32> to vector<1x1x8xf32>
    %163 = vector.shape_cast %162 : vector<1x1x8xf32> to vector<1x8xf32>
    %164 = vector.shape_cast %163 : vector<1x8xf32> to vector<1x1x8xf32>
    %165 = vector.broadcast %164 : vector<1x1x8xf32> to vector<4x32x8xf32>
    %166 = arith.mulf %161, %165 : vector<4x32x8xf32>
    %167 = arith.addf %156, %166 : vector<4x32x8xf32>
    %c8_i32_89 = arith.constant 8 : i32
    %168 = arith.addi %1, %c8_i32_89 : i32
    %c0_i32_90 = arith.constant 0 : i32
    %169 = arith.addi %168, %c0_i32_90 : i32
    %c0_91 = arith.constant 0 : index
    %170 = arith.index_cast %169 : i32 to index
    %c2_92 = arith.constant 2 : index
    %c0_93 = arith.constant 0 : index
    %171 = vector.load %arg2[%c0_91, %170, %c2_92, %c0_93] : memref<1x22x34x8xf32, #tpu.memory_space<vmem>>, vector<1x4x32x8xf32>
    %172 = vector.shape_cast %171 : vector<1x4x32x8xf32> to vector<4x32x8xf32>
    %173 = vector.extract_strided_slice %2 {offsets = [2, 0, 0], sizes = [1, 1, 8], strides = [1, 1, 1]} : vector<9x1x8xf32> to vector<1x1x8xf32>
    %174 = vector.shape_cast %173 : vector<1x1x8xf32> to vector<1x8xf32>
    %175 = vector.shape_cast %174 : vector<1x8xf32> to vector<1x1x8xf32>
    %176 = vector.broadcast %175 : vector<1x1x8xf32> to vector<4x32x8xf32>
    %177 = arith.mulf %172, %176 : vector<4x32x8xf32>
    %178 = arith.addf %167, %177 : vector<4x32x8xf32>
    %c8_i32_94 = arith.constant 8 : i32
    %179 = arith.addi %1, %c8_i32_94 : i32
    %c1_i32_95 = arith.constant 1 : i32
    %180 = arith.addi %179, %c1_i32_95 : i32
    %c0_96 = arith.constant 0 : index
    %181 = arith.index_cast %180 : i32 to index
    %c0_97 = arith.constant 0 : index
    %c0_98 = arith.constant 0 : index
    %182 = vector.load %arg2[%c0_96, %181, %c0_97, %c0_98] : memref<1x22x34x8xf32, #tpu.memory_space<vmem>>, vector<1x4x32x8xf32>
    %183 = vector.shape_cast %182 : vector<1x4x32x8xf32> to vector<4x32x8xf32>
    %184 = vector.extract_strided_slice %2 {offsets = [3, 0, 0], sizes = [1, 1, 8], strides = [1, 1, 1]} : vector<9x1x8xf32> to vector<1x1x8xf32>
    %185 = vector.shape_cast %184 : vector<1x1x8xf32> to vector<1x8xf32>
    %186 = vector.shape_cast %185 : vector<1x8xf32> to vector<1x1x8xf32>
    %187 = vector.broadcast %186 : vector<1x1x8xf32> to vector<4x32x8xf32>
    %188 = arith.mulf %183, %187 : vector<4x32x8xf32>
    %189 = arith.addf %178, %188 : vector<4x32x8xf32>
    %c8_i32_99 = arith.constant 8 : i32
    %190 = arith.addi %1, %c8_i32_99 : i32
    %c1_i32_100 = arith.constant 1 : i32
    %191 = arith.addi %190, %c1_i32_100 : i32
    %c0_101 = arith.constant 0 : index
    %192 = arith.index_cast %191 : i32 to index
    %c1_102 = arith.constant 1 : index
    %c0_103 = arith.constant 0 : index
    %193 = vector.load %arg2[%c0_101, %192, %c1_102, %c0_103] : memref<1x22x34x8xf32, #tpu.memory_space<vmem>>, vector<1x4x32x8xf32>
    %194 = vector.shape_cast %193 : vector<1x4x32x8xf32> to vector<4x32x8xf32>
    %195 = vector.extract_strided_slice %2 {offsets = [4, 0, 0], sizes = [1, 1, 8], strides = [1, 1, 1]} : vector<9x1x8xf32> to vector<1x1x8xf32>
    %196 = vector.shape_cast %195 : vector<1x1x8xf32> to vector<1x8xf32>
    %197 = vector.shape_cast %196 : vector<1x8xf32> to vector<1x1x8xf32>
    %198 = vector.broadcast %197 : vector<1x1x8xf32> to vector<4x32x8xf32>
    %199 = arith.mulf %194, %198 : vector<4x32x8xf32>
    %200 = arith.addf %189, %199 : vector<4x32x8xf32>
    %c8_i32_104 = arith.constant 8 : i32
    %201 = arith.addi %1, %c8_i32_104 : i32
    %c1_i32_105 = arith.constant 1 : i32
    %202 = arith.addi %201, %c1_i32_105 : i32
    %c0_106 = arith.constant 0 : index
    %203 = arith.index_cast %202 : i32 to index
    %c2_107 = arith.constant 2 : index
    %c0_108 = arith.constant 0 : index
    %204 = vector.load %arg2[%c0_106, %203, %c2_107, %c0_108] : memref<1x22x34x8xf32, #tpu.memory_space<vmem>>, vector<1x4x32x8xf32>
    %205 = vector.shape_cast %204 : vector<1x4x32x8xf32> to vector<4x32x8xf32>
    %206 = vector.extract_strided_slice %2 {offsets = [5, 0, 0], sizes = [1, 1, 8], strides = [1, 1, 1]} : vector<9x1x8xf32> to vector<1x1x8xf32>
    %207 = vector.shape_cast %206 : vector<1x1x8xf32> to vector<1x8xf32>
    %208 = vector.shape_cast %207 : vector<1x8xf32> to vector<1x1x8xf32>
    %209 = vector.broadcast %208 : vector<1x1x8xf32> to vector<4x32x8xf32>
    %210 = arith.mulf %205, %209 : vector<4x32x8xf32>
    %211 = arith.addf %200, %210 : vector<4x32x8xf32>
    %c8_i32_109 = arith.constant 8 : i32
    %212 = arith.addi %1, %c8_i32_109 : i32
    %c2_i32_110 = arith.constant 2 : i32
    %213 = arith.addi %212, %c2_i32_110 : i32
    %c0_111 = arith.constant 0 : index
    %214 = arith.index_cast %213 : i32 to index
    %c0_112 = arith.constant 0 : index
    %c0_113 = arith.constant 0 : index
    %215 = vector.load %arg2[%c0_111, %214, %c0_112, %c0_113] : memref<1x22x34x8xf32, #tpu.memory_space<vmem>>, vector<1x4x32x8xf32>
    %216 = vector.shape_cast %215 : vector<1x4x32x8xf32> to vector<4x32x8xf32>
    %217 = vector.extract_strided_slice %2 {offsets = [6, 0, 0], sizes = [1, 1, 8], strides = [1, 1, 1]} : vector<9x1x8xf32> to vector<1x1x8xf32>
    %218 = vector.shape_cast %217 : vector<1x1x8xf32> to vector<1x8xf32>
    %219 = vector.shape_cast %218 : vector<1x8xf32> to vector<1x1x8xf32>
    %220 = vector.broadcast %219 : vector<1x1x8xf32> to vector<4x32x8xf32>
    %221 = arith.mulf %216, %220 : vector<4x32x8xf32>
    %222 = arith.addf %211, %221 : vector<4x32x8xf32>
    %c8_i32_114 = arith.constant 8 : i32
    %223 = arith.addi %1, %c8_i32_114 : i32
    %c2_i32_115 = arith.constant 2 : i32
    %224 = arith.addi %223, %c2_i32_115 : i32
    %c0_116 = arith.constant 0 : index
    %225 = arith.index_cast %224 : i32 to index
    %c1_117 = arith.constant 1 : index
    %c0_118 = arith.constant 0 : index
    %226 = vector.load %arg2[%c0_116, %225, %c1_117, %c0_118] : memref<1x22x34x8xf32, #tpu.memory_space<vmem>>, vector<1x4x32x8xf32>
    %227 = vector.shape_cast %226 : vector<1x4x32x8xf32> to vector<4x32x8xf32>
    %228 = vector.extract_strided_slice %2 {offsets = [7, 0, 0], sizes = [1, 1, 8], strides = [1, 1, 1]} : vector<9x1x8xf32> to vector<1x1x8xf32>
    %229 = vector.shape_cast %228 : vector<1x1x8xf32> to vector<1x8xf32>
    %230 = vector.shape_cast %229 : vector<1x8xf32> to vector<1x1x8xf32>
    %231 = vector.broadcast %230 : vector<1x1x8xf32> to vector<4x32x8xf32>
    %232 = arith.mulf %227, %231 : vector<4x32x8xf32>
    %233 = arith.addf %222, %232 : vector<4x32x8xf32>
    %c8_i32_119 = arith.constant 8 : i32
    %234 = arith.addi %1, %c8_i32_119 : i32
    %c2_i32_120 = arith.constant 2 : i32
    %235 = arith.addi %234, %c2_i32_120 : i32
    %c0_121 = arith.constant 0 : index
    %236 = arith.index_cast %235 : i32 to index
    %c2_122 = arith.constant 2 : index
    %c0_123 = arith.constant 0 : index
    %237 = vector.load %arg2[%c0_121, %236, %c2_122, %c0_123] : memref<1x22x34x8xf32, #tpu.memory_space<vmem>>, vector<1x4x32x8xf32>
    %238 = vector.shape_cast %237 : vector<1x4x32x8xf32> to vector<4x32x8xf32>
    %239 = vector.extract_strided_slice %2 {offsets = [8, 0, 0], sizes = [1, 1, 8], strides = [1, 1, 1]} : vector<9x1x8xf32> to vector<1x1x8xf32>
    %240 = vector.shape_cast %239 : vector<1x1x8xf32> to vector<1x8xf32>
    %241 = vector.shape_cast %240 : vector<1x8xf32> to vector<1x1x8xf32>
    %242 = vector.broadcast %241 : vector<1x1x8xf32> to vector<4x32x8xf32>
    %243 = arith.mulf %238, %242 : vector<4x32x8xf32>
    %244 = arith.addf %233, %243 : vector<4x32x8xf32>
    %245 = vector.shape_cast %3 : vector<1x8xf32> to vector<1x1x8xf32>
    %246 = vector.broadcast %245 : vector<1x1x8xf32> to vector<4x32x8xf32>
    %247 = arith.mulf %244, %246 : vector<4x32x8xf32>
    %248 = vector.shape_cast %4 : vector<1x8xf32> to vector<1x1x8xf32>
    %249 = vector.broadcast %248 : vector<1x1x8xf32> to vector<4x32x8xf32>
    %250 = arith.addf %247, %249 : vector<4x32x8xf32>
    %251 = arith.negf %250 : vector<4x32x8xf32>
    %252 = math.exp %251 : vector<4x32x8xf32>
    %cst_124 = arith.constant 1.000000e+00 : f32
    %253 = vector.broadcast %cst_124 : f32 to vector<4x32x8xf32>
    %254 = arith.addf %253, %252 : vector<4x32x8xf32>
    %255 = arith.divf %253, %254 : vector<4x32x8xf32>
    %256 = arith.mulf %250, %255 : vector<4x32x8xf32>
    %257 = vector.shape_cast %256 : vector<4x32x8xf32> to vector<128x8xf32>
    %258 = arith.truncf %257 : vector<128x8xf32> to vector<128x8xbf16>
    %cst_125 = arith.constant dense<0.000000e+00> : vector<128x8xf32>
    %259 = tpu.matmul %258, %5, %cst_125 {dimension_numbers = #tpu.dot_dimension_numbers<[1], [0], [0], [1], [0, 0, 1, 1], [], []>} : vector<128x8xbf16>, vector<8x8xbf16>, vector<128x8xf32> -> vector<128x8xf32>
    %260 = vector.broadcast %6 : vector<1x8xf32> to vector<128x8xf32>
    %261 = arith.mulf %259, %260 : vector<128x8xf32>
    %262 = vector.broadcast %7 : vector<1x8xf32> to vector<128x8xf32>
    %263 = arith.addf %261, %262 : vector<128x8xf32>
    %264 = arith.negf %263 : vector<128x8xf32>
    %265 = math.exp %264 : vector<128x8xf32>
    %cst_126 = arith.constant 1.000000e+00 : f32
    %266 = vector.broadcast %cst_126 : f32 to vector<128x8xf32>
    %267 = arith.addf %266, %265 : vector<128x8xf32>
    %268 = arith.divf %266, %267 : vector<128x8xf32>
    %269 = arith.mulf %263, %268 : vector<128x8xf32>
    %270 = vector.shape_cast %269 : vector<128x8xf32> to vector<4x32x8xf32>
    %271 = arith.truncf %270 : vector<4x32x8xf32> to vector<4x32x8xbf16>
    %c8 = arith.constant 8 : index
    %c0_127 = arith.constant 0 : index
    %c0_128 = arith.constant 0 : index
    %272 = vector.load %arg19[%c8, %c0_127, %c0_128] : memref<12x32x8xbf16, #tpu.memory_space<vmem>>, vector<4x32x8xbf16>
    tpu.vector_store %arg19[%c8, %c0_127, %c0_128], %271 {strides = array<i32>} : memref<12x32x8xbf16, #tpu.memory_space<vmem>>, vector<4x32x8xbf16>,
    %cst_129 = arith.constant 0.000000e+00 : bf16
    %273 = vector.broadcast %cst_129 : bf16 to vector<12x2x8xbf16>
    %c0_130 = arith.constant 0 : index
    %c0_131 = arith.constant 0 : index
    %c0_132 = arith.constant 0 : index
    %274 = vector.load %arg19[%c0_130, %c0_131, %c0_132] : memref<12x32x8xbf16, #tpu.memory_space<vmem>>, vector<12x2x8xbf16>
    tpu.vector_store %arg19[%c0_130, %c0_131, %c0_132], %273 {strides = array<i32>} : memref<12x32x8xbf16, #tpu.memory_space<vmem>>, vector<12x2x8xbf16>,
    %cst_133 = arith.constant 0.000000e+00 : bf16
    %275 = vector.broadcast %cst_133 : bf16 to vector<12x14x8xbf16>
    %c0_134 = arith.constant 0 : index
    %c18 = arith.constant 18 : index
    %c0_135 = arith.constant 0 : index
    %276 = vector.load %arg19[%c0_134, %c18, %c0_135] : memref<12x32x8xbf16, #tpu.memory_space<vmem>>, vector<12x14x8xbf16>
    tpu.vector_store %arg19[%c0_134, %c18, %c0_135], %275 {strides = array<i32>} : memref<12x32x8xbf16, #tpu.memory_space<vmem>>, vector<12x14x8xbf16>,
    %cst_136 = arith.constant 0.000000e+00 : bf16
    %277 = vector.broadcast %cst_136 : bf16 to vector<1x32x8xbf16>
    %c2_i32_137 = arith.constant 2 : i32
    %278 = arith.cmpi slt, %1, %c2_i32_137 : i32
    %279 = arith.extui %278 : i1 to i32
    %c0_i32_138 = arith.constant 0 : i32
    %280 = arith.cmpi ne, %279, %c0_i32_138 : i32
    scf.if %280 {
      %c0_260 = arith.constant 0 : index
      %c0_261 = arith.constant 0 : index
      %c0_262 = arith.constant 0 : index
      %600 = vector.load %arg19[%c0_260, %c0_261, %c0_262] : memref<12x32x8xbf16, #tpu.memory_space<vmem>>, vector<1x32x8xbf16>
      tpu.vector_store %arg19[%c0_260, %c0_261, %c0_262], %277 {strides = array<i32>} : memref<12x32x8xbf16, #tpu.memory_space<vmem>>, vector<1x32x8xbf16>,
    } else {
    }
    %c9_i32 = arith.constant 9 : i32
    %281 = arith.addi %1, %c9_i32 : i32
    %c16_i32 = arith.constant 16 : i32
    %282 = arith.cmpi sge, %281, %c16_i32 : i32
    %283 = arith.extui %282 : i1 to i32
    %c0_i32_139 = arith.constant 0 : i32
    %284 = arith.cmpi ne, %283, %c0_i32_139 : i32
    scf.if %284 {
      %c11 = arith.constant 11 : index
      %c0_260 = arith.constant 0 : index
      %c0_261 = arith.constant 0 : index
      %600 = vector.load %arg19[%c11, %c0_260, %c0_261] : memref<12x32x8xbf16, #tpu.memory_space<vmem>>, vector<1x32x8xbf16>
      tpu.vector_store %arg19[%c11, %c0_260, %c0_261], %277 {strides = array<i32>} : memref<12x32x8xbf16, #tpu.memory_space<vmem>>, vector<1x32x8xbf16>,
    } else {
    }
    %c1_i32_140 = arith.constant 1 : i32
    %285 = arith.cmpi slt, %1, %c1_i32_140 : i32
    %286 = arith.extui %285 : i1 to i32
    %c0_i32_141 = arith.constant 0 : i32
    %287 = arith.cmpi ne, %286, %c0_i32_141 : i32
    scf.if %287 {
      %c1_260 = arith.constant 1 : index
      %c0_261 = arith.constant 0 : index
      %c0_262 = arith.constant 0 : index
      %600 = vector.load %arg19[%c1_260, %c0_261, %c0_262] : memref<12x32x8xbf16, #tpu.memory_space<vmem>>, vector<1x32x8xbf16>
      tpu.vector_store %arg19[%c1_260, %c0_261, %c0_262], %277 {strides = array<i32>} : memref<12x32x8xbf16, #tpu.memory_space<vmem>>, vector<1x32x8xbf16>,
    } else {
    }
    %c8_i32_142 = arith.constant 8 : i32
    %288 = arith.addi %1, %c8_i32_142 : i32
    %c16_i32_143 = arith.constant 16 : i32
    %289 = arith.cmpi sge, %288, %c16_i32_143 : i32
    %290 = arith.extui %289 : i1 to i32
    %c0_i32_144 = arith.constant 0 : i32
    %291 = arith.cmpi ne, %290, %c0_i32_144 : i32
    scf.if %291 {
      %c10_260 = arith.constant 10 : index
      %c0_261 = arith.constant 0 : index
      %c0_262 = arith.constant 0 : index
      %600 = vector.load %arg19[%c10_260, %c0_261, %c0_262] : memref<12x32x8xbf16, #tpu.memory_space<vmem>>, vector<1x32x8xbf16>
      tpu.vector_store %arg19[%c10_260, %c0_261, %c0_262], %277 {strides = array<i32>} : memref<12x32x8xbf16, #tpu.memory_space<vmem>>, vector<1x32x8xbf16>,
    } else {
    }
    %cst_145 = arith.constant 0.000000e+00 : f32
    %292 = vector.broadcast %cst_145 : f32 to vector<8x24x8xf32>
    %c0_146 = arith.constant 0 : index
    %c0_147 = arith.constant 0 : index
    %c0_148 = arith.constant 0 : index
    %293 = vector.load %arg19[%c0_146, %c0_147, %c0_148] : memref<12x32x8xbf16, #tpu.memory_space<vmem>>, vector<8x24x8xbf16>
    %294 = arith.extf %293 : vector<8x24x8xbf16> to vector<8x24x8xf32>
    %295 = vector.extract_strided_slice %8 {offsets = [0, 0, 0], sizes = [1, 1, 8], strides = [1, 1, 1]} : vector<9x1x8xf32> to vector<1x1x8xf32>
    %296 = vector.shape_cast %295 : vector<1x1x8xf32> to vector<1x8xf32>
    %297 = vector.shape_cast %296 : vector<1x8xf32> to vector<1x1x8xf32>
    %298 = vector.broadcast %297 : vector<1x1x8xf32> to vector<8x24x8xf32>
    %299 = arith.mulf %294, %298 : vector<8x24x8xf32>
    %300 = arith.addf %292, %299 : vector<8x24x8xf32>
    %c0_149 = arith.constant 0 : index
    %c1_150 = arith.constant 1 : index
    %c0_151 = arith.constant 0 : index
    %301 = vector.load %arg19[%c0_149, %c1_150, %c0_151] : memref<12x32x8xbf16, #tpu.memory_space<vmem>>, vector<8x24x8xbf16>
    %302 = arith.extf %301 : vector<8x24x8xbf16> to vector<8x24x8xf32>
    %303 = vector.extract_strided_slice %8 {offsets = [1, 0, 0], sizes = [1, 1, 8], strides = [1, 1, 1]} : vector<9x1x8xf32> to vector<1x1x8xf32>
    %304 = vector.shape_cast %303 : vector<1x1x8xf32> to vector<1x8xf32>
    %305 = vector.shape_cast %304 : vector<1x8xf32> to vector<1x1x8xf32>
    %306 = vector.broadcast %305 : vector<1x1x8xf32> to vector<8x24x8xf32>
    %307 = arith.mulf %302, %306 : vector<8x24x8xf32>
    %308 = arith.addf %300, %307 : vector<8x24x8xf32>
    %c0_152 = arith.constant 0 : index
    %c2_153 = arith.constant 2 : index
    %c0_154 = arith.constant 0 : index
    %309 = vector.load %arg19[%c0_152, %c2_153, %c0_154] : memref<12x32x8xbf16, #tpu.memory_space<vmem>>, vector<8x24x8xbf16>
    %310 = arith.extf %309 : vector<8x24x8xbf16> to vector<8x24x8xf32>
    %311 = vector.extract_strided_slice %8 {offsets = [2, 0, 0], sizes = [1, 1, 8], strides = [1, 1, 1]} : vector<9x1x8xf32> to vector<1x1x8xf32>
    %312 = vector.shape_cast %311 : vector<1x1x8xf32> to vector<1x8xf32>
    %313 = vector.shape_cast %312 : vector<1x8xf32> to vector<1x1x8xf32>
    %314 = vector.broadcast %313 : vector<1x1x8xf32> to vector<8x24x8xf32>
    %315 = arith.mulf %310, %314 : vector<8x24x8xf32>
    %316 = arith.addf %308, %315 : vector<8x24x8xf32>
    %c1_155 = arith.constant 1 : index
    %c0_156 = arith.constant 0 : index
    %c0_157 = arith.constant 0 : index
    %317 = vector.load %arg19[%c1_155, %c0_156, %c0_157] : memref<12x32x8xbf16, #tpu.memory_space<vmem>>, vector<8x24x8xbf16>
    %318 = arith.extf %317 : vector<8x24x8xbf16> to vector<8x24x8xf32>
    %319 = vector.extract_strided_slice %8 {offsets = [3, 0, 0], sizes = [1, 1, 8], strides = [1, 1, 1]} : vector<9x1x8xf32> to vector<1x1x8xf32>
    %320 = vector.shape_cast %319 : vector<1x1x8xf32> to vector<1x8xf32>
    %321 = vector.shape_cast %320 : vector<1x8xf32> to vector<1x1x8xf32>
    %322 = vector.broadcast %321 : vector<1x1x8xf32> to vector<8x24x8xf32>
    %323 = arith.mulf %318, %322 : vector<8x24x8xf32>
    %324 = arith.addf %316, %323 : vector<8x24x8xf32>
    %c1_158 = arith.constant 1 : index
    %c1_159 = arith.constant 1 : index
    %c0_160 = arith.constant 0 : index
    %325 = vector.load %arg19[%c1_158, %c1_159, %c0_160] : memref<12x32x8xbf16, #tpu.memory_space<vmem>>, vector<8x24x8xbf16>
    %326 = arith.extf %325 : vector<8x24x8xbf16> to vector<8x24x8xf32>
    %327 = vector.extract_strided_slice %8 {offsets = [4, 0, 0], sizes = [1, 1, 8], strides = [1, 1, 1]} : vector<9x1x8xf32> to vector<1x1x8xf32>
    %328 = vector.shape_cast %327 : vector<1x1x8xf32> to vector<1x8xf32>
    %329 = vector.shape_cast %328 : vector<1x8xf32> to vector<1x1x8xf32>
    %330 = vector.broadcast %329 : vector<1x1x8xf32> to vector<8x24x8xf32>
    %331 = arith.mulf %326, %330 : vector<8x24x8xf32>
    %332 = arith.addf %324, %331 : vector<8x24x8xf32>
    %c1_161 = arith.constant 1 : index
    %c2_162 = arith.constant 2 : index
    %c0_163 = arith.constant 0 : index
    %333 = vector.load %arg19[%c1_161, %c2_162, %c0_163] : memref<12x32x8xbf16, #tpu.memory_space<vmem>>, vector<8x24x8xbf16>
    %334 = arith.extf %333 : vector<8x24x8xbf16> to vector<8x24x8xf32>
    %335 = vector.extract_strided_slice %8 {offsets = [5, 0, 0], sizes = [1, 1, 8], strides = [1, 1, 1]} : vector<9x1x8xf32> to vector<1x1x8xf32>
    %336 = vector.shape_cast %335 : vector<1x1x8xf32> to vector<1x8xf32>
    %337 = vector.shape_cast %336 : vector<1x8xf32> to vector<1x1x8xf32>
    %338 = vector.broadcast %337 : vector<1x1x8xf32> to vector<8x24x8xf32>
    %339 = arith.mulf %334, %338 : vector<8x24x8xf32>
    %340 = arith.addf %332, %339 : vector<8x24x8xf32>
    %c2_164 = arith.constant 2 : index
    %c0_165 = arith.constant 0 : index
    %c0_166 = arith.constant 0 : index
    %341 = vector.load %arg19[%c2_164, %c0_165, %c0_166] : memref<12x32x8xbf16, #tpu.memory_space<vmem>>, vector<8x24x8xbf16>
    %342 = arith.extf %341 : vector<8x24x8xbf16> to vector<8x24x8xf32>
    %343 = vector.extract_strided_slice %8 {offsets = [6, 0, 0], sizes = [1, 1, 8], strides = [1, 1, 1]} : vector<9x1x8xf32> to vector<1x1x8xf32>
    %344 = vector.shape_cast %343 : vector<1x1x8xf32> to vector<1x8xf32>
    %345 = vector.shape_cast %344 : vector<1x8xf32> to vector<1x1x8xf32>
    %346 = vector.broadcast %345 : vector<1x1x8xf32> to vector<8x24x8xf32>
    %347 = arith.mulf %342, %346 : vector<8x24x8xf32>
    %348 = arith.addf %340, %347 : vector<8x24x8xf32>
    %c2_167 = arith.constant 2 : index
    %c1_168 = arith.constant 1 : index
    %c0_169 = arith.constant 0 : index
    %349 = vector.load %arg19[%c2_167, %c1_168, %c0_169] : memref<12x32x8xbf16, #tpu.memory_space<vmem>>, vector<8x24x8xbf16>
    %350 = arith.extf %349 : vector<8x24x8xbf16> to vector<8x24x8xf32>
    %351 = vector.extract_strided_slice %8 {offsets = [7, 0, 0], sizes = [1, 1, 8], strides = [1, 1, 1]} : vector<9x1x8xf32> to vector<1x1x8xf32>
    %352 = vector.shape_cast %351 : vector<1x1x8xf32> to vector<1x8xf32>
    %353 = vector.shape_cast %352 : vector<1x8xf32> to vector<1x1x8xf32>
    %354 = vector.broadcast %353 : vector<1x1x8xf32> to vector<8x24x8xf32>
    %355 = arith.mulf %350, %354 : vector<8x24x8xf32>
    %356 = arith.addf %348, %355 : vector<8x24x8xf32>
    %c2_170 = arith.constant 2 : index
    %c2_171 = arith.constant 2 : index
    %c0_172 = arith.constant 0 : index
    %357 = vector.load %arg19[%c2_170, %c2_171, %c0_172] : memref<12x32x8xbf16, #tpu.memory_space<vmem>>, vector<8x24x8xbf16>
    %358 = arith.extf %357 : vector<8x24x8xbf16> to vector<8x24x8xf32>
    %359 = vector.extract_strided_slice %8 {offsets = [8, 0, 0], sizes = [1, 1, 8], strides = [1, 1, 1]} : vector<9x1x8xf32> to vector<1x1x8xf32>
    %360 = vector.shape_cast %359 : vector<1x1x8xf32> to vector<1x8xf32>
    %361 = vector.shape_cast %360 : vector<1x8xf32> to vector<1x1x8xf32>
    %362 = vector.broadcast %361 : vector<1x1x8xf32> to vector<8x24x8xf32>
    %363 = arith.mulf %358, %362 : vector<8x24x8xf32>
    %364 = arith.addf %356, %363 : vector<8x24x8xf32>
    %365 = vector.shape_cast %9 : vector<1x8xf32> to vector<1x1x8xf32>
    %366 = vector.broadcast %365 : vector<1x1x8xf32> to vector<8x24x8xf32>
    %367 = arith.mulf %364, %366 : vector<8x24x8xf32>
    %368 = vector.shape_cast %10 : vector<1x8xf32> to vector<1x1x8xf32>
    %369 = vector.broadcast %368 : vector<1x1x8xf32> to vector<8x24x8xf32>
    %370 = arith.addf %367, %369 : vector<8x24x8xf32>
    %371 = arith.negf %370 : vector<8x24x8xf32>
    %372 = math.exp %371 : vector<8x24x8xf32>
    %cst_173 = arith.constant 1.000000e+00 : f32
    %373 = vector.broadcast %cst_173 : f32 to vector<8x24x8xf32>
    %374 = arith.addf %373, %372 : vector<8x24x8xf32>
    %375 = arith.divf %373, %374 : vector<8x24x8xf32>
    %376 = arith.mulf %370, %375 : vector<8x24x8xf32>
    %377 = vector.shape_cast %376 : vector<8x24x8xf32> to vector<192x8xf32>
    %378 = arith.truncf %377 : vector<192x8xf32> to vector<192x8xbf16>
    %cst_174 = arith.constant dense<0.000000e+00> : vector<192x8xf32>
    %379 = tpu.matmul %378, %11, %cst_174 {dimension_numbers = #tpu.dot_dimension_numbers<[1], [0], [0], [1], [0, 0, 1, 1], [], []>} : vector<192x8xbf16>, vector<8x8xbf16>, vector<192x8xf32> -> vector<192x8xf32>
    %380 = vector.broadcast %12 : vector<1x8xf32> to vector<192x8xf32>
    %381 = arith.mulf %379, %380 : vector<192x8xf32>
    %382 = vector.broadcast %13 : vector<1x8xf32> to vector<192x8xf32>
    %383 = arith.addf %381, %382 : vector<192x8xf32>
    %384 = arith.negf %383 : vector<192x8xf32>
    %385 = math.exp %384 : vector<192x8xf32>
    %cst_175 = arith.constant 1.000000e+00 : f32
    %386 = vector.broadcast %cst_175 : f32 to vector<192x8xf32>
    %387 = arith.addf %386, %385 : vector<192x8xf32>
    %388 = arith.divf %386, %387 : vector<192x8xf32>
    %389 = arith.mulf %383, %388 : vector<192x8xf32>
    %390 = vector.shape_cast %389 : vector<192x8xf32> to vector<8x24x8xf32>
    %391 = arith.truncf %390 : vector<8x24x8xf32> to vector<8x24x8xbf16>
    %c0_176 = arith.constant 0 : index
    %c0_177 = arith.constant 0 : index
    %c0_178 = arith.constant 0 : index
    %392 = vector.load %arg20[%c0_176, %c0_177, %c0_178] : memref<10x24x8xbf16, #tpu.memory_space<vmem>>, vector<8x24x8xbf16>
    tpu.vector_store %arg20[%c0_176, %c0_177, %c0_178], %391 {strides = array<i32>} : memref<10x24x8xbf16, #tpu.memory_space<vmem>>, vector<8x24x8xbf16>,
    %cst_179 = arith.constant 0.000000e+00 : f32
    %393 = vector.broadcast %cst_179 : f32 to vector<2x24x8xf32>
    %c8_180 = arith.constant 8 : index
    %c0_181 = arith.constant 0 : index
    %c0_182 = arith.constant 0 : index
    %394 = vector.load %arg19[%c8_180, %c0_181, %c0_182] : memref<12x32x8xbf16, #tpu.memory_space<vmem>>, vector<2x24x8xbf16>
    %395 = arith.extf %394 : vector<2x24x8xbf16> to vector<2x24x8xf32>
    %396 = vector.extract_strided_slice %8 {offsets = [0, 0, 0], sizes = [1, 1, 8], strides = [1, 1, 1]} : vector<9x1x8xf32> to vector<1x1x8xf32>
    %397 = vector.shape_cast %396 : vector<1x1x8xf32> to vector<1x8xf32>
    %398 = vector.shape_cast %397 : vector<1x8xf32> to vector<1x1x8xf32>
    %399 = vector.broadcast %398 : vector<1x1x8xf32> to vector<2x24x8xf32>
    %400 = arith.mulf %395, %399 : vector<2x24x8xf32>
    %401 = arith.addf %393, %400 : vector<2x24x8xf32>
    %c8_183 = arith.constant 8 : index
    %c1_184 = arith.constant 1 : index
    %c0_185 = arith.constant 0 : index
    %402 = vector.load %arg19[%c8_183, %c1_184, %c0_185] : memref<12x32x8xbf16, #tpu.memory_space<vmem>>, vector<2x24x8xbf16>
    %403 = arith.extf %402 : vector<2x24x8xbf16> to vector<2x24x8xf32>
    %404 = vector.extract_strided_slice %8 {offsets = [1, 0, 0], sizes = [1, 1, 8], strides = [1, 1, 1]} : vector<9x1x8xf32> to vector<1x1x8xf32>
    %405 = vector.shape_cast %404 : vector<1x1x8xf32> to vector<1x8xf32>
    %406 = vector.shape_cast %405 : vector<1x8xf32> to vector<1x1x8xf32>
    %407 = vector.broadcast %406 : vector<1x1x8xf32> to vector<2x24x8xf32>
    %408 = arith.mulf %403, %407 : vector<2x24x8xf32>
    %409 = arith.addf %401, %408 : vector<2x24x8xf32>
    %c8_186 = arith.constant 8 : index
    %c2_187 = arith.constant 2 : index
    %c0_188 = arith.constant 0 : index
    %410 = vector.load %arg19[%c8_186, %c2_187, %c0_188] : memref<12x32x8xbf16, #tpu.memory_space<vmem>>, vector<2x24x8xbf16>
    %411 = arith.extf %410 : vector<2x24x8xbf16> to vector<2x24x8xf32>
    %412 = vector.extract_strided_slice %8 {offsets = [2, 0, 0], sizes = [1, 1, 8], strides = [1, 1, 1]} : vector<9x1x8xf32> to vector<1x1x8xf32>
    %413 = vector.shape_cast %412 : vector<1x1x8xf32> to vector<1x8xf32>
    %414 = vector.shape_cast %413 : vector<1x8xf32> to vector<1x1x8xf32>
    %415 = vector.broadcast %414 : vector<1x1x8xf32> to vector<2x24x8xf32>
    %416 = arith.mulf %411, %415 : vector<2x24x8xf32>
    %417 = arith.addf %409, %416 : vector<2x24x8xf32>
    %c9 = arith.constant 9 : index
    %c0_189 = arith.constant 0 : index
    %c0_190 = arith.constant 0 : index
    %418 = vector.load %arg19[%c9, %c0_189, %c0_190] : memref<12x32x8xbf16, #tpu.memory_space<vmem>>, vector<2x24x8xbf16>
    %419 = arith.extf %418 : vector<2x24x8xbf16> to vector<2x24x8xf32>
    %420 = vector.extract_strided_slice %8 {offsets = [3, 0, 0], sizes = [1, 1, 8], strides = [1, 1, 1]} : vector<9x1x8xf32> to vector<1x1x8xf32>
    %421 = vector.shape_cast %420 : vector<1x1x8xf32> to vector<1x8xf32>
    %422 = vector.shape_cast %421 : vector<1x8xf32> to vector<1x1x8xf32>
    %423 = vector.broadcast %422 : vector<1x1x8xf32> to vector<2x24x8xf32>
    %424 = arith.mulf %419, %423 : vector<2x24x8xf32>
    %425 = arith.addf %417, %424 : vector<2x24x8xf32>
    %c9_191 = arith.constant 9 : index
    %c1_192 = arith.constant 1 : index
    %c0_193 = arith.constant 0 : index
    %426 = vector.load %arg19[%c9_191, %c1_192, %c0_193] : memref<12x32x8xbf16, #tpu.memory_space<vmem>>, vector<2x24x8xbf16>
    %427 = arith.extf %426 : vector<2x24x8xbf16> to vector<2x24x8xf32>
    %428 = vector.extract_strided_slice %8 {offsets = [4, 0, 0], sizes = [1, 1, 8], strides = [1, 1, 1]} : vector<9x1x8xf32> to vector<1x1x8xf32>
    %429 = vector.shape_cast %428 : vector<1x1x8xf32> to vector<1x8xf32>
    %430 = vector.shape_cast %429 : vector<1x8xf32> to vector<1x1x8xf32>
    %431 = vector.broadcast %430 : vector<1x1x8xf32> to vector<2x24x8xf32>
    %432 = arith.mulf %427, %431 : vector<2x24x8xf32>
    %433 = arith.addf %425, %432 : vector<2x24x8xf32>
    %c9_194 = arith.constant 9 : index
    %c2_195 = arith.constant 2 : index
    %c0_196 = arith.constant 0 : index
    %434 = vector.load %arg19[%c9_194, %c2_195, %c0_196] : memref<12x32x8xbf16, #tpu.memory_space<vmem>>, vector<2x24x8xbf16>
    %435 = arith.extf %434 : vector<2x24x8xbf16> to vector<2x24x8xf32>
    %436 = vector.extract_strided_slice %8 {offsets = [5, 0, 0], sizes = [1, 1, 8], strides = [1, 1, 1]} : vector<9x1x8xf32> to vector<1x1x8xf32>
    %437 = vector.shape_cast %436 : vector<1x1x8xf32> to vector<1x8xf32>
    %438 = vector.shape_cast %437 : vector<1x8xf32> to vector<1x1x8xf32>
    %439 = vector.broadcast %438 : vector<1x1x8xf32> to vector<2x24x8xf32>
    %440 = arith.mulf %435, %439 : vector<2x24x8xf32>
    %441 = arith.addf %433, %440 : vector<2x24x8xf32>
    %c10 = arith.constant 10 : index
    %c0_197 = arith.constant 0 : index
    %c0_198 = arith.constant 0 : index
    %442 = vector.load %arg19[%c10, %c0_197, %c0_198] : memref<12x32x8xbf16, #tpu.memory_space<vmem>>, vector<2x24x8xbf16>
    %443 = arith.extf %442 : vector<2x24x8xbf16> to vector<2x24x8xf32>
    %444 = vector.extract_strided_slice %8 {offsets = [6, 0, 0], sizes = [1, 1, 8], strides = [1, 1, 1]} : vector<9x1x8xf32> to vector<1x1x8xf32>
    %445 = vector.shape_cast %444 : vector<1x1x8xf32> to vector<1x8xf32>
    %446 = vector.shape_cast %445 : vector<1x8xf32> to vector<1x1x8xf32>
    %447 = vector.broadcast %446 : vector<1x1x8xf32> to vector<2x24x8xf32>
    %448 = arith.mulf %443, %447 : vector<2x24x8xf32>
    %449 = arith.addf %441, %448 : vector<2x24x8xf32>
    %c10_199 = arith.constant 10 : index
    %c1_200 = arith.constant 1 : index
    %c0_201 = arith.constant 0 : index
    %450 = vector.load %arg19[%c10_199, %c1_200, %c0_201] : memref<12x32x8xbf16, #tpu.memory_space<vmem>>, vector<2x24x8xbf16>
    %451 = arith.extf %450 : vector<2x24x8xbf16> to vector<2x24x8xf32>
    %452 = vector.extract_strided_slice %8 {offsets = [7, 0, 0], sizes = [1, 1, 8], strides = [1, 1, 1]} : vector<9x1x8xf32> to vector<1x1x8xf32>
    %453 = vector.shape_cast %452 : vector<1x1x8xf32> to vector<1x8xf32>
    %454 = vector.shape_cast %453 : vector<1x8xf32> to vector<1x1x8xf32>
    %455 = vector.broadcast %454 : vector<1x1x8xf32> to vector<2x24x8xf32>
    %456 = arith.mulf %451, %455 : vector<2x24x8xf32>
    %457 = arith.addf %449, %456 : vector<2x24x8xf32>
    %c10_202 = arith.constant 10 : index
    %c2_203 = arith.constant 2 : index
    %c0_204 = arith.constant 0 : index
    %458 = vector.load %arg19[%c10_202, %c2_203, %c0_204] : memref<12x32x8xbf16, #tpu.memory_space<vmem>>, vector<2x24x8xbf16>
    %459 = arith.extf %458 : vector<2x24x8xbf16> to vector<2x24x8xf32>
    %460 = vector.extract_strided_slice %8 {offsets = [8, 0, 0], sizes = [1, 1, 8], strides = [1, 1, 1]} : vector<9x1x8xf32> to vector<1x1x8xf32>
    %461 = vector.shape_cast %460 : vector<1x1x8xf32> to vector<1x8xf32>
    %462 = vector.shape_cast %461 : vector<1x8xf32> to vector<1x1x8xf32>
    %463 = vector.broadcast %462 : vector<1x1x8xf32> to vector<2x24x8xf32>
    %464 = arith.mulf %459, %463 : vector<2x24x8xf32>
    %465 = arith.addf %457, %464 : vector<2x24x8xf32>
    %466 = vector.shape_cast %9 : vector<1x8xf32> to vector<1x1x8xf32>
    %467 = vector.broadcast %466 : vector<1x1x8xf32> to vector<2x24x8xf32>
    %468 = arith.mulf %465, %467 : vector<2x24x8xf32>
    %469 = vector.shape_cast %10 : vector<1x8xf32> to vector<1x1x8xf32>
    %470 = vector.broadcast %469 : vector<1x1x8xf32> to vector<2x24x8xf32>
    %471 = arith.addf %468, %470 : vector<2x24x8xf32>
    %472 = arith.negf %471 : vector<2x24x8xf32>
    %473 = math.exp %472 : vector<2x24x8xf32>
    %cst_205 = arith.constant 1.000000e+00 : f32
    %474 = vector.broadcast %cst_205 : f32 to vector<2x24x8xf32>
    %475 = arith.addf %474, %473 : vector<2x24x8xf32>
    %476 = arith.divf %474, %475 : vector<2x24x8xf32>
    %477 = arith.mulf %471, %476 : vector<2x24x8xf32>
    %478 = vector.shape_cast %477 : vector<2x24x8xf32> to vector<48x8xf32>
    %479 = arith.truncf %478 : vector<48x8xf32> to vector<48x8xbf16>
    %cst_206 = arith.constant dense<0.000000e+00> : vector<48x8xf32>
    %480 = tpu.matmul %479, %11, %cst_206 {dimension_numbers = #tpu.dot_dimension_numbers<[1], [0], [0], [1], [0, 0, 1, 1], [], []>} : vector<48x8xbf16>, vector<8x8xbf16>, vector<48x8xf32> -> vector<48x8xf32>
    %481 = vector.broadcast %12 : vector<1x8xf32> to vector<48x8xf32>
    %482 = arith.mulf %480, %481 : vector<48x8xf32>
    %483 = vector.broadcast %13 : vector<1x8xf32> to vector<48x8xf32>
    %484 = arith.addf %482, %483 : vector<48x8xf32>
    %485 = arith.negf %484 : vector<48x8xf32>
    %486 = math.exp %485 : vector<48x8xf32>
    %cst_207 = arith.constant 1.000000e+00 : f32
    %487 = vector.broadcast %cst_207 : f32 to vector<48x8xf32>
    %488 = arith.addf %487, %486 : vector<48x8xf32>
    %489 = arith.divf %487, %488 : vector<48x8xf32>
    %490 = arith.mulf %484, %489 : vector<48x8xf32>
    %491 = vector.shape_cast %490 : vector<48x8xf32> to vector<2x24x8xf32>
    %492 = arith.truncf %491 : vector<2x24x8xf32> to vector<2x24x8xbf16>
    %c8_208 = arith.constant 8 : index
    %c0_209 = arith.constant 0 : index
    %c0_210 = arith.constant 0 : index
    %493 = vector.load %arg20[%c8_208, %c0_209, %c0_210] : memref<10x24x8xbf16, #tpu.memory_space<vmem>>, vector<2x24x8xbf16>
    tpu.vector_store %arg20[%c8_208, %c0_209, %c0_210], %492 {strides = array<i32>} : memref<10x24x8xbf16, #tpu.memory_space<vmem>>, vector<2x24x8xbf16>,
    %cst_211 = arith.constant 0.000000e+00 : bf16
    %494 = vector.broadcast %cst_211 : bf16 to vector<10x1x8xbf16>
    %c0_212 = arith.constant 0 : index
    %c0_213 = arith.constant 0 : index
    %c0_214 = arith.constant 0 : index
    %495 = vector.load %arg20[%c0_212, %c0_213, %c0_214] : memref<10x24x8xbf16, #tpu.memory_space<vmem>>, vector<10x1x8xbf16>
    tpu.vector_store %arg20[%c0_212, %c0_213, %c0_214], %494 {strides = array<i32>} : memref<10x24x8xbf16, #tpu.memory_space<vmem>>, vector<10x1x8xbf16>,
    %cst_215 = arith.constant 0.000000e+00 : bf16
    %496 = vector.broadcast %cst_215 : bf16 to vector<10x7x8xbf16>
    %c0_216 = arith.constant 0 : index
    %c17 = arith.constant 17 : index
    %c0_217 = arith.constant 0 : index
    %497 = vector.load %arg20[%c0_216, %c17, %c0_217] : memref<10x24x8xbf16, #tpu.memory_space<vmem>>, vector<10x7x8xbf16>
    tpu.vector_store %arg20[%c0_216, %c17, %c0_217], %496 {strides = array<i32>} : memref<10x24x8xbf16, #tpu.memory_space<vmem>>, vector<10x7x8xbf16>,
    %cst_218 = arith.constant 0.000000e+00 : bf16
    %498 = vector.broadcast %cst_218 : bf16 to vector<1x24x8xbf16>
    %c1_i32_219 = arith.constant 1 : i32
    %499 = arith.cmpi slt, %1, %c1_i32_219 : i32
    %500 = arith.extui %499 : i1 to i32
    %c0_i32_220 = arith.constant 0 : i32
    %501 = arith.cmpi ne, %500, %c0_i32_220 : i32
    scf.if %501 {
      %c0_260 = arith.constant 0 : index
      %c0_261 = arith.constant 0 : index
      %c0_262 = arith.constant 0 : index
      %600 = vector.load %arg20[%c0_260, %c0_261, %c0_262] : memref<10x24x8xbf16, #tpu.memory_space<vmem>>, vector<1x24x8xbf16>
      tpu.vector_store %arg20[%c0_260, %c0_261, %c0_262], %498 {strides = array<i32>} : memref<10x24x8xbf16, #tpu.memory_space<vmem>>, vector<1x24x8xbf16>,
    } else {
    }
    %c8_i32_221 = arith.constant 8 : i32
    %502 = arith.addi %1, %c8_i32_221 : i32
    %c16_i32_222 = arith.constant 16 : i32
    %503 = arith.cmpi sge, %502, %c16_i32_222 : i32
    %504 = arith.extui %503 : i1 to i32
    %c0_i32_223 = arith.constant 0 : i32
    %505 = arith.cmpi ne, %504, %c0_i32_223 : i32
    scf.if %505 {
      %c9_260 = arith.constant 9 : index
      %c0_261 = arith.constant 0 : index
      %c0_262 = arith.constant 0 : index
      %600 = vector.load %arg20[%c9_260, %c0_261, %c0_262] : memref<10x24x8xbf16, #tpu.memory_space<vmem>>, vector<1x24x8xbf16>
      tpu.vector_store %arg20[%c9_260, %c0_261, %c0_262], %498 {strides = array<i32>} : memref<10x24x8xbf16, #tpu.memory_space<vmem>>, vector<1x24x8xbf16>,
    } else {
    }
    %cst_224 = arith.constant 0.000000e+00 : f32
    %506 = vector.broadcast %cst_224 : f32 to vector<8x16x8xf32>
    %c0_225 = arith.constant 0 : index
    %c0_226 = arith.constant 0 : index
    %c0_227 = arith.constant 0 : index
    %507 = vector.load %arg20[%c0_225, %c0_226, %c0_227] : memref<10x24x8xbf16, #tpu.memory_space<vmem>>, vector<8x16x8xbf16>
    %508 = arith.extf %507 : vector<8x16x8xbf16> to vector<8x16x8xf32>
    %509 = vector.extract_strided_slice %14 {offsets = [0, 0, 0], sizes = [1, 1, 8], strides = [1, 1, 1]} : vector<9x1x8xf32> to vector<1x1x8xf32>
    %510 = vector.shape_cast %509 : vector<1x1x8xf32> to vector<1x8xf32>
    %511 = vector.shape_cast %510 : vector<1x8xf32> to vector<1x1x8xf32>
    %512 = vector.broadcast %511 : vector<1x1x8xf32> to vector<8x16x8xf32>
    %513 = arith.mulf %508, %512 : vector<8x16x8xf32>
    %514 = arith.addf %506, %513 : vector<8x16x8xf32>
    %c0_228 = arith.constant 0 : index
    %c1_229 = arith.constant 1 : index
    %c0_230 = arith.constant 0 : index
    %515 = vector.load %arg20[%c0_228, %c1_229, %c0_230] : memref<10x24x8xbf16, #tpu.memory_space<vmem>>, vector<8x16x8xbf16>
    %516 = arith.extf %515 : vector<8x16x8xbf16> to vector<8x16x8xf32>
    %517 = vector.extract_strided_slice %14 {offsets = [1, 0, 0], sizes = [1, 1, 8], strides = [1, 1, 1]} : vector<9x1x8xf32> to vector<1x1x8xf32>
    %518 = vector.shape_cast %517 : vector<1x1x8xf32> to vector<1x8xf32>
    %519 = vector.shape_cast %518 : vector<1x8xf32> to vector<1x1x8xf32>
    %520 = vector.broadcast %519 : vector<1x1x8xf32> to vector<8x16x8xf32>
    %521 = arith.mulf %516, %520 : vector<8x16x8xf32>
    %522 = arith.addf %514, %521 : vector<8x16x8xf32>
    %c0_231 = arith.constant 0 : index
    %c2_232 = arith.constant 2 : index
    %c0_233 = arith.constant 0 : index
    %523 = vector.load %arg20[%c0_231, %c2_232, %c0_233] : memref<10x24x8xbf16, #tpu.memory_space<vmem>>, vector<8x16x8xbf16>
    %524 = arith.extf %523 : vector<8x16x8xbf16> to vector<8x16x8xf32>
    %525 = vector.extract_strided_slice %14 {offsets = [2, 0, 0], sizes = [1, 1, 8], strides = [1, 1, 1]} : vector<9x1x8xf32> to vector<1x1x8xf32>
    %526 = vector.shape_cast %525 : vector<1x1x8xf32> to vector<1x8xf32>
    %527 = vector.shape_cast %526 : vector<1x8xf32> to vector<1x1x8xf32>
    %528 = vector.broadcast %527 : vector<1x1x8xf32> to vector<8x16x8xf32>
    %529 = arith.mulf %524, %528 : vector<8x16x8xf32>
    %530 = arith.addf %522, %529 : vector<8x16x8xf32>
    %c1_234 = arith.constant 1 : index
    %c0_235 = arith.constant 0 : index
    %c0_236 = arith.constant 0 : index
    %531 = vector.load %arg20[%c1_234, %c0_235, %c0_236] : memref<10x24x8xbf16, #tpu.memory_space<vmem>>, vector<8x16x8xbf16>
    %532 = arith.extf %531 : vector<8x16x8xbf16> to vector<8x16x8xf32>
    %533 = vector.extract_strided_slice %14 {offsets = [3, 0, 0], sizes = [1, 1, 8], strides = [1, 1, 1]} : vector<9x1x8xf32> to vector<1x1x8xf32>
    %534 = vector.shape_cast %533 : vector<1x1x8xf32> to vector<1x8xf32>
    %535 = vector.shape_cast %534 : vector<1x8xf32> to vector<1x1x8xf32>
    %536 = vector.broadcast %535 : vector<1x1x8xf32> to vector<8x16x8xf32>
    %537 = arith.mulf %532, %536 : vector<8x16x8xf32>
    %538 = arith.addf %530, %537 : vector<8x16x8xf32>
    %c1_237 = arith.constant 1 : index
    %c1_238 = arith.constant 1 : index
    %c0_239 = arith.constant 0 : index
    %539 = vector.load %arg20[%c1_237, %c1_238, %c0_239] : memref<10x24x8xbf16, #tpu.memory_space<vmem>>, vector<8x16x8xbf16>
    %540 = arith.extf %539 : vector<8x16x8xbf16> to vector<8x16x8xf32>
    %541 = vector.extract_strided_slice %14 {offsets = [4, 0, 0], sizes = [1, 1, 8], strides = [1, 1, 1]} : vector<9x1x8xf32> to vector<1x1x8xf32>
    %542 = vector.shape_cast %541 : vector<1x1x8xf32> to vector<1x8xf32>
    %543 = vector.shape_cast %542 : vector<1x8xf32> to vector<1x1x8xf32>
    %544 = vector.broadcast %543 : vector<1x1x8xf32> to vector<8x16x8xf32>
    %545 = arith.mulf %540, %544 : vector<8x16x8xf32>
    %546 = arith.addf %538, %545 : vector<8x16x8xf32>
    %c1_240 = arith.constant 1 : index
    %c2_241 = arith.constant 2 : index
    %c0_242 = arith.constant 0 : index
    %547 = vector.load %arg20[%c1_240, %c2_241, %c0_242] : memref<10x24x8xbf16, #tpu.memory_space<vmem>>, vector<8x16x8xbf16>
    %548 = arith.extf %547 : vector<8x16x8xbf16> to vector<8x16x8xf32>
    %549 = vector.extract_strided_slice %14 {offsets = [5, 0, 0], sizes = [1, 1, 8], strides = [1, 1, 1]} : vector<9x1x8xf32> to vector<1x1x8xf32>
    %550 = vector.shape_cast %549 : vector<1x1x8xf32> to vector<1x8xf32>
    %551 = vector.shape_cast %550 : vector<1x8xf32> to vector<1x1x8xf32>
    %552 = vector.broadcast %551 : vector<1x1x8xf32> to vector<8x16x8xf32>
    %553 = arith.mulf %548, %552 : vector<8x16x8xf32>
    %554 = arith.addf %546, %553 : vector<8x16x8xf32>
    %c2_243 = arith.constant 2 : index
    %c0_244 = arith.constant 0 : index
    %c0_245 = arith.constant 0 : index
    %555 = vector.load %arg20[%c2_243, %c0_244, %c0_245] : memref<10x24x8xbf16, #tpu.memory_space<vmem>>, vector<8x16x8xbf16>
    %556 = arith.extf %555 : vector<8x16x8xbf16> to vector<8x16x8xf32>
    %557 = vector.extract_strided_slice %14 {offsets = [6, 0, 0], sizes = [1, 1, 8], strides = [1, 1, 1]} : vector<9x1x8xf32> to vector<1x1x8xf32>
    %558 = vector.shape_cast %557 : vector<1x1x8xf32> to vector<1x8xf32>
    %559 = vector.shape_cast %558 : vector<1x8xf32> to vector<1x1x8xf32>
    %560 = vector.broadcast %559 : vector<1x1x8xf32> to vector<8x16x8xf32>
    %561 = arith.mulf %556, %560 : vector<8x16x8xf32>
    %562 = arith.addf %554, %561 : vector<8x16x8xf32>
    %c2_246 = arith.constant 2 : index
    %c1_247 = arith.constant 1 : index
    %c0_248 = arith.constant 0 : index
    %563 = vector.load %arg20[%c2_246, %c1_247, %c0_248] : memref<10x24x8xbf16, #tpu.memory_space<vmem>>, vector<8x16x8xbf16>
    %564 = arith.extf %563 : vector<8x16x8xbf16> to vector<8x16x8xf32>
    %565 = vector.extract_strided_slice %14 {offsets = [7, 0, 0], sizes = [1, 1, 8], strides = [1, 1, 1]} : vector<9x1x8xf32> to vector<1x1x8xf32>
    %566 = vector.shape_cast %565 : vector<1x1x8xf32> to vector<1x8xf32>
    %567 = vector.shape_cast %566 : vector<1x8xf32> to vector<1x1x8xf32>
    %568 = vector.broadcast %567 : vector<1x1x8xf32> to vector<8x16x8xf32>
    %569 = arith.mulf %564, %568 : vector<8x16x8xf32>
    %570 = arith.addf %562, %569 : vector<8x16x8xf32>
    %c2_249 = arith.constant 2 : index
    %c2_250 = arith.constant 2 : index
    %c0_251 = arith.constant 0 : index
    %571 = vector.load %arg20[%c2_249, %c2_250, %c0_251] : memref<10x24x8xbf16, #tpu.memory_space<vmem>>, vector<8x16x8xbf16>
    %572 = arith.extf %571 : vector<8x16x8xbf16> to vector<8x16x8xf32>
    %573 = vector.extract_strided_slice %14 {offsets = [8, 0, 0], sizes = [1, 1, 8], strides = [1, 1, 1]} : vector<9x1x8xf32> to vector<1x1x8xf32>
    %574 = vector.shape_cast %573 : vector<1x1x8xf32> to vector<1x8xf32>
    %575 = vector.shape_cast %574 : vector<1x8xf32> to vector<1x1x8xf32>
    %576 = vector.broadcast %575 : vector<1x1x8xf32> to vector<8x16x8xf32>
    %577 = arith.mulf %572, %576 : vector<8x16x8xf32>
    %578 = arith.addf %570, %577 : vector<8x16x8xf32>
    %579 = vector.shape_cast %15 : vector<1x8xf32> to vector<1x1x8xf32>
    %580 = vector.broadcast %579 : vector<1x1x8xf32> to vector<8x16x8xf32>
    %581 = arith.mulf %578, %580 : vector<8x16x8xf32>
    %582 = vector.shape_cast %16 : vector<1x8xf32> to vector<1x1x8xf32>
    %583 = vector.broadcast %582 : vector<1x1x8xf32> to vector<8x16x8xf32>
    %584 = arith.addf %581, %583 : vector<8x16x8xf32>
    %585 = arith.negf %584 : vector<8x16x8xf32>
    %586 = math.exp %585 : vector<8x16x8xf32>
    %cst_252 = arith.constant 1.000000e+00 : f32
    %587 = vector.broadcast %cst_252 : f32 to vector<8x16x8xf32>
    %588 = arith.addf %587, %586 : vector<8x16x8xf32>
    %589 = arith.divf %587, %588 : vector<8x16x8xf32>
    %590 = arith.mulf %584, %589 : vector<8x16x8xf32>
    %c3_i32 = arith.constant 3 : i32
    %591 = arith.addi %1, %c3_i32 : i32
    %c0_i32_253 = arith.constant 0 : i32
    %592 = arith.addi %591, %c0_i32_253 : i32
    %c0_254 = arith.constant 0 : index
    %593 = arith.index_cast %592 : i32 to index
    %c3 = arith.constant 3 : index
    %c0_255 = arith.constant 0 : index
    %594 = vector.load %arg2[%c0_254, %593, %c3, %c0_255] : memref<1x22x34x8xf32, #tpu.memory_space<vmem>>, vector<1x8x16x8xf32>
    %595 = vector.shape_cast %594 : vector<1x8x16x8xf32> to vector<8x16x8xf32>
    %596 = arith.addf %590, %595 : vector<8x16x8xf32>
    %c0_256 = arith.constant 0 : index
    %c0_257 = arith.constant 0 : index
    %c0_258 = arith.constant 0 : index
    %c0_259 = arith.constant 0 : index
    %597 = vector.load %arg18[%c0_256, %c0_257, %c0_258, %c0_259] : memref<1x8x16x8xf32, #tpu.memory_space<vmem>>, vector<1x8x16x8xf32>
    %598 = vector.shape_cast %597 : vector<1x8x16x8xf32> to vector<8x16x8xf32>
    %599 = vector.shape_cast %596 : vector<8x16x8xf32> to vector<1x8x16x8xf32>
    tpu.vector_store %arg18[%c0_256, %c0_257, %c0_258, %c0_259], %599 {strides = array<i32>} : memref<1x8x16x8xf32, #tpu.memory_space<vmem>>, vector<1x8x16x8xf32>,
    return
  }
  func.func @transform_0(%arg0: i32, %arg1: i32) -> (i32, i32, i32, i32) {
    %c0_i32 = arith.constant 0 : i32
    %c0_i32_0 = arith.constant 0 : i32
    %c0_i32_1 = arith.constant 0 : i32
    %c0_i32_2 = arith.constant 0 : i32
    return %arg0, %c0_i32, %c0_i32_0, %c0_i32_1 : i32, i32, i32, i32
  }
  func.func @transform_1(%arg0: i32, %arg1: i32) -> (i32, i32, i32) {
    %c0_i32 = arith.constant 0 : i32
    %c0_i32_0 = arith.constant 0 : i32
    %c0_i32_1 = arith.constant 0 : i32
    %c0_i32_2 = arith.constant 0 : i32
    return %c0_i32, %c0_i32_0, %c0_i32_1 : i32, i32, i32
  }
  func.func @transform_2(%arg0: i32, %arg1: i32) -> (i32, i32) {
    %c0_i32 = arith.constant 0 : i32
    %c0_i32_0 = arith.constant 0 : i32
    %c0_i32_1 = arith.constant 0 : i32
    return %c0_i32, %c0_i32_0 : i32, i32
  }
  func.func @transform_3(%arg0: i32, %arg1: i32) -> (i32, i32) {
    %c0_i32 = arith.constant 0 : i32
    %c0_i32_0 = arith.constant 0 : i32
    %c0_i32_1 = arith.constant 0 : i32
    return %c0_i32, %c0_i32_0 : i32, i32
  }
  func.func @transform_4(%arg0: i32, %arg1: i32) -> (i32, i32) {
    %c0_i32 = arith.constant 0 : i32
    %c0_i32_0 = arith.constant 0 : i32
    %c0_i32_1 = arith.constant 0 : i32
    return %c0_i32, %c0_i32_0 : i32, i32
  }
  func.func @transform_5(%arg0: i32, %arg1: i32) -> (i32, i32) {
    %c0_i32 = arith.constant 0 : i32
    %c0_i32_0 = arith.constant 0 : i32
    %c0_i32_1 = arith.constant 0 : i32
    return %c0_i32, %c0_i32_0 : i32, i32
  }
  func.func @transform_6(%arg0: i32, %arg1: i32) -> (i32, i32) {
    %c0_i32 = arith.constant 0 : i32
    %c0_i32_0 = arith.constant 0 : i32
    %c0_i32_1 = arith.constant 0 : i32
    return %c0_i32, %c0_i32_0 : i32, i32
  }
  func.func @transform_7(%arg0: i32, %arg1: i32) -> (i32, i32, i32) {
    %c0_i32 = arith.constant 0 : i32
    %c0_i32_0 = arith.constant 0 : i32
    %c0_i32_1 = arith.constant 0 : i32
    %c0_i32_2 = arith.constant 0 : i32
    return %c0_i32, %c0_i32_0, %c0_i32_1 : i32, i32, i32
  }
  func.func @transform_8(%arg0: i32, %arg1: i32) -> (i32, i32) {
    %c0_i32 = arith.constant 0 : i32
    %c0_i32_0 = arith.constant 0 : i32
    %c0_i32_1 = arith.constant 0 : i32
    return %c0_i32, %c0_i32_0 : i32, i32
  }
  func.func @transform_9(%arg0: i32, %arg1: i32) -> (i32, i32) {
    %c0_i32 = arith.constant 0 : i32
    %c0_i32_0 = arith.constant 0 : i32
    %c0_i32_1 = arith.constant 0 : i32
    return %c0_i32, %c0_i32_0 : i32, i32
  }
  func.func @transform_10(%arg0: i32, %arg1: i32) -> (i32, i32) {
    %c0_i32 = arith.constant 0 : i32
    %c0_i32_0 = arith.constant 0 : i32
    %c0_i32_1 = arith.constant 0 : i32
    return %c0_i32, %c0_i32_0 : i32, i32
  }
  func.func @transform_11(%arg0: i32, %arg1: i32) -> (i32, i32) {
    %c0_i32 = arith.constant 0 : i32
    %c0_i32_0 = arith.constant 0 : i32
    %c0_i32_1 = arith.constant 0 : i32
    return %c0_i32, %c0_i32_0 : i32, i32
  }
  func.func @transform_12(%arg0: i32, %arg1: i32) -> (i32, i32) {
    %c0_i32 = arith.constant 0 : i32
    %c0_i32_0 = arith.constant 0 : i32
    %c0_i32_1 = arith.constant 0 : i32
    return %c0_i32, %c0_i32_0 : i32, i32
  }
  func.func @transform_13(%arg0: i32, %arg1: i32) -> (i32, i32, i32) {
    %c0_i32 = arith.constant 0 : i32
    %c0_i32_0 = arith.constant 0 : i32
    %c0_i32_1 = arith.constant 0 : i32
    %c0_i32_2 = arith.constant 0 : i32
    return %c0_i32, %c0_i32_0, %c0_i32_1 : i32, i32, i32
  }
  func.func @transform_14(%arg0: i32, %arg1: i32) -> (i32, i32) {
    %c0_i32 = arith.constant 0 : i32
    %c0_i32_0 = arith.constant 0 : i32
    %c0_i32_1 = arith.constant 0 : i32
    return %c0_i32, %c0_i32_0 : i32, i32
  }
  func.func @transform_15(%arg0: i32, %arg1: i32) -> (i32, i32) {
    %c0_i32 = arith.constant 0 : i32
    %c0_i32_0 = arith.constant 0 : i32
    %c0_i32_1 = arith.constant 0 : i32
    return %c0_i32, %c0_i32_0 : i32, i32
  }
  func.func @transform_16(%arg0: i32, %arg1: i32) -> (i32, i32, i32, i32) {
    %c0_i32 = arith.constant 0 : i32
    %c0_i32_0 = arith.constant 0 : i32
    %c0_i32_1 = arith.constant 0 : i32
    return %arg0, %arg1, %c0_i32, %c0_i32_0 : i32, i32, i32, i32
  }
}

</mosaic_0001>

<bundles_post_ra>
// kernel: tpu_custom_call.1
= control target key start
LH: loop header
LB: loop body
LE: loop exit
PB: predicated region body
PF: predicated region fallthrough
CT: control target
= control target key end

     0   :  { %s9781_s21 = smov 0   ;;  %s9783_s22 = smov 0   ;;  %s14537_s0 = inlined_call_operand.vmem [shape: f32[2,22,34,8], index: 0, kind: input, shape index: {}]   ;;  %s14538_s1 = inlined_call_operand.vmem [shape: f32[9,1,8], index: 1, kind: input, shape index: {}]   ;;  %s14539_s2 = inlined_call_operand.vmem [shape: f32[1,8], index: 2, kind: input, shape index: {}]   ;;  %s14540_s3 = inlined_call_operand.vmem [shape: f32[1,8], index: 3, kind: input, shape index: {}]   ;;  %s14541_s4 = inlined_call_operand.vmem [shape: bf16[8,8], index: 4, kind: input, shape index: {}]   ;;  %s14542_s5 = inlined_call_operand.vmem [shape: f32[1,8], index: 5, kind: input, shape index: {}]   ;;  %s14543_s6 = inlined_call_operand.vmem [shape: f32[1,8], index: 6, kind: input, shape index: {}]   ;;  %s14544_s7 = inlined_call_operand.vmem [shape: f32[9,1,8], index: 7, kind: input, shape index: {}]   ;;  %s14545_s8 = inlined_call_operand.vmem [shape: f32[1,8], index: 8, kind: input, shape index: {}]   ;;  %s14546_s9 = inlined_call_operand.vmem [shape: f32[1,8], index: 9, kind: input, shape index: {}]   ;;  %s14547_s10 = inlined_call_operand.vmem [shape: bf16[8,8], index: 10, kind: input, shape index: {}]   ;;  %s14548_s11 = inlined_call_operand.vmem [shape: f32[1,8], index: 11, kind: input, shape index: {}]   ;;  %s14549_s12 = inlined_call_operand.vmem [shape: f32[1,8], index: 12, kind: input, shape index: {}]   ;;  %s14550_s13 = inlined_call_operand.vmem [shape: f32[9,1,8], index: 13, kind: input, shape index: {}]   ;;  %s14551_s14 = inlined_call_operand.vmem [shape: f32[1,8], index: 14, kind: input, shape index: {}]   ;;  %s14552_s15 = inlined_call_operand.vmem [shape: f32[1,8], index: 15, kind: input, shape index: {}]   ;;  %s14553_s16 = inlined_call_operand.vmem [shape: f32[2,16,16,8], index: 16, kind: output, shape index: {}]  }
   0x1   :  { %14704 = sst [smem:[#allocation56_spill]] %s14537_s0  ;;  %s9785_s23 = smov 0  }
   0x2   :  { %14705 = sst [smem:[#allocation57_spill]] %s14541_s4  ;;  %s9787_s24 = smov 0  }
   0x3   :  { %14706 = sst [smem:[#allocation58_spill]] %s14544_s7  ;;  %s9789_s25 = smov 0  }
   0x4   :  { %14707 = sst [smem:[#allocation59_spill]] %s14545_s8 }
   0x5   :  { %14708 = sst [smem:[#allocation60_spill]] %s14546_s9 }
   0x6   :  { %14709 = sst [smem:[#allocation61_spill]] %s14547_s10 }
   0x7   :  { %14710 = sst [smem:[#allocation62_spill]] %s14548_s11 }
   0x8 LB: > { %s35_s26 = sadd.s32 1, %s9677_s23  ;;  %s38_s27 = sadd.s32 1, %s9681_s24  ;;  %s9685_s25 = sphi %s9789_s25, %s26_s25   ;;  %s9681_s24 = sphi %s9787_s24, %s14938_s24   ;;  %s9677_s23 = sphi %s9785_s23, %s14937_s23   ;;  %s9673_s22 = sphi %s9783_s22, %s14936_s22   ;;  %s9669_s21 = sphi %s9781_s21, %s14935_s21  }
   0x9   : > { %p36_p0 = scmp.ge.s32.totalorder %s35_s26, 2  ;;  %p7761_p1 = scmp.ge.s32.totalorder %s9685_s25, 1 }
   0xa   : > { %p476_p2 = scmp.lt.s32.totalorder %s9685_s25, 5 }
   0xb   : > { %s14940_s26 = smov (%p36_p0, %s35_s26), 0  ;;  %s14942_s27 = smov (!%p36_p0, %s38_s27), %s9681_s24 }
   0xc   : > { %14711 = sst [smem:[#allocation4_spill]] %s14940_s26  ;;  %p477_p3 = pnand %p7761_p1, %p476_p2 }
   0xd   : > { %p40_p4 = scmp.ge.s32.totalorder %s14942_s27, 2 }
   0xe   : > { %480 = sbr.rel (%p477_p3) target bundleno = 1529 (0x5f9), region = 84 }
   0xf   : > { %s14944_s27 = smov (%p40_p4, %s14942_s27), 0 }
  0x10   : > { %14712 = sst [smem:[#allocation5_spill]] %s14944_s27 }
  0x13   : > { %s14713_s7 = sld [smem:[#allocation58_spill]]  ;;  %v9886_v14 = vld [vmem:[%s14549_s12] ss:$0 sm:$0xff]  ;;  %v9896_v16 = vld [vmem:[%s14550_s13 + $0x1] ss:$0 sm:$0xff]  ;;  %vm1879_vm0 = vcmask 1043456  }
  0x14   : > { %s14723_s8 = sld [smem:[#allocation59_spill]]  ;;  %14732 = vst [vmem:[#allocation19_spill] sm:$0xff] %v9886_v14  ;;  %v9891_v15 = vld [vmem:[%s14550_s13] ss:$0 sm:$0xff]  ;;  %14734 = vst [vmem:[#allocation21_spill] sm:$0xff] %v9896_v16  ;;  %p531_p5 = scmp.lt.s32.totalorder %s9673_s22, 1 }
  0x15   : > { %s14725_s9 = sld [smem:[#allocation60_spill]]  ;;  %14733 = vst [vmem:[#allocation20_spill] sm:$0xff] %v9891_v15  ;;  %v9901_v17 = vld [vmem:[%s14550_s13 + $0x2] ss:$0 sm:$0xff]  ;;  %v9906_v18 = vld [vmem:[%s14550_s13 + $0x3] ss:$0 sm:$0xff] }
  0x16   : > { %s14727_s4 = sld [smem:[#allocation57_spill]]  ;;  %14735 = vst [vmem:[#allocation22_spill] sm:$0xff] %v9901_v17  ;;  %14736 = vst [vmem:[#allocation23_spill] sm:$0xff] %v9906_v18  ;;  %v9911_v19 = vld [vmem:[%s14550_s13 + $0x4] ss:$0 sm:$0xff]  ;;  %s9948_s30 = sshll.u32 %s9669_s21, 3 }
  0x17   : > { %s14728_s10 = sld [smem:[#allocation61_spill]]  ;;  %14737 = vst [vmem:[#allocation24_spill] sm:$0xff] %v9911_v19  ;;  %v9916_v20 = vld [vmem:[%s14550_s13 + $0x5] ss:$0 sm:$0xff]  ;;  %v9921_v21 = vld [vmem:[%s14550_s13 + $0x6] ss:$0 sm:$0xff] }
  0x18   : > { %s14730_s11 = sld [smem:[#allocation62_spill]]  ;;  %14738 = vst [vmem:[#allocation25_spill] sm:$0xff] %v9916_v20  ;;  %14739 = vst [vmem:[#allocation26_spill] sm:$0xff] %v9921_v21  ;;  %v9926_v22 = vld [vmem:[%s14550_s13 + $0x7] ss:$0 sm:$0xff]  ;;  %s14946_s22 = smov (!%p531_p5, %s9673_s22), 1 }
  0x19   : > { %v9818_v0 = vld [vmem:[%s14713_s7] ss:$0 sm:$0xff]  ;;  %v9823_v1 = vld [vmem:[%s14713_s7 + $0x1] ss:$0 sm:$0xff]  ;;  %v9828_v2 = vld [vmem:[%s14713_s7 + $0x2] ss:$0 sm:$0xff] }
  0x1a   : > { %14714 = vst [vmem:[#allocation6_spill] sm:$0xff] %v9818_v0  ;;  %14715 = vst [vmem:[#allocation7_spill] sm:$0xff] %v9823_v1  ;;  %v9833_v3 = vld [vmem:[%s14713_s7 + $0x3] ss:$0 sm:$0xff]  ;;  %v9838_v4 = vld [vmem:[%s14713_s7 + $0x4] ss:$0 sm:$0xff] }
  0x1b   : > { %14716 = vst [vmem:[#allocation8_spill] sm:$0xff] %v9828_v2  ;;  %14717 = vst [vmem:[#allocation9_spill] sm:$0xff] %v9833_v3  ;;  %v9843_v5 = vld [vmem:[%s14713_s7 + $0x5] ss:$0 sm:$0xff]  ;;  %v9848_v6 = vld [vmem:[%s14713_s7 + $0x6] ss:$0 sm:$0xff] }
  0x1c   : > { %14718 = vst [vmem:[#allocation10_spill] sm:$0xff] %v9838_v4  ;;  %14719 = vst [vmem:[#allocation11_spill] sm:$0xff] %v9843_v5  ;;  %v9853_v7 = vld [vmem:[%s14713_s7 + $0x7] ss:$0 sm:$0xff]  ;;  %v9858_v8 = vld [vmem:[%s14713_s7 + $0x8] ss:$0 sm:$0xff] }
  0x1d   : > { %14720 = vst [vmem:[#allocation12_spill] sm:$0xff] %v9848_v6  ;;  %14721 = vst [vmem:[#allocation13_spill] sm:$0xff] %v9853_v7  ;;  %v9863_v9 = vld [vmem:[%s14723_s8] ss:$0 sm:$0xff]  ;;  %v9931_v23 = vld [vmem:[%s14550_s13 + $0x8] ss:$0 sm:$0xff] }
  0x1e   : > { %14722 = vst [vmem:[#allocation14_spill] sm:$0xff] %v9858_v8  ;;  %14724 = vst [vmem:[#allocation15_spill] sm:$0xff] %v9863_v9  ;;  %v9868_v10 = vld [vmem:[%s14725_s9] ss:$0 sm:$0xff]  ;;  %p539_p6 = scmp.lt.s32.totalorder %s9948_s30, 15  ;;  %s7768_s0 = smul.u32 320, %s9669_s21 }
  0x1f   : > { %14726 = vst [vmem:[#allocation16_spill] sm:$0xff] %v9868_v10  ;;  %v560_v11 = vld [vmem:[%s14727_s4] sm:$0xf]  ;;  %14740 = vst [vmem:[#allocation27_spill] sm:$0xff] %v9926_v22  ;;  %s8885_s17 = smul.u32 880, %s14946_s22  ;;  %s7765_s18 = sshll.u32 %s14946_s22, 5 }
  0x20   : > { %v9876_v12 = vld [vmem:[%s14728_s10] sm:$0xf]  ;;  %14741 = vst [vmem:[#allocation28_spill] sm:$0xff] %v9931_v23  ;;  %8882 = vmatprep.subr.msk.bf16.mxu0 %vm1879_vm0, %v560_v11  ;;  %8883 = vmatprep.subr.msk.bf16.mxu1 %vm1879_vm0, %v560_v11  ;;  %v1881_v26 = vsel %vm1879_vm0, %v560_v11, 0  ;;  %s540_s19 = scalar_select %p539_p6, %s9948_s30, 15  ;;  %vm1830_vm1 = vcmask 64512  }
  0x21   : > { %14729 = vst [vmem:[#allocation17_spill] sm:$0xff] %v9876_v12  ;;  %v9881_v13 = vld [vmem:[%s14730_s11] ss:$0 sm:$0xff]  ;;  %8791 = vmatpush3.bf16.msra.mxu0 %v1881_v26  ;;  %8825 = vmatpush3.bf16.msra.mxu1 %v1881_v26  ;;  %v9962_v28 = vld [vmem:[%s14538_s1 + $0x1] ss:$0 sm:$0xff]  ;;  %s14744_s7 = sld [smem:[#allocation56_spill]] }
  0x22   : > { %14731 = vst [vmem:[#allocation18_spill] sm:$0xff] %v9881_v13  ;;  %v9936_v24 = vld [vmem:[%s14551_s14] ss:$0 sm:$0xff]  ;;  %v9970_v29 = vld [vmem:[%s14538_s1 + $0x2] ss:$0 sm:$0xff]  ;;  %s2505_s20 = sadd.s32 8, %s9948_s30 }
  0x23   : > { %14742 = vst [vmem:[#allocation29_spill] sm:$0xff] %v9936_v24  ;;  %v9941_v25 = vld [vmem:[%s14552_s15] ss:$0 sm:$0xff]  ;;  %v9975_v30 = vld [vmem:[%s14538_s1 + $0x3] ss:$0 sm:$0xff]  ;;  %s7764_s26 = sshll.u32 %s540_s19, 1 }
  0x24   : > { %14743 = vst [vmem:[#allocation30_spill] sm:$0xff] %v9941_v25  ;;  %v9957_v27 = vld [vmem:[%s14538_s1] ss:$0 sm:$0xff]  ;;  %v9981_v31 = vld [vmem:[%s14538_s1 + $0x4] ss:$0 sm:$0xff]  ;;  %s543_s9 = sadd.s32 %s7765_s18, %s7764_s26  ;;  %vm2472_vm2 = vcmask 60416  }
  0x25   : > { %v9986_v32 = vld [vmem:[%s14538_s1 + $0x5] ss:$0 sm:$0xff]  ;;  %v9993_v33 = vld [vmem:[%s14538_s1 + $0x6] ss:$0 sm:$0xff]  ;;  %v9998_v34 = vld [vmem:[%s14538_s1 + $0x7] ss:$0 sm:$0xff] }
  0x26   : > { %s7766_s11 = sshll.u32 %s543_s9, 3  ;;  %v10007_v38 = vld [vmem:[%s14538_s1 + $0x8] ss:$0 sm:$0xff]  ;;  %vm3457_vm3 = vcmask 60417   ;;  %vm3444_vm4 = vcmask 57344   ;;  %p8296_p7 = scmp.ge.s32.totalorder %s9948_s30, 2 }
  0x27   : > { %s535_s8 = scalar_lea.vmem %s14744_s7, %s8885_s17  ;;  %s10018_s26 = scalar_lea.vmem %s14553_s16, %s7766_s11 }
  0x28   : > { %s9988_s7 = scalar_lea.vmem %s535_s8, %s7768_s0  ;;  %s2652_s8 = sadd.s32 9, %s9948_s30 }
  0x29   : > { %v590_v35 = vld [vmem:[%s9988_s7] sm:$0xff]  ;;  %v591_v36 = vld [vmem:[%s9988_s7 + $0x8] sm:$0xff]  ;;  %v10027_v49 = vld [vmem:[%s9988_s7 + $0x30] sm:$0xff] }
  0x2a   : > { %v692_v37 = vld [vmem:[%s9988_s7 + $0x1] sm:$0xff]  ;;  %v628_v39 = vmul.f32 %v9957_v27, %v590_v35  ;;  %v629_v40 = vmul.f32 %v9957_v27, %v591_v36  ;;  %v693_v41 = vld [vmem:[%s9988_s7 + $0x9] sm:$0xff]  ;;  %v938_v53 = vmul.f32 %v9975_v30, %v10027_v49  ;;  %v10037_v54 = vld [vmem:[%s9988_s7 + $0x31] sm:$0xff] }
  0x2b   : > { %v730_v42 = vmul.f32 %v9962_v28, %v692_v37  ;;  %v794_v43 = vld [vmem:[%s9988_s7 + $0x2] sm:$0xff]  ;;  %v795_v44 = vld [vmem:[%s9988_s7 + $0xa] sm:$0xff]  ;;  %v731_v45 = vmul.f32 %v9962_v28, %v693_v41  ;;  %v10045_v57 = vld [vmem:[%s9988_s7 + $0x32] sm:$0xff]  ;;  %v1040_v59 = vmul.f32 %v9981_v31, %v10037_v54 }
  0x2c   : > { %v832_v46 = vmul.f32 %v9970_v29, %v794_v43  ;;  %v833_v47 = vmul.f32 %v9970_v29, %v795_v44  ;;  %v10024_v48 = vld [vmem:[%s9988_s7 + $0x28] sm:$0xff]  ;;  %v1142_v61 = vmul.f32 %v9986_v32, %v10045_v57  ;;  %v10054_v62 = vld [vmem:[%s9988_s7 + $0x50] sm:$0xff]  ;;  %v10057_v63 = vld [vmem:[%s9988_s7 + $0x58] sm:$0xff] }
  0x2d   : > { %v10030_v50 = vld [vmem:[%s9988_s7 + $0x29] sm:$0xff]  ;;  %v762_v51 = vadd.f32 %v730_v42, %v628_v39  ;;  %v937_v52 = vmul.f32 %v9975_v30, %v10024_v48  ;;  %v763_v58 = vadd.f32 %v731_v45, %v629_v40  ;;  %v10060_v11 = vld [vmem:[%s9988_s7 + $0x51] sm:$0xff]  ;;  %v1246_v35 = vmul.f32 %v9993_v33, %v10054_v62  ;;  %v10067_v37 = vld [vmem:[%s9988_s7 + $0x59] sm:$0xff] }
  0x2e   : > { %v1039_v55 = vmul.f32 %v9981_v31, %v10030_v50  ;;  %v10042_v56 = vld [vmem:[%s9988_s7 + $0x2a] sm:$0xff]  ;;  %v1247_v36 = vmul.f32 %v9993_v33, %v10057_v63  ;;  %v10071_v39 = vmul.f32 %v9998_v34, %v10060_v11  ;;  %v10074_v40 = vld [vmem:[%s9988_s7 + $0x52] sm:$0xff]  ;;  %v10077_v41 = vld [vmem:[%s9988_s7 + $0x5a] sm:$0xff]  ;;  %v10081_v43 = vmul.f32 %v9998_v34, %v10067_v37 }
  0x2f   : > { %v1141_v60 = vmul.f32 %v9986_v32, %v10042_v56  ;;  %v864_v26 = vadd.f32 %v832_v46, %v762_v51  ;;  %v865_v42 = vadd.f32 %v833_v47, %v763_v58  ;;  %v10085_v44 = vmul.f32 %v10007_v38, %v10074_v40  ;;  %v8092_v46 = vld [vmem:[%s9988_s7 + $0x140] sm:$0xff]  ;;  %v8093_v51 = vld [vmem:[%s9988_s7 + $0x148] sm:$0xff]  ;;  %v10136_v13 = vld [vmem:[%s9988_s7 + $0x191] sm:$0xff] }
  0x30   : > { %v10089_v45 = vmul.f32 %v10007_v38, %v10077_v41  ;;  %v8108_v25 = vld [vmem:[%s9988_s7 + $0x141] sm:$0xff]  ;;  %v2524_v47 = vmul.f32 %v8092_v46, %v9957_v27  ;;  %v2525_v58 = vmul.f32 %v8093_v51, %v9957_v27  ;;  %v8109_v23 = vld [vmem:[%s9988_s7 + $0x149] sm:$0xff]  ;;  %v2866_v3 = vmul.f32 %v10136_v13, %v9998_v34 }
  0x31   : > { %v969_v24 = vadd.f32 %v937_v52, %v864_v26  ;;  %v2572_v22 = vmul.f32 %v8108_v25, %v9962_v28  ;;  %v8124_v21 = vld [vmem:[%s9988_s7 + $0x142] sm:$0xff]  ;;  %v8125_v20 = vld [vmem:[%s9988_s7 + $0x14a] sm:$0xff]  ;;  %v970_v19 = vadd.f32 %v938_v53, %v865_v42  ;;  %v2573_v18 = vmul.f32 %v8109_v23, %v9962_v28  ;;  %v10123_v42 = vld [vmem:[%s9988_s7 + $0x172] sm:$0xff] }
  0x32   : > { %v2620_v17 = vmul.f32 %v8124_v21, %v9970_v29  ;;  %v2621_v52 = vmul.f32 %v8125_v20, %v9970_v29  ;;  %v10104_v26 = vld [vmem:[%s9988_s7 + $0x168] sm:$0xff]  ;;  %v10107_v46 = vld [vmem:[%s9988_s7 + $0x170] sm:$0xff]  ;;  %v10149_v8 = vld [vmem:[%s9988_s7 + $0x19a] sm:$0xff] }
  0x33   : > { %v10110_v51 = vld [vmem:[%s9988_s7 + $0x169] sm:$0xff]  ;;  %v1071_v25 = vadd.f32 %v1039_v55, %v969_v24  ;;  %v2588_v16 = vadd.f32 %v2572_v22, %v2524_v47  ;;  %v2671_v53 = vmul.f32 %v10104_v26, %v9975_v30  ;;  %v2672_v21 = vmul.f32 %v10107_v46, %v9975_v30  ;;  %v10117_v23 = vld [vmem:[%s9988_s7 + $0x171] sm:$0xff]  ;;  %14746 = vst [vmem:[#allocation32_spill] sm:$0xff] %v10149_v8 }
  0x34   : > { %v10120_v20 = vld [vmem:[%s9988_s7 + $0x16a] sm:$0xff]  ;;  %v1072_v15 = vadd.f32 %v1040_v59, %v970_v19  ;;  %v2589_v14 = vadd.f32 %v2573_v18, %v2525_v58  ;;  %v2719_v22 = vmul.f32 %v10110_v51, %v9981_v31  ;;  %v2720_v24 = vmul.f32 %v10117_v23, %v9981_v31  ;;  %v10133_v47 = vld [vmem:[%s9988_s7 + $0x198] sm:$0xff] }
  0x35   : > { %v10130_v55 = vld [vmem:[%s9988_s7 + $0x190] sm:$0xff]  ;;  %v1173_v10 = vadd.f32 %v1141_v60, %v1071_v25  ;;  %v2636_v9 = vadd.f32 %v2620_v17, %v2588_v16  ;;  %v2767_v18 = vmul.f32 %v10120_v20, %v9986_v32  ;;  %v2768_v19 = vmul.f32 %v10123_v42, %v9986_v32  ;;  %v10143_v59 = vld [vmem:[%s9988_s7 + $0x199] sm:$0xff] }
  0x36   : > { %14745 = vst [vmem:[#allocation31_spill] sm:$0xff] %v10143_v59  ;;  %v10146_v58 = vld [vmem:[%s9988_s7 + $0x192] sm:$0xff]  ;;  %v1174_v7 = vadd.f32 %v1142_v61, %v1072_v15  ;;  %v2637_v6 = vadd.f32 %v2621_v52, %v2589_v14  ;;  %v2818_v16 = vmul.f32 %v10130_v55, %v9993_v33  ;;  %v2819_v17 = vmul.f32 %v10133_v47, %v9993_v33 }
  0x37   : > { %v592_v60 = vld [vmem:[%s9988_s7 + $0x10] sm:$0xff]  ;;  %v593_v25 = vld [vmem:[%s9988_s7 + $0x18] sm:$0xff]  ;;  %v1278_v5 = vadd.f32 %v1246_v35, %v1173_v10  ;;  %v2687_v4 = vadd.f32 %v2671_v53, %v2636_v9  ;;  %v2867_v2 = vmul.f32 %v10143_v59, %v9998_v34  ;;  %v2914_v1 = vmul.f32 %v10146_v58, %v10007_v38 }
  0x38   : > { %v694_v15 = vld [vmem:[%s9988_s7 + $0x11] sm:$0xff]  ;;  %v695_v61 = vld [vmem:[%s9988_s7 + $0x19] sm:$0xff]  ;;  %v1279_v14 = vadd.f32 %v1247_v36, %v1174_v7  ;;  %v2688_v52 = vadd.f32 %v2672_v21, %v2637_v6  ;;  %v2915_v0 = vmul.f32 %v10149_v8, %v10007_v38  ;;  %v630_v12 = vmul.f32 %v9957_v27, %v592_v60 }
  0x39   : > { %v796_v10 = vld [vmem:[%s9988_s7 + $0x12] sm:$0xff]  ;;  %v797_v9 = vld [vmem:[%s9988_s7 + $0x1a] sm:$0xff]  ;;  %v1380_v35 = vadd.f32 %v10071_v39, %v1278_v5  ;;  %v2735_v53 = vadd.f32 %v2719_v22, %v2687_v4  ;;  %v631_v59 = vmul.f32 %v9957_v27, %v593_v25  ;;  %v732_v21 = vmul.f32 %v9962_v28, %v694_v15 }
  0x3a   : > { %v10175_v7 = vld [vmem:[%s14539_s2] ss:$0 sm:$0xff]  ;;  %v1381_v6 = vadd.f32 %v10081_v43, %v1279_v14  ;;  %v2736_v36 = vadd.f32 %v2720_v24, %v2688_v52  ;;  %v733_v8 = vmul.f32 %v9962_v28, %v695_v61  ;;  %v10181_v5 = vld [vmem:[%s9988_s7 + $0x38] sm:$0xff]  ;;  %v834_v60 = vmul.f32 %v9970_v29, %v796_v10 }
  0x3b   : > { %v10184_v4 = vld [vmem:[%s9988_s7 + $0x40] sm:$0xff]  ;;  %v1482_v39 = vadd.f32 %v10085_v44, %v1380_v35  ;;  %v2783_v22 = vadd.f32 %v2767_v18, %v2735_v53  ;;  %v835_v25 = vmul.f32 %v9970_v29, %v797_v9  ;;  %v764_v61 = vadd.f32 %v732_v21, %v630_v12 }
  0x3c   : > { %v10192_v43 = vld [vmem:[%s14540_s3] ss:$0 sm:$0xff]  ;;  %v1483_v24 = vadd.f32 %v10089_v45, %v1381_v6  ;;  %v2784_v15 = vadd.f32 %v2768_v19, %v2736_v36  ;;  %v765_v14 = vadd.f32 %v733_v8, %v631_v59  ;;  %v10199_v44 = vld [vmem:[%s9988_s7 + $0x41] sm:$0xff]  ;;  %v939_v9 = vmul.f32 %v9975_v30, %v10181_v5 }
  0x3d   : > { %v10196_v52 = vld [vmem:[%s9988_s7 + $0x39] sm:$0xff]  ;;  %14748 = vst [vmem:[#allocation34_spill] sm:$0xff] %v10199_v44  ;;  %v1520_v18 = vmul.f32 %v10175_v7, %v1482_v39  ;;  %v2834_v10 = vadd.f32 %v2818_v16, %v2783_v22  ;;  %v940_v35 = vmul.f32 %v9975_v30, %v10184_v4  ;;  %v866_v12 = vadd.f32 %v834_v60, %v764_v61  ;;  %v10211_v53 = vld [vmem:[%s9988_s7 + $0x42] sm:$0xff] }
  0x3e   : > { %14747 = vst [vmem:[#allocation33_spill] sm:$0xff] %v10196_v52  ;;  %v1521_v45 = vmul.f32 %v10175_v7, %v1483_v24  ;;  %v2835_v19 = vadd.f32 %v2819_v17, %v2784_v15  ;;  %v867_v8 = vadd.f32 %v835_v25, %v765_v14  ;;  %v10208_v59 = vld [vmem:[%s9988_s7 + $0x3a] sm:$0xff]  ;;  %14750 = vst [vmem:[#allocation36_spill] sm:$0xff] %v10211_v53  ;;  %v10227_v24 = vld [vmem:[%s9988_s7 + $0x68] sm:$0xff] }
  0x3f   : > { %14749 = vst [vmem:[#allocation35_spill] sm:$0xff] %v10208_v59  ;;  %v10214_v6 = vadd.f32 %v10192_v43, %v1520_v18  ;;  %v2882_v16 = vadd.f32 %v2866_v3, %v2834_v10  ;;  %v1041_v36 = vmul.f32 %v9981_v31, %v10196_v52  ;;  %v1042_v21 = vmul.f32 %v9981_v31, %v10199_v44  ;;  %v10224_v25 = vld [vmem:[%s9988_s7 + $0x60] sm:$0xff] }
  0x40   : > { %v10221_v17 = vadd.f32 %v10192_v43, %v1521_v45  ;;  %v2883_v39 = vadd.f32 %v2867_v2, %v2835_v19  ;;  %v971_v22 = vadd.f32 %v939_v9, %v866_v12  ;;  %v972_v60 = vadd.f32 %v940_v35, %v867_v8  ;;  %14751 = vst [vmem:[#allocation37_spill] sm:$0xff] %v10224_v25  ;;  %v10236_v35 = vld [vmem:[%s9988_s7 + $0x61] sm:$0xff]  ;;  %v10239_v45 = vld [vmem:[%s9988_s7 + $0x69] sm:$0xff] }
  0x41   : > { %14752 = vst [vmem:[#allocation38_spill] sm:$0xff] %v10227_v24  ;;  %v7976_v3 = vmul.f32 -1.442695, %v10214_v6  ;;  %v2930_v15 = vadd.f32 %v2914_v1, %v2882_v16  ;;  %v1143_v61 = vmul.f32 %v9986_v32, %v10208_v59  ;;  %v1144_v14 = vmul.f32 %v9986_v32, %v10211_v53  ;;  %14753 = vst [vmem:[#allocation39_spill] sm:$0xff] %v10236_v35  ;;  %v10242_v19 = vld [vmem:[%s9988_s7 + $0x62] sm:$0xff]  ;;  %v10250_v8 = vld [vmem:[%s9988_s7 + $0x6a] sm:$0xff] }
  0x42   : > { %v7977_v18 = vmul.f32 -1.442695, %v10221_v17  ;;  %v2931_v2 = vadd.f32 %v2915_v0, %v2883_v39  ;;  %v1073_v10 = vadd.f32 %v1041_v36, %v971_v22  ;;  %v1074_v9 = vadd.f32 %v1042_v21, %v972_v60  ;;  %14754 = vst [vmem:[#allocation40_spill] sm:$0xff] %v10239_v45  ;;  %14755 = vst [vmem:[#allocation41_spill] sm:$0xff] %v10242_v19  ;;  %v8094_v39 = vld [vmem:[%s9988_s7 + $0x150] sm:$0xff]  ;;  %v8095_v22 = vld [vmem:[%s9988_s7 + $0x158] sm:$0xff] }
  0x43   : > { %8935 = vpow2.f32 %v7976_v3  ;;  %v2946_v1 = vmul.f32 %v10175_v7, %v2930_v15  ;;  %v1248_v12 = vmul.f32 %v9993_v33, %v10224_v25  ;;  %v1249_v0 = vmul.f32 %v9993_v33, %v10227_v24  ;;  %14756 = vst [vmem:[#allocation42_spill] sm:$0xff] %v10250_v8  ;;  %v8110_v60 = vld [vmem:[%s9988_s7 + $0x151] sm:$0xff]  ;;  %v10291_v44 = vld [vmem:[%s9988_s7 + $0x181] sm:$0xff] }
  0x44   : > { %8937 = vpow2.f32 %v7977_v18  ;;  %v2947_v16 = vmul.f32 %v10175_v7, %v2931_v2  ;;  %v1175_v36 = vadd.f32 %v1143_v61, %v1073_v10  ;;  %v1176_v21 = vadd.f32 %v1144_v14, %v1074_v9  ;;  %v8111_v2 = vld [vmem:[%s9988_s7 + $0x159] sm:$0xff]  ;;  %14760 = vst [vmem:[#allocation46_spill] sm:$0xff] %v10291_v44 }
  0x45   : > { %v10257_v3 = vadd.f32 %v10192_v43, %v2946_v1  ;;  %v1350_v15 = vmul.f32 %v9998_v34, %v10236_v35  ;;  %v1351_v24 = vmul.f32 %v9998_v34, %v10239_v45  ;;  %v1452_v18 = vmul.f32 %v10007_v38, %v10242_v19  ;;  %v8126_v1 = vld [vmem:[%s9988_s7 + $0x152] sm:$0xff]  ;;  %v8127_v35 = vld [vmem:[%s9988_s7 + $0x15a] sm:$0xff] }
  0x46   : > { %v10267_v61 = vadd.f32 %v10192_v43, %v2947_v16  ;;  %v1280_v14 = vadd.f32 %v1248_v12, %v1175_v36  ;;  %v1281_v10 = vadd.f32 %v1249_v0, %v1176_v21  ;;  %v1453_v9 = vmul.f32 %v10007_v38, %v10250_v8  ;;  %v10280_v36 = vld [vmem:[%s9988_s7 + $0x178] sm:$0xff]  ;;  %v10283_v21 = vld [vmem:[%s9988_s7 + $0x180] sm:$0xff] }
  0x47   : > { %v8240_v45 = vmul.f32 -1.442695, %v10257_v3  ;;  %v2526_v25 = vmul.f32 %v8094_v39, %v9957_v27  ;;  %v2527_v19 = vmul.f32 %v8095_v22, %v9957_v27  ;;  %v2574_v53 = vmul.f32 %v8110_v60, %v9962_v28  ;;  %14757 = vst [vmem:[#allocation43_spill] sm:$0xff] %v10280_v36  ;;  %14758 = vst [vmem:[#allocation44_spill] sm:$0xff] %v10283_v21  ;;  %v10286_v8 = vld [vmem:[%s9988_s7 + $0x179] sm:$0xff] }
  0x48   : > { %v8241_v16 = vmul.f32 -1.442695, %v10267_v61  ;;  %v1382_v59 = vadd.f32 %v1350_v15, %v1280_v14  ;;  %v1383_v12 = vadd.f32 %v1351_v24, %v1281_v10  ;;  %v2575_v0 = vmul.f32 %v8111_v2, %v9962_v28  ;;  %14759 = vst [vmem:[#allocation45_spill] sm:$0xff] %v10286_v8  ;;  %v10294_v14 = vld [vmem:[%s9988_s7 + $0x17a] sm:$0xff]  ;;  %v10297_v10 = vld [vmem:[%s9988_s7 + $0x182] sm:$0xff] }
  0x49   : > { %8939 = vpow2.f32 %v8240_v45  ;;  %v2590_v39 = vadd.f32 %v2574_v53, %v2526_v25  ;;  %v2622_v22 = vmul.f32 %v8126_v1, %v9970_v29  ;;  %v2623_v60 = vmul.f32 %v8127_v35, %v9970_v29  ;;  %14761 = vst [vmem:[#allocation47_spill] sm:$0xff] %v10294_v14  ;;  %14762 = vst [vmem:[#allocation48_spill] sm:$0xff] %v10297_v10  ;;  %v10300_v45 = vld [vmem:[%s9988_s7 + $0x1a0] sm:$0xff] }
  0x4a   : > { %8941 = vpow2.f32 %v8241_v16  ;;  %v1484_v24 = vadd.f32 %v1452_v18, %v1382_v59  ;;  %v1485_v15 = vadd.f32 %v1453_v9, %v1383_v12  ;;  %v2591_v2 = vadd.f32 %v2575_v0, %v2527_v19  ;;  %14763 = vst [vmem:[#allocation49_spill] sm:$0xff] %v10300_v45  ;;  %v10309_v18 = vld [vmem:[%s9988_s7 + $0x1a8] sm:$0xff] }
  0x4b   : > { %v2638_v53 = vadd.f32 %v2622_v22, %v2590_v39  ;;  %v2673_v25 = vmul.f32 %v10280_v36, %v9975_v30  ;;  %v2674_v35 = vmul.f32 %v10283_v21, %v9975_v30  ;;  %v2721_v59 = vmul.f32 %v10286_v8, %v9981_v31  ;;  %14764 = vst [vmem:[#allocation50_spill] sm:$0xff] %v10309_v18  ;;  %v10316_v12 = vld [vmem:[%s9988_s7 + $0x1a1] sm:$0xff]  ;;  %v10319_v0 = vld [vmem:[%s9988_s7 + $0x1a9] sm:$0xff] }
  0x4c   : > { %v1522_v19 = vmul.f32 %v10175_v7, %v1484_v24  ;;  %v1523_v9 = vmul.f32 %v10175_v7, %v1485_v15  ;;  %v2639_v1 = vadd.f32 %v2623_v60, %v2591_v2  ;;  %v2722_v16 = vmul.f32 %v10291_v44, %v9981_v31  ;;  %14765 = vst [vmem:[#allocation51_spill] sm:$0xff] %v10316_v12  ;;  %v10322_v39 = vld [vmem:[%s9988_s7 + $0x1a2] sm:$0xff]  ;;  %v10331_v60 = vld [vmem:[%s9988_s7 + $0x1aa] sm:$0xff] }
  0x4d   : > { %14766 = vst [vmem:[#allocation52_spill] sm:$0xff] %v10319_v0  ;;  %14767 = vst [vmem:[#allocation53_spill] sm:$0xff] %v10322_v39  ;;  %v2689_v22 = vadd.f32 %v2673_v25, %v2638_v53  ;;  %v2769_v8 = vmul.f32 %v10294_v14, %v9986_v32  ;;  %v2770_v21 = vmul.f32 %v10297_v10, %v9986_v32 }
  0x4e   : > { %v2820_v24 = vmul.f32 %v10300_v45, %v9993_v33  ;;  %v10334_v15 = vadd.f32 %v10192_v43, %v1522_v19  ;;  %v10337_v2 = vadd.f32 %v10192_v43, %v1523_v9  ;;  %v2690_v44 = vadd.f32 %v2674_v35, %v2639_v1 }
  0x4f   : > { %v2821_v53 = vmul.f32 %v10309_v18, %v9993_v33  ;;  %v2737_v25 = vadd.f32 %v2721_v59, %v2689_v22  ;;  %v2868_v14 = vmul.f32 %v10316_v12, %v9998_v34  ;;  %v2869_v10 = vmul.f32 %v10319_v0, %v9998_v34 }
  0x50   : > { %14768 = vst [vmem:[#allocation54_spill] sm:$0xff] %v10334_v15  ;;  %v2916_v45 = vmul.f32 %v10322_v39, %v10007_v38  ;;  %v8936_v36 = vpop.eup %8935  ;;  %v7978_v19 = vmul.f32 -1.442695, %v10334_v15  ;;  %v7979_v9 = vmul.f32 -1.442695, %v10337_v2  ;;  %v2738_v52 = vadd.f32 %v2722_v16, %v2690_v44 }
  0x51   : > { %v2917_v35 = vmul.f32 %v10331_v60, %v10007_v38  ;;  %v8938_v1 = vpop.eup %8937  ;;  %v1686_v59 = vadd.f32 1.0, %v8936_v36  ;;  %v2785_v22 = vadd.f32 %v2769_v8, %v2737_v25  ;;  %v632_v12 = vmul.f32 %v10024_v48, %v9957_v27 }
  0x52   : > { %v633_v0 = vmul.f32 %v10027_v49, %v9957_v27  ;;  %v1687_v18 = vadd.f32 1.0, %v8938_v1  ;;  %8943 = vpow2.f32 %v7978_v19  ;;  %v2786_v39 = vadd.f32 %v2770_v21, %v2738_v52  ;;  %v10377_v19 = vld [vmem:[%s9988_s7 + $0x80] sm:$0xff] }
  0x53   : > { %v734_v15 = vmul.f32 %v10030_v50, %v9962_v28  ;;  %8945 = vrcp.f32 %v1686_v59  ;;  %v2836_v44 = vadd.f32 %v2820_v24, %v2785_v22  ;;  %v735_v16 = vmul.f32 %v10037_v54, %v9962_v28  ;;  %v10386_v22 = vld [vmem:[%s9988_s7 + $0x81] sm:$0xff] }
  0x54   : > { %v836_v8 = vmul.f32 %v10042_v56, %v9970_v29  ;;  %8947 = vrcp.f32 %v1687_v18  ;;  %v2837_v36 = vadd.f32 %v2821_v53, %v2786_v39  ;;  %v837_v49 = vmul.f32 %v10045_v57, %v9970_v29  ;;  %v10372_v39 = vld [vmem:[%s9988_s7 + $0x78] sm:$0xff] }
  0x55   : > { %v766_v48 = vadd.f32 %v734_v15, %v632_v12  ;;  %8949 = vpow2.f32 %v7979_v9  ;;  %v2884_v52 = vadd.f32 %v2868_v14, %v2836_v44  ;;  %v767_v21 = vadd.f32 %v735_v16, %v633_v0  ;;  %v10380_v9 = vld [vmem:[%s9988_s7 + $0x79] sm:$0xff] }
  0x56   : > { %v941_v50 = vmul.f32 %v10054_v62, %v9975_v30  ;;  %v8940_v24 = vpop.eup %8939  ;;  %v2885_v54 = vadd.f32 %v2869_v10, %v2837_v36  ;;  %v942_v56 = vmul.f32 %v10057_v63, %v9975_v30  ;;  %v1043_v18 = vmul.f32 %v10060_v11, %v9981_v31  ;;  %v10389_v44 = vld [vmem:[%s9988_s7 + $0x7a] sm:$0xff]  ;;  %v10395_v36 = vld [vmem:[%s9988_s7 + $0x82] sm:$0xff] }
  0x57   : > { %v868_v25 = vadd.f32 %v836_v8, %v766_v48  ;;  %v8942_v12 = vpop.eup %8941  ;;  %v3026_v57 = vadd.f32 1.0, %v8940_v24  ;;  %v2932_v14 = vadd.f32 %v2916_v45, %v2884_v52  ;;  %v869_v0 = vadd.f32 %v837_v49, %v767_v21 }
  0x58   : > { %v1044_v62 = vmul.f32 %v10067_v37, %v9981_v31  ;;  %v3027_v15 = vadd.f32 1.0, %v8942_v12  ;;  %v2933_v10 = vadd.f32 %v2917_v35, %v2885_v54  ;;  %v1145_v63 = vmul.f32 %v10074_v40, %v9986_v32 }
  0x59   : > { %v973_v53 = vadd.f32 %v941_v50, %v868_v25  ;;  %8951 = vrcp.f32 %v3026_v57  ;;  %v2948_v45 = vmul.f32 %v10175_v7, %v2932_v14  ;;  %v974_v1 = vadd.f32 %v942_v56, %v869_v0 }
  0x5a   : > { %v1146_v59 = vmul.f32 %v10077_v41, %v9986_v32  ;;  %8953 = vrcp.f32 %v3027_v15  ;;  %v2949_v35 = vmul.f32 %v10175_v7, %v2933_v10  ;;  %v1250_v8 = vmul.f32 %v9993_v33, %v10372_v39 }
  0x5b   : > { %v1075_v16 = vadd.f32 %v1043_v18, %v973_v53  ;;  %v10398_v48 = vadd.f32 %v10192_v43, %v2948_v45  ;;  %v1076_v49 = vadd.f32 %v1044_v62, %v974_v1  ;;  %v1251_v52 = vmul.f32 %v9993_v33, %v10377_v19 }
  0x5c   : > { %v1352_v21 = vmul.f32 %v9998_v34, %v10380_v9  ;;  %v10405_v50 = vadd.f32 %v10192_v43, %v2949_v35  ;;  %v1353_v54 = vmul.f32 %v9998_v34, %v10386_v22  ;;  %v1454_v25 = vmul.f32 %v10007_v38, %v10389_v44 }
  0x5d   : > { %v1177_v24 = vadd.f32 %v1145_v63, %v1075_v16  ;;  %v8242_v56 = vmul.f32 -1.442695, %v10398_v48  ;;  %v1178_v18 = vadd.f32 %v1146_v59, %v1076_v49  ;;  %v1455_v12 = vmul.f32 %v10007_v38, %v10395_v36 }
  0x5e   : > { %v2528_v57 = vmul.f32 %v10104_v26, %v9957_v27  ;;  %v8243_v14 = vmul.f32 -1.442695, %v10405_v50  ;;  %v2529_v62 = vmul.f32 %v10107_v46, %v9957_v27  ;;  %v2576_v15 = vmul.f32 %v10110_v51, %v9962_v28 }
  0x5f   : > { %v1282_v0 = vadd.f32 %v1250_v8, %v1177_v24  ;;  %v8944_v10 = vpop.eup %8943  ;;  %8955 = vpow2.f32 %v8242_v56  ;;  %v1283_v53 = vadd.f32 %v1251_v52, %v1178_v18  ;;  %v2577_v63 = vmul.f32 %v10117_v23, %v9962_v28 }
  0x60   : > { %v2624_v45 = vmul.f32 %v10120_v20, %v9970_v29  ;;  %v8946_v1 = vpop.eup %8945  ;;  %v1688_v26 = vadd.f32 1.0, %v8944_v10  ;;  %8957 = vpow2.f32 %v8243_v14  ;;  %v2592_v35 = vadd.f32 %v2576_v15, %v2528_v57  ;;  %v10437_v14 = vld [vmem:[%s9988_s7 + $0x1b8] sm:$0xff]  ;;  %v10443_v15 = vld [vmem:[%s9988_s7 + $0x1c0] sm:$0xff] }
  0x61   : > { %v1384_v59 = vadd.f32 %v1352_v21, %v1282_v0  ;;  %v8948_v16 = vpop.eup %8947  ;;  %v1782_v46 = vmul.f32 %v8946_v1, %v10214_v6  ;;  %v1385_v8 = vadd.f32 %v1353_v54, %v1283_v53  ;;  %v2593_v51 = vadd.f32 %v2577_v63, %v2529_v62  ;;  %v14769_v0 = vld [vmem:[#allocation31_spill] sm:$0xff]  ;;  %v14770_v1 = vld [vmem:[#allocation32_spill] sm:$0xff] }
  0x62   : > { %v2625_v49 = vmul.f32 %v10123_v42, %v9970_v29  ;;  %v8950_v52 = vpop.eup %8949  ;;  %v1783_v23 = vmul.f32 %v8948_v16, %v10221_v17  ;;  %8959 = vrcp.f32 %v1688_v26  ;;  %v2640_v24 = vadd.f32 %v2624_v45, %v2592_v35  ;;  %v10457_v35 = vld [vmem:[%s9988_s7 + $0x1c1] sm:$0xff] }
  0x63   : > { %v1486_v20 = vadd.f32 %v1454_v25, %v1384_v59  ;;  %v1689_v56 = vadd.f32 1.0, %v8950_v52  ;;  %v1487_v18 = vadd.f32 %v1455_v12, %v1385_v8  ;;  %v2675_v57 = vmul.f32 %v10130_v55, %v9975_v30  ;;  %v10454_v59 = vld [vmem:[%s9988_s7 + $0x1b9] sm:$0xff] }
  0x64   : > { %v2641_v21 = vadd.f32 %v2625_v49, %v2593_v51  ;;  %v1814_v6 = vpack.c.bf16 %v1783_v23, %v1782_v46  ;;  %v2676_v42 = vmul.f32 %v10133_v47, %v9975_v30  ;;  %v2723_v17 = vmul.f32 %v10136_v13, %v9981_v31  ;;  %v10466_v52 = vld [vmem:[%s9988_s7 + $0x1ba] sm:$0xff] }
  0x65   : > { %v1524_v54 = vmul.f32 %v10175_v7, %v1486_v20  ;;  %8961 = vrcp.f32 %v1689_v56  ;;  %v1525_v25 = vmul.f32 %v10175_v7, %v1487_v18  ;;  %v2691_v12 = vadd.f32 %v2675_v57, %v2640_v24  ;;  %14771 = vst [vmem:[#allocation31_spill] sm:$0xff] %v10466_v52  ;;  %v10473_v18 = vld [vmem:[%s9988_s7 + $0x1c2] sm:$0xff] }
  0x66   : > { %v2724_v62 = vmul.f32 %v14769_v0, %v9981_v31  ;;  %v8952_v10 = vpop.eup %8951  ;;  %8792 = vmatprep.mubr.msk.bf16.mxu0 %vm1830_vm1, %v1814_v6  ;;  %v2692_v63 = vadd.f32 %v2676_v42, %v2641_v21  ;;  %v2771_v45 = vmul.f32 %v10146_v58, %v9986_v32  ;;  %v2772_v26 = vmul.f32 %v14770_v1, %v9986_v32 }
  0x67   : > { %v10447_v53 = vadd.f32 %v10192_v43, %v1524_v54  ;;  %v8954_v16 = vpop.eup %8953  ;;  %v3074_v46 = vmul.f32 %v8952_v10, %v10257_v3  ;;  %v10461_v8 = vadd.f32 %v10192_v43, %v1525_v25  ;;  %v2739_v51 = vadd.f32 %v2723_v17, %v2691_v12  ;;  %14772 = vst [vmem:[#allocation32_spill] sm:$0xff] %v10473_v18 }
  0x68   : > { %v2822_v49 = vmul.f32 %v10437_v14, %v9993_v33  ;;  %v3075_v23 = vmul.f32 %v8954_v16, %v10267_v61  ;;  %v2740_v24 = vadd.f32 %v2724_v62, %v2692_v63  ;;  %v2823_v56 = vmul.f32 %v10443_v15, %v9993_v33  ;;  %v14774_v16 = vld [vmem:[#allocation34_spill] sm:$0xff] }
  0x69   : > { %v7980_v20 = vmul.f32 -1.442695, %v10447_v53  ;;  %v7981_v3 = vmul.f32 -1.442695, %v10461_v8  ;;  %v2787_v21 = vadd.f32 %v2771_v45, %v2739_v51  ;;  %v2870_v57 = vmul.f32 %v10454_v59, %v9998_v34  ;;  %v14773_v45 = vld [vmem:[#allocation33_spill] sm:$0xff] }
  0x6a   : > { %v2871_v6 = vmul.f32 %v10457_v35, %v9998_v34  ;;  %v3090_v54 = vpack.c.bf16 %v3075_v23, %v3074_v46  ;;  %v2788_v61 = vadd.f32 %v2772_v26, %v2740_v24  ;;  %v2918_v42 = vmul.f32 %v10466_v52, %v10007_v38  ;;  %v14776_v24 = vld [vmem:[#allocation36_spill] sm:$0xff]  ;;  %v14793_v52 = vld [vmem:[#allocation46_spill] sm:$0xff] }
  0x6b   : > { %8963 = vpow2.f32 %v7980_v20  ;;  %v2838_v17 = vadd.f32 %v2822_v49, %v2787_v21  ;;  %v2919_v25 = vmul.f32 %v10473_v18, %v10007_v38  ;;  %v634_v12 = vmul.f32 %v10181_v5, %v9957_v27  ;;  %v14775_v20 = vld [vmem:[#allocation35_spill] sm:$0xff]  ;;  %v14779_v18 = vld [vmem:[#allocation54_spill] sm:$0xff] }
  0x6c   : > { %8965 = vpow2.f32 %v7981_v3  ;;  %v8956_v62 = vpop.eup %8955  ;;  %8826 = vmatprep.mubr.msk.bf16.mxu1 %vm1830_vm1, %v3090_v54  ;;  %v2839_v10 = vadd.f32 %v2823_v56, %v2788_v61  ;;  %v635_v63 = vmul.f32 %v10184_v4, %v9957_v27  ;;  %v736_v26 = vmul.f32 %v14773_v45, %v9962_v28 }
  0x6d   : > { %v737_v46 = vmul.f32 %v14774_v16, %v9962_v28  ;;  %v8958_v51 = vpop.eup %8957  ;;  %v3028_v49 = vadd.f32 1.0, %v8956_v62  ;;  %v2886_v23 = vadd.f32 %v2870_v57, %v2838_v17  ;;  %v838_v5 = vmul.f32 %v14775_v20, %v9970_v29  ;;  %v14777_v16 = vld [vmem:[#allocation37_spill] sm:$0xff]  ;;  %v14778_v57 = vld [vmem:[#allocation38_spill] sm:$0xff] }
  0x6e   : > { %v839_v3 = vmul.f32 %v14776_v24, %v9970_v29  ;;  %v3029_v56 = vadd.f32 1.0, %v8958_v51  ;;  %v2887_v21 = vadd.f32 %v2871_v6, %v2839_v10  ;;  %v768_v54 = vadd.f32 %v736_v26, %v634_v12  ;;  %v10503_v6 = vld [vmem:[%s9988_s7 + $0x88] sm:$0xff] }
  0x6f   : > { %v769_v4 = vadd.f32 %v737_v46, %v635_v63  ;;  %v8960_v61 = vpop.eup %8959  ;;  %8967 = vrcp.f32 %v3028_v49  ;;  %v2934_v45 = vadd.f32 %v2918_v42, %v2886_v23  ;;  %v943_v62 = vmul.f32 %v14777_v16, %v9975_v30  ;;  %14780 = vst [vmem:[#allocation33_spill] sm:$0xff] %v10503_v6  ;;  %v14781_v42 = vld [vmem:[#allocation39_spill] sm:$0xff]  ;;  %v14782_v26 = vld [vmem:[#allocation40_spill] sm:$0xff]  ;;  %v10511_v49 = vld [vmem:[%s9988_s7 + $0x90] sm:$0xff] }
  0x70   : > { %v944_v17 = vmul.f32 %v14778_v57, %v9975_v30  ;;  %v1784_v20 = vmul.f32 %v8960_v61, %v14779_v18  ;;  %8969 = vrcp.f32 %v3029_v56  ;;  %v2935_v24 = vadd.f32 %v2919_v25, %v2887_v21  ;;  %14783 = vst [vmem:[#allocation34_spill] sm:$0xff] %v10511_v49  ;;  %v10514_v18 = vld [vmem:[%s9988_s7 + $0x89] sm:$0xff] }
  0x71   : > { %v870_v51 = vadd.f32 %v838_v5, %v768_v54  ;;  %v2950_v12 = vmul.f32 %v10175_v7, %v2934_v45  ;;  %v871_v10 = vadd.f32 %v839_v3, %v769_v4  ;;  %v1045_v63 = vmul.f32 %v14781_v42, %v9981_v31  ;;  %14784 = vst [vmem:[#allocation35_spill] sm:$0xff] %v10514_v18  ;;  %v14785_v56 = vld [vmem:[#allocation41_spill] sm:$0xff]  ;;  %v14786_v3 = vld [vmem:[#allocation42_spill] sm:$0xff] }
  0x72   : > { %v1046_v46 = vmul.f32 %v14782_v26, %v9981_v31  ;;  %v8962_v23 = vpop.eup %8961  ;;  %v2951_v25 = vmul.f32 %v10175_v7, %v2935_v24  ;;  %v1147_v21 = vmul.f32 %v14785_v56, %v9986_v32  ;;  %v1148_v54 = vmul.f32 %v14786_v3, %v9986_v32  ;;  %v10522_v4 = vld [vmem:[%s9988_s7 + $0x91] sm:$0xff] }
  0x73   : > { %v975_v5 = vadd.f32 %v943_v62, %v870_v51  ;;  %14787 = vst [vmem:[#allocation36_spill] sm:$0xff] %v10522_v4  ;;  %v1785_v61 = vmul.f32 %v8962_v23, %v10337_v2  ;;  %v10526_v45 = vadd.f32 %v10192_v43, %v2950_v12  ;;  %v976_v26 = vadd.f32 %v944_v17, %v871_v10  ;;  %v10531_v57 = vld [vmem:[%s9988_s7 + $0x8a] sm:$0xff]  ;;  %v10534_v62 = vld [vmem:[%s9988_s7 + $0x92] sm:$0xff] }
  0x74   : > { %v1252_v42 = vmul.f32 %v9993_v33, %v10503_v6  ;;  %14788 = vst [vmem:[#allocation54_spill] sm:$0xff] %v10531_v57  ;;  %14789 = vst [vmem:[#allocation55_spill] sm:$0xff] %v10534_v62  ;;  %v10537_v24 = vadd.f32 %v10192_v43, %v2951_v25  ;;  %v1253_v3 = vmul.f32 %v9993_v33, %v10511_v49 }
  0x75   : > { %v1077_v51 = vadd.f32 %v1045_v63, %v975_v5  ;;  %v1354_v2 = vmul.f32 %v9998_v34, %v10514_v18  ;;  %v1815_v12 = vpack.c.bf16 %v1785_v61, %v1784_v20  ;;  %v8244_v17 = vmul.f32 -1.442695, %v10526_v45  ;;  %v14790_v61 = vld [vmem:[#allocation43_spill] sm:$0xff] }
  0x76   : > { %v1078_v10 = vadd.f32 %v1046_v46, %v976_v26  ;;  %v1355_v23 = vmul.f32 %v9998_v34, %v10522_v4  ;;  %v8245_v6 = vmul.f32 -1.442695, %v10537_v24  ;;  %v1456_v25 = vmul.f32 %v10007_v38, %v10531_v57  ;;  %v14791_v46 = vld [vmem:[#allocation44_spill] sm:$0xff] }
  0x77   : > { %v1179_v56 = vadd.f32 %v1147_v21, %v1077_v51  ;;  %v1457_v63 = vmul.f32 %v10007_v38, %v10534_v62  ;;  %8793 = vmatmul.mubr.msk.bf16.vlgmr.msra.gmra.mxu0 %vm1830_vm1, %v1815_v12  ;;  %8971 = vpow2.f32 %v8244_v17  ;;  %v2530_v26 = vmul.f32 %v14790_v61, %v9957_v27  ;;  %v14792_v51 = vld [vmem:[#allocation45_spill] sm:$0xff] }
  0x78   : > { %v8964_v5 = vpop.eup %8963  ;;  %v1180_v20 = vadd.f32 %v1148_v54, %v1078_v10  ;;  %v2531_v4 = vmul.f32 %v14791_v46, %v9957_v27  ;;  %8973 = vpow2.f32 %v8245_v6  ;;  %v2578_v57 = vmul.f32 %v14792_v51, %v9962_v28  ;;  %v14794_v54 = vld [vmem:[#allocation47_spill] sm:$0xff]  ;;  %v14795_v46 = vld [vmem:[#allocation48_spill] sm:$0xff]  ;;  %v14797_v51 = vld [vmem:[#allocation50_spill] sm:$0xff] }
  0x79   : > { %v8966_v18 = vpop.eup %8965  ;;  %v1690_v49 = vadd.f32 1.0, %v8964_v5  ;;  %v1284_v21 = vadd.f32 %v1252_v42, %v1179_v56  ;;  %v2579_v12 = vmul.f32 %v14793_v52, %v9962_v28  ;;  %v2626_v17 = vmul.f32 %v14794_v54, %v9970_v29 }
  0x7a   : > { %v1691_v16 = vadd.f32 1.0, %v8966_v18  ;;  %v1285_v62 = vadd.f32 %v1253_v3, %v1180_v20  ;;  %v2594_v61 = vadd.f32 %v2578_v57, %v2530_v26  ;;  %v2627_v5 = vmul.f32 %v14795_v46, %v9970_v29  ;;  %v14796_v18 = vld [vmem:[#allocation49_spill] sm:$0xff]  ;;  %v14798_v57 = vld [vmem:[#allocation51_spill] sm:$0xff]  ;;  %v10571_v26 = vld [vmem:[%s9988_s7 + $0x1c8] sm:$0xff] }
  0x7b   : > { %8975 = vrcp.f32 %v1690_v49  ;;  %v1386_v10 = vadd.f32 %v1354_v2, %v1284_v21  ;;  %v2595_v42 = vadd.f32 %v2579_v12, %v2531_v4  ;;  %v2677_v56 = vmul.f32 %v14796_v18, %v9975_v30  ;;  %14799 = vst [vmem:[#allocation43_spill] sm:$0xff] %v10571_v26  ;;  %v10577_v12 = vld [vmem:[%s9988_s7 + $0x1d0] sm:$0xff] }
  0x7c   : > { %8977 = vrcp.f32 %v1691_v16  ;;  %v1387_v6 = vadd.f32 %v1355_v23, %v1285_v62  ;;  %v8968_v3 = vpop.eup %8967  ;;  %v2642_v52 = vadd.f32 %v2626_v17, %v2594_v61  ;;  %v2678_v49 = vmul.f32 %v14797_v51, %v9975_v30  ;;  %v14800_v23 = vld [vmem:[#allocation52_spill] sm:$0xff]  ;;  %v14801_v61 = vld [vmem:[#allocation53_spill] sm:$0xff] }
  0x7d   : > { %v1488_v20 = vadd.f32 %v1456_v25, %v1386_v10  ;;  %v2725_v2 = vmul.f32 %v14798_v57, %v9981_v31  ;;  %v8970_v21 = vpop.eup %8969  ;;  %v3076_v16 = vmul.f32 %v8968_v3, %v10398_v48  ;;  %v2643_v62 = vadd.f32 %v2627_v5, %v2595_v42  ;;  %v10584_v57 = vld [vmem:[%s9988_s7 + $0x1c9] sm:$0xff]  ;;  %v10587_v48 = vld [vmem:[%s9988_s7 + $0x1d1] sm:$0xff] }
  0x7e   : > { %v1489_v4 = vadd.f32 %v1457_v63, %v1387_v6  ;;  %v2726_v25 = vmul.f32 %v14800_v23, %v9981_v31  ;;  %v3077_v54 = vmul.f32 %v8970_v21, %v10405_v50  ;;  %v2693_v10 = vadd.f32 %v2677_v56, %v2642_v52  ;;  %v10595_v6 = vld [vmem:[%s9988_s7 + $0x1ca] sm:$0xff]  ;;  %v10598_v42 = vld [vmem:[%s9988_s7 + $0x1d2] sm:$0xff] }
  0x7f   : > { %v1526_v17 = vmul.f32 %v10175_v7, %v1488_v20  ;;  %v2773_v46 = vmul.f32 %v14801_v61, %v9986_v32  ;;  %v2694_v5 = vadd.f32 %v2678_v49, %v2643_v62  ;;  %v2774_v31 = vmul.f32 %v10331_v60, %v9986_v32  ;;  %14802 = vst [vmem:[#allocation44_spill] sm:$0xff] %v10595_v6  ;;  %v598_v21 = vld [vmem:[%s9988_s7 + $0x50] sm:$0xff]  ;;  %v599_v49 = vld [vmem:[%s9988_s7 + $0x58] sm:$0xff] }
  0x80   : > { %v1527_v63 = vmul.f32 %v10175_v7, %v1489_v4  ;;  %v2824_v50 = vmul.f32 %v10571_v26, %v9993_v33  ;;  %14803 = vst [vmem:[#allocation45_spill] sm:$0xff] %v10598_v42  ;;  %v3091_v56 = vpack.c.bf16 %v3077_v54, %v3076_v16  ;;  %v2741_v20 = vadd.f32 %v2725_v2, %v2693_v10 }
  0x81   : > { %v10601_v3 = vadd.f32 %v10192_v43, %v1526_v17  ;;  %v2825_v52 = vmul.f32 %v10577_v12, %v9993_v33  ;;  %v2742_v32 = vadd.f32 %v2726_v25, %v2694_v5  ;;  %v2872_v62 = vmul.f32 %v10584_v57, %v9998_v34 }
  0x82   : > { %v10608_v4 = vadd.f32 %v10192_v43, %v1527_v63  ;;  %v2873_v26 = vmul.f32 %v10587_v48, %v9998_v34  ;;  %8827 = vmatmul.mubr.msk.bf16.vlgmr.msra.gmra.mxu1 %vm1830_vm1, %v3091_v56  ;;  %v2789_v2 = vadd.f32 %v2773_v46, %v2741_v20  ;;  %v2920_v33 = vmul.f32 %v10595_v6, %v10007_v38 }
  0x83   : > { %v7982_v16 = vmul.f32 -1.442695, %v10601_v3  ;;  %v2921_v54 = vmul.f32 %v10598_v42, %v10007_v38  ;;  %v2790_v25 = vadd.f32 %v2774_v31, %v2742_v32  ;;  %v636_v10 = vmul.f32 %v9957_v27, %v598_v21 }
  0x84   : > { %v7983_v17 = vmul.f32 -1.442695, %v10608_v4  ;;  %v637_v63 = vmul.f32 %v9957_v27, %v599_v49  ;;  %v8972_v5 = vpop.eup %8971  ;;  %v2840_v34 = vadd.f32 %v2824_v50, %v2789_v2  ;;  %v738_v56 = vmul.f32 %v10060_v11, %v9962_v28 }
  0x85   : > { %8979 = vpow2.f32 %v7982_v16  ;;  %v739_v46 = vmul.f32 %v10067_v37, %v9962_v28  ;;  %v8974_v20 = vpop.eup %8973  ;;  %v3030_v6 = vadd.f32 1.0, %v8972_v5  ;;  %v2841_v38 = vadd.f32 %v2825_v52, %v2790_v25  ;;  %v10665_v5 = vld [vmem:[%s14538_s1 + $0x5] ss:$0 sm:$0xff] }
  0x86   : > { %8981 = vpow2.f32 %v7983_v17  ;;  %v840_v31 = vmul.f32 %v10074_v40, %v9970_v29  ;;  %v3031_v32 = vadd.f32 1.0, %v8974_v20  ;;  %v2888_v21 = vadd.f32 %v2872_v62, %v2840_v34 }
  0x87   : > { %v770_v42 = vadd.f32 %v738_v56, %v636_v10  ;;  %v771_v27 = vadd.f32 %v739_v46, %v637_v63  ;;  %8983 = vrcp.f32 %v3030_v6  ;;  %v2889_v50 = vadd.f32 %v2873_v26, %v2841_v38  ;;  %v10670_v56 = vld [vmem:[%s9988_s7 + $0xa9] sm:$0xff] }
  0x88   : > { %v8976_v49 = vpop.eup %8975  ;;  %v841_v11 = vmul.f32 %v10077_v41, %v9970_v29  ;;  %v945_v28 = vmul.f32 %v10372_v39, %v9975_v30  ;;  %8985 = vrcp.f32 %v3031_v32  ;;  %v2936_v40 = vadd.f32 %v2920_v33, %v2888_v21  ;;  %v10638_v29 = vld [vmem:[%s14538_s1 + $0x3] ss:$0 sm:$0xff]  ;;  %v10656_v33 = vld [vmem:[%s9988_s7 + $0xa8] sm:$0xff]  ;;  %14804 = vst [vmem:[#allocation46_spill] sm:$0xff] %v10670_v56  ;;  %v10683_v32 = vld [vmem:[%s14538_s1 + $0x6] ss:$0 sm:$0xff] }
  0x89   : > { %v8978_v37 = vpop.eup %8977  ;;  %v1786_v52 = vmul.f32 %v8976_v49, %v10447_v53  ;;  %v872_v62 = vadd.f32 %v840_v31, %v770_v42  ;;  %v2937_v2 = vadd.f32 %v2921_v54, %v2889_v50  ;;  %v946_v30 = vmul.f32 %v10638_v29, %v10377_v19  ;;  %v10643_v41 = vld [vmem:[%s9988_s7 + $0xa0] sm:$0xff] }
  0x8a   : > { %v1787_v16 = vmul.f32 %v8978_v37, %v10461_v8  ;;  %v873_v17 = vadd.f32 %v841_v11, %v771_v27  ;;  %v2952_v53 = vmul.f32 %v10175_v7, %v2936_v40  ;;  %v10649_v8 = vld [vmem:[%s14538_s1 + $0x4] ss:$0 sm:$0xff]  ;;  %v1149_v34 = vmul.f32 %v10665_v5, %v10389_v44  ;;  %v10688_v27 = vld [vmem:[%s9988_s7 + $0xaa] sm:$0xff] }
  0x8b   : > { %v977_v26 = vadd.f32 %v945_v28, %v872_v62  ;;  %v1047_v6 = vmul.f32 %v10649_v8, %v10380_v9  ;;  %v1048_v42 = vmul.f32 %v10649_v8, %v10386_v22  ;;  %v10659_v54 = vld [vmem:[%s9988_s7 + $0xa1] sm:$0xff]  ;;  %v2953_v10 = vmul.f32 %v10175_v7, %v2937_v2  ;;  %14806 = vst [vmem:[#allocation48_spill] sm:$0xff] %v10688_v27 }
  0x8c   : > { %v1816_v25 = vpack.c.bf16 %v1787_v16, %v1786_v52  ;;  %v978_v63 = vadd.f32 %v946_v30, %v873_v17  ;;  %v10673_v46 = vld [vmem:[%s9988_s7 + $0xa2] sm:$0xff]  ;;  %v10676_v20 = vadd.f32 %v10192_v43, %v2952_v53  ;;  %v1150_v31 = vmul.f32 %v10665_v5, %v10395_v36 }
  0x8d   : > { %14805 = vst [vmem:[#allocation47_spill] sm:$0xff] %v10673_v46  ;;  %v1079_v38 = vadd.f32 %v1047_v6, %v977_v26  ;;  %v1254_v21 = vmul.f32 %v10683_v32, %v10643_v41  ;;  %v10692_v49 = vadd.f32 %v10192_v43, %v2953_v10  ;;  %v1255_v11 = vmul.f32 %v10683_v32, %v10656_v33  ;;  %v10699_v28 = vld [vmem:[%s14538_s1 + $0x7] ss:$0 sm:$0xff]  ;;  %v10709_v16 = vld [vmem:[%s14538_s1 + $0x8] ss:$0 sm:$0xff] }
  0x8e   : > { %8796 = vmatprep.mubr.msk.bf16.mxu0 %vm1830_vm1, %v1816_v25  ;;  %v1080_v50 = vadd.f32 %v1048_v42, %v978_v63  ;;  %v1356_v37 = vmul.f32 %v10699_v28, %v10659_v54  ;;  %v8246_v52 = vmul.f32 -1.442695, %v10676_v20  ;;  %v1357_v62 = vmul.f32 %v10699_v28, %v10670_v56  ;;  %v10719_v26 = vld [vmem:[%s14538_s1] ss:$0 sm:$0xff]  ;;  %v10728_v10 = vld [vmem:[%s14538_s1 + $0x1] ss:$0 sm:$0xff] }
  0x8f   : > { %v1181_v40 = vadd.f32 %v1149_v34, %v1079_v38  ;;  %v1458_v2 = vmul.f32 %v10709_v16, %v10673_v46  ;;  %v8247_v17 = vmul.f32 -1.442695, %v10692_v49  ;;  %v1459_v53 = vmul.f32 %v10709_v16, %v10688_v27 }
  0x90   : > { %v1182_v30 = vadd.f32 %v1150_v31, %v1080_v50  ;;  %v2532_v6 = vmul.f32 %v10719_v26, %v10130_v55  ;;  %8987 = vpow2.f32 %v8246_v52  ;;  %v2533_v25 = vmul.f32 %v10719_v26, %v10133_v47  ;;  %v10737_v55 = vld [vmem:[%s14538_s1 + $0x2] ss:$0 sm:$0xff] }
  0x91   : > { %v1286_v42 = vadd.f32 %v1254_v21, %v1181_v40  ;;  %v2580_v63 = vmul.f32 %v10728_v10, %v10136_v13  ;;  %8989 = vpow2.f32 %v8247_v17  ;;  %v2581_v31 = vmul.f32 %v10728_v10, %v14769_v0 }
  0x92   : > { %v8980_v34 = vpop.eup %8979  ;;  %v1287_v38 = vadd.f32 %v1255_v11, %v1182_v30  ;;  %v2628_v47 = vmul.f32 %v10737_v55, %v10146_v58  ;;  %v2629_v13 = vmul.f32 %v10737_v55, %v14770_v1  ;;  %v2679_v0 = vmul.f32 %v10638_v29, %v10437_v14 }
  0x93   : > { %v8982_v21 = vpop.eup %8981  ;;  %v1692_v50 = vadd.f32 1.0, %v8980_v34  ;;  %v1388_v52 = vadd.f32 %v1356_v37, %v1286_v42  ;;  %v2596_v40 = vadd.f32 %v2580_v63, %v2532_v6  ;;  %v2597_v30 = vadd.f32 %v2581_v31, %v2533_v25  ;;  %v10753_v34 = vld [vmem:[%s9988_s7 + $0x1e0] sm:$0xff] }
  0x94   : > { %v1693_v17 = vadd.f32 1.0, %v8982_v21  ;;  %v1389_v11 = vadd.f32 %v1357_v62, %v1287_v38  ;;  %v8984_v27 = vpop.eup %8983  ;;  %v2680_v58 = vmul.f32 %v10638_v29, %v10443_v15  ;;  %14807 = vst [vmem:[#allocation49_spill] sm:$0xff] %v10753_v34  ;;  %v10756_v38 = vld [vmem:[%s9988_s7 + $0x1e8] sm:$0xff] }
  0x95   : > { %8991 = vrcp.f32 %v1692_v50  ;;  %v1490_v46 = vadd.f32 %v1458_v2, %v1388_v52  ;;  %v2644_v56 = vadd.f32 %v2628_v47, %v2596_v40  ;;  %v8986_v37 = vpop.eup %8985  ;;  %v3078_v1 = vmul.f32 %v8984_v27, %v10526_v45  ;;  %14808 = vst [vmem:[#allocation50_spill] sm:$0xff] %v10756_v38  ;;  %v10764_v47 = vld [vmem:[%s9988_s7 + $0x1e1] sm:$0xff] }
  0x96   : > { %8993 = vrcp.f32 %v1693_v17  ;;  %v1491_v62 = vadd.f32 %v1459_v53, %v1389_v11  ;;  %v2645_v6 = vadd.f32 %v2629_v13, %v2597_v30  ;;  %v3079_v42 = vmul.f32 %v8986_v37, %v10537_v24  ;;  %v14809_v53 = vld [vmem:[#allocation31_spill] sm:$0xff]  ;;  %14810 = vst [vmem:[#allocation52_spill] sm:$0xff] %v10764_v47  ;;  %v14812_v52 = vld [vmem:[#allocation32_spill] sm:$0xff] }
  0x97   : > { %v1528_v25 = vmul.f32 %v10175_v7, %v1490_v46  ;;  %v2695_v63 = vadd.f32 %v2679_v0, %v2644_v56  ;;  %v2727_v2 = vmul.f32 %v10649_v8, %v10454_v59  ;;  %v2728_v27 = vmul.f32 %v10649_v8, %v10457_v35  ;;  %v10767_v46 = vld [vmem:[%s9988_s7 + $0x1e9] sm:$0xff] }
  0x98   : > { %v1529_v31 = vmul.f32 %v10175_v7, %v1491_v62  ;;  %v2696_v45 = vadd.f32 %v2680_v58, %v2645_v6  ;;  %v2775_v24 = vmul.f32 %v10665_v5, %v14809_v53  ;;  %14811 = vst [vmem:[#allocation53_spill] sm:$0xff] %v10767_v46  ;;  %v3092_v56 = vpack.c.bf16 %v3079_v42, %v3078_v1  ;;  %v10775_v7 = vld [vmem:[%s9988_s7 + $0x1e2] sm:$0xff]  ;;  %v10778_v13 = vld [vmem:[%s9988_s7 + $0x1ea] sm:$0xff] }
  0x99   : > { %v10770_v21 = vadd.f32 %v10192_v43, %v1528_v25  ;;  %v2743_v50 = vadd.f32 %v2727_v2, %v2695_v63  ;;  %v2776_v40 = vmul.f32 %v10665_v5, %v14812_v52  ;;  %14813 = vst [vmem:[#allocation31_spill] sm:$0xff] %v10775_v7  ;;  %14814 = vst [vmem:[#allocation32_spill] sm:$0xff] %v10778_v13  ;;  %v14815_v2 = vld [vmem:[#allocation37_spill] sm:$0xff] }
  0x9a   : > { %v10781_v17 = vadd.f32 %v10192_v43, %v1529_v31  ;;  %v2744_v11 = vadd.f32 %v2728_v27, %v2696_v45  ;;  %v2826_v30 = vmul.f32 %v10683_v32, %v10753_v34  ;;  %v2827_v0 = vmul.f32 %v10683_v32, %v10756_v38  ;;  %8830 = vmatprep.mubr.msk.bf16.mxu1 %vm1830_vm1, %v3092_v56  ;;  %v14816_v45 = vld [vmem:[#allocation38_spill] sm:$0xff] }
  0x9b   : > { %v7984_v58 = vmul.f32 -1.442695, %v10770_v21  ;;  %v2791_v37 = vadd.f32 %v2775_v24, %v2743_v50  ;;  %v2874_v1 = vmul.f32 %v10699_v28, %v10764_v47  ;;  %v2875_v62 = vmul.f32 %v10699_v28, %v10767_v46  ;;  %v14817_v50 = vld [vmem:[#allocation39_spill] sm:$0xff] }
  0x9c   : > { %v7985_v43 = vmul.f32 -1.442695, %v10781_v17  ;;  %v2792_v6 = vadd.f32 %v2776_v40, %v2744_v11  ;;  %v2922_v42 = vmul.f32 %v10709_v16, %v10775_v7  ;;  %v2923_v25 = vmul.f32 %v10709_v16, %v10778_v13  ;;  %v14818_v11 = vld [vmem:[#allocation40_spill] sm:$0xff] }
  0x9d   : > { %8995 = vpow2.f32 %v7984_v58  ;;  %v2842_v63 = vadd.f32 %v2826_v30, %v2791_v37  ;;  %v638_v31 = vmul.f32 %v10719_v26, %v14815_v2  ;;  %v639_v27 = vmul.f32 %v10719_v26, %v14816_v45  ;;  %v8988_v24 = vpop.eup %8987  ;;  %v14819_v58 = vld [vmem:[#allocation41_spill] sm:$0xff]  ;;  %v14820_v37 = vld [vmem:[#allocation42_spill] sm:$0xff] }
  0x9e   : > { %8997 = vpow2.f32 %v7985_v43  ;;  %v2843_v56 = vadd.f32 %v2827_v0, %v2792_v6  ;;  %v740_v40 = vmul.f32 %v10728_v10, %v14817_v50  ;;  %v741_v7 = vmul.f32 %v10728_v10, %v14818_v11  ;;  %v8990_v46 = vpop.eup %8989  ;;  %v14821_v50 = vld [vmem:[#allocation33_spill] sm:$0xff]  ;;  %v14822_v11 = vld [vmem:[#allocation34_spill] sm:$0xff] }
  0x9f   : > { %v3032_v47 = vadd.f32 1.0, %v8988_v24  ;;  %v2890_v13 = vadd.f32 %v2874_v1, %v2842_v63  ;;  %v842_v30 = vmul.f32 %v10737_v55, %v14819_v58  ;;  %v843_v2 = vmul.f32 %v10737_v55, %v14820_v37 }
  0xa0   : > { %v3033_v45 = vadd.f32 1.0, %v8990_v46  ;;  %v2891_v38 = vadd.f32 %v2875_v62, %v2843_v56  ;;  %v772_v43 = vadd.f32 %v740_v40, %v638_v31  ;;  %v773_v0 = vadd.f32 %v741_v7, %v639_v27  ;;  %v10815_v46 = vld [vmem:[%s9988_s7 + $0xb0] sm:$0xff]  ;;  %v10821_v7 = vld [vmem:[%s14539_s2] ss:$0 sm:$0xff] }
  0xa1   : > { %8999 = vrcp.f32 %v3032_v47  ;;  %v2938_v6 = vadd.f32 %v2922_v42, %v2890_v13  ;;  %v947_v34 = vmul.f32 %v10638_v29, %v14821_v50  ;;  %v948_v24 = vmul.f32 %v10638_v29, %v14822_v11  ;;  %14823 = vst [vmem:[#allocation37_spill] sm:$0xff] %v10815_v46  ;;  %v14824_v42 = vld [vmem:[#allocation35_spill] sm:$0xff] }
  0xa2   : > { %v8992_v1 = vpop.eup %8991  ;;  %9001 = vrcp.f32 %v3033_v45  ;;  %v2939_v63 = vadd.f32 %v2923_v25, %v2891_v38  ;;  %v874_v58 = vadd.f32 %v842_v30, %v772_v43  ;;  %v875_v37 = vadd.f32 %v843_v2, %v773_v0  ;;  %v14825_v38 = vld [vmem:[#allocation36_spill] sm:$0xff]  ;;  %v10831_v30 = vld [vmem:[%s9988_s7 + $0xb8] sm:$0xff]  ;;  %v10842_v43 = vld [vmem:[%s14540_s3] ss:$0 sm:$0xff] }
  0xa3   : > { %v8994_v62 = vpop.eup %8993  ;;  %v1788_v47 = vmul.f32 %v8992_v1, %v10601_v3  ;;  %v2954_v13 = vmul.f32 %v10821_v7, %v2938_v6  ;;  %v1049_v31 = vmul.f32 %v10649_v8, %v14824_v42  ;;  %v1050_v25 = vmul.f32 %v10649_v8, %v14825_v38  ;;  %14826 = vst [vmem:[#allocation38_spill] sm:$0xff] %v10831_v30  ;;  %v10834_v2 = vld [vmem:[%s9988_s7 + $0xb1] sm:$0xff]  ;;  %v10837_v45 = vld [vmem:[%s9988_s7 + $0xb9] sm:$0xff] }
  0xa4   : > { %v1789_v27 = vmul.f32 %v8994_v62, %v10608_v4  ;;  %v2955_v56 = vmul.f32 %v10821_v7, %v2939_v63  ;;  %v979_v3 = vadd.f32 %v947_v34, %v874_v58  ;;  %v980_v40 = vadd.f32 %v948_v24, %v875_v37  ;;  %14827 = vst [vmem:[#allocation39_spill] sm:$0xff] %v10834_v2  ;;  %v14829_v4 = vld [vmem:[#allocation54_spill] sm:$0xff]  ;;  %v14830_v1 = vld [vmem:[#allocation55_spill] sm:$0xff] }
  0xa5   : > { %14828 = vst [vmem:[#allocation40_spill] sm:$0xff] %v10837_v45  ;;  %v10845_v0 = vadd.f32 %v10842_v43, %v2954_v13  ;;  %v1151_v6 = vmul.f32 %v10665_v5, %v14829_v4  ;;  %v1152_v34 = vmul.f32 %v10665_v5, %v14830_v1  ;;  %v1256_v24 = vmul.f32 %v10683_v32, %v10815_v46  ;;  %v10854_v63 = vld [vmem:[%s9988_s7 + $0xb2] sm:$0xff]  ;;  %v10860_v42 = vld [vmem:[%s9988_s7 + $0xba] sm:$0xff] }
  0xa6   : > { %v1817_v58 = vpack.c.bf16 %v1789_v27, %v1788_v47  ;;  %v10857_v37 = vadd.f32 %v10842_v43, %v2955_v56  ;;  %v1081_v62 = vadd.f32 %v1049_v31, %v979_v3  ;;  %v1082_v38 = vadd.f32 %v1050_v25, %v980_v40  ;;  %14831 = vst [vmem:[#allocation41_spill] sm:$0xff] %v10860_v42 }
  0xa7   : > { %v8248_v13 = vmul.f32 -1.442695, %v10845_v0  ;;  %v1257_v4 = vmul.f32 %v10683_v32, %v10831_v30  ;;  %v1358_v1 = vmul.f32 %v10699_v28, %v10834_v2  ;;  %v1359_v46 = vmul.f32 %v10699_v28, %v10837_v45  ;;  %v14832_v30 = vld [vmem:[#allocation51_spill] sm:$0xff] }
  0xa8   : > { %8797 = vmatmul.mubr.msk.bf16.gmra.mxu0 %vm1830_vm1, %v1817_v58  ;;  %v8249_v47 = vmul.f32 -1.442695, %v10857_v37  ;;  %v1183_v27 = vadd.f32 %v1151_v6, %v1081_v62  ;;  %v1184_v31 = vadd.f32 %v1152_v34, %v1082_v38  ;;  %v1460_v25 = vmul.f32 %v10709_v16, %v10854_v63 }
  0xa9   : > { %9003 = vpow2.f32 %v8248_v13  ;;  %v1461_v56 = vmul.f32 %v10709_v16, %v10860_v42  ;;  %v2534_v3 = vmul.f32 %v10719_v26, %v14796_v18  ;;  %v2535_v40 = vmul.f32 %v10719_v26, %v14797_v51 }
  0xaa   : > { %v8996_v45 = vpop.eup %8995  ;;  %9005 = vpow2.f32 %v8249_v47  ;;  %v1288_v58 = vadd.f32 %v1256_v24, %v1183_v27  ;;  %v1289_v2 = vadd.f32 %v1257_v4, %v1184_v31  ;;  %v2582_v38 = vmul.f32 %v10728_v10, %v14832_v30  ;;  %v14833_v27 = vld [vmem:[#allocation43_spill] sm:$0xff] }
  0xab   : > { %v8998_v6 = vpop.eup %8997  ;;  %v1694_v34 = vadd.f32 1.0, %v8996_v45  ;;  %v2583_v62 = vmul.f32 %v10728_v10, %v14800_v23  ;;  %v2630_v13 = vmul.f32 %v10737_v55, %v14801_v61  ;;  %v2631_v18 = vmul.f32 %v10737_v55, %v10331_v60 }
  0xac   : > { %v1695_v51 = vadd.f32 1.0, %v8998_v6  ;;  %v1390_v42 = vadd.f32 %v1358_v1, %v1288_v58  ;;  %v1391_v47 = vadd.f32 %v1359_v46, %v1289_v2  ;;  %v2598_v24 = vadd.f32 %v2582_v38, %v2534_v3  ;;  %v10892_v6 = vld [vmem:[%s9988_s7 + $0x1f0] sm:$0xff]  ;;  %v10903_v38 = vld [vmem:[%s9988_s7 + $0x1f8] sm:$0xff] }
  0xad   : > { %9007 = vrcp.f32 %v1694_v34  ;;  %v2599_v4 = vadd.f32 %v2583_v62, %v2535_v40  ;;  %v2681_v30 = vmul.f32 %v10638_v29, %v14833_v27  ;;  %v2682_v45 = vmul.f32 %v10638_v29, %v10577_v12  ;;  %14834 = vst [vmem:[#allocation42_spill] sm:$0xff] %v10903_v38  ;;  %v10906_v34 = vld [vmem:[%s9988_s7 + $0x1f1] sm:$0xff] }
  0xae   : > { %v9000_v23 = vpop.eup %8999  ;;  %9009 = vrcp.f32 %v1695_v51  ;;  %v1492_v61 = vadd.f32 %v1460_v25, %v1390_v42  ;;  %v1493_v31 = vadd.f32 %v1461_v56, %v1391_v47  ;;  %v2646_v60 = vadd.f32 %v2630_v13, %v2598_v24  ;;  %14835 = vst [vmem:[#allocation33_spill] sm:$0xff] %v10906_v34  ;;  %v14837_v13 = vld [vmem:[#allocation44_spill] sm:$0xff]  ;;  %v14838_v51 = vld [vmem:[#allocation45_spill] sm:$0xff] }
  0xaf   : > { %v9002_v46 = vpop.eup %9001  ;;  %v3080_v2 = vmul.f32 %v9000_v23, %v10676_v20  ;;  %v2647_v1 = vadd.f32 %v2631_v18, %v2599_v4  ;;  %v2729_v3 = vmul.f32 %v10649_v8, %v10584_v57  ;;  %v2730_v40 = vmul.f32 %v10649_v8, %v10587_v48  ;;  %v10909_v20 = vld [vmem:[%s9988_s7 + $0x1f9] sm:$0xff] }
  0xb0   : > { %v3081_v58 = vmul.f32 %v9002_v46, %v10692_v49  ;;  %v1530_v42 = vmul.f32 %v10821_v7, %v1492_v61  ;;  %v1531_v25 = vmul.f32 %v10821_v7, %v1493_v31  ;;  %v2697_v56 = vadd.f32 %v2681_v30, %v2646_v60  ;;  %14836 = vst [vmem:[#allocation34_spill] sm:$0xff] %v10909_v20  ;;  %v10918_v24 = vld [vmem:[%s9988_s7 + $0x1f2] sm:$0xff] }
  0xb1   : > { %v2698_v62 = vadd.f32 %v2682_v45, %v2647_v1  ;;  %v2777_v18 = vmul.f32 %v10665_v5, %v14837_v13  ;;  %v2778_v47 = vmul.f32 %v10665_v5, %v14838_v51  ;;  %v2828_v49 = vmul.f32 %v10683_v32, %v10892_v6  ;;  %14839 = vst [vmem:[#allocation51_spill] sm:$0xff] %v10918_v24  ;;  %v10927_v45 = vld [vmem:[%s9988_s7 + $0x1fa] sm:$0xff] }
  0xb2   : > { %v3093_v4 = vpack.c.bf16 %v3081_v58, %v3080_v2  ;;  %v10921_v30 = vadd.f32 %v10842_v43, %v1530_v42  ;;  %v10924_v23 = vadd.f32 %v10842_v43, %v1531_v25  ;;  %v2745_v61 = vadd.f32 %v2729_v3, %v2697_v56  ;;  %14840 = vst [vmem:[#allocation43_spill] sm:$0xff] %v10927_v45 }
  0xb3   : > { %v2746_v31 = vadd.f32 %v2730_v40, %v2698_v62  ;;  %v2829_v60 = vmul.f32 %v10683_v32, %v10903_v38  ;;  %v2876_v46 = vmul.f32 %v10699_v28, %v10906_v34  ;;  %v2877_v1 = vmul.f32 %v10699_v28, %v10909_v20 }
  0xb4   : > { %8831 = vmatmul.mubr.msk.bf16.gmra.mxu1 %vm1830_vm1, %v3093_v4  ;;  %v7986_v2 = vmul.f32 -1.442695, %v10921_v30  ;;  %v7987_v58 = vmul.f32 -1.442695, %v10924_v23  ;;  %v2793_v42 = vadd.f32 %v2777_v18, %v2745_v61  ;;  %v2924_v3 = vmul.f32 %v10709_v16, %v10918_v24 }
  0xb5   : > { %v2794_v40 = vadd.f32 %v2778_v47, %v2746_v31  ;;  %v2925_v25 = vmul.f32 %v10709_v16, %v10927_v45  ;;  %v640_v56 = vmul.f32 %v10719_v26, %v10372_v39  ;;  %v641_v62 = vmul.f32 %v10719_v26, %v10377_v19 }
  0xb6   : > { %v9004_v20 = vpop.eup %9003  ;;  %9011 = vpow2.f32 %v7986_v2  ;;  %v2844_v4 = vadd.f32 %v2828_v49, %v2793_v42  ;;  %v742_v34 = vmul.f32 %v10728_v10, %v10380_v9  ;;  %v743_v18 = vmul.f32 %v10728_v10, %v10386_v22  ;;  %v10962_v42 = vld [vmem:[%s9988_s7 + $0xc8] sm:$0xff] }
  0xb7   : > { %v9006_v61 = vpop.eup %9005  ;;  %v3034_v47 = vadd.f32 1.0, %v9004_v20  ;;  %9013 = vpow2.f32 %v7987_v58  ;;  %v2845_v31 = vadd.f32 %v2829_v60, %v2794_v40  ;;  %v844_v45 = vmul.f32 %v10737_v55, %v10389_v44 }
  0xb8   : > { %v3035_v39 = vadd.f32 1.0, %v9006_v61  ;;  %v2892_v24 = vadd.f32 %v2876_v46, %v2844_v4  ;;  %v774_v38 = vadd.f32 %v742_v34, %v640_v56  ;;  %v775_v19 = vadd.f32 %v743_v18, %v641_v62  ;;  %v10969_v56 = vld [vmem:[%s9988_s7 + $0xd0] sm:$0xff]  ;;  %v14842_v4 = vld [vmem:[#allocation47_spill] sm:$0xff]  ;;  %v14843_v61 = vld [vmem:[#allocation48_spill] sm:$0xff] }
  0xb9   : > { %9015 = vrcp.f32 %v3034_v47  ;;  %v2893_v49 = vadd.f32 %v2877_v1, %v2845_v31  ;;  %v845_v9 = vmul.f32 %v10737_v55, %v10395_v36  ;;  %v949_v22 = vmul.f32 %v10638_v29, %v10643_v41  ;;  %v10980_v47 = vld [vmem:[%s9988_s7 + $0xd1] sm:$0xff] }
  0xba   : > { %v9008_v20 = vpop.eup %9007  ;;  %9017 = vrcp.f32 %v3035_v39  ;;  %v2940_v60 = vadd.f32 %v2924_v3, %v2892_v24  ;;  %v876_v2 = vadd.f32 %v844_v45, %v774_v38  ;;  %v950_v44 = vmul.f32 %v10638_v29, %v10656_v33  ;;  %v14841_v45 = vld [vmem:[#allocation46_spill] sm:$0xff]  ;;  %v10983_v31 = vld [vmem:[%s9988_s7 + $0xca] sm:$0xff] }
  0xbb   : > { %v9010_v34 = vpop.eup %9009  ;;  %v1790_v46 = vmul.f32 %v9008_v20, %v10770_v21  ;;  %v2941_v1 = vadd.f32 %v2925_v25, %v2893_v49  ;;  %v877_v58 = vadd.f32 %v845_v9, %v775_v19  ;;  %v1051_v36 = vmul.f32 %v10649_v8, %v10659_v54  ;;  %v10972_v21 = vld [vmem:[%s9988_s7 + $0xc9] sm:$0xff]  ;;  %14844 = vst [vmem:[#allocation44_spill] sm:$0xff] %v10983_v31 }
  0xbc   : > { %v1791_v40 = vmul.f32 %v9010_v34, %v10781_v17  ;;  %v2956_v38 = vmul.f32 %v10821_v7, %v2940_v60  ;;  %v981_v24 = vadd.f32 %v949_v22, %v876_v2  ;;  %v1052_v3 = vmul.f32 %v10649_v8, %v14841_v45  ;;  %v10991_v22 = vld [vmem:[%s9988_s7 + $0xd2] sm:$0xff] }
  0xbd   : > { %v2957_v25 = vmul.f32 %v10821_v7, %v2941_v1  ;;  %v982_v62 = vadd.f32 %v950_v44, %v877_v58  ;;  %v1153_v18 = vmul.f32 %v10665_v5, %v14842_v4  ;;  %v1154_v17 = vmul.f32 %v10665_v5, %v14843_v61  ;;  %14845 = vst [vmem:[#allocation45_spill] sm:$0xff] %v10991_v22 }
  0xbe   : > { %v1818_v39 = vpack.c.bf16 %v1791_v40, %v1790_v46  ;;  %v10986_v19 = vadd.f32 %v10842_v43, %v2956_v38  ;;  %v1083_v49 = vadd.f32 %v1051_v36, %v981_v24  ;;  %v1258_v9 = vmul.f32 %v10683_v32, %v10962_v42 }
  0xbf   : > { %v10994_v20 = vadd.f32 %v10842_v43, %v2957_v25  ;;  %v1084_v60 = vadd.f32 %v1052_v3, %v982_v62  ;;  %v1259_v2 = vmul.f32 %v10683_v32, %v10969_v56  ;;  %v1360_v44 = vmul.f32 %v10699_v28, %v10972_v21 }
  0xc0   : > { %8800 = vmatprep.mubr.msk.bf16.mxu0 %vm1830_vm1, %v1818_v39  ;;  %v8250_v34 = vmul.f32 -1.442695, %v10986_v19  ;;  %v1185_v46 = vadd.f32 %v1153_v18, %v1083_v49  ;;  %v1361_v1 = vmul.f32 %v10699_v28, %v10980_v47  ;;  %v1462_v58 = vmul.f32 %v10709_v16, %v10983_v31 }
  0xc1   : > { %v8251_v36 = vmul.f32 -1.442695, %v10994_v20  ;;  %v1186_v40 = vadd.f32 %v1154_v17, %v1084_v60  ;;  %v1463_v38 = vmul.f32 %v10709_v16, %v10991_v22  ;;  %v2536_v24 = vmul.f32 %v10719_v26, %v10437_v14 }
  0xc2   : > { %9019 = vpow2.f32 %v8250_v34  ;;  %v1290_v3 = vadd.f32 %v1258_v9, %v1185_v46  ;;  %v2537_v25 = vmul.f32 %v10719_v26, %v10443_v15  ;;  %v2584_v62 = vmul.f32 %v10728_v10, %v10454_v59  ;;  %v14846_v59 = vld [vmem:[#allocation49_spill] sm:$0xff] }
  0xc3   : > { %v9012_v18 = vpop.eup %9011  ;;  %9021 = vpow2.f32 %v8251_v36  ;;  %v1291_v39 = vadd.f32 %v1259_v2, %v1186_v40  ;;  %v2585_v17 = vmul.f32 %v10728_v10, %v10457_v35  ;;  %v2632_v49 = vmul.f32 %v10737_v55, %v14809_v53  ;;  %v14847_v53 = vld [vmem:[#allocation50_spill] sm:$0xff] }
  0xc4   : > { %v9014_v60 = vpop.eup %9013  ;;  %v1696_v22 = vadd.f32 1.0, %v9012_v18  ;;  %v1392_v14 = vadd.f32 %v1360_v44, %v1290_v3  ;;  %v2600_v34 = vadd.f32 %v2584_v62, %v2536_v24  ;;  %v2633_v9 = vmul.f32 %v10737_v55, %v14812_v52 }
  0xc5   : > { %v1697_v15 = vadd.f32 1.0, %v9014_v60  ;;  %v1393_v46 = vadd.f32 %v1361_v1, %v1291_v39  ;;  %v2601_v31 = vadd.f32 %v2585_v17, %v2537_v25  ;;  %v2683_v2 = vmul.f32 %v10638_v29, %v14846_v59  ;;  %v8204_v39 = vld [vmem:[%s9988_s7 + $0x208] sm:$0xff]  ;;  %v8205_v17 = vld [vmem:[%s9988_s7 + $0x210] sm:$0xff] }
  0xc6   : > { %v9016_v36 = vpop.eup %9015  ;;  %9023 = vrcp.f32 %v1696_v22  ;;  %v1494_v35 = vadd.f32 %v1462_v58, %v1392_v14  ;;  %v2648_v40 = vadd.f32 %v2632_v49, %v2600_v34  ;;  %v2684_v18 = vmul.f32 %v10638_v29, %v14847_v53  ;;  %v14848_v58 = vld [vmem:[#allocation52_spill] sm:$0xff]  ;;  %v14849_v14 = vld [vmem:[#allocation53_spill] sm:$0xff] }
  0xc7   : > { %v9018_v44 = vpop.eup %9017  ;;  %v3082_v52 = vmul.f32 %v9016_v36, %v10845_v0  ;;  %9025 = vrcp.f32 %v1697_v15  ;;  %v1495_v1 = vadd.f32 %v1463_v38, %v1393_v46  ;;  %v2649_v24 = vadd.f32 %v2633_v9, %v2601_v31  ;;  %v14850_v38 = vld [vmem:[#allocation31_spill] sm:$0xff]  ;;  %v8221_v34 = vld [vmem:[%s9988_s7 + $0x211] sm:$0xff]  ;;  %v14851_v59 = vld [vmem:[#allocation32_spill] sm:$0xff] }
  0xc8   : > { %v3083_v3 = vmul.f32 %v9018_v44, %v10857_v37  ;;  %v1532_v25 = vmul.f32 %v10821_v7, %v1494_v35  ;;  %v2699_v22 = vadd.f32 %v2683_v2, %v2648_v40  ;;  %v2731_v62 = vmul.f32 %v10649_v8, %v14848_v58  ;;  %v8220_v37 = vld [vmem:[%s9988_s7 + $0x209] sm:$0xff]  ;;  %v8237_v35 = vld [vmem:[%s9988_s7 + $0x212] sm:$0xff] }
  0xc9   : > { %v1533_v49 = vmul.f32 %v10821_v7, %v1495_v1  ;;  %v2700_v60 = vadd.f32 %v2684_v18, %v2649_v24  ;;  %v2732_v0 = vmul.f32 %v10649_v8, %v14849_v14  ;;  %v2779_v31 = vmul.f32 %v10665_v5, %v14850_v38  ;;  %v8236_v36 = vld [vmem:[%s9988_s7 + $0x20a] sm:$0xff] }
  0xca   : > { %v3094_v9 = vpack.c.bf16 %v3083_v3, %v3082_v52  ;;  %v11040_v15 = vadd.f32 %v10842_v43, %v1532_v25  ;;  %v2747_v46 = vadd.f32 %v2731_v62, %v2699_v22  ;;  %v2780_v2 = vmul.f32 %v10665_v5, %v14851_v59  ;;  %v14854_v59 = vld [vmem:[#allocation54_spill] sm:$0xff] }
  0xcb   : > { %v11047_v40 = vadd.f32 %v10842_v43, %v1533_v49  ;;  %v2748_v53 = vadd.f32 %v2732_v0, %v2700_v60  ;;  %v2830_v18 = vmul.f32 %v10683_v32, %v8204_v39  ;;  %v2831_v44 = vmul.f32 %v10683_v32, %v8205_v17  ;;  %v14852_v0 = vld [vmem:[#allocation35_spill] sm:$0xff] }
  0xcc   : > { %8834 = vmatprep.mubr.msk.bf16.mxu1 %vm1830_vm1, %v3094_v9  ;;  %v7988_v52 = vmul.f32 -1.442695, %v11040_v15  ;;  %v2795_v1 = vadd.f32 %v2779_v31, %v2747_v46  ;;  %v2878_v24 = vmul.f32 %v10699_v28, %v8220_v37  ;;  %v2879_v3 = vmul.f32 %v10699_v28, %v8221_v34  ;;  %v14853_v31 = vld [vmem:[#allocation36_spill] sm:$0xff] }
  0xcd   : > { %v7989_v25 = vmul.f32 -1.442695, %v11047_v40  ;;  %v2796_v22 = vadd.f32 %v2780_v2, %v2748_v53  ;;  %v2926_v58 = vmul.f32 %v10709_v16, %v8236_v36  ;;  %v2927_v62 = vmul.f32 %v10709_v16, %v8237_v35 }
  0xce   : > { %9027 = vpow2.f32 %v7988_v52  ;;  %v2846_v39 = vadd.f32 %v2830_v18, %v2795_v1  ;;  %v642_v17 = vmul.f32 %v10719_v26, %v14821_v50  ;;  %v643_v49 = vmul.f32 %v10719_v26, %v14822_v11  ;;  %v14855_v50 = vld [vmem:[#allocation55_spill] sm:$0xff]  ;;  %v14856_v52 = vld [vmem:[#allocation37_spill] sm:$0xff] }
  0xcf   : > { %v9020_v60 = vpop.eup %9019  ;;  %9029 = vpow2.f32 %v7989_v25  ;;  %v2847_v14 = vadd.f32 %v2831_v44, %v2796_v22  ;;  %v744_v38 = vmul.f32 %v10728_v10, %v14852_v0  ;;  %v745_v37 = vmul.f32 %v10728_v10, %v14853_v31  ;;  %v14857_v25 = vld [vmem:[#allocation38_spill] sm:$0xff] }
  0xd0   : > { %v9022_v34 = vpop.eup %9021  ;;  %v3036_v9 = vadd.f32 1.0, %v9020_v60  ;;  %v2894_v46 = vadd.f32 %v2878_v24, %v2846_v39  ;;  %v846_v2 = vmul.f32 %v10737_v55, %v14854_v59  ;;  %v847_v36 = vmul.f32 %v10737_v55, %v14855_v50  ;;  %v11075_v31 = vld [vmem:[%s9988_s7 + $0xd8] sm:$0xff]  ;;  %v11086_v59 = vld [vmem:[%s9988_s7 + $0xe0] sm:$0xff] }
  0xd1   : > { %v3037_v11 = vadd.f32 1.0, %v9022_v34  ;;  %v2895_v35 = vadd.f32 %v2879_v3, %v2847_v14  ;;  %v776_v53 = vadd.f32 %v744_v38, %v642_v17  ;;  %v777_v18 = vadd.f32 %v745_v37, %v643_v49  ;;  %v14858_v49 = vld [vmem:[#allocation39_spill] sm:$0xff]  ;;  %v14859_v38 = vld [vmem:[#allocation40_spill] sm:$0xff] }
  0xd2   : > { %9031 = vrcp.f32 %v3036_v9  ;;  %v2942_v44 = vadd.f32 %v2926_v58, %v2894_v46  ;;  %v951_v1 = vmul.f32 %v10638_v29, %v14856_v52  ;;  %v952_v22 = vmul.f32 %v10638_v29, %v14857_v25 }
  0xd3   : > { %v9024_v24 = vpop.eup %9023  ;;  %9033 = vrcp.f32 %v3037_v11  ;;  %v2943_v39 = vadd.f32 %v2927_v62, %v2895_v35  ;;  %v878_v60 = vadd.f32 %v846_v2, %v776_v53  ;;  %v879_v0 = vadd.f32 %v847_v36, %v777_v18  ;;  %v11089_v2 = vld [vmem:[%s9988_s7 + $0xd9] sm:$0xff]  ;;  %v14861_v11 = vld [vmem:[#allocation41_spill] sm:$0xff] }
  0xd4   : > { %v9026_v3 = vpop.eup %9025  ;;  %v1792_v58 = vmul.f32 %v9024_v24, %v10921_v30  ;;  %v2958_v17 = vmul.f32 %v10821_v7, %v2942_v44  ;;  %v1053_v14 = vmul.f32 %v10649_v8, %v14858_v49  ;;  %v1054_v37 = vmul.f32 %v10649_v8, %v14859_v38  ;;  %v11092_v30 = vld [vmem:[%s9988_s7 + $0xe1] sm:$0xff] }
  0xd5   : > { %v1793_v34 = vmul.f32 %v9026_v3, %v10924_v23  ;;  %v2959_v62 = vmul.f32 %v10821_v7, %v2943_v39  ;;  %v983_v9 = vadd.f32 %v951_v1, %v878_v60  ;;  %v984_v46 = vadd.f32 %v952_v22, %v879_v0  ;;  %14860 = vst [vmem:[#allocation46_spill] sm:$0xff] %v11092_v30  ;;  %v11104_v53 = vld [vmem:[%s9988_s7 + $0xda] sm:$0xff]  ;;  %v11110_v24 = vld [vmem:[%s9988_s7 + $0xe2] sm:$0xff] }
  0xd6   : > { %v11095_v50 = vadd.f32 %v10842_v43, %v2958_v17  ;;  %v1155_v36 = vmul.f32 %v10665_v5, %v10854_v63  ;;  %v1156_v23 = vmul.f32 %v10665_v5, %v14861_v11  ;;  %v1260_v35 = vmul.f32 %v10683_v32, %v11075_v31  ;;  %14862 = vst [vmem:[#allocation47_spill] sm:$0xff] %v11110_v24 }
  0xd7   : > { %v1819_v18 = vpack.c.bf16 %v1793_v34, %v1792_v58  ;;  %v11107_v44 = vadd.f32 %v10842_v43, %v2959_v62  ;;  %v1085_v1 = vadd.f32 %v1053_v14, %v983_v9  ;;  %v1086_v22 = vadd.f32 %v1054_v37, %v984_v46 }
  0xd8   : > { %v8252_v39 = vmul.f32 -1.442695, %v11095_v50  ;;  %v1261_v60 = vmul.f32 %v10683_v32, %v11086_v59  ;;  %v1362_v0 = vmul.f32 %v10699_v28, %v11089_v2  ;;  %v1363_v3 = vmul.f32 %v10699_v28, %v11092_v30 }
  0xd9   : > { %8801 = vmatmul.mubr.msk.bf16.gmra.mxu0 %vm1830_vm1, %v1819_v18  ;;  %v8253_v58 = vmul.f32 -1.442695, %v11107_v44  ;;  %v1187_v17 = vadd.f32 %v1155_v36, %v1085_v1  ;;  %v1188_v14 = vadd.f32 %v1156_v23, %v1086_v22  ;;  %v1464_v37 = vmul.f32 %v10709_v16, %v11104_v53 }
  0xda   : > { %9035 = vpow2.f32 %v8252_v39  ;;  %v1465_v34 = vmul.f32 %v10709_v16, %v11110_v24  ;;  %v2538_v62 = vmul.f32 %v10719_v26, %v14833_v27  ;;  %v2539_v9 = vmul.f32 %v10719_v26, %v10577_v12 }
  0xdb   : > { %v9028_v46 = vpop.eup %9027  ;;  %9037 = vpow2.f32 %v8253_v58  ;;  %v1292_v18 = vadd.f32 %v1260_v35, %v1187_v17  ;;  %v1293_v30 = vadd.f32 %v1261_v60, %v1188_v14  ;;  %v2586_v36 = vmul.f32 %v10728_v10, %v10584_v57  ;;  %v14863_v17 = vld [vmem:[#allocation42_spill] sm:$0xff] }
  0xdc   : > { %v9030_v23 = vpop.eup %9029  ;;  %v1698_v1 = vadd.f32 1.0, %v9028_v46  ;;  %v2587_v22 = vmul.f32 %v10728_v10, %v10587_v48  ;;  %v2634_v39 = vmul.f32 %v10737_v55, %v14837_v13  ;;  %v2635_v27 = vmul.f32 %v10737_v55, %v14838_v51 }
  0xdd   : > { %v1699_v12 = vadd.f32 1.0, %v9030_v23  ;;  %v1394_v24 = vadd.f32 %v1362_v0, %v1292_v18  ;;  %v1395_v58 = vadd.f32 %v1363_v3, %v1293_v30  ;;  %v2602_v35 = vadd.f32 %v2586_v36, %v2538_v62  ;;  %v8206_v23 = vld [vmem:[%s9988_s7 + $0x218] sm:$0xff]  ;;  %v14864_v62 = vld [vmem:[#allocation33_spill] sm:$0xff] }
  0xde   : > { %9039 = vrcp.f32 %v1698_v1  ;;  %v2603_v60 = vadd.f32 %v2587_v22, %v2539_v9  ;;  %v2685_v57 = vmul.f32 %v10638_v29, %v10892_v6  ;;  %v2686_v14 = vmul.f32 %v10638_v29, %v14863_v17  ;;  %v14865_v9 = vld [vmem:[#allocation34_spill] sm:$0xff] }
  0xdf   : > { %v9032_v48 = vpop.eup %9031  ;;  %9041 = vrcp.f32 %v1699_v12  ;;  %v1496_v13 = vadd.f32 %v1464_v37, %v1394_v24  ;;  %v1497_v46 = vadd.f32 %v1465_v34, %v1395_v58  ;;  %v2650_v51 = vadd.f32 %v2634_v39, %v2602_v35  ;;  %v8207_v34 = vld [vmem:[%s9988_s7 + $0x220] sm:$0xff] }
  0xe0   : > { %v9034_v0 = vpop.eup %9033  ;;  %v3084_v30 = vmul.f32 %v9032_v48, %v10986_v19  ;;  %v2651_v3 = vadd.f32 %v2635_v27, %v2603_v60  ;;  %v2733_v6 = vmul.f32 %v10649_v8, %v14864_v62  ;;  %v2734_v18 = vmul.f32 %v10649_v8, %v14865_v9  ;;  %v8222_v22 = vld [vmem:[%s9988_s7 + $0x219] sm:$0xff]  ;;  %v8223_v39 = vld [vmem:[%s9988_s7 + $0x221] sm:$0xff] }
  0xe1   : > { %v3085_v36 = vmul.f32 %v9034_v0, %v10994_v20  ;;  %v1534_v1 = vmul.f32 %v10821_v7, %v1496_v13  ;;  %v1535_v24 = vmul.f32 %v10821_v7, %v1497_v46  ;;  %v2701_v37 = vadd.f32 %v2685_v57, %v2650_v51  ;;  %v14866_v19 = vld [vmem:[#allocation51_spill] sm:$0xff] }
  0xe2   : > { %v2702_v12 = vadd.f32 %v2686_v14, %v2651_v3  ;;  %v2781_v27 = vmul.f32 %v10665_v5, %v14866_v19  ;;  %v14867_v58 = vld [vmem:[#allocation43_spill] sm:$0xff]  ;;  %v2832_v60 = vmul.f32 %v10683_v32, %v8206_v23  ;;  %v2833_v14 = vmul.f32 %v10683_v32, %v8207_v34 }
  0xe3   : > { %v2782_v35 = vmul.f32 %v10665_v5, %v14867_v58  ;;  %v8238_v17 = vld [vmem:[%s9988_s7 + $0x21a] sm:$0xff]  ;;  %v3095_v20 = vpack.c.bf16 %v3085_v36, %v3084_v30  ;;  %v11160_v48 = vadd.f32 %v10842_v43, %v1534_v1  ;;  %v11163_v13 = vadd.f32 %v10842_v43, %v1535_v24  ;;  %v8239_v46 = vld [vmem:[%s9988_s7 + $0x222] sm:$0xff] }
  0xe4   : > { %v2749_v57 = vadd.f32 %v2733_v6, %v2701_v37  ;;  %v2750_v51 = vadd.f32 %v2734_v18, %v2702_v12  ;;  %v2880_v0 = vmul.f32 %v10699_v28, %v8222_v22  ;;  %v2881_v3 = vmul.f32 %v10699_v28, %v8223_v39 }
  0xe5   : > { %8835 = vmatmul.mubr.msk.bf16.gmra.mxu1 %vm1830_vm1, %v3095_v20  ;;  %v7990_v23 = vmul.f32 -1.442695, %v11160_v48  ;;  %v7991_v30 = vmul.f32 -1.442695, %v11163_v13  ;;  %v2928_v9 = vmul.f32 %v10709_v16, %v8238_v17  ;;  %v2929_v6 = vmul.f32 %v10709_v16, %v8239_v46 }
  0xe6   : > { %v2797_v62 = vadd.f32 %v2781_v27, %v2749_v57  ;;  %v2798_v36 = vadd.f32 %v2782_v35, %v2750_v51  ;;  %v644_v18 = vmul.f32 %v10719_v26, %v10643_v41  ;;  %v645_v1 = vmul.f32 %v10719_v26, %v10656_v33 }
  0xe7   : > { %v9036_v24 = vpop.eup %9035  ;;  %9043 = vpow2.f32 %v7990_v23  ;;  %v746_v34 = vmul.f32 %v10728_v10, %v10659_v54  ;;  %v747_v22 = vmul.f32 %v10728_v10, %v14841_v45  ;;  %v848_v27 = vmul.f32 %v10737_v55, %v14842_v4 }
  0xe8   : > { %v2848_v37 = vadd.f32 %v2832_v60, %v2797_v62  ;;  %v9038_v39 = vpop.eup %9037  ;;  %v3038_v12 = vadd.f32 1.0, %v9036_v24  ;;  %9045 = vpow2.f32 %v7991_v30  ;;  %v2849_v19 = vadd.f32 %v2833_v14, %v2798_v36  ;;  %v14869_v24 = vld [vmem:[#allocation45_spill] sm:$0xff] }
  0xe9   : > { %v3039_v41 = vadd.f32 1.0, %v9038_v39  ;;  %v778_v35 = vadd.f32 %v746_v34, %v644_v18  ;;  %v779_v33 = vadd.f32 %v747_v22, %v645_v1  ;;  %v849_v54 = vmul.f32 %v10737_v55, %v14843_v61  ;;  %v14868_v18 = vld [vmem:[#allocation44_spill] sm:$0xff]  ;;  %v11215_v34 = vld [vmem:[%s9988_s7 + $0xf2] sm:$0xff] }
  0xea   : > { %v2896_v58 = vadd.f32 %v2880_v0, %v2848_v37  ;;  %9047 = vrcp.f32 %v3038_v12  ;;  %v2897_v60 = vadd.f32 %v2881_v3, %v2849_v19  ;;  %v953_v45 = vmul.f32 %v10638_v29, %v10962_v42  ;;  %v11194_v3 = vld [vmem:[%s9988_s7 + $0xf0] sm:$0xff]  ;;  %v11212_v37 = vld [vmem:[%s9988_s7 + $0xf9] sm:$0xff] }
  0xeb   : > { %v9040_v17 = vpop.eup %9039  ;;  %9049 = vrcp.f32 %v3039_v41  ;;  %v880_v57 = vadd.f32 %v848_v27, %v778_v35  ;;  %v954_v4 = vmul.f32 %v10638_v29, %v10969_v56  ;;  %v881_v0 = vadd.f32 %v849_v54, %v779_v33  ;;  %v11223_v19 = vld [vmem:[%s9988_s7 + $0xfa] sm:$0xff] }
  0xec   : > { %v2944_v20 = vadd.f32 %v2928_v9, %v2896_v58  ;;  %v9042_v46 = vpop.eup %9041  ;;  %v1794_v51 = vmul.f32 %v9040_v17, %v11040_v15  ;;  %v2945_v14 = vadd.f32 %v2929_v6, %v2897_v60  ;;  %v1055_v61 = vmul.f32 %v10649_v8, %v10972_v21  ;;  %v11201_v9 = vld [vmem:[%s9988_s7 + $0xf8] sm:$0xff] }
  0xed   : > { %v1795_v23 = vmul.f32 %v9042_v46, %v11047_v40  ;;  %v985_v62 = vadd.f32 %v953_v45, %v880_v57  ;;  %v1056_v29 = vmul.f32 %v10649_v8, %v10980_v47  ;;  %v11204_v15 = vld [vmem:[%s9988_s7 + $0xf1] sm:$0xff]  ;;  %v986_v6 = vadd.f32 %v954_v4, %v881_v0 }
  0xee   : > { %v2960_v30 = vmul.f32 %v10821_v7, %v2944_v20  ;;  %v2961_v36 = vmul.f32 %v10821_v7, %v2945_v14  ;;  %v1157_v1 = vmul.f32 %v10665_v5, %v14868_v18  ;;  %v1158_v40 = vmul.f32 %v10665_v5, %v14869_v24 }
  0xef   : > { %v1820_v22 = vpack.c.bf16 %v1795_v23, %v1794_v51  ;;  %v1087_v39 = vadd.f32 %v1055_v61, %v985_v62  ;;  %v1262_v12 = vmul.f32 %v10683_v32, %v11194_v3  ;;  %v1088_v41 = vadd.f32 %v1056_v29, %v986_v6 }
  0xf0   : > { %v11218_v8 = vadd.f32 %v10842_v43, %v2960_v30  ;;  %v11226_v27 = vadd.f32 %v10842_v43, %v2961_v36  ;;  %v1263_v5 = vmul.f32 %v10683_v32, %v11201_v9  ;;  %v1364_v58 = vmul.f32 %v10699_v28, %v11204_v15 }
  0xf1   : > { %8804 = vmatprep.mubr.msk.bf16.mxu0 %vm1830_vm1, %v1820_v22  ;;  %v1189_v33 = vadd.f32 %v1157_v1, %v1087_v39  ;;  %v1365_v60 = vmul.f32 %v10699_v28, %v11212_v37  ;;  %v1466_v54 = vmul.f32 %v10709_v16, %v11215_v34  ;;  %v1190_v17 = vadd.f32 %v1158_v40, %v1088_v41  ;;  %v11273_v41 = vld [vmem:[%s9988_s7 + $0x100] sm:$0xff] }
  0xf2   : > { %v8254_v35 = vmul.f32 -1.442695, %v11218_v8  ;;  %v8255_v45 = vmul.f32 -1.442695, %v11226_v27  ;;  %v1467_v32 = vmul.f32 %v10709_v16, %v11223_v19  ;;  %v646_v20 = vmul.f32 %v10719_v26, %v14856_v52 }
  0xf3   : > { %v1294_v57 = vadd.f32 %v1262_v12, %v1189_v33  ;;  %v647_v4 = vmul.f32 %v10719_v26, %v14857_v25  ;;  %v748_v28 = vmul.f32 %v10728_v10, %v14858_v49  ;;  %v1295_v51 = vadd.f32 %v1263_v5, %v1190_v17  ;;  %v11256_v49 = vld [vmem:[%s14538_s1 + $0x3] ss:$0 sm:$0xff]  ;;  %v11268_v12 = vld [vmem:[%s14538_s1 + $0x4] ss:$0 sm:$0xff]  ;;  %v11276_v5 = vld [vmem:[%s9988_s7 + $0x108] sm:$0xff] }
  0xf4   : > { %9051 = vpow2.f32 %v8254_v35  ;;  %v9044_v46 = vpop.eup %9043  ;;  %v749_v14 = vmul.f32 %v10728_v10, %v14859_v38  ;;  %v850_v16 = vmul.f32 %v10737_v55, %v10854_v63  ;;  %v851_v30 = vmul.f32 %v10737_v55, %v14861_v11  ;;  %v14870_v35 = vld [vmem:[#allocation46_spill] sm:$0xff]  ;;  %v11292_v17 = vld [vmem:[%s9988_s7 + $0x109] sm:$0xff] }
  0xf5   : > { %9053 = vpow2.f32 %v8255_v45  ;;  %v9046_v0 = vpop.eup %9045  ;;  %v1700_v61 = vadd.f32 1.0, %v9044_v46  ;;  %v1396_v52 = vadd.f32 %v1364_v58, %v1294_v57  ;;  %v780_v23 = vadd.f32 %v748_v28, %v646_v20  ;;  %v11289_v45 = vld [vmem:[%s9988_s7 + $0x101] sm:$0xff] }
  0xf6   : > { %v1701_v26 = vadd.f32 1.0, %v9046_v0  ;;  %v1397_v25 = vadd.f32 %v1365_v60, %v1295_v51  ;;  %v781_v62 = vadd.f32 %v749_v14, %v647_v4  ;;  %v955_v10 = vmul.f32 %v11256_v49, %v11075_v31  ;;  %v11284_v60 = vld [vmem:[%s14538_s1 + $0x5] ss:$0 sm:$0xff]  ;;  %v11303_v51 = vld [vmem:[%s9988_s7 + $0x10a] sm:$0xff]  ;;  %v11311_v0 = vld [vmem:[%s14538_s1 + $0x6] ss:$0 sm:$0xff] }
  0xf7   : > { %v9048_v63 = vpop.eup %9047  ;;  %9055 = vrcp.f32 %v1700_v61  ;;  %v1498_v38 = vadd.f32 %v1466_v54, %v1396_v52  ;;  %v882_v29 = vadd.f32 %v850_v16, %v780_v23  ;;  %v956_v55 = vmul.f32 %v11256_v49, %v11086_v59  ;;  %v14871_v4 = vld [vmem:[#allocation47_spill] sm:$0xff] }
  0xf8   : > { %v9050_v11 = vpop.eup %9049  ;;  %v3086_v36 = vmul.f32 %v9048_v63, %v11095_v50  ;;  %9057 = vrcp.f32 %v1701_v26  ;;  %v1499_v6 = vadd.f32 %v1467_v32, %v1397_v25  ;;  %v883_v1 = vadd.f32 %v851_v30, %v781_v62  ;;  %v11300_v46 = vld [vmem:[%s9988_s7 + $0x102] sm:$0xff] }
  0xf9   : > { %v3087_v40 = vmul.f32 %v9050_v11, %v11107_v44  ;;  %v1536_v22 = vmul.f32 %v10821_v7, %v1498_v38  ;;  %v987_v39 = vadd.f32 %v955_v10, %v882_v29  ;;  %v1057_v50 = vmul.f32 %v11268_v12, %v11089_v2  ;;  %v11322_v26 = vld [vmem:[%s14538_s1 + $0x7] ss:$0 sm:$0xff]  ;;  %v11332_v38 = vld [vmem:[%s14538_s1 + $0x8] ss:$0 sm:$0xff] }
  0xfa   : > { %v1537_v58 = vmul.f32 %v10821_v7, %v1499_v6  ;;  %v988_v44 = vadd.f32 %v956_v55, %v883_v1  ;;  %v1058_v33 = vmul.f32 %v11268_v12, %v14870_v35  ;;  %v1159_v54 = vmul.f32 %v11284_v60, %v11104_v53 }
  0xfb   : > { %v3096_v32 = vpack.c.bf16 %v3087_v40, %v3086_v36  ;;  %v11295_v20 = vadd.f32 %v10842_v43, %v1536_v22  ;;  %v1089_v57 = vadd.f32 %v1057_v50, %v987_v39  ;;  %v1160_v28 = vmul.f32 %v11284_v60, %v14871_v4  ;;  %v11341_v36 = vld [vmem:[%s14538_s1] ss:$0 sm:$0xff]  ;;  %v11350_v39 = vld [vmem:[%s14538_s1 + $0x1] ss:$0 sm:$0xff] }
  0xfc   : > { %v11306_v14 = vadd.f32 %v10842_v43, %v1537_v58  ;;  %v1090_v16 = vadd.f32 %v1058_v33, %v988_v44  ;;  %v1264_v61 = vmul.f32 %v11311_v0, %v11273_v41  ;;  %v1265_v52 = vmul.f32 %v11311_v0, %v11276_v5 }
  0xfd   : > { %8838 = vmatprep.mubr.msk.bf16.mxu1 %vm1830_vm1, %v3096_v32  ;;  %v7992_v23 = vmul.f32 -1.442695, %v11295_v20  ;;  %v1191_v30 = vadd.f32 %v1159_v54, %v1089_v57  ;;  %v1366_v25 = vmul.f32 %v11322_v26, %v11289_v45  ;;  %v1367_v62 = vmul.f32 %v11322_v26, %v11292_v17 }
  0xfe   : > { %v7993_v10 = vmul.f32 -1.442695, %v11306_v14  ;;  %v1192_v63 = vadd.f32 %v1160_v28, %v1090_v16  ;;  %v1468_v29 = vmul.f32 %v11332_v38, %v11300_v46  ;;  %v1469_v55 = vmul.f32 %v11332_v38, %v11303_v51 }
  0xff   : > { %9059 = vpow2.f32 %v7992_v23  ;;  %v1296_v11 = vadd.f32 %v1264_v61, %v1191_v30  ;;  %v648_v6 = vmul.f32 %v11341_v36, %v10962_v42  ;;  %v649_v1 = vmul.f32 %v11341_v36, %v10969_v56  ;;  %v11359_v56 = vld [vmem:[%s14538_s1 + $0x2] ss:$0 sm:$0xff] }
 0x100   : > { %9061 = vpow2.f32 %v7993_v10  ;;  %v1297_v22 = vadd.f32 %v1265_v52, %v1192_v63  ;;  %v750_v50 = vmul.f32 %v11350_v39, %v10972_v21  ;;  %v751_v58 = vmul.f32 %v11350_v39, %v10980_v47 }
 0x101   : > { %v9052_v40 = vpop.eup %9051  ;;  %v1398_v42 = vadd.f32 %v1366_v25, %v1296_v11  ;;  %v852_v54 = vmul.f32 %v11359_v56, %v14868_v18  ;;  %v853_v32 = vmul.f32 %v11359_v56, %v14869_v24  ;;  %v957_v61 = vmul.f32 %v11256_v49, %v11194_v3  ;;  %v11370_v25 = vld [vmem:[%s9988_s7 + $0x118] sm:$0xff] }
 0x102   : > { %v9054_v44 = vpop.eup %9053  ;;  %v3040_v33 = vadd.f32 1.0, %v9052_v40  ;;  %v1399_v21 = vadd.f32 %v1367_v62, %v1297_v22  ;;  %v782_v28 = vadd.f32 %v750_v50, %v648_v6  ;;  %v783_v16 = vadd.f32 %v751_v58, %v649_v1  ;;  %v11381_v22 = vld [vmem:[%s9988_s7 + $0x120] sm:$0xff] }
 0x103   : > { %v3041_v57 = vadd.f32 1.0, %v9054_v44  ;;  %v1500_v47 = vadd.f32 %v1468_v29, %v1398_v42  ;;  %v958_v52 = vmul.f32 %v11256_v49, %v11201_v9  ;;  %v1059_v29 = vmul.f32 %v11268_v12, %v11204_v15  ;;  %v11384_v50 = vld [vmem:[%s9988_s7 + $0x119] sm:$0xff] }
 0x104   : > { %9063 = vrcp.f32 %v3040_v33  ;;  %v9056_v23 = vpop.eup %9055  ;;  %v1501_v18 = vadd.f32 %v1469_v55, %v1399_v21  ;;  %v884_v30 = vadd.f32 %v852_v54, %v782_v28  ;;  %v885_v24 = vadd.f32 %v853_v32, %v783_v16  ;;  %v11399_v33 = vld [vmem:[%s9988_s7 + $0x11a] sm:$0xff]  ;;  %v11405_v21 = vld [vmem:[%s9988_s7 + $0x122] sm:$0xff] }
 0x105   : > { %9065 = vrcp.f32 %v3041_v57  ;;  %v9058_v62 = vpop.eup %9057  ;;  %v1796_v10 = vmul.f32 %v9056_v23, %v11160_v48  ;;  %v1538_v63 = vmul.f32 %v10821_v7, %v1500_v47  ;;  %v1060_v11 = vmul.f32 %v11268_v12, %v11212_v37  ;;  %v11387_v48 = vld [vmem:[%s9988_s7 + $0x121] sm:$0xff] }
 0x106   : > { %v1797_v6 = vmul.f32 %v9058_v62, %v11163_v13  ;;  %v1539_v55 = vmul.f32 %v10821_v7, %v1501_v18  ;;  %v989_v1 = vadd.f32 %v957_v61, %v884_v30  ;;  %v990_v40 = vadd.f32 %v958_v52, %v885_v24 }
 0x107   : > { %v11390_v58 = vadd.f32 %v10842_v43, %v1538_v63  ;;  %v1161_v44 = vmul.f32 %v11284_v60, %v11215_v34  ;;  %v1162_v13 = vmul.f32 %v11284_v60, %v11223_v19  ;;  %v1266_v7 = vmul.f32 %v11311_v0, %v11370_v25 }
 0x108   : > { %v1821_v42 = vpack.c.bf16 %v1797_v6, %v1796_v10  ;;  %v11402_v54 = vadd.f32 %v10842_v43, %v1539_v55  ;;  %v1091_v32 = vadd.f32 %v1059_v29, %v989_v1  ;;  %v1092_v57 = vadd.f32 %v1060_v11, %v990_v40 }
 0x109   : > { %v7994_v28 = vmul.f32 -1.442695, %v11390_v58  ;;  %v1267_v16 = vmul.f32 %v11311_v0, %v11381_v22  ;;  %v1368_v47 = vmul.f32 %v11322_v26, %v11384_v50  ;;  %v1369_v61 = vmul.f32 %v11322_v26, %v11387_v48 }
 0x10a   : > { %8805 = vmatmul.mubr.msk.bf16.gmra.mxu0 %vm1830_vm1, %v1821_v42  ;;  %v7995_v43 = vmul.f32 -1.442695, %v11402_v54  ;;  %v1193_v52 = vadd.f32 %v1161_v44, %v1091_v32  ;;  %v1194_v23 = vadd.f32 %v1162_v13, %v1092_v57  ;;  %v1470_v18 = vmul.f32 %v11332_v38, %v11399_v33 }
 0x10b   : > { %9067 = vpow2.f32 %v7994_v28  ;;  %v1471_v30 = vmul.f32 %v11332_v38, %v11405_v21  ;;  %v650_v24 = vmul.f32 %v11341_v36, %v11075_v31  ;;  %v651_v62 = vmul.f32 %v11341_v36, %v11086_v59  ;;  %v11437_v28 = vld [vmem:[%s9988_s7 + $0x128] sm:$0xff] }
 0x10c   : > { %v9060_v10 = vpop.eup %9059  ;;  %9069 = vpow2.f32 %v7995_v43  ;;  %v1298_v63 = vadd.f32 %v1266_v7, %v1193_v52  ;;  %v1299_v29 = vadd.f32 %v1267_v16, %v1194_v23  ;;  %v752_v11 = vmul.f32 %v11350_v39, %v11089_v2 }
 0x10d   : > { %v9062_v6 = vpop.eup %9061  ;;  %v1702_v55 = vadd.f32 1.0, %v9060_v10  ;;  %v753_v1 = vmul.f32 %v11350_v39, %v14870_v35  ;;  %v854_v40 = vmul.f32 %v11359_v56, %v11104_v53  ;;  %v855_v31 = vmul.f32 %v11359_v56, %v14871_v4  ;;  %v11456_v10 = vld [vmem:[%s9988_s7 + $0x129] sm:$0xff] }
 0x10e   : > { %v1703_v59 = vadd.f32 1.0, %v9062_v6  ;;  %v1400_v44 = vadd.f32 %v1368_v47, %v1298_v63  ;;  %v1401_v13 = vadd.f32 %v1369_v61, %v1299_v29  ;;  %v784_v7 = vadd.f32 %v752_v11, %v650_v24  ;;  %v11459_v63 = vld [vmem:[%s9988_s7 + $0x131] sm:$0xff] }
 0x10f   : > { %9071 = vrcp.f32 %v1702_v55  ;;  %v785_v42 = vadd.f32 %v753_v1, %v651_v62  ;;  %v959_v2 = vmul.f32 %v11256_v49, %v11273_v41  ;;  %v960_v32 = vmul.f32 %v11256_v49, %v11276_v5  ;;  %v11453_v62 = vld [vmem:[%s9988_s7 + $0x130] sm:$0xff] }
 0x110   : > { %9073 = vrcp.f32 %v1703_v59  ;;  %v1502_v53 = vadd.f32 %v1470_v18, %v1400_v44  ;;  %v1503_v57 = vadd.f32 %v1471_v30, %v1401_v13  ;;  %v886_v4 = vadd.f32 %v854_v40, %v784_v7  ;;  %v11448_v18 = vld [vmem:[%s14539_s2] ss:$0 sm:$0xff]  ;;  %v11468_v55 = vld [vmem:[%s9988_s7 + $0x12a] sm:$0xff]  ;;  %v11482_v13 = vld [vmem:[%s9988_s7 + $0x132] sm:$0xff] }
 0x111   : > { %v9064_v35 = vpop.eup %9063  ;;  %v887_v61 = vadd.f32 %v855_v31, %v785_v42  ;;  %v1061_v43 = vmul.f32 %v11268_v12, %v11289_v45  ;;  %v1062_v52 = vmul.f32 %v11268_v12, %v11292_v17  ;;  %v1164_v11 = vmul.f32 %v11284_v60, %v11303_v51  ;;  %v11473_v40 = vld [vmem:[%s14540_s3] ss:$0 sm:$0xff] }
 0x112   : > { %v9066_v16 = vpop.eup %9065  ;;  %v3088_v47 = vmul.f32 %v9064_v35, %v11218_v8  ;;  %v1540_v30 = vmul.f32 %v11448_v18, %v1502_v53  ;;  %v1541_v8 = vmul.f32 %v11448_v18, %v1503_v57  ;;  %v991_v24 = vadd.f32 %v959_v2, %v886_v4 }
 0x113   : > { %v3089_v23 = vmul.f32 %v9066_v16, %v11226_v27  ;;  %v992_v29 = vadd.f32 %v960_v32, %v887_v61  ;;  %v1163_v27 = vmul.f32 %v11284_v60, %v11300_v46  ;;  %v1268_v6 = vmul.f32 %v11311_v0, %v11437_v28 }
 0x114   : > { %v11476_v31 = vadd.f32 %v11473_v40, %v1540_v30  ;;  %v11479_v59 = vadd.f32 %v11473_v40, %v1541_v8  ;;  %v1093_v44 = vadd.f32 %v1061_v43, %v991_v24  ;;  %v1269_v42 = vmul.f32 %v11311_v0, %v11453_v62 }
 0x115   : > { %v3097_v1 = vpack.c.bf16 %v3089_v23, %v3088_v47  ;;  %v1094_v7 = vadd.f32 %v1062_v52, %v992_v29  ;;  %v1370_v2 = vmul.f32 %v11322_v26, %v11456_v10  ;;  %v1371_v32 = vmul.f32 %v11322_v26, %v11459_v63 }
 0x116   : > { %v7996_v35 = vmul.f32 -1.442695, %v11476_v31  ;;  %v7997_v53 = vmul.f32 -1.442695, %v11479_v59  ;;  %v1195_v57 = vadd.f32 %v1163_v27, %v1093_v44  ;;  %v1472_v4 = vmul.f32 %v11332_v38, %v11468_v55 }
 0x117   : > { %8839 = vmatmul.mubr.msk.bf16.gmra.mxu1 %vm1830_vm1, %v3097_v1  ;;  %v1196_v16 = vadd.f32 %v1164_v11, %v1094_v7  ;;  %v1473_v47 = vmul.f32 %v11332_v38, %v11482_v13  ;;  %v652_v61 = vmul.f32 %v11341_v36, %v11194_v3  ;;  %v653_v43 = vmul.f32 %v11341_v36, %v11201_v9 }
 0x118   : > { %v9068_v52 = vpop.eup %9067  ;;  %9075 = vpow2.f32 %v7996_v35  ;;  %v1300_v23 = vadd.f32 %v1268_v6, %v1195_v57  ;;  %v754_v30 = vmul.f32 %v11350_v39, %v11204_v15  ;;  %v755_v8 = vmul.f32 %v11350_v39, %v11212_v37 }
 0x119   : > { %v9070_v24 = vpop.eup %9069  ;;  %v1704_v29 = vadd.f32 1.0, %v9068_v52  ;;  %9077 = vpow2.f32 %v7997_v53  ;;  %v1301_v27 = vadd.f32 %v1269_v42, %v1196_v16  ;;  %v856_v11 = vmul.f32 %v11359_v56, %v11215_v34  ;;  %v11517_v16 = vld [vmem:[%s9988_s7 + $0x140] sm:$0xff] }
 0x11a   : > { %v1705_v3 = vadd.f32 1.0, %v9070_v24  ;;  %v1402_v1 = vadd.f32 %v1370_v2, %v1300_v23  ;;  %v786_v44 = vadd.f32 %v754_v30, %v652_v61  ;;  %v787_v9 = vadd.f32 %v755_v8, %v653_v43  ;;  %v11524_v23 = vld [vmem:[%s9988_s7 + $0x148] sm:$0xff] }
 0x11b   : > { %9079 = vrcp.f32 %v1704_v29  ;;  %v1403_v6 = vadd.f32 %v1371_v32, %v1301_v27  ;;  %v857_v15 = vmul.f32 %v11359_v56, %v11223_v19  ;;  %v961_v37 = vmul.f32 %v11256_v49, %v11370_v25  ;;  %v11535_v24 = vld [vmem:[%s9988_s7 + $0x149] sm:$0xff] }
 0x11c   : > { %v9072_v7 = vpop.eup %9071  ;;  %9081 = vrcp.f32 %v1705_v3  ;;  %v1504_v42 = vadd.f32 %v1472_v4, %v1402_v1  ;;  %v888_v35 = vadd.f32 %v856_v11, %v786_v44  ;;  %v962_v34 = vmul.f32 %v11256_v49, %v11381_v22  ;;  %v11538_v29 = vld [vmem:[%s9988_s7 + $0x142] sm:$0xff]  ;;  %v11546_v44 = vld [vmem:[%s9988_s7 + $0x14a] sm:$0xff] }
 0x11d   : > { %v9074_v2 = vpop.eup %9073  ;;  %v1798_v53 = vmul.f32 %v9072_v7, %v11295_v20  ;;  %v1505_v32 = vadd.f32 %v1473_v47, %v1403_v6  ;;  %v889_v57 = vadd.f32 %v857_v15, %v787_v9  ;;  %v1063_v19 = vmul.f32 %v11268_v12, %v11384_v50  ;;  %v11527_v20 = vld [vmem:[%s9988_s7 + $0x141] sm:$0xff] }
 0x11e   : > { %v1799_v61 = vmul.f32 %v9074_v2, %v11306_v14  ;;  %v1542_v4 = vmul.f32 %v11448_v18, %v1504_v42  ;;  %v993_v43 = vadd.f32 %v961_v37, %v888_v35  ;;  %v1064_v52 = vmul.f32 %v11268_v12, %v11387_v48 }
 0x11f   : > { %v1543_v47 = vmul.f32 %v11448_v18, %v1505_v32  ;;  %v994_v30 = vadd.f32 %v962_v34, %v889_v57  ;;  %v1165_v8 = vmul.f32 %v11284_v60, %v11399_v33  ;;  %v1166_v14 = vmul.f32 %v11284_v60, %v11405_v21 }
 0x120   : > { %v1822_v27 = vpack.c.bf16 %v1799_v61, %v1798_v53  ;;  %v11541_v11 = vadd.f32 %v11473_v40, %v1542_v4  ;;  %v1095_v3 = vadd.f32 %v1063_v19, %v993_v43  ;;  %v1270_v1 = vmul.f32 %v11311_v0, %v11517_v16 }
 0x121   : > { %v11549_v9 = vadd.f32 %v11473_v40, %v1543_v47  ;;  %v1096_v6 = vadd.f32 %v1064_v52, %v994_v30  ;;  %v1271_v15 = vmul.f32 %v11311_v0, %v11524_v23  ;;  %v1372_v37 = vmul.f32 %v11322_v26, %v11527_v20 }
 0x122   : > { %8808 = vmatprep.mubr.msk.bf16.mxu0 %vm1830_vm1, %v1822_v27  ;;  %v7998_v7 = vmul.f32 -1.442695, %v11541_v11  ;;  %v1197_v42 = vadd.f32 %v1165_v8, %v1095_v3  ;;  %v1373_v35 = vmul.f32 %v11322_v26, %v11535_v24  ;;  %v1474_v34 = vmul.f32 %v11332_v38, %v11538_v29 }
 0x123   : > { %v7999_v2 = vmul.f32 -1.442695, %v11549_v9  ;;  %v1198_v53 = vadd.f32 %v1166_v14, %v1096_v6  ;;  %v1475_v32 = vmul.f32 %v11332_v38, %v11546_v44  ;;  %v654_v57 = vmul.f32 %v11341_v36, %v11273_v41 }
 0x124   : > { %9083 = vpow2.f32 %v7998_v7  ;;  %v1302_v19 = vadd.f32 %v1270_v1, %v1197_v42  ;;  %v655_v61 = vmul.f32 %v11341_v36, %v11276_v5  ;;  %v756_v4 = vmul.f32 %v11350_v39, %v11289_v45 }
 0x125   : > { %v9076_v43 = vpop.eup %9075  ;;  %9085 = vpow2.f32 %v7999_v2  ;;  %v1303_v52 = vadd.f32 %v1271_v15, %v1198_v53  ;;  %v757_v47 = vmul.f32 %v11350_v39, %v11292_v17  ;;  %v858_v30 = vmul.f32 %v11359_v56, %v11300_v46 }
 0x126   : > { %v9078_v8 = vpop.eup %9077  ;;  %v1706_v14 = vadd.f32 1.0, %v9076_v43  ;;  %v1404_v41 = vadd.f32 %v1372_v37, %v1302_v19  ;;  %v788_v27 = vadd.f32 %v756_v4, %v654_v57  ;;  %v859_v3 = vmul.f32 %v11359_v56, %v11303_v51  ;;  %v11586_v19 = vld [vmem:[%s9988_s7 + $0x150] sm:$0xff] }
 0x127   : > { %v1707_v5 = vadd.f32 1.0, %v9078_v8  ;;  %v1405_v1 = vadd.f32 %v1373_v35, %v1303_v52  ;;  %v789_v6 = vadd.f32 %v757_v47, %v655_v61  ;;  %v963_v45 = vmul.f32 %v11256_v49, %v11437_v28  ;;  %v11589_v61 = vld [vmem:[%s9988_s7 + $0x158] sm:$0xff] }
 0x128   : > { %v9080_v15 = vpop.eup %9079  ;;  %9087 = vrcp.f32 %v1706_v14  ;;  %v1506_v17 = vadd.f32 %v1474_v34, %v1404_v41  ;;  %v890_v7 = vadd.f32 %v858_v30, %v788_v27  ;;  %v964_v46 = vmul.f32 %v11256_v49, %v11453_v62  ;;  %v11597_v43 = vld [vmem:[%s9988_s7 + $0x151] sm:$0xff]  ;;  %v11600_v52 = vld [vmem:[%s9988_s7 + $0x159] sm:$0xff] }
 0x129   : > { %v9082_v37 = vpop.eup %9081  ;;  %v1800_v51 = vmul.f32 %v9080_v15, %v11390_v58  ;;  %9089 = vrcp.f32 %v1707_v5  ;;  %v1507_v42 = vadd.f32 %v1475_v32, %v1405_v1  ;;  %v891_v35 = vadd.f32 %v859_v3, %v789_v6  ;;  %v11608_v41 = vld [vmem:[%s9988_s7 + $0x152] sm:$0xff]  ;;  %v11611_v27 = vld [vmem:[%s9988_s7 + $0x15a] sm:$0xff] }
 0x12a   : > { %v1801_v2 = vmul.f32 %v9082_v37, %v11402_v54  ;;  %v1544_v53 = vmul.f32 %v11448_v18, %v1506_v17  ;;  %v995_v57 = vadd.f32 %v963_v45, %v890_v7  ;;  %v1065_v34 = vmul.f32 %v11268_v12, %v11456_v10 }
 0x12b   : > { %v1545_v4 = vmul.f32 %v11448_v18, %v1507_v42  ;;  %v996_v58 = vadd.f32 %v964_v46, %v891_v35  ;;  %v1066_v32 = vmul.f32 %v11268_v12, %v11459_v63  ;;  %v1167_v54 = vmul.f32 %v11284_v60, %v11468_v55 }
 0x12c   : > { %v1823_v47 = vpack.c.bf16 %v1801_v2, %v1800_v51  ;;  %v11603_v30 = vadd.f32 %v11473_v40, %v1544_v53  ;;  %v1097_v8 = vadd.f32 %v1065_v34, %v995_v57  ;;  %v1168_v14 = vmul.f32 %v11284_v60, %v11482_v13 }
 0x12d   : > { %v11614_v3 = vadd.f32 %v11473_v40, %v1545_v4  ;;  %v1098_v5 = vadd.f32 %v1066_v32, %v996_v58  ;;  %v1272_v1 = vmul.f32 %v11311_v0, %v11586_v19  ;;  %v1273_v6 = vmul.f32 %v11311_v0, %v11589_v61 }
 0x12e   : > { %8809 = vmatmul.mubr.msk.bf16.gmra.mxu0 %vm1830_vm1, %v1823_v47  ;;  %v8000_v45 = vmul.f32 -1.442695, %v11603_v30  ;;  %v1199_v15 = vadd.f32 %v1167_v54, %v1097_v8  ;;  %v1374_v17 = vmul.f32 %v11322_v26, %v11597_v43  ;;  %v1375_v7 = vmul.f32 %v11322_v26, %v11600_v52 }
 0x12f   : > { %v8001_v46 = vmul.f32 -1.442695, %v11614_v3  ;;  %v1200_v37 = vadd.f32 %v1168_v14, %v1098_v5  ;;  %v1476_v51 = vmul.f32 %v11332_v38, %v11608_v41  ;;  %v1477_v42 = vmul.f32 %v11332_v38, %v11611_v27 }
 0x130   : > { %9091 = vpow2.f32 %v8000_v45  ;;  %v1304_v35 = vadd.f32 %v1272_v1, %v1199_v15  ;;  %v656_v2 = vmul.f32 %v11341_v36, %v11370_v25  ;;  %v657_v53 = vmul.f32 %v11341_v36, %v11381_v22 }
 0x131   : > { %v9084_v57 = vpop.eup %9083  ;;  %9093 = vpow2.f32 %v8001_v46  ;;  %v1305_v34 = vadd.f32 %v1273_v6, %v1200_v37  ;;  %v758_v4 = vmul.f32 %v11350_v39, %v11384_v50  ;;  %v759_v58 = vmul.f32 %v11350_v39, %v11387_v48 }
 0x132   : > { %v9086_v32 = vpop.eup %9085  ;;  %v1708_v54 = vadd.f32 1.0, %v9084_v57  ;;  %v1406_v47 = vadd.f32 %v1374_v17, %v1304_v35  ;;  %v860_v8 = vmul.f32 %v11359_v56, %v11399_v33  ;;  %v861_v25 = vmul.f32 %v11359_v56, %v11405_v21  ;;  %v7903_v17 = vld [vmem:[%s9988_s7 + $0x168] sm:$0xff] }
 0x133   : > { %v1709_v22 = vadd.f32 1.0, %v9086_v32  ;;  %v1407_v14 = vadd.f32 %v1375_v7, %v1305_v34  ;;  %v790_v5 = vadd.f32 %v758_v4, %v656_v2  ;;  %v791_v1 = vadd.f32 %v759_v58, %v657_v53  ;;  %v7904_v53 = vld [vmem:[%s9988_s7 + $0x170] sm:$0xff] }
 0x134   : > { %9095 = vrcp.f32 %v1708_v54  ;;  %v1508_v6 = vadd.f32 %v1476_v51, %v1406_v47  ;;  %v965_v50 = vmul.f32 %v11256_v49, %v11517_v16  ;;  %v966_v48 = vmul.f32 %v11256_v49, %v11524_v23  ;;  %v7936_v57 = vld [vmem:[%s9988_s7 + $0x169] sm:$0xff]  ;;  %v7937_v34 = vld [vmem:[%s9988_s7 + $0x171] sm:$0xff] }
 0x135   : > { %v9088_v45 = vpop.eup %9087  ;;  %9097 = vrcp.f32 %v1709_v22  ;;  %v1509_v33 = vadd.f32 %v1477_v42, %v1407_v14  ;;  %v892_v15 = vadd.f32 %v860_v8, %v790_v5  ;;  %v893_v21 = vadd.f32 %v861_v25, %v791_v1  ;;  %v7970_v8 = vld [vmem:[%s9988_s7 + $0x172] sm:$0xff] }
 0x136   : > { %v9090_v7 = vpop.eup %9089  ;;  %v1802_v46 = vmul.f32 %v9088_v45, %v11476_v31  ;;  %v1546_v37 = vmul.f32 %v11448_v18, %v1508_v6  ;;  %v1067_v16 = vmul.f32 %v11268_v12, %v11527_v20  ;;  %v1068_v23 = vmul.f32 %v11268_v12, %v11535_v24 }
 0x137   : > { %v1803_v51 = vmul.f32 %v9090_v7, %v11479_v59  ;;  %v1547_v42 = vmul.f32 %v11448_v18, %v1509_v33  ;;  %v997_v35 = vadd.f32 %v965_v50, %v892_v15  ;;  %v998_v2 = vadd.f32 %v966_v48, %v893_v21  ;;  %v7969_v59 = vld [vmem:[%s9988_s7 + $0x16a] sm:$0xff] }
 0x138   : > { %v11660_v31 = vadd.f32 %v11473_v40, %v1546_v37  ;;  %v1169_v4 = vmul.f32 %v11284_v60, %v11538_v29  ;;  %v1170_v20 = vmul.f32 %v11284_v60, %v11546_v44  ;;  %v1274_v24 = vmul.f32 %v11311_v0, %v7903_v17 }
 0x139   : > { %v1824_v58 = vpack.c.bf16 %v1803_v51, %v1802_v46  ;;  %v11669_v32 = vadd.f32 %v11473_v40, %v1547_v42  ;;  %v1099_v54 = vadd.f32 %v1067_v16, %v997_v35  ;;  %v1100_v47 = vadd.f32 %v1068_v23, %v998_v2 }
 0x13a   : > { %v8002_v25 = vmul.f32 -1.442695, %v11660_v31  ;;  %v1275_v22 = vmul.f32 %v11311_v0, %v7904_v53  ;;  %v1376_v14 = vmul.f32 %v11322_v26, %v7936_v57  ;;  %v1377_v29 = vmul.f32 %v11322_v26, %v7937_v34  ;;  %v7905_v53 = vld [vmem:[%s9988_s7 + $0x178] sm:$0xff] }
 0x13b   : > { %8812 = vmatprep.mubr.msk.bf16.mxu0 %vm1830_vm1, %v1824_v58  ;;  %v8003_v44 = vmul.f32 -1.442695, %v11669_v32  ;;  %v1201_v5 = vadd.f32 %v1169_v4, %v1099_v54  ;;  %v1202_v1 = vadd.f32 %v1170_v20, %v1100_v47  ;;  %v1478_v6 = vmul.f32 %v11332_v38, %v7969_v59  ;;  %v8794_v4 = vpop.f32.mrf.mxu0  ;;  %v7906_v59 = vld [vmem:[%s9988_s7 + $0x180] sm:$0xff] }
 0x13c   : > { %9099 = vpow2.f32 %v8002_v25  ;;  %v1479_v50 = vmul.f32 %v11332_v38, %v7970_v8  ;;  %v658_v48 = vmul.f32 %v11341_v36, %v11437_v28  ;;  %v659_v45 = vmul.f32 %v11341_v36, %v11453_v62 }
 0x13d   : > { %v9092_v33 = vpop.eup %9091  ;;  %9101 = vpow2.f32 %v8003_v44  ;;  %v1306_v15 = vadd.f32 %v1274_v24, %v1201_v5  ;;  %v1307_v21 = vadd.f32 %v1275_v22, %v1202_v1  ;;  %v760_v17 = vmul.f32 %v11350_v39, %v11456_v10  ;;  %v7939_v22 = vld [vmem:[%s9988_s7 + $0x181] sm:$0xff]  ;;  %v1917_v44 = vpop.f32.mrf.mxu0 }
 0x13e   : > { %v9094_v7 = vpop.eup %9093  ;;  %v1710_v46 = vadd.f32 1.0, %v9092_v33  ;;  %v761_v37 = vmul.f32 %v11350_v39, %v11459_v63  ;;  %v862_v16 = vmul.f32 %v11359_v56, %v11468_v55  ;;  %v863_v28 = vmul.f32 %v11359_v56, %v11482_v13 }
 0x13f   : > { %v1711_v36 = vadd.f32 1.0, %v9094_v7  ;;  %v1408_v62 = vadd.f32 %v1376_v14, %v1306_v15  ;;  %v1409_v23 = vadd.f32 %v1377_v29, %v1307_v21  ;;  %v792_v51 = vadd.f32 %v760_v17, %v658_v48  ;;  %v7972_v29 = vld [vmem:[%s9988_s7 + $0x182] sm:$0xff]  ;;  %v11734_v48 = vld [vmem:[%s14543_s6] ss:$0 sm:$0xff] }
 0x140   : > { %9103 = vrcp.f32 %v1710_v46  ;;  %v793_v42 = vadd.f32 %v761_v37, %v659_v45  ;;  %v967_v10 = vmul.f32 %v11256_v49, %v11586_v19  ;;  %v968_v35 = vmul.f32 %v11256_v49, %v11589_v61 }
 0x141   : > { %v9096_v39 = vpop.eup %9095  ;;  %9105 = vrcp.f32 %v1711_v36  ;;  %v1510_v63 = vadd.f32 %v1478_v6, %v1408_v62  ;;  %v1511_v55 = vadd.f32 %v1479_v50, %v1409_v23  ;;  %v894_v2 = vadd.f32 %v862_v16, %v792_v51  ;;  %v8795_v62 = vpop.f32.mrf.mxu0 }
 0x142   : > { %v9098_v56 = vpop.eup %9097  ;;  %v1804_v13 = vmul.f32 %v9096_v39, %v11541_v11  ;;  %v895_v57 = vadd.f32 %v863_v28, %v793_v42  ;;  %v1069_v34 = vmul.f32 %v11268_v12, %v11597_v43  ;;  %v1070_v19 = vmul.f32 %v11268_v12, %v11600_v52  ;;  %v7938_v52 = vld [vmem:[%s9988_s7 + $0x179] sm:$0xff]  ;;  %v8828_v54 = vpop.f32.mrf.mxu1 }
 0x143   : > { %v1805_v49 = vmul.f32 %v9098_v56, %v11549_v9  ;;  %v1548_v61 = vmul.f32 %v11448_v18, %v1510_v63  ;;  %v1549_v20 = vmul.f32 %v11448_v18, %v1511_v55  ;;  %v999_v24 = vadd.f32 %v967_v10, %v894_v2 }
 0x144   : > { %v1000_v11 = vadd.f32 %v968_v35, %v895_v57  ;;  %v1171_v58 = vmul.f32 %v11284_v60, %v11608_v41  ;;  %v1172_v43 = vmul.f32 %v11284_v60, %v11611_v27  ;;  %v1276_v12 = vmul.f32 %v11311_v0, %v7905_v53  ;;  %v11722_v41 = vld [vmem:[%s14542_s5] ss:$0 sm:$0xff]  ;;  %v3156_v15 = vpop.f32.mrf.mxu1 }
 0x145   : > { %v1825_v9 = vpack.c.bf16 %v1805_v49, %v1804_v13  ;;  %v11713_v47 = vadd.f32 %v11473_v40, %v1548_v61  ;;  %v11716_v8 = vadd.f32 %v11473_v40, %v1549_v20  ;;  %v1101_v25 = vadd.f32 %v1069_v34, %v999_v24  ;;  %v7971_v27 = vld [vmem:[%s9988_s7 + $0x17a] sm:$0xff]  ;;  %v1920_v34 = vpop.f32.mrf.mxu0 }
 0x146   : > { %v1102_v14 = vadd.f32 %v1070_v19, %v1000_v11  ;;  %v1277_v60 = vmul.f32 %v11311_v0, %v7906_v59  ;;  %v1378_v50 = vmul.f32 %v11322_v26, %v7938_v52  ;;  %v1379_v0 = vmul.f32 %v11322_v26, %v7939_v22  ;;  %v8829_v39 = vpop.f32.mrf.mxu1 }
 0x147   : > { %8813 = vmatmul.mubr.msk.bf16.gmra.mxu0 %vm1830_vm1, %v1825_v9  ;;  %v8004_v5 = vmul.f32 -1.442695, %v11713_v47  ;;  %v8005_v1 = vmul.f32 -1.442695, %v11716_v8  ;;  %v1203_v6 = vadd.f32 %v1171_v58, %v1101_v25  ;;  %v2052_v33 = vmul.f32 %v8794_v4, %v11722_v41 }
 0x148   : > { %v1204_v45 = vadd.f32 %v1172_v43, %v1102_v14  ;;  %v1480_v7 = vmul.f32 %v11332_v38, %v7971_v27  ;;  %v1481_v46 = vmul.f32 %v11332_v38, %v7972_v29  ;;  %v3221_v51 = vmul.f32 %v8828_v54, %v11722_v41  ;;  %v3159_v11 = vpop.f32.mrf.mxu1 }
 0x149   : > { %v9100_v21 = vpop.eup %9099  ;;  %9107 = vpow2.f32 %v8004_v5  ;;  %v1308_v17 = vadd.f32 %v1276_v12, %v1203_v6  ;;  %v11741_v36 = vadd.f32 %v11734_v48, %v2052_v33  ;;  %v2050_v42 = vmul.f32 %v11722_v41, %v1917_v44 }
 0x14a   : > { %v9102_v37 = vpop.eup %9101  ;;  %v1712_v16 = vadd.f32 1.0, %v9100_v21  ;;  %9109 = vpow2.f32 %v8005_v1  ;;  %v1309_v28 = vadd.f32 %v1277_v60, %v1204_v45  ;;  %v11747_v55 = vadd.f32 %v11734_v48, %v3221_v51 }
 0x14b   : > { %v1713_v23 = vadd.f32 1.0, %v9102_v37  ;;  %v1410_v26 = vadd.f32 %v1378_v50, %v1308_v17  ;;  %v8028_v35 = vmul.f32 -1.442695, %v11741_v36  ;;  %v11750_v2 = vadd.f32 %v11734_v48, %v2050_v42 }
 0x14c   : > { %9111 = vrcp.f32 %v1712_v16  ;;  %v1411_v10 = vadd.f32 %v1379_v0, %v1309_v28  ;;  %v3219_v57 = vmul.f32 %v11722_v41, %v3156_v15  ;;  %v8266_v49 = vmul.f32 -1.442695, %v11747_v55 }
 0x14d   : > { %v9104_v38 = vpop.eup %9103  ;;  %9113 = vrcp.f32 %v1713_v23  ;;  %v1512_v63 = vadd.f32 %v1480_v7, %v1410_v26  ;;  %v8026_v61 = vmul.f32 -1.442695, %v11750_v2  ;;  %v3222_v59 = vmul.f32 %v8829_v39, %v11722_v41 }
 0x14e   : > { %v9106_v53 = vpop.eup %9105  ;;  %v1806_v56 = vmul.f32 %v9104_v38, %v11603_v30  ;;  %v1513_v13 = vadd.f32 %v1481_v46, %v1411_v10  ;;  %9115 = vpow2.f32 %v8028_v35  ;;  %v11760_v24 = vadd.f32 %v11734_v48, %v3219_v57 }
 0x14f   : > { %v1807_v19 = vmul.f32 %v9106_v53, %v11614_v3  ;;  %v1550_v4 = vmul.f32 %v11448_v18, %v1512_v63  ;;  %v2053_v30 = vmul.f32 %v8795_v62, %v11722_v41  ;;  %9117 = vpow2.f32 %v8266_v49 }
 0x150   : > { %v1551_v20 = vmul.f32 %v11448_v18, %v1513_v13  ;;  %v2051_v3 = vmul.f32 %v11722_v41, %v1920_v34  ;;  %9119 = vpow2.f32 %v8026_v61  ;;  %v8264_v18 = vmul.f32 -1.442695, %v11760_v24 }
 0x151   : > { %v1826_v58 = vpack.c.bf16 %v1807_v19, %v1806_v56  ;;  %v11765_v43 = vadd.f32 %v11473_v40, %v1550_v4  ;;  %v11773_v52 = vadd.f32 %v11734_v48, %v2053_v30  ;;  %v11778_v9 = vadd.f32 %v11734_v48, %v3222_v59 }
 0x152   : > { %v11769_v12 = vadd.f32 %v11473_v40, %v1551_v20  ;;  %v11781_v25 = vadd.f32 %v11734_v48, %v2051_v3  ;;  %v3220_v22 = vmul.f32 %v11722_v41, %v3159_v11  ;;  %9121 = vpow2.f32 %v8264_v18 }
 0x153   : > { %8816 = vmatprep.mubr.msk.bf16.mxu0 %vm1830_vm1, %v1826_v58  ;;  %v8006_v54 = vmul.f32 -1.442695, %v11765_v43  ;;  %v8029_v14 = vmul.f32 -1.442695, %v11773_v52  ;;  %v8267_v60 = vmul.f32 -1.442695, %v11778_v9 }
 0x154   : > { %v8007_v40 = vmul.f32 -1.442695, %v11769_v12  ;;  %v11788_v27 = vadd.f32 %v11734_v48, %v3220_v22  ;;  %v8027_v1 = vmul.f32 -1.442695, %v11781_v25 }
 0x155   : > { %9123 = vpow2.f32 %v8006_v54 }
 0x156   : > { %v9108_v29 = vpop.eup %9107  ;;  %9125 = vpow2.f32 %v8007_v40  ;;  %v8265_v50 = vmul.f32 -1.442695, %v11788_v27 }
 0x157   : > { %v9110_v44 = vpop.eup %9109  ;;  %v1714_v5 = vadd.f32 1.0, %v9108_v29  ;;  %9127 = vpow2.f32 %v8029_v14 }
 0x158   : > { %v1715_v6 = vadd.f32 1.0, %v9110_v44  ;;  %9129 = vpow2.f32 %v8267_v60 }
 0x159   : > { %v9112_v45 = vpop.eup %9111  ;;  %9131 = vrcp.f32 %v1714_v5 }
 0x15a   : > { %v9114_v0 = vpop.eup %9113  ;;  %v1808_v33 = vmul.f32 %v9112_v45, %v11660_v31  ;;  %9133 = vrcp.f32 %v1715_v6  ;;  %v9687_v6 = vmov 0  }
 0x15b   : > { %v9116_v15 = vpop.eup %9115  ;;  %v1809_v21 = vmul.f32 %v9114_v0, %v11669_v32  ;;  %9135 = vpow2.f32 %v8027_v1 }
 0x15c   : > { %v2218_v17 = vadd.f32 1.0, %v9116_v15  ;;  %9137 = vpow2.f32 %v8265_v50  ;;  %v9118_v46 = vpop.eup %9117 }
 0x15d   : > { %v1827_v7 = vpack.c.bf16 %v1809_v21, %v1808_v33  ;;  %v9120_v37 = vpop.eup %9119  ;;  %v3301_v16 = vadd.f32 1.0, %v9118_v46 }
 0x15e   : > { %9139 = vrcp.f32 %v2218_v17  ;;  %v2216_v28 = vadd.f32 1.0, %v9120_v37 }
 0x15f   : > { %8817 = vmatmul.mubr.msk.bf16.gmra.mxu0 %vm1830_vm1, %v1827_v7  ;;  %v9122_v62 = vpop.eup %9121  ;;  %9141 = vrcp.f32 %v3301_v16 }
 0x160   : > { %9143 = vrcp.f32 %v2216_v28  ;;  %v3299_v31 = vadd.f32 1.0, %v9122_v62 }
 0x162   : > { %v9124_v23 = vpop.eup %9123  ;;  %9145 = vrcp.f32 %v3299_v31 }
 0x163   : > { %v9126_v26 = vpop.eup %9125  ;;  %v1716_v51 = vadd.f32 1.0, %v9124_v23 }
 0x164   : > { %v9128_v42 = vpop.eup %9127  ;;  %v1717_v32 = vadd.f32 1.0, %v9126_v26 }
 0x165   : > { %v9130_v10 = vpop.eup %9129  ;;  %9147 = vrcp.f32 %v1716_v51  ;;  %v2219_v35 = vadd.f32 1.0, %v9128_v42 }
 0x166   : > { %v9132_v39 = vpop.eup %9131  ;;  %9149 = vrcp.f32 %v1717_v32  ;;  %v3302_v38 = vadd.f32 1.0, %v9130_v10 }
 0x167   : > { %v9134_v63 = vpop.eup %9133  ;;  %v1810_v53 = vmul.f32 %v9132_v39, %v11713_v47  ;;  %9151 = vrcp.f32 %v2219_v35 }
 0x168   : > { %v9136_v56 = vpop.eup %9135  ;;  %v1811_v13 = vmul.f32 %v9134_v63, %v11716_v8  ;;  %9153 = vrcp.f32 %v3302_v38  ;;  %v8798_v57 = vpop.f32.mrf.mxu0 }
 0x169   : > { %v9138_v34 = vpop.eup %9137  ;;  %v2217_v19 = vadd.f32 1.0, %v9136_v56  ;;  %v2056_v4 = vmul.f32 %v8798_v57, %v11722_v41 }
 0x16a   : > { %v1828_v49 = vpack.c.bf16 %v1811_v13, %v1810_v53  ;;  %v3300_v61 = vadd.f32 1.0, %v9138_v34  ;;  %v1933_v20 = vpop.f32.mrf.mxu0 }
 0x16b   : > { %v9140_v30 = vpop.eup %9139  ;;  %9155 = vrcp.f32 %v2217_v19  ;;  %v11799_v59 = vadd.f32 %v11734_v48, %v2056_v4  ;;  %v2054_v47 = vmul.f32 %v11722_v41, %v1933_v20 }
 0x16c   : > { %8820 = vmatprep.mubr.msk.bf16.mxu0 %vm1830_vm1, %v1828_v49  ;;  %v2314_v8 = vmul.f32 %v9140_v30, %v11741_v36  ;;  %9157 = vrcp.f32 %v3300_v61  ;;  %v8799_v11 = vpop.f32.mrf.mxu0  ;;  %v9142_v54 = vpop.eup %9141 }
 0x16d   : > { %v8032_v58 = vmul.f32 -1.442695, %v11799_v59  ;;  %v11806_v3 = vadd.f32 %v11734_v48, %v2054_v47  ;;  %v2057_v18 = vmul.f32 %v8799_v11, %v11722_v41  ;;  %v9144_v14 = vpop.eup %9143  ;;  %v3349_v60 = vmul.f32 %v9142_v54, %v11747_v55 }
 0x16e   : > { %v8469_v22 = vpack.c.bf16 %v2314_v8, %v2314_v8  ;;  %v1936_v40 = vpop.f32.mrf.mxu0  ;;  %v2312_v44 = vmul.f32 %v9144_v14, %v11750_v2 }
 0x16f   : > { %9159 = vpow2.f32 %v8032_v58  ;;  %v8030_v36 = vmul.f32 -1.442695, %v11806_v3  ;;  %v11812_v29 = vadd.f32 %v11734_v48, %v2057_v18  ;;  %v2055_v5 = vmul.f32 %v11722_v41, %v1936_v40  ;;  %v9146_v1 = vpop.eup %9145 }
 0x170   : > { %2475 = vst.msk [vmem:[#allocation2 + $0x8] sm:$0xf] %vm2472_vm2, %v8469_v22  ;;  %v8501_v50 = vpack.c.bf16 %v3349_v60, %v3349_v60  ;;  %v8467_v0 = vpack.c.bf16 %v2312_v44, %v2312_v44  ;;  %v3347_v33 = vmul.f32 %v9146_v1, %v11760_v24 }
 0x171   : > { %3458 = vst.msk [vmem:[#allocation2 + $0x8] sm:$0xe] %vm3457_vm3, %v9687_v6  ;;  %9161 = vpow2.f32 %v8030_v36  ;;  %v8033_v55 = vmul.f32 -1.442695, %v11812_v29  ;;  %v11822_v15 = vadd.f32 %v11734_v48, %v2055_v5 }
 0x172   : > { %v9148_v45 = vpop.eup %9147  ;;  %3430 = vst.msk [vmem:[#allocation2 + $0x88] sm:$0xf] %vm2472_vm2, %v8501_v50  ;;  %2473 = vst.msk [vmem:[#allocation2] sm:$0xf] %vm2472_vm2, %v8467_v0  ;;  %v8499_v46 = vpack.c.bf16 %v3347_v33, %v3347_v33 }
 0x173   : > { %v9150_v2 = vpop.eup %9149  ;;  %v1812_v21 = vmul.f32 %v9148_v45, %v11765_v43  ;;  %9163 = vpow2.f32 %v8033_v55  ;;  %3474 = vst.msk [vmem:[#allocation2 + $0x88] sm:$0xe] %vm3457_vm3, %v9687_v6  ;;  %v8031_v24 = vmul.f32 -1.442695, %v11822_v15 }
 0x174   : > { %v9152_v17 = vpop.eup %9151  ;;  %v1813_v7 = vmul.f32 %v9150_v2, %v11769_v12  ;;  %v8832_v37 = vpop.f32.mrf.mxu1  ;;  %3445 = vst.msk [vmem:[#allocation2] sm:$0x1] %vm3444_vm4, %v9687_v6 }
 0x175   : > { %v9154_v16 = vpop.eup %9153  ;;  %v2315_v43 = vmul.f32 %v9152_v17, %v11773_v52  ;;  %v3225_v28 = vmul.f32 %v8832_v37, %v11722_v41  ;;  %3428 = vst.msk [vmem:[#allocation2 + $0x80] sm:$0xf] %vm2472_vm2, %v8499_v46  ;;  %9165 = vpow2.f32 %v8031_v24 }
 0x176   : > { %v1829_v62 = vpack.c.bf16 %v1813_v7, %v1812_v21  ;;  %v3350_v12 = vmul.f32 %v9154_v16, %v11778_v9  ;;  %v3172_v23 = vpop.f32.mrf.mxu1  ;;  %3453 = vst.msk [vmem:[#allocation2 + $0x80] sm:$0x1] %vm3444_vm4, %v9687_v6 }
 0x177   : > { %v8470_v31 = vpack.c.bf16 %v2315_v43, %v2315_v43  ;;  %v11840_v26 = vadd.f32 %v11734_v48, %v3225_v28  ;;  %v3223_v51 = vmul.f32 %v11722_v41, %v3172_v23 }
 0x178   : > { %v9156_v42 = vpop.eup %9155  ;;  %8821 = vmatmul.mubr.msk.bf16.gmra.mxu0 %vm1830_vm1, %v1829_v62  ;;  %v8502_v52 = vpack.c.bf16 %v3350_v12, %v3350_v12  ;;  %v8833_v32 = vpop.f32.mrf.mxu1 }
 0x179   : > { %v9158_v10 = vpop.eup %9157  ;;  %2476 = vst.msk [vmem:[#allocation2 + $0xc] sm:$0xf] %vm2472_vm2, %v8470_v31  ;;  %v2313_v9 = vmul.f32 %v9156_v42, %v11781_v25  ;;  %v8270_v35 = vmul.f32 -1.442695, %v11840_v26  ;;  %v11848_v39 = vadd.f32 %v11734_v48, %v3223_v51  ;;  %v3226_v38 = vmul.f32 %v8833_v32, %v11722_v41 }
 0x17a   : > { %3459 = vst.msk [vmem:[#allocation2 + $0xc] sm:$0xf] %vm2472_vm2, %v9687_v6  ;;  %3431 = vst.msk [vmem:[#allocation2 + $0x8c] sm:$0xf] %vm2472_vm2, %v8502_v52  ;;  %v3348_v63 = vmul.f32 %v9158_v10, %v11788_v27  ;;  %v3175_v53 = vpop.f32.mrf.mxu1 }
 0x17b   : > { %3475 = vst.msk [vmem:[#allocation2 + $0x8c] sm:$0xf] %vm2472_vm2, %v9687_v6  ;;  %v8468_v56 = vpack.c.bf16 %v2313_v9, %v2313_v9  ;;  %9167 = vpow2.f32 %v8270_v35  ;;  %v8268_v25 = vmul.f32 -1.442695, %v11848_v39  ;;  %v11859_v13 = vadd.f32 %v11734_v48, %v3226_v38 }
 0x17c   : > { %v9160_v57 = vpop.eup %9159  ;;  %v8500_v34 = vpack.c.bf16 %v3348_v63, %v3348_v63  ;;  %v3224_v19 = vmul.f32 %v11722_v41, %v3175_v53 }
 0x17d   : > { %2474 = vst.msk [vmem:[#allocation2 + $0x4] sm:$0xf] %vm2472_vm2, %v8468_v56  ;;  %v2222_v4 = vadd.f32 1.0, %v9160_v57  ;;  %9169 = vpow2.f32 %v8268_v25  ;;  %v8271_v27 = vmul.f32 -1.442695, %v11859_v13 }
 0x17e   : > { %v9162_v49 = vpop.eup %9161  ;;  %3429 = vst.msk [vmem:[#allocation2 + $0x84] sm:$0xf] %vm2472_vm2, %v8500_v34  ;;  %v11866_v61 = vadd.f32 %v11734_v48, %v3224_v19 }
 0x17f   : > { %9171 = vrcp.f32 %v2222_v4  ;;  %v2220_v20 = vadd.f32 1.0, %v9162_v49 }
 0x180   : > { %v9164_v30 = vpop.eup %9163  ;;  %9173 = vpow2.f32 %v8271_v27  ;;  %v8269_v47 = vmul.f32 -1.442695, %v11866_v61 }
 0x181   : > { %9175 = vrcp.f32 %v2220_v20  ;;  %v2223_v8 = vadd.f32 1.0, %v9164_v30 }
 0x182   : > { %9177 = vpow2.f32 %v8269_v47  ;;  %v9166_v11 = vpop.eup %9165 }
 0x183   : > { %9179 = vrcp.f32 %v2223_v8  ;;  %v2221_v58 = vadd.f32 1.0, %v9166_v11 }
 0x185   : > { %9181 = vrcp.f32 %v2221_v58 }
 0x188   : > { %v9168_v18 = vpop.eup %9167 }
 0x189   : > { %v3305_v54 = vadd.f32 1.0, %v9168_v18 }
 0x18a   : > { %v9170_v22 = vpop.eup %9169 }
 0x18b   : > { %9183 = vrcp.f32 %v3305_v54  ;;  %v3303_v40 = vadd.f32 1.0, %v9170_v22 }
 0x18c   : > { %v9172_v14 = vpop.eup %9171 }
 0x18d   : > { %v9174_v60 = vpop.eup %9173  ;;  %v2318_v36 = vmul.f32 %v9172_v14, %v11799_v59  ;;  %9185 = vrcp.f32 %v3303_v40 }
 0x18e   : > { %v9176_v44 = vpop.eup %9175  ;;  %v3306_v5 = vadd.f32 1.0, %v9174_v60 }
 0x18f   : > { %v9178_v1 = vpop.eup %9177  ;;  %v8473_v50 = vpack.c.bf16 %v2318_v36, %v2318_v36  ;;  %v2316_v55 = vmul.f32 %v9176_v44, %v11806_v3 }
 0x190   : > { %v9180_v45 = vpop.eup %9179  ;;  %9187 = vrcp.f32 %v3306_v5  ;;  %v3304_v0 = vadd.f32 1.0, %v9178_v1 }
 0x191   : > { %2479 = vst.msk [vmem:[#allocation2 + $0x18] sm:$0xf] %vm2472_vm2, %v8473_v50  ;;  %v8471_v33 = vpack.c.bf16 %v2316_v55, %v2316_v55  ;;  %v2319_v2 = vmul.f32 %v9180_v45, %v11812_v29 }
 0x192   : > { %3460 = vst.msk [vmem:[#allocation2 + $0x18] sm:$0xe] %vm3457_vm3, %v9687_v6  ;;  %9189 = vrcp.f32 %v3304_v0  ;;  %v9182_v59 = vpop.eup %9181 }
 0x193   : > { %2477 = vst.msk [vmem:[#allocation2 + $0x10] sm:$0xf] %vm2472_vm2, %v8471_v33  ;;  %v8474_v21 = vpack.c.bf16 %v2319_v2, %v2319_v2  ;;  %v2317_v3 = vmul.f32 %v9182_v59, %v11822_v15 }
 0x194   : > { %3446 = vst.msk [vmem:[#allocation2 + $0x10] sm:$0x1] %vm3444_vm4, %v9687_v6 }
 0x195   : > { %2480 = vst.msk [vmem:[#allocation2 + $0x1c] sm:$0xf] %vm2472_vm2, %v8474_v21  ;;  %v8472_v17 = vpack.c.bf16 %v2317_v3, %v2317_v3 }
 0x196   : > { %3461 = vst.msk [vmem:[#allocation2 + $0x1c] sm:$0xf] %vm2472_vm2, %v9687_v6 }
 0x197   : > { %2478 = vst.msk [vmem:[#allocation2 + $0x14] sm:$0xf] %vm2472_vm2, %v8472_v17 }
 0x198   : > { %v9184_v29 = vpop.eup %9183 }
 0x199   : > { %v3353_v7 = vmul.f32 %v9184_v29, %v11840_v26  ;;  %v8802_v46 = vpop.f32.mrf.mxu0 }
 0x19a   : > { %v9186_v37 = vpop.eup %9185  ;;  %v2060_v24 = vmul.f32 %v8802_v46, %v11722_v41 }
 0x19b   : > { %v8505_v16 = vpack.c.bf16 %v3353_v7, %v3353_v7  ;;  %v3351_v43 = vmul.f32 %v9186_v37, %v11848_v39  ;;  %v1949_v28 = vpop.f32.mrf.mxu0 }
 0x19c   : > { %v11887_v15 = vadd.f32 %v11734_v48, %v2060_v24  ;;  %v2058_v62 = vmul.f32 %v11722_v41, %v1949_v28 }
 0x19d   : > { %v9188_v12 = vpop.eup %9187  ;;  %3434 = vst.msk [vmem:[#allocation2 + $0x98] sm:$0xf] %vm2472_vm2, %v8505_v16  ;;  %v8503_v23 = vpack.c.bf16 %v3351_v43, %v3351_v43  ;;  %v8803_v31 = vpop.f32.mrf.mxu0 }
 0x19e   : > { %3476 = vst.msk [vmem:[#allocation2 + $0x98] sm:$0xe] %vm3457_vm3, %v9687_v6  ;;  %v3354_v26 = vmul.f32 %v9188_v12, %v11859_v13  ;;  %v8036_v51 = vmul.f32 -1.442695, %v11887_v15  ;;  %v11896_v42 = vadd.f32 %v11734_v48, %v2058_v62  ;;  %v2061_v52 = vmul.f32 %v8803_v31, %v11722_v41 }
 0x19f   : > { %v9190_v32 = vpop.eup %9189  ;;  %3432 = vst.msk [vmem:[#allocation2 + $0x90] sm:$0xf] %vm2472_vm2, %v8503_v23  ;;  %v1952_v10 = vpop.f32.mrf.mxu0 }
 0x1a0   : > { %3454 = vst.msk [vmem:[#allocation2 + $0x90] sm:$0x1] %vm3444_vm4, %v9687_v6  ;;  %v8506_v9 = vpack.c.bf16 %v3354_v26, %v3354_v26  ;;  %v3352_v35 = vmul.f32 %v9190_v32, %v11866_v61  ;;  %9191 = vpow2.f32 %v8036_v51  ;;  %v8034_v39 = vmul.f32 -1.442695, %v11896_v42 }
 0x1a1   : > { %v11905_v38 = vadd.f32 %v11734_v48, %v2061_v52  ;;  %v2059_v63 = vmul.f32 %v11722_v41, %v1952_v10 }
 0x1a2   : > { %3435 = vst.msk [vmem:[#allocation2 + $0x9c] sm:$0xf] %vm2472_vm2, %v8506_v9  ;;  %v8504_v53 = vpack.c.bf16 %v3352_v35, %v3352_v35  ;;  %9193 = vpow2.f32 %v8034_v39 }
 0x1a3   : > { %3477 = vst.msk [vmem:[#allocation2 + $0x9c] sm:$0xf] %vm2472_vm2, %v9687_v6  ;;  %v8037_v56 = vmul.f32 -1.442695, %v11905_v38  ;;  %v11913_v25 = vadd.f32 %v11734_v48, %v2059_v63 }
 0x1a4   : > { %3433 = vst.msk [vmem:[#allocation2 + $0x94] sm:$0xf] %vm2472_vm2, %v8504_v53 }
 0x1a5   : > { %v8836_v13 = vpop.f32.mrf.mxu1  ;;  %9195 = vpow2.f32 %v8037_v56  ;;  %v8035_v57 = vmul.f32 -1.442695, %v11913_v25 }
 0x1a6   : > { %v3229_v34 = vmul.f32 %v8836_v13, %v11722_v41 }
 0x1a7   : > { %v3188_v19 = vpop.f32.mrf.mxu1  ;;  %9197 = vpow2.f32 %v8035_v57 }
 0x1a8   : > { %v3245_v4 = vadd.f32 %v11734_v48, %v3229_v34  ;;  %v3227_v27 = vmul.f32 %v11722_v41, %v3188_v19 }
 0x1a9   : > { %v8837_v49 = vpop.f32.mrf.mxu1 }
 0x1aa   : > { %v8274_v61 = vmul.f32 -1.442695, %v3245_v4  ;;  %v3243_v20 = vadd.f32 %v11734_v48, %v3227_v27  ;;  %v3230_v30 = vmul.f32 %v8837_v49, %v11722_v41 }
 0x1ab   : > { %v3191_v47 = vpop.f32.mrf.mxu1 }
 0x1ac   : > { %9199 = vpow2.f32 %v8274_v61  ;;  %v8272_v8 = vmul.f32 -1.442695, %v3243_v20  ;;  %v11923_v11 = vadd.f32 %v11734_v48, %v3230_v30  ;;  %v3228_v58 = vmul.f32 %v11722_v41, %v3191_v47 }
 0x1ad   : > { %v9192_v18 = vpop.eup %9191 }
 0x1ae   : > { %v2226_v54 = vadd.f32 1.0, %v9192_v18  ;;  %9201 = vpow2.f32 %v8272_v8  ;;  %v8275_v22 = vmul.f32 -1.442695, %v11923_v11  ;;  %v11928_v40 = vadd.f32 %v11734_v48, %v3228_v58 }
 0x1af   : > { %v9194_v14 = vpop.eup %9193 }
 0x1b0   : > { %9203 = vrcp.f32 %v2226_v54  ;;  %v2224_v60 = vadd.f32 1.0, %v9194_v14  ;;  %v8273_v36 = vmul.f32 -1.442695, %v11928_v40 }
 0x1b1   : > { %9205 = vpow2.f32 %v8275_v22 }
 0x1b2   : > { %v9196_v44 = vpop.eup %9195  ;;  %9207 = vrcp.f32 %v2224_v60 }
 0x1b3   : > { %v2227_v5 = vadd.f32 1.0, %v9196_v44  ;;  %9209 = vpow2.f32 %v8273_v36 }
 0x1b4   : > { %v9198_v1 = vpop.eup %9197 }
 0x1b5   : > { %9211 = vrcp.f32 %v2227_v5  ;;  %v2225_v50 = vadd.f32 1.0, %v9198_v1 }
 0x1b7   : > { %9213 = vrcp.f32 %v2225_v50 }
 0x1b9   : > { %v9200_v55 = vpop.eup %9199 }
 0x1ba   : > { %v3309_v45 = vadd.f32 1.0, %v9200_v55 }
 0x1bb   : > { %v9202_v0 = vpop.eup %9201 }
 0x1bc   : > { %9215 = vrcp.f32 %v3309_v45  ;;  %v3307_v33 = vadd.f32 1.0, %v9202_v0 }
 0x1bd   : > { %v9204_v2 = vpop.eup %9203 }
 0x1be   : > { %v9206_v59 = vpop.eup %9205  ;;  %v2322_v21 = vmul.f32 %v9204_v2, %v11887_v15  ;;  %9217 = vrcp.f32 %v3307_v33 }
 0x1bf   : > { %v9208_v3 = vpop.eup %9207  ;;  %v3310_v17 = vadd.f32 1.0, %v9206_v59 }
 0x1c0   : > { %v9210_v29 = vpop.eup %9209  ;;  %v8477_v7 = vpack.c.bf16 %v2322_v21, %v2322_v21  ;;  %v2320_v46 = vmul.f32 %v9208_v3, %v11896_v42 }
 0x1c1   : > { %9219 = vrcp.f32 %v3310_v17  ;;  %v3308_v37 = vadd.f32 1.0, %v9210_v29 }
 0x1c2   : > { %v9212_v24 = vpop.eup %9211  ;;  %2483 = vst.msk [vmem:[#allocation2 + $0x28] sm:$0xf] %vm2472_vm2, %v8477_v7  ;;  %v8475_v16 = vpack.c.bf16 %v2320_v46, %v2320_v46 }
 0x1c3   : > { %3462 = vst.msk [vmem:[#allocation2 + $0x28] sm:$0xe] %vm3457_vm3, %v9687_v6  ;;  %v2323_v43 = vmul.f32 %v9212_v24, %v11905_v38  ;;  %9221 = vrcp.f32 %v3308_v37 }
 0x1c4   : > { %v9214_v28 = vpop.eup %9213  ;;  %2481 = vst.msk [vmem:[#allocation2 + $0x20] sm:$0xf] %vm2472_vm2, %v8475_v16 }
 0x1c5   : > { %3447 = vst.msk [vmem:[#allocation2 + $0x20] sm:$0x1] %vm3444_vm4, %v9687_v6  ;;  %v8478_v15 = vpack.c.bf16 %v2323_v43, %v2323_v43  ;;  %v2321_v62 = vmul.f32 %v9214_v28, %v11913_v25 }
 0x1c7   : > { %2484 = vst.msk [vmem:[#allocation2 + $0x2c] sm:$0xf] %vm2472_vm2, %v8478_v15  ;;  %v8476_v12 = vpack.c.bf16 %v2321_v62, %v2321_v62 }
 0x1c8   : > { %3463 = vst.msk [vmem:[#allocation2 + $0x2c] sm:$0xf] %vm2472_vm2, %v9687_v6 }
 0x1c9   : > { %v9216_v23 = vpop.eup %9215  ;;  %2482 = vst.msk [vmem:[#allocation2 + $0x24] sm:$0xf] %vm2472_vm2, %v8476_v12 }
 0x1ca   : > { %v3357_v31 = vmul.f32 %v9216_v23, %v3245_v4  ;;  %v8806_v26 = vpop.f32.mrf.mxu0 }
 0x1cb   : > { %v9218_v51 = vpop.eup %9217  ;;  %v2064_v42 = vmul.f32 %v8806_v26, %v11722_v41 }
 0x1cc   : > { %v8509_v52 = vpack.c.bf16 %v3357_v31, %v3357_v31  ;;  %v3355_v32 = vmul.f32 %v9218_v51, %v3243_v20  ;;  %v1965_v10 = vpop.f32.mrf.mxu0 }
 0x1cd   : > { %v11947_v9 = vadd.f32 %v11734_v48, %v2064_v42  ;;  %v2062_v35 = vmul.f32 %v11722_v41, %v1965_v10 }
 0x1ce   : > { %v9220_v39 = vpop.eup %9219  ;;  %3438 = vst.msk [vmem:[#allocation2 + $0xa8] sm:$0xf] %vm2472_vm2, %v8509_v52  ;;  %v8507_v38 = vpack.c.bf16 %v3355_v32, %v3355_v32  ;;  %v8807_v63 = vpop.f32.mrf.mxu0 }
 0x1cf   : > { %3478 = vst.msk [vmem:[#allocation2 + $0xa8] sm:$0xe] %vm3457_vm3, %v9687_v6  ;;  %v3358_v53 = vmul.f32 %v9220_v39, %v11923_v11  ;;  %v8040_v56 = vmul.f32 -1.442695, %v11947_v9  ;;  %v11956_v25 = vadd.f32 %v11734_v48, %v2062_v35  ;;  %v2065_v13 = vmul.f32 %v8807_v63, %v11722_v41 }
 0x1d0   : > { %v9222_v57 = vpop.eup %9221  ;;  %3436 = vst.msk [vmem:[#allocation2 + $0xa0] sm:$0xf] %vm2472_vm2, %v8507_v38  ;;  %v1968_v34 = vpop.f32.mrf.mxu0 }
 0x1d1   : > { %3455 = vst.msk [vmem:[#allocation2 + $0xa0] sm:$0x1] %vm3444_vm4, %v9687_v6  ;;  %v8510_v19 = vpack.c.bf16 %v3358_v53, %v3358_v53  ;;  %v3356_v4 = vmul.f32 %v9222_v57, %v11928_v40  ;;  %9223 = vpow2.f32 %v8040_v56  ;;  %v8038_v27 = vmul.f32 -1.442695, %v11956_v25 }
 0x1d2   : > { %v11965_v49 = vadd.f32 %v11734_v48, %v2065_v13  ;;  %v2063_v61 = vmul.f32 %v11722_v41, %v1968_v34 }
 0x1d3   : > { %3439 = vst.msk [vmem:[#allocation2 + $0xac] sm:$0xf] %vm2472_vm2, %v8510_v19  ;;  %v8508_v20 = vpack.c.bf16 %v3356_v4, %v3356_v4  ;;  %9225 = vpow2.f32 %v8038_v27 }
 0x1d4   : > { %3479 = vst.msk [vmem:[#allocation2 + $0xac] sm:$0xf] %vm2472_vm2, %v9687_v6  ;;  %v8041_v30 = vmul.f32 -1.442695, %v11965_v49  ;;  %v11973_v47 = vadd.f32 %v11734_v48, %v2063_v61 }
 0x1d5   : > { %3437 = vst.msk [vmem:[#allocation2 + $0xa4] sm:$0xf] %vm2472_vm2, %v8508_v20 }
 0x1d6   : > { %9227 = vpow2.f32 %v8041_v30  ;;  %v8039_v11 = vmul.f32 -1.442695, %v11973_v47 }
 0x1d7   : > { %v8840_v8 = vpop.f32.mrf.mxu1 }
 0x1d8   : > { %v3233_v58 = vmul.f32 %v8840_v8, %v11722_v41  ;;  %9229 = vpow2.f32 %v8039_v11 }
 0x1d9   : > { %v3204_v18 = vpop.f32.mrf.mxu1 }
 0x1da   : > { %v11979_v54 = vadd.f32 %v11734_v48, %v3233_v58  ;;  %v3231_v22 = vmul.f32 %v11722_v41, %v3204_v18 }
 0x1db   : > { %v8841_v40 = vpop.f32.mrf.mxu1 }
 0x1dc   : > { %v8278_v14 = vmul.f32 -1.442695, %v11979_v54  ;;  %v11984_v60 = vadd.f32 %v11734_v48, %v3231_v22  ;;  %v3234_v36 = vmul.f32 %v8841_v40, %v11722_v41 }
 0x1dd   : > { %v3207_v44 = vpop.f32.mrf.mxu1 }
 0x1de   : > { %9231 = vpow2.f32 %v8278_v14  ;;  %v8276_v5 = vmul.f32 -1.442695, %v11984_v60  ;;  %v11989_v1 = vadd.f32 %v11734_v48, %v3234_v36  ;;  %v3232_v50 = vmul.f32 %v11722_v41, %v3207_v44  ;;  %v9224_v55 = vpop.eup %9223 }
 0x1df   : > { %v2230_v45 = vadd.f32 1.0, %v9224_v55 }
 0x1e0   : > { %9233 = vpow2.f32 %v8276_v5  ;;  %v8279_v0 = vmul.f32 -1.442695, %v11989_v1  ;;  %v11994_v33 = vadd.f32 %v11734_v48, %v3232_v50  ;;  %v9226_v2 = vpop.eup %9225 }
 0x1e1   : > { %9235 = vrcp.f32 %v2230_v45  ;;  %v2228_v59 = vadd.f32 1.0, %v9226_v2 }
 0x1e2   : > { %v8277_v21 = vmul.f32 -1.442695, %v11994_v33  ;;  %9237 = vpow2.f32 %v8279_v0 }
 0x1e3   : > { %v9228_v3 = vpop.eup %9227  ;;  %9239 = vrcp.f32 %v2228_v59 }
 0x1e4   : > { %v2231_v17 = vadd.f32 1.0, %v9228_v3  ;;  %9241 = vpow2.f32 %v8277_v21 }
 0x1e5   : > { %v9230_v29 = vpop.eup %9229 }
 0x1e6   : > { %9243 = vrcp.f32 %v2231_v17  ;;  %v2229_v7 = vadd.f32 1.0, %v9230_v29 }
 0x1e8   : > { %9245 = vrcp.f32 %v2229_v7 }
 0x1eb   : > { %v9232_v46 = vpop.eup %9231 }
 0x1ec   : > { %v3313_v37 = vadd.f32 1.0, %v9232_v46 }
 0x1ed   : > { %v9234_v24 = vpop.eup %9233 }
 0x1ee   : > { %9247 = vrcp.f32 %v3313_v37  ;;  %v3311_v16 = vadd.f32 1.0, %v9234_v24  ;;  %v9236_v43 = vpop.eup %9235  ;;  %v8810_v28 = vpop.f32.mrf.mxu0 }
 0x1ef   : > { %v9238_v15 = vpop.eup %9237  ;;  %v2326_v62 = vmul.f32 %v9236_v43, %v11947_v9  ;;  %v2068_v12 = vmul.f32 %v8810_v28, %v11722_v41 }
 0x1f0   : > { %9249 = vrcp.f32 %v3311_v16  ;;  %v9240_v23 = vpop.eup %9239  ;;  %v3314_v31 = vadd.f32 1.0, %v9238_v15  ;;  %v1981_v26 = vpop.f32.mrf.mxu0  ;;  %v12064_v15 = vld [vmem:[%s14543_s6] ss:$0 sm:$0xff] }
 0x1f1   : > { %v9242_v51 = vpop.eup %9241  ;;  %v8481_v42 = vpack.c.bf16 %v2326_v62, %v2326_v62  ;;  %v2324_v52 = vmul.f32 %v9240_v23, %v11956_v25  ;;  %v12001_v32 = vadd.f32 %v11734_v48, %v2068_v12  ;;  %v2066_v10 = vmul.f32 %v11722_v41, %v1981_v26 }
 0x1f2   : > { %9251 = vrcp.f32 %v3314_v31  ;;  %v3312_v35 = vadd.f32 1.0, %v9242_v51  ;;  %v8811_v39 = vpop.f32.mrf.mxu0 }
 0x1f3   : > { %v9244_v38 = vpop.eup %9243  ;;  %2487 = vst.msk [vmem:[#allocation2 + $0x38] sm:$0xf] %vm2472_vm2, %v8481_v42  ;;  %v8479_v9 = vpack.c.bf16 %v2324_v52, %v2324_v52  ;;  %v8044_v63 = vmul.f32 -1.442695, %v12001_v32  ;;  %v12007_v53 = vadd.f32 %v11734_v48, %v2066_v10  ;;  %v2069_v56 = vmul.f32 %v8811_v39, %v11722_v41 }
 0x1f4   : > { %3464 = vst.msk [vmem:[#allocation2 + $0x38] sm:$0xe] %vm3457_vm3, %v9687_v6  ;;  %v2327_v25 = vmul.f32 %v9244_v38, %v11965_v49  ;;  %9253 = vrcp.f32 %v3312_v35  ;;  %v1984_v13 = vpop.f32.mrf.mxu0 }
 0x1f5   : > { %v9246_v57 = vpop.eup %9245  ;;  %2485 = vst.msk [vmem:[#allocation2 + $0x30] sm:$0xf] %vm2472_vm2, %v8479_v9  ;;  %9255 = vpow2.f32 %v8044_v63  ;;  %v8042_v34 = vmul.f32 -1.442695, %v12007_v53  ;;  %v12016_v19 = vadd.f32 %v11734_v48, %v2069_v56  ;;  %v2067_v4 = vmul.f32 %v11722_v41, %v1984_v13 }
 0x1f6   : > { %3448 = vst.msk [vmem:[#allocation2 + $0x30] sm:$0x1] %vm3444_vm4, %v9687_v6  ;;  %v8482_v27 = vpack.c.bf16 %v2327_v25, %v2327_v25  ;;  %v2325_v61 = vmul.f32 %v9246_v57, %v11973_v47 }
 0x1f7   : > { %9257 = vpow2.f32 %v8042_v34  ;;  %v8045_v49 = vmul.f32 -1.442695, %v12016_v19  ;;  %v12024_v20 = vadd.f32 %v11734_v48, %v2067_v4 }
 0x1f8   : > { %2488 = vst.msk [vmem:[#allocation2 + $0x3c] sm:$0xf] %vm2472_vm2, %v8482_v27  ;;  %v8480_v30 = vpack.c.bf16 %v2325_v61, %v2325_v61 }
 0x1f9   : > { %3465 = vst.msk [vmem:[#allocation2 + $0x3c] sm:$0xf] %vm2472_vm2, %v9687_v6  ;;  %9259 = vpow2.f32 %v8045_v49  ;;  %v8043_v41 = vmul.f32 -1.442695, %v12024_v20 }
 0x1fa   : > { %2486 = vst.msk [vmem:[#allocation2 + $0x34] sm:$0xf] %vm2472_vm2, %v8480_v30 }
 0x1fb   : > { %v9248_v8 = vpop.eup %9247  ;;  %9261 = vpow2.f32 %v8043_v41 }
 0x1fc   : > { %v3361_v47 = vmul.f32 %v9248_v8, %v11979_v54 }
 0x1fd   : > { %v9250_v11 = vpop.eup %9249 }
 0x1fe   : > { %v8513_v58 = vpack.c.bf16 %v3361_v47, %v3361_v47  ;;  %v3359_v18 = vmul.f32 %v9250_v11, %v11984_v60 }
 0x1ff   : > { %v9252_v22 = vpop.eup %9251 }
 0x200   : > { %3442 = vst.msk [vmem:[#allocation2 + $0xb8] sm:$0xf] %vm2472_vm2, %v8513_v58  ;;  %v8511_v40 = vpack.c.bf16 %v3359_v18, %v3359_v18  ;;  %v3362_v14 = vmul.f32 %v9252_v22, %v11989_v1 }
 0x201   : > { %3480 = vst.msk [vmem:[#allocation2 + $0xb8] sm:$0xe] %vm3457_vm3, %v9687_v6  ;;  %v9254_v36 = vpop.eup %9253 }
 0x202   : > { %3440 = vst.msk [vmem:[#allocation2 + $0xb0] sm:$0xf] %vm2472_vm2, %v8511_v40  ;;  %v9256_v44 = vpop.eup %9255  ;;  %v8514_v54 = vpack.c.bf16 %v3362_v14, %v3362_v14  ;;  %v3360_v5 = vmul.f32 %v9254_v36, %v11994_v33  ;;  %v12048_v33 = vld [vmem:[%s14542_s5] ss:$0 sm:$0xff] }
 0x203   : > { %3456 = vst.msk [vmem:[#allocation2 + $0xb0] sm:$0x1] %vm3444_vm4, %v9687_v6  ;;  %v2234_v60 = vadd.f32 1.0, %v9256_v44 }
 0x204   : > { %v9258_v50 = vpop.eup %9257  ;;  %3443 = vst.msk [vmem:[#allocation2 + $0xbc] sm:$0xf] %vm2472_vm2, %v8514_v54  ;;  %v8512_v55 = vpack.c.bf16 %v3360_v5, %v3360_v5 }
 0x205   : > { %3481 = vst.msk [vmem:[#allocation2 + $0xbc] sm:$0xf] %vm2472_vm2, %v9687_v6  ;;  %9263 = vrcp.f32 %v2234_v60  ;;  %v2232_v1 = vadd.f32 1.0, %v9258_v50 }
 0x206   : > { %v9260_v45 = vpop.eup %9259  ;;  %3441 = vst.msk [vmem:[#allocation2 + $0xb4] sm:$0xf] %vm2472_vm2, %v8512_v55 }
 0x207   : > { %9265 = vrcp.f32 %v2232_v1  ;;  %v2235_v0 = vadd.f32 1.0, %v9260_v45  ;;  %v8814_v2 = vpop.f32.mrf.mxu0 }
 0x208   : > { %v9262_v59 = vpop.eup %9261  ;;  %v2072_v21 = vmul.f32 %v12048_v33, %v8814_v2 }
 0x209   : > { %9267 = vrcp.f32 %v2235_v0  ;;  %v2233_v3 = vadd.f32 1.0, %v9262_v59  ;;  %v1997_v17 = vpop.f32.mrf.mxu0 }
 0x20a   : > { %v12052_v29 = vadd.f32 %v11734_v48, %v2072_v21  ;;  %v2070_v7 = vmul.f32 %v12048_v33, %v1997_v17 }
 0x20b   : > { %9269 = vrcp.f32 %v2233_v3  ;;  %v8815_v46 = vpop.f32.mrf.mxu0 }
 0x20c   : > { %v8048_v37 = vmul.f32 -1.442695, %v12052_v29  ;;  %v12057_v24 = vadd.f32 %v11734_v48, %v2070_v7  ;;  %v2073_v16 = vmul.f32 %v12048_v33, %v8815_v46 }
 0x20d   : > { %v2000_v43 = vpop.f32.mrf.mxu0 }
 0x20e   : > { %9271 = vpow2.f32 %v8048_v37  ;;  %v8046_v28 = vmul.f32 -1.442695, %v12057_v24  ;;  %v12067_v62 = vadd.f32 %v12064_v15, %v2073_v16  ;;  %v2071_v12 = vmul.f32 %v12048_v33, %v2000_v43 }
 0x210   : > { %9273 = vpow2.f32 %v8046_v28  ;;  %v8049_v48 = vmul.f32 -1.442695, %v12067_v62  ;;  %v12072_v23 = vadd.f32 %v12064_v15, %v2071_v12 }
 0x212   : > { %v9264_v31 = vpop.eup %9263  ;;  %9275 = vpow2.f32 %v8049_v48  ;;  %v8047_v26 = vmul.f32 -1.442695, %v12072_v23 }
 0x213   : > { %v2330_v51 = vmul.f32 %v9264_v31, %v12001_v32 }
 0x214   : > { %v9266_v42 = vpop.eup %9265  ;;  %9277 = vpow2.f32 %v8047_v26 }
 0x215   : > { %v8485_v52 = vpack.c.bf16 %v2330_v51, %v2330_v51  ;;  %v2328_v10 = vmul.f32 %v9266_v42, %v12007_v53 }
 0x216   : > { %v9268_v35 = vpop.eup %9267 }
 0x217   : > { %2491 = vst.msk [vmem:[#allocation2 + $0x48] sm:$0xf] %vm2472_vm2, %v8485_v52  ;;  %v8483_v39 = vpack.c.bf16 %v2328_v10, %v2328_v10  ;;  %v2331_v38 = vmul.f32 %v9268_v35, %v12016_v19 }
 0x218   : > { %v9270_v9 = vpop.eup %9269  ;;  %3466 = vst.msk [vmem:[#allocation2 + $0x48] sm:$0xe] %vm3457_vm3, %v9687_v6 }
 0x219   : > { %2489 = vst.msk [vmem:[#allocation2 + $0x40] sm:$0xf] %vm2472_vm2, %v8483_v39  ;;  %v8486_v63 = vpack.c.bf16 %v2331_v38, %v2331_v38  ;;  %v2329_v32 = vmul.f32 %v9270_v9, %v12024_v20 }
 0x21a   : > { %3449 = vst.msk [vmem:[#allocation2 + $0x40] sm:$0x1] %vm3444_vm4, %v9687_v6 }
 0x21b   : > { %v9272_v56 = vpop.eup %9271  ;;  %2492 = vst.msk [vmem:[#allocation2 + $0x4c] sm:$0xf] %vm2472_vm2, %v8486_v63  ;;  %v8484_v53 = vpack.c.bf16 %v2329_v32, %v2329_v32 }
 0x21c   : > { %3467 = vst.msk [vmem:[#allocation2 + $0x4c] sm:$0xf] %vm2472_vm2, %v9687_v6  ;;  %v2238_v25 = vadd.f32 1.0, %v9272_v56 }
 0x21d   : > { %v9274_v13 = vpop.eup %9273  ;;  %2490 = vst.msk [vmem:[#allocation2 + $0x44] sm:$0xf] %vm2472_vm2, %v8484_v53 }
 0x21e   : > { %9279 = vrcp.f32 %v2238_v25  ;;  %v2236_v57 = vadd.f32 1.0, %v9274_v13 }
 0x21f   : > { %v9276_v34 = vpop.eup %9275  ;;  %v8818_v19 = vpop.f32.mrf.mxu0 }
 0x220   : > { %9281 = vrcp.f32 %v2236_v57  ;;  %v2239_v4 = vadd.f32 1.0, %v9276_v34  ;;  %v2076_v27 = vmul.f32 %v12048_v33, %v8818_v19 }
 0x221   : > { %v9278_v61 = vpop.eup %9277  ;;  %v2013_v49 = vpop.f32.mrf.mxu0 }
 0x222   : > { %9283 = vrcp.f32 %v2239_v4  ;;  %v2237_v20 = vadd.f32 1.0, %v9278_v61  ;;  %v12091_v30 = vadd.f32 %v12064_v15, %v2076_v27  ;;  %v2074_v41 = vmul.f32 %v12048_v33, %v2013_v49 }
 0x223   : > { %v8819_v8 = vpop.f32.mrf.mxu0 }
 0x224   : > { %9285 = vrcp.f32 %v2237_v20  ;;  %v8052_v47 = vmul.f32 -1.442695, %v12091_v30  ;;  %v12096_v11 = vadd.f32 %v12064_v15, %v2074_v41  ;;  %v2077_v58 = vmul.f32 %v12048_v33, %v8819_v8 }
 0x225   : > { %v2016_v18 = vpop.f32.mrf.mxu0 }
 0x226   : > { %9287 = vpow2.f32 %v8052_v47  ;;  %v8050_v22 = vmul.f32 -1.442695, %v12096_v11  ;;  %v12101_v40 = vadd.f32 %v12064_v15, %v2077_v58  ;;  %v2075_v14 = vmul.f32 %v12048_v33, %v2016_v18 }
 0x228   : > { %9289 = vpow2.f32 %v8050_v22  ;;  %v8053_v36 = vmul.f32 -1.442695, %v12101_v40  ;;  %v12106_v44 = vadd.f32 %v12064_v15, %v2075_v14 }
 0x22a   : > { %9291 = vpow2.f32 %v8053_v36  ;;  %v8051_v54 = vmul.f32 -1.442695, %v12106_v44 }
 0x22b   : > { %v9280_v5 = vpop.eup %9279 }
 0x22c   : > { %v2334_v60 = vmul.f32 %v9280_v5, %v12052_v29  ;;  %9293 = vpow2.f32 %v8051_v54 }
 0x22d   : > { %v9282_v50 = vpop.eup %9281 }
 0x22e   : > { %v8489_v55 = vpack.c.bf16 %v2334_v60, %v2334_v60  ;;  %v2332_v1 = vmul.f32 %v9282_v50, %v12057_v24 }
 0x22f   : > { %v9284_v45 = vpop.eup %9283 }
 0x230   : > { %2495 = vst.msk [vmem:[#allocation2 + $0x58] sm:$0xf] %vm2472_vm2, %v8489_v55  ;;  %v8487_v0 = vpack.c.bf16 %v2332_v1, %v2332_v1  ;;  %v2335_v2 = vmul.f32 %v9284_v45, %v12067_v62 }
 0x231   : > { %v9286_v59 = vpop.eup %9285  ;;  %3468 = vst.msk [vmem:[#allocation2 + $0x58] sm:$0xe] %vm3457_vm3, %v9687_v6 }
 0x232   : > { %2493 = vst.msk [vmem:[#allocation2 + $0x50] sm:$0xf] %vm2472_vm2, %v8487_v0  ;;  %v8490_v21 = vpack.c.bf16 %v2335_v2, %v2335_v2  ;;  %v2333_v3 = vmul.f32 %v9286_v59, %v12072_v23 }
 0x233   : > { %v9288_v17 = vpop.eup %9287  ;;  %3450 = vst.msk [vmem:[#allocation2 + $0x50] sm:$0x1] %vm3444_vm4, %v9687_v6 }
 0x234   : > { %2496 = vst.msk [vmem:[#allocation2 + $0x5c] sm:$0xf] %vm2472_vm2, %v8490_v21  ;;  %v8488_v29 = vpack.c.bf16 %v2333_v3, %v2333_v3  ;;  %v2242_v7 = vadd.f32 1.0, %v9288_v17 }
 0x235   : > { %v9290_v46 = vpop.eup %9289  ;;  %3469 = vst.msk [vmem:[#allocation2 + $0x5c] sm:$0xf] %vm2472_vm2, %v9687_v6 }
 0x236   : > { %2494 = vst.msk [vmem:[#allocation2 + $0x54] sm:$0xf] %vm2472_vm2, %v8488_v29  ;;  %9295 = vrcp.f32 %v2242_v7  ;;  %v2240_v37 = vadd.f32 1.0, %v9290_v46 }
 0x237   : > { %v9292_v24 = vpop.eup %9291 }
 0x238   : > { %9297 = vrcp.f32 %v2240_v37  ;;  %v2243_v16 = vadd.f32 1.0, %v9292_v24  ;;  %v8822_v43 = vpop.f32.mrf.mxu0 }
 0x239   : > { %v9294_v28 = vpop.eup %9293  ;;  %v2080_v62 = vmul.f32 %v12048_v33, %v8822_v43 }
 0x23a   : > { %9299 = vrcp.f32 %v2243_v16  ;;  %v2241_v12 = vadd.f32 1.0, %v9294_v28  ;;  %v2029_v48 = vpop.f32.mrf.mxu0 }
 0x23b   : > { %v2118_v23 = vadd.f32 %v12064_v15, %v2080_v62  ;;  %v2078_v31 = vmul.f32 %v12048_v33, %v2029_v48 }
 0x23c   : > { %9301 = vrcp.f32 %v2241_v12  ;;  %v8823_v26 = vpop.f32.mrf.mxu0 }
 0x23d   : > { %v8056_v51 = vmul.f32 -1.442695, %v2118_v23  ;;  %v2116_v42 = vadd.f32 %v12064_v15, %v2078_v31  ;;  %v2081_v52 = vmul.f32 %v12048_v33, %v8823_v26 }
 0x23e   : > { %v2032_v10 = vpop.f32.mrf.mxu0 }
 0x23f   : > { %9303 = vpow2.f32 %v8056_v51  ;;  %v8054_v35 = vmul.f32 -1.442695, %v2116_v42  ;;  %v2119_v39 = vadd.f32 %v12064_v15, %v2081_v52  ;;  %v2079_v38 = vmul.f32 %v12048_v33, %v2032_v10 }
 0x241   : > { %9305 = vpow2.f32 %v8054_v35  ;;  %v8057_v9 = vmul.f32 -1.442695, %v2119_v39  ;;  %v2117_v63 = vadd.f32 %v12064_v15, %v2079_v38 }
 0x243   : > { %v9296_v32 = vpop.eup %9295  ;;  %9307 = vpow2.f32 %v8057_v9  ;;  %v8055_v56 = vmul.f32 -1.442695, %v2117_v63 }
 0x244   : > { %v2338_v53 = vmul.f32 %v9296_v32, %v12091_v30 }
 0x245   : > { %v9298_v25 = vpop.eup %9297  ;;  %9309 = vpow2.f32 %v8055_v56 }
 0x246   : > { %v8493_v13 = vpack.c.bf16 %v2338_v53, %v2338_v53  ;;  %v2336_v57 = vmul.f32 %v9298_v25, %v12096_v11 }
 0x247   : > { %v9300_v34 = vpop.eup %9299 }
 0x248   : > { %2499 = vst.msk [vmem:[#allocation2 + $0x68] sm:$0xf] %vm2472_vm2, %v8493_v13  ;;  %v8491_v19 = vpack.c.bf16 %v2336_v57, %v2336_v57  ;;  %v2339_v33 = vmul.f32 %v9300_v34, %v12101_v40 }
 0x249   : > { %v9302_v4 = vpop.eup %9301  ;;  %3470 = vst.msk [vmem:[#allocation2 + $0x68] sm:$0xe] %vm3457_vm3, %v9687_v6 }
 0x24a   : > { %2497 = vst.msk [vmem:[#allocation2 + $0x60] sm:$0xf] %vm2472_vm2, %v8491_v19  ;;  %v8494_v15 = vpack.c.bf16 %v2339_v33, %v2339_v33  ;;  %v2337_v27 = vmul.f32 %v9302_v4, %v12106_v44 }
 0x24b   : > { %3451 = vst.msk [vmem:[#allocation2 + $0x60] sm:$0x1] %vm3444_vm4, %v9687_v6 }
 0x24c   : > { %v9304_v61 = vpop.eup %9303  ;;  %2500 = vst.msk [vmem:[#allocation2 + $0x6c] sm:$0xf] %vm2472_vm2, %v8494_v15  ;;  %v8492_v49 = vpack.c.bf16 %v2337_v27, %v2337_v27 }
 0x24d   : > { %3471 = vst.msk [vmem:[#allocation2 + $0x6c] sm:$0xf] %vm2472_vm2, %v9687_v6  ;;  %v2246_v20 = vadd.f32 1.0, %v9304_v61 }
 0x24e   : > { %v9306_v30 = vpop.eup %9305  ;;  %2498 = vst.msk [vmem:[#allocation2 + $0x64] sm:$0xf] %vm2472_vm2, %v8492_v49 }
 0x24f   : > { %9311 = vrcp.f32 %v2246_v20  ;;  %v2244_v41 = vadd.f32 1.0, %v9306_v30 }
 0x250   : > { %v9308_v8 = vpop.eup %9307 }
 0x251   : > { %9313 = vrcp.f32 %v2244_v41  ;;  %v2247_v47 = vadd.f32 1.0, %v9308_v8 }
 0x252   : > { %v9310_v11 = vpop.eup %9309 }
 0x253   : > { %9315 = vrcp.f32 %v2247_v47  ;;  %v2245_v58 = vadd.f32 1.0, %v9310_v11 }
 0x255   : > { %9317 = vrcp.f32 %v2245_v58 }
 0x25c   : > { %v9312_v18 = vpop.eup %9311 }
 0x25d   : > { %v2342_v22 = vmul.f32 %v9312_v18, %v2118_v23 }
 0x25e   : > { %v9314_v40 = vpop.eup %9313 }
 0x25f   : > { %v8497_v14 = vpack.c.bf16 %v2342_v22, %v2342_v22  ;;  %v2340_v36 = vmul.f32 %v9314_v40, %v2116_v42 }
 0x260   : > { %v9316_v44 = vpop.eup %9315 }
 0x261   : > { %2503 = vst.msk [vmem:[#allocation2 + $0x78] sm:$0xf] %vm2472_vm2, %v8497_v14  ;;  %v8495_v54 = vpack.c.bf16 %v2340_v36, %v2340_v36  ;;  %v2343_v5 = vmul.f32 %v9316_v44, %v2119_v39 }
 0x262   : > { %v9318_v60 = vpop.eup %9317  ;;  %3472 = vst.msk [vmem:[#allocation2 + $0x78] sm:$0xe] %vm3457_vm3, %v9687_v6 }
 0x263   : > { %2501 = vst.msk [vmem:[#allocation2 + $0x70] sm:$0xf] %vm2472_vm2, %v8495_v54  ;;  %v8498_v50 = vpack.c.bf16 %v2343_v5, %v2343_v5  ;;  %v2341_v55 = vmul.f32 %v9318_v60, %v2117_v63  ;;  %3485 = sbr.rel (%p8296_p7) target bundleno = 619 (0x26b), region = 88 }
 0x264   : > { %3452 = vst.msk [vmem:[#allocation2 + $0x70] sm:$0x1] %vm3444_vm4, %v9687_v6 }
 0x265   : > { %2504 = vst.msk [vmem:[#allocation2 + $0x7c] sm:$0xf] %vm2472_vm2, %v8498_v50  ;;  %v8496_v1 = vpack.c.bf16 %v2341_v55, %v2341_v55 }
 0x266   : > { %3473 = vst.msk [vmem:[#allocation2 + $0x7c] sm:$0xf] %vm2472_vm2, %v9687_v6 }
 0x267   : > { %2502 = vst.msk [vmem:[#allocation2 + $0x74] sm:$0xf] %vm2472_vm2, %v8496_v1 }
 0x268   : > { %v9688_v45 = vmov 0  }
 0x269   : > { %3486 = vst.msk [vmem:[#allocation2] sm:$0xf] %vm2472_vm2, %v9688_v45  ;;  %3487 = vst.msk [vmem:[#allocation2 + $0x4] sm:$0xf] %vm2472_vm2, %v9688_v45 }
 0x26a   : > { %3488 = vst.msk [vmem:[#allocation2 + $0x8] sm:$0xf] %vm2472_vm2, %v9688_v45  ;;  %3489 = vst.msk [vmem:[#allocation2 + $0xc] sm:$0xf] %vm2472_vm2, %v9688_v45 }
 0x26b PF: > { %p8297_p8 = scmp.lt.s32.totalorder %s2652_s8, 16 }
 0x26d   : > { %3493 = sbr.rel (%p8297_p8) target bundleno = 629 (0x275), region = 92 }
 0x272   : > { %v9689_v6 = vmov 0  }
 0x273   : > { %3495 = vst.msk [vmem:[#allocation2 + $0xb0] sm:$0xf] %vm2472_vm2, %v9689_v6  ;;  %3496 = vst.msk [vmem:[#allocation2 + $0xb4] sm:$0xf] %vm2472_vm2, %v9689_v6 }
 0x274   : > { %3497 = vst.msk [vmem:[#allocation2 + $0xb8] sm:$0xf] %vm2472_vm2, %v9689_v6  ;;  %3498 = vst.msk [vmem:[#allocation2 + $0xbc] sm:$0xf] %vm2472_vm2, %v9689_v6 }
 0x275 PF: > { %p8298_p9 = scmp.ge.s32.totalorder %s9948_s30, 1 }
 0x277   : > { %3502 = sbr.rel (%p8298_p9) target bundleno = 639 (0x27f), region = 96 }
 0x27c   : > { %v9690_v0 = vmov 0  }
 0x27d   : > { %3504 = vst.msk [vmem:[#allocation2 + $0x10] sm:$0xf] %vm2472_vm2, %v9690_v0  ;;  %3505 = vst.msk [vmem:[#allocation2 + $0x14] sm:$0xf] %vm2472_vm2, %v9690_v0 }
 0x27e   : > { %3506 = vst.msk [vmem:[#allocation2 + $0x18] sm:$0xf] %vm2472_vm2, %v9690_v0  ;;  %3507 = vst.msk [vmem:[#allocation2 + $0x1c] sm:$0xf] %vm2472_vm2, %v9690_v0 }
 0x27f PF: > { %p12175_p10 = scmp.lt.s32.totalorder %s2505_s20, 16 }
 0x281   : > { %3511 = sbr.rel (%p12175_p10) target bundleno = 649 (0x289), region = 100 }
 0x286   : > { %v9691_v2 = vmov 0  }
 0x287   : > { %3513 = vst.msk [vmem:[#allocation2 + $0xa0] sm:$0xf] %vm2472_vm2, %v9691_v2  ;;  %3514 = vst.msk [vmem:[#allocation2 + $0xa4] sm:$0xf] %vm2472_vm2, %v9691_v2 }
 0x288   : > { %3515 = vst.msk [vmem:[#allocation2 + $0xa8] sm:$0xf] %vm2472_vm2, %v9691_v2  ;;  %3516 = vst.msk [vmem:[#allocation2 + $0xac] sm:$0xf] %vm2472_vm2, %v9691_v2 }
 0x289 PF: > { %v14873_v59 = vld [vmem:[#allocation17_spill] sm:$0xff]  ;;  %v8546_v3 = vld [vmem:[#allocation2] sm:$0xff]   ;;  %v3519_v17 = vld [vmem:[#allocation2 + $0x8] ss:$16 sps:$4 sm:$0xff]   ;;  %v14676_v29 = vmov 0.0   ;;  %vm3705_vm5 = vcmask 1046528  }
 0x28a   : > { %8884 = vmatprep.subr.msk.bf16.mxu1 %vm1879_vm0, %v14873_v59  ;;  %v5244_v21 = vsel %vm1879_vm0, %v14873_v59, 0  ;;  %8868 = vmatprep.subr.bf16.mxu0 %v14676_v29  ;;  %v8547_v7 = vunpack.c.l.bf16 %v8546_v3  ;;  %v8548_v46 = vunpack.c.h.bf16 %v8546_v3  ;;  %v12190_v37 = vunpack.c.l.bf16 %v3519_v17  ;;  %v3810_v24 = vld [vmem:[#allocation2] sm:$0xe]  ;;  %v8578_v16 = vld [vmem:[#allocation2 + $0x10] sm:$0xff]   ;;  %v14874_v12 = vld [vmem:[#allocation6_spill] sm:$0xff] }
 0x28b   : > { %8843 = vmatpush3.bf16.msra.mxu1 %v5244_v21  ;;  %8869 = vmatpush3.bf16.msra.mxu0 %v5244_v21  ;;  %vm9693_vm6 = vmmov 0   ;;  %v3818_v43 = vunpack.c.l.bf16 %v3810_v24  ;;  %vm3896_vm7 = vcmask 1045504   ;;  %v12194_v28 = vunpack.c.l.bf16 %v8578_v16  ;;  %v14875_v31 = vld [vmem:[#allocation7_spill] sm:$0xff]  ;;  %v14876_v52 = vld [vmem:[#allocation8_spill] sm:$0xff]  ;;  %v14877_v32 = vld [vmem:[#allocation9_spill] sm:$0xff] }
 0x28c   : > { %8870 = vmatprep.mubr.msk.bf16.mxu0 %vm9693_vm6, %v14676_v29  ;;  %v12196_v62 = vunpack.c.h.bf16 %v8578_v16  ;;  %v3571_v48 = vmul.f32 %v8547_v7, %v14874_v12  ;;  %v3572_v23 = vmul.f32 %v8548_v46, %v14874_v12  ;;  %v3641_v26 = vmul.f32 %v8547_v7, %v14875_v31  ;;  %v14878_v33 = vld [vmem:[#allocation10_spill] sm:$0xff]  ;;  %v4294_v27 = vld [vmem:[#allocation2 + $0x10] sm:$0xe]  ;;  %v8610_v41 = vld [vmem:[#allocation2 + $0x20] sm:$0xff]  }
 0x28d   : > { %v3642_v51 = vmul.f32 %v8548_v46, %v14875_v31  ;;  %v12204_v42 = vmul.f32 %v14875_v31, %v12190_v37  ;;  %v3832_v10 = vmul.f32 %v14876_v52, %v3818_v43  ;;  %v3833_v35 = vmul.f32 %v8548_v46, %v14876_v52  ;;  %v14879_v40 = vld [vmem:[#allocation11_spill] sm:$0xff]  ;;  %v12248_v6 = vld [vmem:[#allocation2 + $0x28] ss:$112 sps:$4 sm:$0xff]  }
 0x28e   : > { %v12210_v39 = vmul.f32 %v14876_v52, %v12190_v37  ;;  %v3706_v38 = vrot.slane %v3641_v26, 1  ;;  %v12212_v63 = vunpack.c.h.bf16 %v3519_v17  ;;  %v4056_v56 = vmul.f32 %v12194_v28, %v14877_v32  ;;  %v4777_v3 = vld [vmem:[#allocation2 + $0x20] sm:$0xe]  ;;  %v14881_v24 = vld [vmem:[#allocation12_spill] sm:$0xff] }
 0x28f   : > { %v3707_v9 = vrot.slane %v3642_v51, 1  ;;  %v14686_v53 = vrot.slane %v12204_v42, 1  ;;  %v3897_v25 = vrot.slane %v3832_v10, 2  ;;  %v3898_v13 = vrot.slane %v3833_v35, 2 }
 0x290   : > { %v14684_v57 = vrot.slane %v12210_v39, 2  ;;  %v4057_v19 = vmul.f32 %v12196_v62, %v14877_v32  ;;  %v4126_v4 = vmul.f32 %v12194_v28, %v14878_v33  ;;  %v4127_v15 = vmul.f32 %v12196_v62, %v14878_v33 }
 0x291   : > { %v3708_v34 = vsel %vm3705_vm5, %v3706_v38, %v3707_v9  ;;  %v3710_v61 = vsel %vm3705_vm5, %v3707_v9, %v14686_v53  ;;  %v3899_v20 = vsel %vm3896_vm7, %v3897_v25, %v3898_v13  ;;  %v12234_v47 = vmul.f32 %v14878_v33, %v12212_v63  ;;  %v14883_v9 = vld [vmem:[#allocation14_spill] sm:$0xff]  ;;  %v8642_v25 = vld [vmem:[#allocation2 + $0x80] sm:$0xff]  }
 0x292   : > { %v3786_v49 = vadd.f32 %v3708_v34, %v3571_v48  ;;  %v3901_v30 = vsel %vm3896_vm7, %v3898_v13, %v14684_v57  ;;  %v3787_v8 = vadd.f32 %v3710_v61, %v3572_v23  ;;  %v4190_v11 = vrot.slane %v4126_v4, 1  ;;  %v14882_v23 = vld [vmem:[#allocation13_spill] sm:$0xff] }
 0x293   : > { %v4191_v58 = vrot.slane %v4127_v15, 1  ;;  %v4302_v22 = vunpack.c.l.bf16 %v4294_v27  ;;  %v4317_v14 = vmul.f32 %v12196_v62, %v14879_v40  ;;  %v12240_v36 = vmul.f32 %v14879_v40, %v12212_v63 }
 0x294   : > { %v3977_v18 = vadd.f32 %v3899_v20, %v3786_v49  ;;  %v3978_v44 = vadd.f32 %v3901_v30, %v3787_v8  ;;  %v14682_v5 = vrot.slane %v12234_v47, 1  ;;  %v12244_v60 = vunpack.c.l.bf16 %v8610_v41  ;;  %v12282_v20 = vld [vmem:[#allocation2 + $0x18] ss:$112 sps:$4 sm:$0xff]  }
 0x295   : > { %v4192_v54 = vsel %vm3705_vm5, %v4190_v11, %v4191_v58  ;;  %v4316_v55 = vmul.f32 %v14879_v40, %v4302_v22  ;;  %v4381_v1 = vrot.slane %v4317_v14, 2  ;;  %v14681_v45 = vrot.slane %v12240_v36, 2 }
 0x296   : > { %14880 = vst [vmem:[#allocation48_spill] sm:$0xff] %v12244_v60  ;;  %v4080_v50 = vadd.f32 %v4056_v56, %v3977_v18  ;;  %v4081_v0 = vadd.f32 %v4057_v19, %v3978_v44  ;;  %v4194_v2 = vsel %vm3705_vm5, %v4191_v58, %v14682_v5  ;;  %v12253_v59 = vunpack.c.h.bf16 %v8610_v41 }
 0x297   : > { %v12256_v21 = vunpack.c.l.bf16 %v12248_v6  ;;  %v4380_v7 = vrot.slane %v4316_v55, 2  ;;  %v4384_v46 = vsel %vm3896_vm7, %v4381_v1, %v14681_v45  ;;  %v4539_v16 = vmul.f32 %v12244_v60, %v14881_v24 }
 0x298   : > { %v4270_v17 = vadd.f32 %v4192_v54, %v4080_v50  ;;  %v4271_v43 = vadd.f32 %v4194_v2, %v4081_v0  ;;  %v4540_v48 = vmul.f32 %v12253_v59, %v14881_v24  ;;  %v4609_v26 = vmul.f32 %v12244_v60, %v14882_v23 }
 0x299   : > { %v4610_v51 = vmul.f32 %v12253_v59, %v14882_v23  ;;  %v4382_v10 = vsel %vm3896_vm7, %v4380_v7, %v4381_v1  ;;  %v12272_v35 = vmul.f32 %v14882_v23, %v12256_v21  ;;  %v4785_v38 = vunpack.c.l.bf16 %v4777_v3  ;;  %v5801_v1 = vld [vmem:[#allocation2 + $0x80] sm:$0xe] }
 0x29a   : > { %v4800_v56 = vmul.f32 %v12253_v59, %v14883_v9  ;;  %v4460_v13 = vadd.f32 %v4382_v10, %v4270_v17  ;;  %v4461_v34 = vadd.f32 %v4384_v46, %v4271_v43  ;;  %v4673_v19 = vrot.slane %v4609_v26, 1 }
 0x29b   : > { %v4674_v4 = vrot.slane %v4610_v51, 1  ;;  %v14680_v15 = vrot.slane %v12272_v35, 1  ;;  %v4799_v27 = vmul.f32 %v14883_v9, %v4785_v38  ;;  %v12280_v61 = vmul.f32 %v14883_v9, %v12256_v21 }
 0x29c   : > { %v4864_v49 = vrot.slane %v4800_v56, 2  ;;  %v4563_v30 = vadd.f32 %v4539_v16, %v4460_v13  ;;  %v4564_v41 = vadd.f32 %v4540_v48, %v4461_v34  ;;  %v8643_v11 = vunpack.c.l.bf16 %v8642_v25  ;;  %v8650_v48 = vld [vmem:[#allocation2 + $0x90] sm:$0xff]   ;;  %v14884_v56 = vld [vmem:[#allocation15_spill] sm:$0xff] }
 0x29d   : > { %v4675_v8 = vsel %vm3705_vm5, %v4673_v19, %v4674_v4  ;;  %v4677_v58 = vsel %vm3705_vm5, %v4674_v4, %v14680_v15  ;;  %v4863_v18 = vrot.slane %v4799_v27, 2  ;;  %v14679_v22 = vrot.slane %v12280_v61, 2 }
 0x29e   : > { %v8644_v14 = vunpack.c.h.bf16 %v8642_v25  ;;  %v4753_v44 = vadd.f32 %v4675_v8, %v4563_v30  ;;  %v4754_v54 = vadd.f32 %v4677_v58, %v4564_v41  ;;  %v12290_v50 = vunpack.c.h.bf16 %v12282_v20  ;;  %v14885_v41 = vld [vmem:[#allocation16_spill] sm:$0xff] }
 0x29f   : > { %v5743_v55 = vmul.f32 %v8643_v11, %v14874_v12  ;;  %v4865_v0 = vsel %vm3896_vm7, %v4863_v18, %v4864_v49  ;;  %v4867_v2 = vsel %vm3896_vm7, %v4864_v49, %v14679_v22  ;;  %v5759_v17 = vmul.f32 %v8643_v11, %v14875_v31 }
 0x2a0   : > { %v5744_v3 = vmul.f32 %v8644_v14, %v14874_v12  ;;  %v4943_v7 = vadd.f32 %v4865_v0, %v4753_v44  ;;  %v4944_v46 = vadd.f32 %v4867_v2, %v4754_v54  ;;  %v5760_v16 = vmul.f32 %v8644_v14, %v14875_v31 }
 0x2a1   : > { %v12302_v43 = vmul.f32 %v14875_v31, %v12290_v50  ;;  %v5775_v26 = vrot.slane %v5759_v17, 1  ;;  %v5803_v51 = vunpack.c.l.bf16 %v5801_v1  ;;  %v5806_v10 = vmul.f32 %v8644_v14, %v14876_v52 }
 0x2a2   : > { %v12307_v38 = vmul.f32 %v14876_v52, %v12290_v50  ;;  %v4973_v25 = vmul.f32 %v14884_v56, %v4943_v7  ;;  %v4974_v13 = vmul.f32 %v14884_v56, %v4944_v46  ;;  %v5776_v34 = vrot.slane %v5760_v16, 1  ;;  %v5918_v46 = vld [vmem:[#allocation2 + $0x90] sm:$0xe] }
 0x2a3   : > { %v14675_v19 = vrot.slane %v12302_v43, 1  ;;  %v5805_v4 = vmul.f32 %v14876_v52, %v5803_v51  ;;  %v5822_v27 = vrot.slane %v5806_v10, 2  ;;  %v12314_v30 = vunpack.c.l.bf16 %v8650_v48 }
 0x2a4   : > { %v14673_v49 = vrot.slane %v12307_v38, 2  ;;  %v12317_v8 = vadd.f32 %v14885_v41, %v4973_v25  ;;  %v12320_v11 = vadd.f32 %v14885_v41, %v4974_v13  ;;  %v5777_v58 = vsel %vm3705_vm5, %v5775_v26, %v5776_v34 }
 0x2a5   : > { %v5779_v18 = vsel %vm3705_vm5, %v5776_v34, %v14675_v19  ;;  %v5795_v14 = vadd.f32 %v5777_v58, %v5743_v55  ;;  %v5821_v54 = vrot.slane %v5805_v4, 2  ;;  %v12331_v17 = vunpack.c.h.bf16 %v8650_v48  ;;  %v12349_v4 = vld [vmem:[#allocation2 + $0x38] ss:$112 sps:$4 sm:$0xff]  }
 0x2a6   : > { %v5796_v44 = vadd.f32 %v5779_v18, %v5744_v3  ;;  %v5825_v1 = vsel %vm3896_vm7, %v5822_v27, %v14673_v49  ;;  %v8311_v0 = vmul.f32 -1.442695, %v12317_v8  ;;  %v8312_v2 = vmul.f32 -1.442695, %v12320_v11 }
 0x2a7   : > { %v12334_v7 = vunpack.c.h.bf16 %v12248_v6  ;;  %v5823_v16 = vsel %vm3896_vm7, %v5821_v54, %v5822_v27  ;;  %v5860_v55 = vmul.f32 %v12314_v30, %v14877_v32  ;;  %v5876_v3 = vmul.f32 %v12314_v30, %v14878_v33  ;;  %v8658_v6 = vld [vmem:[#allocation2 + $0xa0] sm:$0xff]  }
 0x2a8   : > { %v5842_v26 = vadd.f32 %v5825_v1, %v5796_v44  ;;  %9343 = vpow2.f32 %v8311_v0  ;;  %v5841_v51 = vadd.f32 %v5823_v16, %v5795_v14  ;;  %v5861_v10 = vmul.f32 %v12331_v17, %v14877_v32 }
 0x2a9   : > { %v5877_v48 = vmul.f32 %v12331_v17, %v14878_v33  ;;  %9345 = vpow2.f32 %v8312_v2  ;;  %v12347_v25 = vmul.f32 %v14878_v33, %v12334_v7  ;;  %v5892_v13 = vrot.slane %v5876_v3, 1 }
 0x2aa   : > { %v5920_v34 = vunpack.c.l.bf16 %v5918_v46  ;;  %v5866_v27 = vadd.f32 %v5860_v55, %v5841_v51  ;;  %v5867_v58 = vadd.f32 %v5861_v10, %v5842_v26  ;;  %v5923_v14 = vmul.f32 %v12331_v17, %v14879_v40 }
 0x2ab   : > { %v5893_v18 = vrot.slane %v5877_v48, 1  ;;  %v14674_v44 = vrot.slane %v12347_v25, 1  ;;  %v12357_v1 = vmul.f32 %v14879_v40, %v12334_v7  ;;  %v12359_v0 = vunpack.c.l.bf16 %v8658_v6  ;;  %v6035_v48 = vld [vmem:[#allocation2 + $0xa0] sm:$0xe] }
 0x2ac   : > { %v5922_v54 = vmul.f32 %v14879_v40, %v5920_v34  ;;  %v5939_v46 = vrot.slane %v5923_v14, 2  ;;  %v12362_v16 = vunpack.c.h.bf16 %v8658_v6  ;;  %v12365_v26 = vunpack.c.h.bf16 %v12349_v4 }
 0x2ad   : > { %v5894_v2 = vsel %vm3705_vm5, %v5892_v13, %v5893_v18  ;;  %v5896_v55 = vsel %vm3705_vm5, %v5893_v18, %v14674_v44  ;;  %v14678_v10 = vrot.slane %v12357_v1, 2  ;;  %v5977_v49 = vmul.f32 %v12359_v0, %v14881_v24 }
 0x2ae   : > { %v5912_v3 = vadd.f32 %v5894_v2, %v5866_v27  ;;  %v5938_v51 = vrot.slane %v5922_v54, 2  ;;  %v5913_v34 = vadd.f32 %v5896_v55, %v5867_v58  ;;  %v5978_v6 = vmul.f32 %v12362_v16, %v14881_v24 }
 0x2af   : > { %v5993_v13 = vmul.f32 %v12359_v0, %v14882_v23  ;;  %v5942_v27 = vsel %vm3896_vm7, %v5939_v46, %v14678_v10  ;;  %v5994_v18 = vmul.f32 %v12362_v16, %v14882_v23  ;;  %v12385_v58 = vmul.f32 %v14882_v23, %v12365_v26 }
 0x2b0   : > { %v5940_v14 = vsel %vm3896_vm7, %v5938_v51, %v5939_v46  ;;  %v5959_v2 = vadd.f32 %v5942_v27, %v5913_v34  ;;  %v6037_v44 = vunpack.c.l.bf16 %v6035_v48  ;;  %v6040_v51 = vmul.f32 %v12362_v16, %v14883_v9  ;;  %v3619_v34 = vld [vmem:[#allocation2 + $0xc] sm:$0x1] }
 0x2b1   : > { %v5958_v54 = vadd.f32 %v5940_v14, %v5912_v3  ;;  %v6009_v55 = vrot.slane %v5993_v13, 1  ;;  %v6010_v19 = vrot.slane %v5994_v18, 1  ;;  %v14683_v29 = vrot.slane %v12385_v58, 1  ;;  %v3811_v18 = vld [vmem:[#allocation2 + $0x10] sm:$0xe] }
 0x2b2   : > { %v12392_v46 = vmul.f32 %v14883_v9, %v12365_v26  ;;  %v5984_v22 = vadd.f32 %v5978_v6, %v5959_v2  ;;  %v6039_v15 = vmul.f32 %v14883_v9, %v6037_v44  ;;  %v3573_v3 = vmul.f32 %v14874_v12, %v12190_v37 }
 0x2b3   : > { %v5983_v10 = vadd.f32 %v5977_v49, %v5958_v54  ;;  %v6011_v48 = vsel %vm3705_vm5, %v6009_v55, %v6010_v19  ;;  %v6013_v13 = vsel %vm3705_vm5, %v6010_v19, %v14683_v29  ;;  %v6056_v14 = vrot.slane %v6040_v51, 2 }
 0x2b4   : > { %14886 = vst [vmem:[#allocation49_spill] sm:$0xff] %v12392_v46  ;;  %v14685_v27 = vrot.slane %v12392_v46, 2  ;;  %v6030_v5 = vadd.f32 %v6013_v13, %v5984_v22  ;;  %v6055_v49 = vrot.slane %v6039_v15, 2  ;;  %v3574_v44 = vmul.f32 %v12194_v28, %v14874_v12 }
 0x2b5   : > { %v6029_v45 = vadd.f32 %v6011_v48, %v5983_v10  ;;  %v9344_v6 = vpop.eup %9343  ;;  %v3627_v54 = vunpack.c.l.bf16 %v3619_v34  ;;  %v3645_v2 = vmul.f32 %v12194_v28, %v14875_v31  ;;  %v12411_v19 = vmul.f32 %v12196_v62, %v14875_v31 }
 0x2b6   : > { %v6059_v37 = vsel %vm3896_vm7, %v6056_v14, %v14685_v27  ;;  %v9346_v55 = vpop.eup %9345  ;;  %v5099_v10 = vadd.f32 1.0, %v9344_v6  ;;  %v6057_v15 = vsel %vm3896_vm7, %v6055_v49, %v6056_v14  ;;  %v3819_v51 = vunpack.c.l.bf16 %v3811_v18 }
 0x2b7   : > { %v6076_v22 = vadd.f32 %v6059_v37, %v6030_v5  ;;  %v5100_v48 = vadd.f32 1.0, %v9346_v55  ;;  %v6075_v13 = vadd.f32 %v6057_v15, %v6029_v45  ;;  %v3644_v29 = vmul.f32 %v14875_v31, %v3627_v54  ;;  %v4104_v37 = vld [vmem:[#allocation2 + $0x1c] sm:$0x1] }
 0x2b8   : > { %v3713_v57 = vrot.slane %v3645_v2, 1  ;;  %9347 = vrcp.f32 %v5099_v10  ;;  %v14689_v28 = vrot.slane %v12411_v19, 1  ;;  %v3835_v27 = vmul.f32 %v14876_v52, %v3627_v54 }
 0x2b9   : > { %v6082_v34 = vmul.f32 %v14884_v56, %v6076_v22  ;;  %9349 = vrcp.f32 %v5100_v48  ;;  %v6081_v53 = vmul.f32 %v14884_v56, %v6075_v13  ;;  %v3711_v6 = vrot.slane %v3644_v29, 1 }
 0x2ba   : > { %v3836_v14 = vmul.f32 %v14876_v52, %v3819_v51  ;;  %v3715_v45 = vsel %vm3705_vm5, %v3713_v57, %v14689_v28  ;;  %v12428_v18 = vmul.f32 %v12196_v62, %v14876_v52  ;;  %v3902_v49 = vrot.slane %v3835_v27, 2 }
 0x2bb   : > { %v12421_v5 = vadd.f32 %v14885_v41, %v6082_v34  ;;  %v12431_v54 = vadd.f32 %v14885_v41, %v6081_v53  ;;  %v14887_v29 = vrot.slane %v12204_v42, 1  ;;  %v3789_v55 = vadd.f32 %v3715_v45, %v3574_v44  ;;  %v4295_v44 = vld [vmem:[#allocation2 + $0x20] sm:$0xe]  ;;  %v8727_v45 = vld [vmem:[#allocation2 + $0x30] sm:$0xff]  }
 0x2bc   : > { %v3904_v10 = vrot.slane %v3836_v14, 2  ;;  %v14888_v57 = vrot.slane %v12210_v39, 2  ;;  %v14687_v48 = vrot.slane %v12428_v18, 2  ;;  %v4058_v53 = vmul.f32 %v14877_v32, %v12212_v63 }
 0x2bd   : > { %v3712_v2 = vsel %vm3705_vm5, %v14887_v29, %v3711_v6  ;;  %v8398_v15 = vmul.f32 -1.442695, %v12421_v5  ;;  %v8397_v27 = vmul.f32 -1.442695, %v12431_v54  ;;  %v4059_v42 = vmul.f32 %v12244_v60, %v14877_v32 }
 0x2be   : > { %v3788_v22 = vadd.f32 %v3712_v2, %v3573_v3  ;;  %v3903_v51 = vsel %vm3896_vm7, %v14888_v57, %v3902_v49  ;;  %v4112_v13 = vunpack.c.l.bf16 %v4104_v37  ;;  %v3906_v3 = vsel %vm3896_vm7, %v3904_v10, %v14687_v48 }
 0x2bf   : > { %9351 = vpow2.f32 %v8398_v15  ;;  %v4130_v34 = vmul.f32 %v12244_v60, %v14878_v33  ;;  %v3980_v6 = vadd.f32 %v3906_v3, %v3789_v55  ;;  %v12454_v63 = vmul.f32 %v12253_v59, %v14878_v33 }
 0x2c0   : > { %v3979_v39 = vadd.f32 %v3903_v51, %v3788_v22  ;;  %9353 = vpow2.f32 %v8397_v27  ;;  %v4129_v14 = vmul.f32 %v14878_v33, %v4112_v13  ;;  %v4303_v29 = vunpack.c.l.bf16 %v4295_v44 }
 0x2c1   : > { %v4197_v37 = vrot.slane %v4130_v34, 1  ;;  %v4319_v2 = vmul.f32 %v14879_v40, %v4112_v13  ;;  %v4083_v15 = vadd.f32 %v4059_v42, %v3980_v6  ;;  %v14688_v22 = vrot.slane %v12454_v63, 1  ;;  %v4778_v6 = vld [vmem:[#allocation2 + $0x30] sm:$0xe] }
 0x2c2   : > { %v4082_v49 = vadd.f32 %v4058_v53, %v3979_v39  ;;  %v4195_v10 = vrot.slane %v4129_v14, 1  ;;  %v12460_v57 = vmul.f32 %v12253_v59, %v14879_v40  ;;  %v4320_v55 = vmul.f32 %v14879_v40, %v4303_v29  ;;  %v4587_v53 = vld [vmem:[#allocation2 + $0x2c] sm:$0x1] }
 0x2c3   : > { %v4385_v51 = vrot.slane %v4319_v2, 2  ;;  %v12463_v27 = vunpack.c.l.bf16 %v8727_v45  ;;  %v12465_v3 = vunpack.c.h.bf16 %v8727_v45  ;;  %v14890_v44 = vrot.slane %v12234_v47, 1 }
 0x2c4   : > { %v4199_v42 = vsel %vm3705_vm5, %v4197_v37, %v14688_v22  ;;  %v4388_v39 = vrot.slane %v12460_v57, 2  ;;  %v4541_v34 = vmul.f32 %v14881_v24, %v12256_v21  ;;  %v14891_v45 = vrot.slane %v12240_v36, 2 }
 0x2c5   : > { %14889 = vst [vmem:[#allocation50_spill] sm:$0xff] %v12463_v27  ;;  %v4196_v13 = vsel %vm3705_vm5, %v14890_v44, %v4195_v10  ;;  %v4273_v29 = vadd.f32 %v4199_v42, %v4083_v15  ;;  %v4387_v48 = vrot.slane %v4320_v55, 2  ;;  %v9348_v47 = vpop.eup %9347  ;;  %v4542_v10 = vmul.f32 %v12463_v27, %v14881_v24 }
 0x2c6   : > { %v4272_v14 = vadd.f32 %v4196_v13, %v4082_v49  ;;  %v4386_v2 = vsel %vm3896_vm7, %v14891_v45, %v4385_v51  ;;  %v4595_v44 = vunpack.c.l.bf16 %v4587_v53  ;;  %v4613_v37 = vmul.f32 %v12463_v27, %v14882_v23  ;;  %v9350_v21 = vpop.eup %9349 }
 0x2c7   : > { %v12485_v22 = vmul.f32 %v12465_v3, %v14882_v23  ;;  %v5171_v49 = vmul.f32 %v9348_v47, %v12317_v8  ;;  %v4389_v36 = vsel %vm3896_vm7, %v4387_v48, %v4388_v39  ;;  %v4786_v55 = vunpack.c.l.bf16 %v4778_v6 }
 0x2c8   : > { %v4462_v15 = vadd.f32 %v4386_v2, %v4272_v14  ;;  %v5172_v51 = vmul.f32 %v9350_v21, %v12320_v11  ;;  %v4463_v13 = vadd.f32 %v4389_v36, %v4273_v29  ;;  %v4612_v53 = vmul.f32 %v14882_v23, %v4595_v44  ;;  %v3620_v29 = vld [vmem:[#allocation2 + $0x1c] sm:$0x1] }
 0x2c9   : > { %v4680_v42 = vrot.slane %v4613_v37, 1  ;;  %v4681_v28 = vrot.slane %v12485_v22, 1  ;;  %v4802_v27 = vmul.f32 %v14883_v9, %v4595_v44  ;;  %v4803_v60 = vmul.f32 %v14883_v9, %v4786_v55 }
 0x2ca   : > { %v4565_v45 = vadd.f32 %v4541_v34, %v4462_v15  ;;  %v5195_v8 = vpack.c.bf16 %v5172_v51, %v5171_v49  ;;  %v4566_v47 = vadd.f32 %v4542_v10, %v4463_v13  ;;  %v4678_v46 = vrot.slane %v4612_v53, 1  ;;  %v12519_v53 = vld [vmem:[#allocation2 + $0x28] ss:$16 sps:$4 sm:$0xff]  }
 0x2cb   : > { %v12498_v48 = vmul.f32 %v12465_v3, %v14883_v9  ;;  %v4682_v11 = vsel %vm3705_vm5, %v4680_v42, %v4681_v28  ;;  %v4868_v6 = vrot.slane %v4802_v27, 2  ;;  %v4870_v14 = vrot.slane %v4803_v60, 2 }
 0x2cc   : > { %v3546_v34 = vunpack.c.l.bf16 %v12282_v20  ;;  %v9352_v2 = vpop.eup %9351  ;;  %8844 = vmatprep.mubr.msk.bf16.mxu1 %vm1830_vm1, %v5195_v8  ;;  %v14892_v44 = vrot.slane %v12272_v35, 1  ;;  %v4756_v37 = vadd.f32 %v4682_v11, %v4566_v47  ;;  %v3575_v49 = vmul.f32 %v12196_v62, %v14874_v12 }
 0x2cd   : > { %v4871_v21 = vrot.slane %v12498_v48, 2  ;;  %v9354_v36 = vpop.eup %9353  ;;  %v6112_v15 = vadd.f32 1.0, %v9352_v2  ;;  %v14893_v60 = vrot.slane %v12280_v61, 2  ;;  %v4105_v2 = vld [vmem:[#allocation2 + $0x2c] sm:$0x1]  ;;  %v5763_v22 = vmul.f32 %v12314_v30, %v14875_v31 }
 0x2ce   : > { %v4679_v10 = vsel %vm3705_vm5, %v14892_v44, %v4678_v46  ;;  %v3576_v55 = vmul.f32 %v14874_v12, %v3546_v34  ;;  %v6111_v51 = vadd.f32 1.0, %v9354_v36  ;;  %v3628_v46 = vunpack.c.l.bf16 %v3620_v29 }
 0x2cf   : > { %v4755_v27 = vadd.f32 %v4679_v10, %v4565_v45  ;;  %v4869_v20 = vsel %vm3896_vm7, %v14893_v60, %v4868_v6  ;;  %v4872_v35 = vsel %vm3896_vm7, %v4870_v14, %v4871_v21  ;;  %v3647_v13 = vmul.f32 %v14875_v31, %v3546_v34 }
 0x2d0   : > { %9355 = vrcp.f32 %v6112_v15  ;;  %v4946_v42 = vadd.f32 %v4872_v35, %v4756_v37  ;;  %v3838_v45 = vmul.f32 %v14876_v52, %v3546_v34  ;;  %v3648_v61 = vmul.f32 %v14875_v31, %v3628_v46 }
 0x2d1   : > { %v4945_v62 = vadd.f32 %v4869_v20, %v4755_v27  ;;  %9357 = vrcp.f32 %v6111_v51  ;;  %v3716_v8 = vrot.slane %v3647_v13, 1  ;;  %v3839_v47 = vmul.f32 %v14876_v52, %v3628_v46 }
 0x2d2   : > { %v4976_v6 = vmul.f32 %v14884_v56, %v4946_v42  ;;  %v3907_v14 = vrot.slane %v3838_v45, 2  ;;  %v4031_v29 = vunpack.c.l.bf16 %v12519_v53  ;;  %v14894_v44 = vrot.slane %v12411_v19, 1 }
 0x2d3   : > { %v4975_v11 = vmul.f32 %v14884_v56, %v4945_v62  ;;  %v3718_v37 = vrot.slane %v3648_v61, 1  ;;  %v3909_v34 = vrot.slane %v3839_v47, 2  ;;  %v4060_v36 = vmul.f32 %v12253_v59, %v14877_v32 }
 0x2d4   : > { %v3717_v10 = vsel %vm3705_vm5, %v14894_v44, %v3716_v8  ;;  %v12536_v27 = vadd.f32 %v14885_v41, %v4976_v6  ;;  %v14895_v20 = vrot.slane %v12428_v18, 2  ;;  %v4061_v46 = vmul.f32 %v14877_v32, %v4031_v29 }
 0x2d5   : > { %v12533_v15 = vadd.f32 %v14885_v41, %v4975_v11  ;;  %v3790_v60 = vadd.f32 %v3717_v10, %v3575_v49  ;;  %v3719_v19 = vsel %vm3705_vm5, %v3716_v8, %v3718_v37  ;;  %v3910_v35 = vsel %vm3896_vm7, %v3907_v14, %v3909_v34 }
 0x2d6   : > { %v3908_v51 = vsel %vm3896_vm7, %v14895_v20, %v3907_v14  ;;  %v4113_v13 = vunpack.c.l.bf16 %v4105_v2  ;;  %v8314_v42 = vmul.f32 -1.442695, %v12536_v27  ;;  %v3791_v45 = vadd.f32 %v3719_v19, %v3576_v55  ;;  %v4588_v2 = vld [vmem:[#allocation2 + $0x3c] sm:$0x1] }
 0x2d7   : > { %v8313_v62 = vmul.f32 -1.442695, %v12533_v15  ;;  %v3981_v61 = vadd.f32 %v3908_v51, %v3790_v60  ;;  %v4132_v47 = vmul.f32 %v14878_v33, %v4031_v29  ;;  %v4322_v18 = vmul.f32 %v14879_v40, %v4031_v29 }
 0x2d8   : > { %v4133_v49 = vmul.f32 %v14878_v33, %v4113_v13  ;;  %v4323_v11 = vmul.f32 %v14879_v40, %v4113_v13  ;;  %v3982_v8 = vadd.f32 %v3910_v35, %v3791_v45  ;;  %v4514_v14 = vunpack.c.l.bf16 %v12349_v4 }
 0x2d9   : > { %9359 = vpow2.f32 %v8313_v62  ;;  %v4084_v6 = vadd.f32 %v4060_v36, %v3981_v61  ;;  %v4200_v44 = vrot.slane %v4132_v47, 1  ;;  %v4390_v37 = vrot.slane %v4322_v18, 2 }
 0x2da   : > { %9361 = vpow2.f32 %v8314_v42  ;;  %v4202_v10 = vrot.slane %v4133_v49, 1  ;;  %v4085_v55 = vadd.f32 %v4061_v46, %v3982_v8  ;;  %v4392_v34 = vrot.slane %v4323_v11, 2 }
 0x2db   : > { %v4543_v60 = vmul.f32 %v12465_v3, %v14881_v24  ;;  %v4544_v20 = vmul.f32 %v14881_v24, %v4514_v14  ;;  %v14896_v29 = vrot.slane %v12454_v63, 1  ;;  %v4391_v4 = vsel %vm3896_vm7, %v4388_v39, %v4390_v37 }
 0x2dc   : > { %v4203_v36 = vsel %vm3705_vm5, %v4200_v44, %v4202_v10  ;;  %v4596_v19 = vunpack.c.l.bf16 %v4588_v2  ;;  %v4393_v46 = vsel %vm3896_vm7, %v4390_v37, %v4392_v34  ;;  %v4615_v62 = vmul.f32 %v14882_v23, %v4514_v14  ;;  %v5755_v10 = vld [vmem:[#allocation2 + $0x8c] sm:$0x1]  ;;  %v5802_v34 = vld [vmem:[#allocation2 + $0x90] sm:$0xe] }
 0x2dd   : > { %v4201_v51 = vsel %vm3705_vm5, %v14896_v29, %v4200_v44  ;;  %v4275_v13 = vadd.f32 %v4203_v36, %v4085_v55  ;;  %v9356_v42 = vpop.eup %9355  ;;  %v4805_v63 = vmul.f32 %v14883_v9, %v4514_v14  ;;  %v5745_v47 = vmul.f32 %v14874_v12, %v12290_v50 }
 0x2de   : > { %v4274_v35 = vadd.f32 %v4201_v51, %v4084_v6  ;;  %v4616_v45 = vmul.f32 %v14882_v23, %v4596_v19  ;;  %v4806_v61 = vmul.f32 %v14883_v9, %v4596_v19  ;;  %v9358_v57 = vpop.eup %9357  ;;  %v6130_v39 = vmul.f32 %v9356_v42, %v12421_v5 }
 0x2df   : > { %v4465_v18 = vadd.f32 %v4393_v46, %v4275_v13  ;;  %v4683_v11 = vrot.slane %v4615_v62, 1  ;;  %v6129_v8 = vmul.f32 %v9358_v57, %v12431_v54  ;;  %v4873_v2 = vrot.slane %v4805_v63, 2 }
 0x2e0   : > { %v4464_v49 = vadd.f32 %v4391_v4, %v4274_v35  ;;  %v4685_v6 = vrot.slane %v4616_v45, 1  ;;  %v4875_v44 = vrot.slane %v4806_v61, 2  ;;  %v5746_v50 = vmul.f32 %v12314_v30, %v14874_v12 }
 0x2e1   : > { %v4568_v55 = vadd.f32 %v4544_v20, %v4465_v18  ;;  %v4684_v14 = vsel %vm3705_vm5, %v4681_v28, %v4683_v11  ;;  %v6135_v5 = vpack.c.bf16 %v6130_v39, %v6129_v8  ;;  %v4874_v54 = vsel %vm3896_vm7, %v4871_v21, %v4873_v2 }
 0x2e2   : > { %v4567_v37 = vadd.f32 %v4543_v60, %v4464_v49  ;;  %v4686_v29 = vsel %vm3705_vm5, %v4683_v11, %v4685_v6  ;;  %v4876_v51 = vsel %vm3896_vm7, %v4873_v2, %v4875_v44  ;;  %v5757_v20 = vunpack.c.l.bf16 %v5755_v10 }
 0x2e3   : > { %v4758_v60 = vadd.f32 %v4686_v29, %v4568_v55  ;;  %8871 = vmatmul.mubr.msk.bf16.vlgmr.msra.gmra.mxu0 %vm1830_vm1, %v6135_v5  ;;  %v12585_v28 = vmul.f32 %v12331_v17, %v14875_v31  ;;  %v5804_v4 = vunpack.c.l.bf16 %v5802_v34  ;;  %v12589_v48 = vmul.f32 %v12331_v17, %v14876_v52 }
 0x2e4   : > { %v4757_v36 = vadd.f32 %v4684_v14, %v4567_v37  ;;  %v5862_v21 = vmul.f32 %v14877_v32, %v12334_v7  ;;  %v14897_v19 = vmov 0.0   ;;  %v5762_v30 = vmul.f32 %v14875_v31, %v5757_v20  ;;  %v5872_v14 = vld [vmem:[#allocation2 + $0x9c] sm:$0x1] }
 0x2e5   : > { %8874 = vmatprep.mubr.msk.bf16.mxu0 %vm9693_vm6, %v14897_v19  ;;  %v4948_v13 = vadd.f32 %v4876_v51, %v4758_v60  ;;  %v5782_v46 = vrot.slane %v5763_v22, 1  ;;  %v14700_v42 = vrot.slane %v12585_v28, 1  ;;  %v5808_v45 = vmul.f32 %v14876_v52, %v5757_v20  ;;  %v5919_v51 = vld [vmem:[#allocation2 + $0xa0] sm:$0xe] }
 0x2e6   : > { %v4947_v35 = vadd.f32 %v4874_v54, %v4757_v36  ;;  %v9360_v62 = vpop.eup %9359  ;;  %v5809_v63 = vmul.f32 %v14876_v52, %v5804_v4  ;;  %v14699_v61 = vrot.slane %v12589_v48, 2  ;;  %v5780_v18 = vrot.slane %v5762_v30, 1  ;;  %v8736_v30 = vld [vmem:[#allocation2 + $0xb0] sm:$0xff]  }
 0x2e7   : > { %v9362_v57 = vpop.eup %9361  ;;  %v5101_v39 = vadd.f32 1.0, %v9360_v62  ;;  %v4978_v49 = vmul.f32 %v14884_v56, %v4948_v13  ;;  %v5784_v8 = vsel %vm3705_vm5, %v5782_v46, %v14700_v42  ;;  %v5826_v6 = vrot.slane %v5808_v45, 2 }
 0x2e8   : > { %v4977_v7 = vmul.f32 %v14884_v56, %v4947_v35  ;;  %v5102_v11 = vadd.f32 1.0, %v9362_v57  ;;  %v5828_v2 = vrot.slane %v5809_v63, 2  ;;  %v14898_v37 = vrot.slane %v12302_v43, 1 }
 0x2e9   : > { %9363 = vrcp.f32 %v5101_v39  ;;  %v12609_v10 = vadd.f32 %v14885_v41, %v4978_v49  ;;  %v5798_v5 = vadd.f32 %v5784_v8, %v5746_v50  ;;  %v14899_v29 = vrot.slane %v12307_v38, 2 }
 0x2ea   : > { %v12606_v44 = vadd.f32 %v14885_v41, %v4977_v7  ;;  %v5781_v55 = vsel %vm3705_vm5, %v14898_v37, %v5780_v18  ;;  %9365 = vrcp.f32 %v5102_v11  ;;  %v5830_v20 = vsel %vm3896_vm7, %v5828_v2, %v14699_v61  ;;  %v5989_v7 = vld [vmem:[#allocation2 + $0xac] sm:$0x1] }
 0x2eb   : > { %v5797_v34 = vadd.f32 %v5781_v55, %v5745_v47  ;;  %v5827_v54 = vsel %vm3896_vm7, %v14899_v29, %v5826_v6  ;;  %v8316_v60 = vmul.f32 -1.442695, %v12609_v10  ;;  %v5863_v43 = vmul.f32 %v12359_v0, %v14877_v32  ;;  %v6036_v55 = vld [vmem:[#allocation2 + $0xb0] sm:$0xe] }
 0x2ec   : > { %v8315_v36 = vmul.f32 -1.442695, %v12606_v44  ;;  %v5844_v4 = vadd.f32 %v5830_v20, %v5798_v5  ;;  %v5874_v47 = vunpack.c.l.bf16 %v5872_v14  ;;  %v5880_v38 = vmul.f32 %v12359_v0, %v14878_v33 }
 0x2ed   : > { %v5843_v22 = vadd.f32 %v5827_v54, %v5797_v34  ;;  %v12628_v50 = vmul.f32 %v12362_v16, %v14878_v33  ;;  %v5921_v35 = vunpack.c.l.bf16 %v5919_v51  ;;  %v12632_v13 = vmul.f32 %v12362_v16, %v14879_v40 }
 0x2ee   : > { %9367 = vpow2.f32 %v8315_v36  ;;  %v5869_v62 = vadd.f32 %v5863_v43, %v5844_v4  ;;  %v5879_v45 = vmul.f32 %v14878_v33, %v5874_v47  ;;  %v5899_v63 = vrot.slane %v5880_v38, 1 }
 0x2ef   : > { %9369 = vpow2.f32 %v8316_v60  ;;  %v5868_v46 = vadd.f32 %v5862_v21, %v5843_v22  ;;  %v14698_v57 = vrot.slane %v12628_v50, 1  ;;  %v5925_v0 = vmul.f32 %v14879_v40, %v5874_v47 }
 0x2f0   : > { %v5926_v39 = vmul.f32 %v14879_v40, %v5921_v35  ;;  %v5897_v49 = vrot.slane %v5879_v45, 1  ;;  %v14697_v18 = vrot.slane %v12632_v13, 2  ;;  %v8663_v11 = vunpack.c.l.bf16 %v8736_v30 }
 0x2f1   : > { %v12639_v8 = vunpack.c.h.bf16 %v8736_v30  ;;  %v5901_v21 = vsel %vm3705_vm5, %v5899_v63, %v14698_v57  ;;  %v5943_v6 = vrot.slane %v5925_v0, 2  ;;  %v5979_v37 = vmul.f32 %v14881_v24, %v12365_v26  ;;  %v12669_v0 = vld [vmem:[#allocation2 + $0x28] ss:$112 sps:$4 sm:$0xff]  }
 0x2f2   : > { %v5945_v2 = vrot.slane %v5926_v39, 2  ;;  %v14900_v14 = vrot.slane %v12347_v25, 1  ;;  %v5915_v5 = vadd.f32 %v5901_v21, %v5869_v62  ;;  %v5980_v29 = vmul.f32 %v8663_v11, %v14881_v24 }
 0x2f3   : > { %v5991_v54 = vunpack.c.l.bf16 %v5989_v7  ;;  %v14901_v36 = vrot.slane %v12357_v1, 2  ;;  %v5997_v26 = vmul.f32 %v8663_v11, %v14882_v23  ;;  %v12660_v22 = vmul.f32 %v12639_v8, %v14882_v23 }
 0x2f4   : > { %v5898_v34 = vsel %vm3705_vm5, %v14900_v14, %v5897_v49  ;;  %v5947_v20 = vsel %vm3896_vm7, %v5945_v2, %v14697_v18  ;;  %v6038_v4 = vunpack.c.l.bf16 %v6036_v55  ;;  %v12665_v35 = vmul.f32 %v12639_v8, %v14883_v9 }
 0x2f5   : > { %v5914_v51 = vadd.f32 %v5898_v34, %v5868_v46  ;;  %v5944_v60 = vsel %vm3896_vm7, %v14901_v36, %v5943_v6  ;;  %v5961_v43 = vadd.f32 %v5947_v20, %v5915_v5  ;;  %v5996_v25 = vmul.f32 %v14882_v23, %v5991_v54  ;;  %v3812_v36 = vld [vmem:[#allocation2 + $0x20] sm:$0xe]  ;;  %v14905_v20 = vld [vmem:[#allocation48_spill] sm:$0xff] }
 0x2f6   : > { %v6016_v38 = vrot.slane %v5997_v26, 1  ;;  %v6042_v1 = vmul.f32 %v14883_v9, %v5991_v54  ;;  %v9364_v30 = vpop.eup %9363  ;;  %v14696_v45 = vrot.slane %v12660_v22, 1  ;;  %v6043_v63 = vmul.f32 %v14883_v9, %v6038_v4  ;;  %v14903_v54 = vld [vmem:[#allocation49_spill] sm:$0xff] }
 0x2f7   : > { %v5960_v47 = vadd.f32 %v5944_v60, %v5914_v51  ;;  %v5986_v46 = vadd.f32 %v5980_v29, %v5961_v43  ;;  %v6014_v62 = vrot.slane %v5996_v25, 1  ;;  %v9366_v39 = vpop.eup %9365  ;;  %v5173_v7 = vmul.f32 %v9364_v30, %v12533_v15 }
 0x2f8   : > { %v6060_v11 = vrot.slane %v6042_v1, 2  ;;  %v14695_v21 = vrot.slane %v12665_v35, 2  ;;  %v5174_v6 = vmul.f32 %v9366_v39, %v12536_v27  ;;  %v14902_v2 = vrot.slane %v12385_v58, 1 }
 0x2f9   : > { %v5985_v49 = vadd.f32 %v5979_v37, %v5960_v47  ;;  %v6018_v14 = vsel %vm3705_vm5, %v6016_v38, %v14696_v45  ;;  %v6062_v34 = vrot.slane %v6043_v63, 2  ;;  %v14904_v51 = vrot.slane %v14903_v54, 2 }
 0x2fa   : > { %v6015_v55 = vsel %vm3705_vm5, %v14902_v2, %v6014_v62  ;;  %v6032_v29 = vadd.f32 %v6018_v14, %v5986_v46  ;;  %v12684_v37 = vunpack.c.l.bf16 %v12669_v0  ;;  %v5196_v60 = vpack.c.bf16 %v5174_v6, %v5173_v7 }
 0x2fb   : > { %v6031_v5 = vadd.f32 %v6015_v55, %v5985_v49  ;;  %v6061_v15 = vsel %vm3896_vm7, %v14904_v51, %v6060_v11  ;;  %v9368_v27 = vpop.eup %9367  ;;  %v6064_v58 = vsel %vm3896_vm7, %v6062_v34, %v14695_v21  ;;  %v3577_v26 = vmul.f32 %v14905_v20, %v14874_v12 }
 0x2fc   : > { %v3578_v43 = vmul.f32 %v12253_v59, %v14874_v12  ;;  %v9370_v25 = vpop.eup %9369  ;;  %v5103_v4 = vadd.f32 1.0, %v9368_v27  ;;  %v6078_v38 = vadd.f32 %v6064_v58, %v6032_v29  ;;  %v3649_v1 = vmul.f32 %v14905_v20, %v14875_v31  ;;  %8845 = vmatmul.mubr.msk.bf16.vlgmr.msra.gmra.mxu1 %vm1830_vm1, %v5196_v60  ;;  %v4296_v58 = vld [vmem:[#allocation2 + $0x30] sm:$0xe] }
 0x2fd   : > { %v6077_v47 = vadd.f32 %v6061_v15, %v6031_v5  ;;  %v5104_v30 = vadd.f32 1.0, %v9370_v25  ;;  %v3650_v46 = vmul.f32 %v12253_v59, %v14875_v31  ;;  %v12700_v62 = vmul.f32 %v14875_v31, %v12684_v37 }
 0x2fe   : > { %v3820_v63 = vunpack.c.l.bf16 %v3812_v36  ;;  %9371 = vrcp.f32 %v5103_v4  ;;  %v6084_v7 = vmul.f32 %v14884_v56, %v6078_v38  ;;  %v3720_v49 = vrot.slane %v3649_v1, 1  ;;  %v14906_v4 = vld [vmem:[#allocation50_spill] sm:$0xff] }
 0x2ff   : > { %v6083_v39 = vmul.f32 %v14884_v56, %v6077_v47  ;;  %9373 = vrcp.f32 %v5104_v30  ;;  %v3721_v11 = vrot.slane %v3650_v46, 1  ;;  %v3723_v6 = vrot.slane %v12700_v62, 1 }
 0x300   : > { %v3840_v2 = vmul.f32 %v14876_v52, %v3820_v63  ;;  %v12710_v14 = vadd.f32 %v14885_v41, %v6084_v7  ;;  %v3841_v34 = vmul.f32 %v12253_v59, %v14876_v52  ;;  %v12716_v5 = vmul.f32 %v14876_v52, %v12684_v37  ;;  %v8728_v63 = vld [vmem:[#allocation2 + $0x40] sm:$0xff]  }
 0x301   : > { %v12707_v55 = vadd.f32 %v14885_v41, %v6083_v39  ;;  %v3722_v29 = vsel %vm3705_vm5, %v3720_v49, %v3721_v11  ;;  %v3724_v54 = vsel %vm3705_vm5, %v3721_v11, %v3723_v6  ;;  %v12723_v15 = vunpack.c.h.bf16 %v12519_v53 }
 0x302   : > { %v3911_v51 = vrot.slane %v3840_v2, 2  ;;  %v8400_v27 = vmul.f32 -1.442695, %v12710_v14  ;;  %v3792_v60 = vadd.f32 %v3722_v29, %v3577_v26  ;;  %v3793_v59 = vadd.f32 %v3724_v54, %v3578_v43 }
 0x303   : > { %v8399_v36 = vmul.f32 -1.442695, %v12707_v55  ;;  %v3912_v20 = vrot.slane %v3841_v34, 2  ;;  %v3914_v25 = vrot.slane %v12716_v5, 2  ;;  %v4062_v47 = vmul.f32 %v14906_v4, %v14877_v32 }
 0x304   : > { %v4063_v38 = vmul.f32 %v12465_v3, %v14877_v32  ;;  %v4134_v53 = vmul.f32 %v14906_v4, %v14878_v33  ;;  %v4135_v1 = vmul.f32 %v12465_v3, %v14878_v33  ;;  %v12738_v26 = vmul.f32 %v14878_v33, %v12723_v15 }
 0x305   : > { %9375 = vpow2.f32 %v8399_v36  ;;  %v3913_v43 = vsel %vm3896_vm7, %v3911_v51, %v3912_v20  ;;  %v3915_v30 = vsel %vm3896_vm7, %v3912_v20, %v3914_v25  ;;  %v4304_v46 = vunpack.c.l.bf16 %v4296_v58  ;;  %v12752_v51 = vld [vmem:[#allocation2 + $0x48] ss:$112 sps:$4 sm:$0xff]  }
 0x306   : > { %9377 = vpow2.f32 %v8400_v27  ;;  %v3983_v39 = vadd.f32 %v3913_v43, %v3792_v60  ;;  %v3984_v7 = vadd.f32 %v3915_v30, %v3793_v59  ;;  %v4204_v49 = vrot.slane %v4134_v53, 1 }
 0x307   : > { %v4205_v11 = vrot.slane %v4135_v1, 1  ;;  %v4207_v2 = vrot.slane %v12738_v26, 1  ;;  %v4324_v34 = vmul.f32 %v14879_v40, %v4304_v46  ;;  %v4325_v29 = vmul.f32 %v12465_v3, %v14879_v40 }
 0x308   : > { %v12750_v54 = vmul.f32 %v14879_v40, %v12723_v15  ;;  %v4086_v36 = vadd.f32 %v4062_v47, %v3983_v39  ;;  %v4087_v27 = vadd.f32 %v4063_v38, %v3984_v7  ;;  %v12755_v59 = vunpack.c.l.bf16 %v8728_v63 }
 0x309   : > { %v4206_v60 = vsel %vm3705_vm5, %v4204_v49, %v4205_v11  ;;  %v4208_v58 = vsel %vm3705_vm5, %v4205_v11, %v4207_v2  ;;  %v4394_v20 = vrot.slane %v4324_v34, 2  ;;  %v4395_v53 = vrot.slane %v4325_v29, 2  ;;  %v4779_v11 = vld [vmem:[#allocation2 + $0x40] sm:$0xe] }
 0x30a   : > { %v14701_v1 = vrot.slane %v12750_v54, 2  ;;  %v4276_v43 = vadd.f32 %v4206_v60, %v4086_v36  ;;  %v4277_v30 = vadd.f32 %v4208_v58, %v4087_v27  ;;  %v12761_v46 = vunpack.c.h.bf16 %v8728_v63 }
 0x30b   : > { %v12764_v21 = vunpack.c.l.bf16 %v12752_v51  ;;  %v9372_v47 = vpop.eup %9371  ;;  %v4396_v38 = vsel %vm3896_vm7, %v4394_v20, %v4395_v53  ;;  %v4545_v7 = vmul.f32 %v12755_v59, %v14881_v24  ;;  %v4617_v49 = vmul.f32 %v12755_v59, %v14882_v23 }
 0x30c   : > { %v4398_v39 = vsel %vm3896_vm7, %v4395_v53, %v14701_v1  ;;  %v9374_v34 = vpop.eup %9373  ;;  %v5175_v63 = vmul.f32 %v9372_v47, %v12606_v44  ;;  %v4466_v29 = vadd.f32 %v4396_v38, %v4276_v43  ;;  %v4546_v27 = vmul.f32 %v12761_v46, %v14881_v24  ;;  %v3621_v43 = vld [vmem:[#allocation2 + $0x2c] sm:$0x1]  ;;  %v3813_v1 = vld [vmem:[#allocation2 + $0x30] sm:$0xe] }
 0x30d   : > { %v4467_v36 = vadd.f32 %v4398_v39, %v4277_v30  ;;  %v5176_v60 = vmul.f32 %v9374_v34, %v12609_v10  ;;  %v4618_v58 = vmul.f32 %v12761_v46, %v14882_v23  ;;  %v12782_v20 = vmul.f32 %v14882_v23, %v12764_v21 }
 0x30e   : > { %v4687_v53 = vrot.slane %v4617_v49, 1  ;;  %v4569_v45 = vadd.f32 %v4545_v7, %v4466_v29  ;;  %v4787_v57 = vunpack.c.l.bf16 %v4779_v11  ;;  %v4808_v44 = vmul.f32 %v12761_v46, %v14883_v9 }
 0x30f   : > { %v4570_v18 = vadd.f32 %v4546_v27, %v4467_v36  ;;  %v5197_v30 = vpack.c.bf16 %v5176_v60, %v5175_v63  ;;  %v4688_v47 = vrot.slane %v4618_v58, 1  ;;  %v4690_v38 = vrot.slane %v12782_v20, 1 }
 0x310   : > { %v12789_v10 = vmul.f32 %v14883_v9, %v12764_v21  ;;  %v4807_v39 = vmul.f32 %v14883_v9, %v4787_v57  ;;  %v4878_v34 = vrot.slane %v4808_v44, 2  ;;  %v3579_v7 = vmul.f32 %v14874_v12, %v12684_v37 }
 0x311   : > { %v3580_v49 = vmul.f32 %v14906_v4, %v14874_v12  ;;  %8848 = vmatprep.mubr.msk.bf16.mxu1 %vm1830_vm1, %v5197_v30  ;;  %v4689_v63 = vsel %vm3705_vm5, %v4687_v53, %v4688_v47  ;;  %v4691_v29 = vsel %vm3705_vm5, %v4688_v47, %v4690_v38  ;;  %v3629_v27 = vunpack.c.l.bf16 %v3621_v43 }
 0x312   : > { %v9376_v11 = vpop.eup %9375  ;;  %v14703_v36 = vrot.slane %v12789_v10, 2  ;;  %v4759_v58 = vadd.f32 %v4689_v63, %v4569_v45  ;;  %v4760_v44 = vadd.f32 %v4691_v29, %v4570_v18  ;;  %v4877_v37 = vrot.slane %v4807_v39, 2 }
 0x313   : > { %v9378_v57 = vpop.eup %9377  ;;  %v6113_v60 = vadd.f32 1.0, %v9376_v11  ;;  %v3652_v30 = vmul.f32 %v14875_v31, %v3629_v27  ;;  %v3653_v53 = vmul.f32 %v14906_v4, %v14875_v31  ;;  %v12811_v45 = vmul.f32 %v12465_v3, %v14875_v31 }
 0x314   : > { %v6114_v61 = vadd.f32 1.0, %v9378_v57  ;;  %v4881_v42 = vsel %vm3896_vm7, %v4878_v34, %v14703_v36  ;;  %v4879_v47 = vsel %vm3896_vm7, %v4877_v37, %v4878_v34  ;;  %v3821_v57 = vunpack.c.l.bf16 %v3813_v1 }
 0x315   : > { %9379 = vrcp.f32 %v6113_v60  ;;  %v4950_v43 = vadd.f32 %v4881_v42, %v4760_v44  ;;  %v4949_v18 = vadd.f32 %v4879_v47, %v4759_v58  ;;  %v3725_v39 = vrot.slane %v3652_v30, 1  ;;  %v4106_v58 = vld [vmem:[#allocation2 + $0x3c] sm:$0x1] }
 0x316   : > { %9381 = vrcp.f32 %v6114_v61  ;;  %v3727_v11 = vrot.slane %v3653_v53, 1  ;;  %v14702_v29 = vrot.slane %v12811_v45, 1  ;;  %v3843_v4 = vmul.f32 %v14876_v52, %v3629_v27 }
 0x317   : > { %v4980_v63 = vmul.f32 %v14884_v56, %v4950_v43  ;;  %v4979_v60 = vmul.f32 %v14884_v56, %v4949_v18  ;;  %v3726_v42 = vsel %vm3705_vm5, %v3723_v6, %v3725_v39  ;;  %v12822_v34 = vmul.f32 %v12465_v3, %v14876_v52 }
 0x318   : > { %v4064_v61 = vmul.f32 %v14877_v32, %v12723_v15  ;;  %v3729_v1 = vsel %vm3705_vm5, %v3727_v11, %v14702_v29  ;;  %v3794_v27 = vadd.f32 %v3726_v42, %v3579_v7  ;;  %v3844_v62 = vmul.f32 %v14876_v52, %v3821_v57  ;;  %v8729_v42 = vld [vmem:[#allocation2 + $0x50] sm:$0xff]  }
 0x319   : > { %v12827_v44 = vadd.f32 %v14885_v41, %v4980_v63  ;;  %v12834_v6 = vadd.f32 %v14885_v41, %v4979_v60  ;;  %v3795_v37 = vadd.f32 %v3729_v1, %v3580_v49  ;;  %v3916_v30 = vrot.slane %v3843_v4, 2  ;;  %v4297_v63 = vld [vmem:[#allocation2 + $0x40] sm:$0xe] }
 0x31a   : > { %v3919_v53 = vrot.slane %v12822_v34, 2  ;;  %v3918_v47 = vrot.slane %v3844_v62, 2  ;;  %v4065_v43 = vmul.f32 %v12755_v59, %v14877_v32  ;;  %v4114_v18 = vunpack.c.l.bf16 %v4106_v58 }
 0x31b   : > { %v8318_v15 = vmul.f32 -1.442695, %v12827_v44  ;;  %v8317_v39 = vmul.f32 -1.442695, %v12834_v6  ;;  %v3917_v7 = vsel %vm3896_vm7, %v3914_v25, %v3916_v30  ;;  %v4138_v11 = vmul.f32 %v12755_v59, %v14878_v33 }
 0x31c   : > { %v12848_v49 = vmul.f32 %v12761_v46, %v14878_v33  ;;  %v3920_v57 = vsel %vm3896_vm7, %v3918_v47, %v3919_v53  ;;  %v3985_v4 = vadd.f32 %v3917_v7, %v3794_v27  ;;  %v4137_v60 = vmul.f32 %v14878_v33, %v4114_v18 }
 0x31d   : > { %9383 = vpow2.f32 %v8318_v15  ;;  %v3986_v5 = vadd.f32 %v3920_v57, %v3795_v37  ;;  %v4211_v25 = vrot.slane %v4138_v11, 1  ;;  %v4305_v30 = vunpack.c.l.bf16 %v4297_v63 }
 0x31e   : > { %9385 = vpow2.f32 %v8317_v39  ;;  %v4212_v58 = vrot.slane %v12848_v49, 1  ;;  %v4088_v1 = vadd.f32 %v4064_v61, %v3985_v4  ;;  %v4209_v62 = vrot.slane %v4137_v60, 1  ;;  %v4780_v60 = vld [vmem:[#allocation2 + $0x50] sm:$0xe] }
 0x31f   : > { %v4327_v29 = vmul.f32 %v14879_v40, %v4114_v18  ;;  %v4089_v36 = vadd.f32 %v4065_v43, %v3986_v5  ;;  %v12861_v27 = vmul.f32 %v12761_v46, %v14879_v40  ;;  %v12863_v47 = vunpack.c.l.bf16 %v8729_v42  ;;  %v4589_v43 = vld [vmem:[#allocation2 + $0x4c] sm:$0x1] }
 0x320   : > { %v4213_v15 = vsel %vm3705_vm5, %v4211_v25, %v4212_v58  ;;  %v4210_v37 = vsel %vm3705_vm5, %v4207_v2, %v4209_v62  ;;  %v4328_v61 = vmul.f32 %v14879_v40, %v4305_v30  ;;  %v12869_v7 = vunpack.c.h.bf16 %v8729_v42 }
 0x321   : > { %v4399_v39 = vrot.slane %v4327_v29, 2  ;;  %v4278_v11 = vadd.f32 %v4210_v37, %v4088_v1  ;;  %v4279_v63 = vadd.f32 %v4213_v15, %v4089_v36  ;;  %v4402_v57 = vrot.slane %v12861_v27, 2 }
 0x322   : > { %v9380_v18 = vpop.eup %9379  ;;  %v4547_v4 = vmul.f32 %v14881_v24, %v12764_v21  ;;  %v14907_v2 = vrot.slane %v12750_v54, 2  ;;  %v4401_v29 = vrot.slane %v4328_v61, 2  ;;  %v4548_v42 = vmul.f32 %v12863_v47, %v14881_v24 }
 0x323   : > { %v9382_v5 = vpop.eup %9381  ;;  %v6131_v26 = vmul.f32 %v9380_v18, %v12707_v55  ;;  %v4597_v62 = vunpack.c.l.bf16 %v4589_v43  ;;  %v4621_v30 = vmul.f32 %v12863_v47, %v14882_v23  ;;  %v12888_v55 = vmul.f32 %v12869_v7, %v14882_v23 }
 0x324   : > { %v4400_v25 = vsel %vm3896_vm7, %v14907_v2, %v4399_v39  ;;  %v6132_v1 = vmul.f32 %v9382_v5, %v12710_v14  ;;  %v4403_v21 = vsel %vm3896_vm7, %v4401_v29, %v4402_v57  ;;  %v4788_v54 = vunpack.c.l.bf16 %v4780_v60  ;;  %v5756_v2 = vld [vmem:[#allocation2 + $0x9c] sm:$0x1] }
 0x325   : > { %v4468_v36 = vadd.f32 %v4400_v25, %v4278_v11  ;;  %v12892_v15 = vmul.f32 %v12869_v7, %v14883_v9  ;;  %v4469_v14 = vadd.f32 %v4403_v21, %v4279_v63  ;;  %v4620_v39 = vmul.f32 %v14882_v23, %v4597_v62 }
 0x326   : > { %v6136_v37 = vpack.c.bf16 %v6132_v1, %v6131_v26  ;;  %v4694_v43 = vrot.slane %v4621_v30, 1  ;;  %v4695_v18 = vrot.slane %v12888_v55, 1  ;;  %v4810_v11 = vmul.f32 %v14883_v9, %v4597_v62 }
 0x327   : > { %v4571_v61 = vadd.f32 %v4547_v4, %v4468_v36  ;;  %v4811_v5 = vmul.f32 %v14883_v9, %v4788_v54  ;;  %v4572_v60 = vadd.f32 %v4548_v42, %v4469_v14  ;;  %v4692_v25 = vrot.slane %v4620_v39, 1 }
 0x328   : > { %8875 = vmatmul.mubr.msk.bf16.gmra.mxu0 %vm1830_vm1, %v6136_v37  ;;  %v4885_v29 = vrot.slane %v12892_v15, 2  ;;  %v5742_v26 = vunpack.c.h.bf16 %v12669_v0  ;;  %v4696_v63 = vsel %vm3705_vm5, %v4694_v43, %v4695_v18  ;;  %v4882_v4 = vrot.slane %v4810_v11, 2 }
 0x329   : > { %8878 = vmatprep.mubr.msk.bf16.mxu0 %vm9693_vm6, %v14897_v19  ;;  %v4884_v1 = vrot.slane %v4811_v5, 2  ;;  %v5747_v36 = vmul.f32 %v12331_v17, %v14874_v12  ;;  %v4693_v42 = vsel %vm3705_vm5, %v4690_v38, %v4692_v25  ;;  %v4762_v30 = vadd.f32 %v4696_v63, %v4572_v60  ;;  %v5853_v63 = vld [vmem:[#allocation2 + $0x38] ss:$112 sps:$4 sm:$0xff]  }
 0x32a   : > { %v9384_v62 = vpop.eup %9383  ;;  %v5748_v0 = vmul.f32 %v14874_v12, %v5742_v26  ;;  %v5758_v21 = vunpack.c.l.bf16 %v5756_v2  ;;  %v4761_v37 = vadd.f32 %v4693_v42, %v4571_v61  ;;  %v14908_v14 = vrot.slane %v12789_v10, 2 }
 0x32b   : > { %v9386_v54 = vpop.eup %9385  ;;  %v5106_v19 = vadd.f32 1.0, %v9384_v62  ;;  %v4886_v17 = vsel %vm3896_vm7, %v4884_v1, %v4885_v29  ;;  %v5765_v20 = vmul.f32 %v14875_v31, %v5742_v26  ;;  %v5811_v2 = vmul.f32 %v14876_v52, %v5742_v26 }
 0x32c   : > { %v4883_v39 = vsel %vm3896_vm7, %v14908_v14, %v4882_v4  ;;  %v5105_v43 = vadd.f32 1.0, %v9386_v54  ;;  %v4952_v11 = vadd.f32 %v4886_v17, %v4762_v30  ;;  %v5766_v38 = vmul.f32 %v14875_v31, %v5758_v21  ;;  %v5873_v30 = vld [vmem:[#allocation2 + $0xac] sm:$0x1] }
 0x32d   : > { %9387 = vrcp.f32 %v5106_v19  ;;  %v4951_v5 = vadd.f32 %v4883_v39, %v4761_v37  ;;  %v5812_v61 = vmul.f32 %v14876_v52, %v5758_v21  ;;  %v5785_v60 = vrot.slane %v5765_v20, 1 }
 0x32e   : > { %9389 = vrcp.f32 %v5105_v43  ;;  %v4982_v10 = vmul.f32 %v14884_v56, %v4952_v11  ;;  %v5787_v25 = vrot.slane %v5766_v38, 1  ;;  %v5831_v1 = vrot.slane %v5811_v2, 2 }
 0x32f   : > { %v4981_v4 = vmul.f32 %v14884_v56, %v4951_v5  ;;  %v5833_v62 = vrot.slane %v5812_v61, 2  ;;  %v5859_v42 = vunpack.c.h.bf16 %v5853_v63  ;;  %v14909_v19 = vrot.slane %v12585_v28, 1 }
 0x330   : > { %v12925_v54 = vadd.f32 %v14885_v41, %v4982_v10  ;;  %v5788_v21 = vsel %vm3705_vm5, %v5785_v60, %v5787_v25  ;;  %v5864_v37 = vmul.f32 %v12362_v16, %v14877_v32  ;;  %v14910_v43 = vrot.slane %v12589_v48, 2 }
 0x331   : > { %v5786_v26 = vsel %vm3705_vm5, %v14909_v19, %v5785_v60  ;;  %v12934_v14 = vadd.f32 %v14885_v41, %v4981_v4  ;;  %v5800_v17 = vadd.f32 %v5788_v21, %v5748_v0  ;;  %v5834_v28 = vsel %vm3896_vm7, %v5831_v1, %v5833_v62  ;;  %v5990_v60 = vld [vmem:[#allocation2 + $0xbc] sm:$0x1] }
 0x332   : > { %v5799_v39 = vadd.f32 %v5786_v26, %v5747_v36  ;;  %v5832_v11 = vsel %vm3896_vm7, %v14910_v43, %v5831_v1  ;;  %v8320_v20 = vmul.f32 -1.442695, %v12925_v54  ;;  %v5865_v38 = vmul.f32 %v14877_v32, %v5859_v42 }
 0x333   : > { %v5875_v5 = vunpack.c.l.bf16 %v5873_v30  ;;  %v8319_v2 = vmul.f32 -1.442695, %v12934_v14  ;;  %v5846_v16 = vadd.f32 %v5834_v28, %v5800_v17  ;;  %v5882_v10 = vmul.f32 %v14878_v33, %v5859_v42 }
 0x334   : > { %v5845_v61 = vadd.f32 %v5832_v11, %v5799_v39  ;;  %9391 = vpow2.f32 %v8320_v20  ;;  %v5928_v48 = vmul.f32 %v14879_v40, %v5859_v42  ;;  %v5976_v26 = vunpack.c.h.bf16 %v12752_v51 }
 0x335   : > { %v5883_v36 = vmul.f32 %v14878_v33, %v5875_v5  ;;  %v5929_v0 = vmul.f32 %v14879_v40, %v5875_v5  ;;  %9393 = vpow2.f32 %v8319_v2  ;;  %v5871_v4 = vadd.f32 %v5865_v38, %v5846_v16 }
 0x336   : > { %v5870_v25 = vadd.f32 %v5864_v37, %v5845_v61  ;;  %v5902_v1 = vrot.slane %v5882_v10, 1  ;;  %v5948_v30 = vrot.slane %v5928_v48, 2  ;;  %v14911_v21 = vrot.slane %v12628_v50, 1 }
 0x337   : > { %v5904_v62 = vrot.slane %v5883_v36, 1  ;;  %v5950_v19 = vrot.slane %v5929_v0, 2  ;;  %v5981_v17 = vmul.f32 %v12639_v8, %v14881_v24  ;;  %v5992_v42 = vunpack.c.l.bf16 %v5990_v60 }
 0x338   : > { %v5903_v39 = vsel %vm3705_vm5, %v14911_v21, %v5902_v1  ;;  %v3552_v43 = vunpack.c.l.bf16 %v5853_v63  ;;  %v14912_v37 = vrot.slane %v12632_v13, 2  ;;  %v5982_v51 = vmul.f32 %v14881_v24, %v5976_v26 }
 0x339   : > { %v5905_v11 = vsel %vm3705_vm5, %v5902_v1, %v5904_v62  ;;  %v5916_v20 = vadd.f32 %v5903_v39, %v5870_v25  ;;  %v5951_v38 = vsel %vm3896_vm7, %v5948_v30, %v5950_v19  ;;  %v5999_v50 = vmul.f32 %v14882_v23, %v5976_v26 }
 0x33a   : > { %v5949_v28 = vsel %vm3896_vm7, %v14912_v37, %v5948_v30  ;;  %v5917_v5 = vadd.f32 %v5905_v11, %v5871_v4  ;;  %v6000_v2 = vmul.f32 %v14882_v23, %v5992_v42  ;;  %v9388_v61 = vpop.eup %9387  ;;  %v6045_v63 = vmul.f32 %v14883_v9, %v5976_v26  ;;  %v3622_v30 = vld [vmem:[#allocation2 + $0x3c] sm:$0x1] }
 0x33b   : > { %v5962_v8 = vadd.f32 %v5949_v28, %v5916_v20  ;;  %v6046_v16 = vmul.f32 %v14883_v9, %v5992_v42  ;;  %v3581_v13 = vmul.f32 %v12465_v3, %v14874_v12  ;;  %v9390_v10 = vpop.eup %9389  ;;  %v5178_v36 = vmul.f32 %v9388_v61, %v12827_v44  ;;  %v4013_v42 = vld [vmem:[#allocation2 + $0x48] ss:$16 sps:$4 sm:$0xff]   ;;  %v4107_v44 = vld [vmem:[#allocation2 + $0x4c] sm:$0x1] }
 0x33c   : > { %v5963_v48 = vadd.f32 %v5951_v38, %v5917_v5  ;;  %v6019_v0 = vrot.slane %v5999_v50, 1  ;;  %v6021_v60 = vrot.slane %v6000_v2, 1  ;;  %v5177_v25 = vmul.f32 %v9390_v10, %v12834_v6 }
 0x33d   : > { %v5987_v4 = vadd.f32 %v5981_v17, %v5962_v8  ;;  %v6065_v1 = vrot.slane %v6045_v63, 2  ;;  %v6067_v62 = vrot.slane %v6046_v16, 2  ;;  %v14913_v26 = vrot.slane %v12660_v22, 1 }
 0x33e   : > { %v5988_v19 = vadd.f32 %v5982_v51, %v5963_v48  ;;  %v6022_v39 = vsel %vm3705_vm5, %v6019_v0, %v6021_v60  ;;  %v3582_v3 = vmul.f32 %v14874_v12, %v3552_v43  ;;  %v5198_v11 = vpack.c.bf16 %v5178_v36, %v5177_v25 }
 0x33f   : > { %v6020_v21 = vsel %vm3705_vm5, %v14913_v26, %v6019_v0  ;;  %v14914_v37 = vrot.slane %v12665_v35, 2  ;;  %v6068_v17 = vsel %vm3896_vm7, %v6065_v1, %v6067_v62  ;;  %v3630_v38 = vunpack.c.l.bf16 %v3622_v30 }
 0x340   : > { %v6033_v20 = vadd.f32 %v6020_v21, %v5987_v4  ;;  %v6034_v28 = vadd.f32 %v6022_v39, %v5988_v19  ;;  %v3655_v22 = vmul.f32 %v14875_v31, %v3552_v43  ;;  %v3846_v5 = vmul.f32 %v14876_v52, %v3552_v43  ;;  %8849 = vmatmul.mubr.msk.bf16.gmra.mxu1 %vm1830_vm1, %v5198_v11 }
 0x341   : > { %v6066_v6 = vsel %vm3896_vm7, %v14914_v37, %v6065_v1  ;;  %v4037_v50 = vunpack.c.l.bf16 %v4013_v42  ;;  %v4066_v2 = vmul.f32 %v12761_v46, %v14877_v32  ;;  %v4115_v61 = vunpack.c.l.bf16 %v4107_v44  ;;  %v9392_v8 = vpop.eup %9391 }
 0x342   : > { %v6079_v51 = vadd.f32 %v6066_v6, %v6033_v20  ;;  %v6080_v35 = vadd.f32 %v6068_v17, %v6034_v28  ;;  %v3656_v63 = vmul.f32 %v14875_v31, %v3630_v38  ;;  %v3730_v16 = vrot.slane %v3655_v22, 1  ;;  %v9394_v36 = vpop.eup %9393 }
 0x343   : > { %v3847_v10 = vmul.f32 %v14876_v52, %v3630_v38  ;;  %v5108_v48 = vadd.f32 1.0, %v9392_v8  ;;  %v3921_v43 = vrot.slane %v3846_v5, 2  ;;  %v4067_v60 = vmul.f32 %v14877_v32, %v4037_v50  ;;  %v4590_v8 = vld [vmem:[#allocation2 + $0x5c] sm:$0x1] }
 0x344   : > { %v6085_v0 = vmul.f32 %v14884_v56, %v6079_v51  ;;  %v5107_v25 = vadd.f32 1.0, %v9394_v36  ;;  %v6086_v4 = vmul.f32 %v14884_v56, %v6080_v35  ;;  %v14915_v1 = vrot.slane %v12811_v45, 1 }
 0x345   : > { %v3732_v30 = vrot.slane %v3656_v63, 1  ;;  %9395 = vrcp.f32 %v5108_v48  ;;  %v3922_v21 = vsel %vm3896_vm7, %v3919_v53, %v3921_v43  ;;  %v3923_v11 = vrot.slane %v3847_v10, 2 }
 0x346   : > { %v3731_v62 = vsel %vm3705_vm5, %v14915_v1, %v3730_v16  ;;  %v12990_v19 = vadd.f32 %v14885_v41, %v6085_v0  ;;  %9397 = vrcp.f32 %v5107_v25  ;;  %v12996_v39 = vadd.f32 %v14885_v41, %v6086_v4 }
 0x347   : > { %v3796_v26 = vadd.f32 %v3731_v62, %v3581_v13  ;;  %v3733_v44 = vsel %vm3705_vm5, %v3730_v16, %v3732_v30  ;;  %v4140_v6 = vmul.f32 %v14878_v33, %v4037_v50  ;;  %v3924_v13 = vsel %vm3896_vm7, %v3921_v43, %v3923_v11 }
 0x348   : > { %v8401_v45 = vmul.f32 -1.442695, %v12990_v19  ;;  %v3797_v20 = vadd.f32 %v3733_v44, %v3582_v3  ;;  %v8402_v17 = vmul.f32 -1.442695, %v12996_v39  ;;  %v4141_v34 = vmul.f32 %v14878_v33, %v4115_v61 }
 0x349   : > { %v3987_v37 = vadd.f32 %v3922_v21, %v3796_v26  ;;  %v4330_v53 = vmul.f32 %v14879_v40, %v4037_v50  ;;  %v4214_v22 = vrot.slane %v4140_v6, 1  ;;  %v4331_v51 = vmul.f32 %v14879_v40, %v4115_v61  ;;  %v13011_v50 = vld [vmem:[#allocation2 + $0x48] ss:$16 sps:$4 sm:$0xff]  }
 0x34a   : > { %9399 = vpow2.f32 %v8401_v45  ;;  %v3988_v28 = vadd.f32 %v3924_v13, %v3797_v20  ;;  %v4216_v5 = vrot.slane %v4141_v34, 1  ;;  %v4520_v16 = vunpack.c.h.bf16 %v4013_v42 }
 0x34b   : > { %v4090_v38 = vadd.f32 %v4066_v2, %v3987_v37  ;;  %9401 = vpow2.f32 %v8402_v17  ;;  %v4404_v3 = vrot.slane %v4330_v53, 2  ;;  %v4215_v63 = vsel %vm3705_vm5, %v4212_v58, %v4214_v22 }
 0x34c   : > { %v4091_v35 = vadd.f32 %v4067_v60, %v3988_v28  ;;  %v4549_v10 = vmul.f32 %v12869_v7, %v14881_v24  ;;  %v4217_v2 = vsel %vm3705_vm5, %v4214_v22, %v4216_v5  ;;  %v4406_v48 = vrot.slane %v4331_v51, 2  ;;  %v3814_v28 = vld [vmem:[#allocation2 + $0x40] sm:$0xe] }
 0x34d   : > { %v4280_v36 = vadd.f32 %v4215_v63, %v4090_v38  ;;  %v4405_v61 = vsel %vm3896_vm7, %v4402_v57, %v4404_v3  ;;  %v4550_v43 = vmul.f32 %v14881_v24, %v4520_v16  ;;  %v4598_v49 = vunpack.c.l.bf16 %v4590_v8 }
 0x34e   : > { %v4281_v0 = vadd.f32 %v4217_v2, %v4091_v35  ;;  %v4623_v58 = vmul.f32 %v14882_v23, %v4520_v16  ;;  %v4407_v42 = vsel %vm3896_vm7, %v4404_v3, %v4406_v48  ;;  %v4813_v25 = vmul.f32 %v14883_v9, %v4520_v16 }
 0x34f   : > { %v4470_v60 = vadd.f32 %v4405_v61, %v4280_v36  ;;  %v13022_v4 = vunpack.c.l.bf16 %v13011_v50  ;;  %v4624_v27 = vmul.f32 %v14882_v23, %v4598_v49  ;;  %v4814_v57 = vmul.f32 %v14883_v9, %v4598_v49 }
 0x350   : > { %v4471_v1 = vadd.f32 %v4407_v42, %v4281_v0  ;;  %v4697_v62 = vrot.slane %v4623_v58, 1  ;;  %v4887_v26 = vrot.slane %v4813_v25, 2  ;;  %v3583_v21 = vmul.f32 %v12755_v59, %v14874_v12 }
 0x351   : > { %v4573_v30 = vadd.f32 %v4549_v10, %v4470_v60  ;;  %v3584_v44 = vmul.f32 %v12761_v46, %v14874_v12  ;;  %v4699_v20 = vrot.slane %v4624_v27, 1  ;;  %v4889_v37 = vrot.slane %v4814_v57, 2 }
 0x352   : > { %v4574_v11 = vadd.f32 %v4550_v43, %v4471_v1  ;;  %v4698_v45 = vsel %vm3705_vm5, %v4695_v18, %v4697_v62  ;;  %v9396_v6 = vpop.eup %9395  ;;  %v4888_v13 = vsel %vm3896_vm7, %v4885_v29, %v4887_v26  ;;  %v3657_v34 = vmul.f32 %v12755_v59, %v14875_v31 }
 0x353   : > { %v4763_v17 = vadd.f32 %v4698_v45, %v4573_v30  ;;  %v3658_v53 = vmul.f32 %v12761_v46, %v14875_v31  ;;  %v9398_v38 = vpop.eup %9397  ;;  %v5180_v55 = vmul.f32 %v9396_v6, %v12925_v54  ;;  %v4700_v18 = vsel %vm3705_vm5, %v4697_v62, %v4699_v20 }
 0x354   : > { %v4890_v22 = vsel %vm3896_vm7, %v4887_v26, %v4889_v37  ;;  %v13045_v5 = vmul.f32 %v14875_v31, %v13022_v4  ;;  %v5179_v15 = vmul.f32 %v9398_v38, %v12934_v14  ;;  %v4764_v29 = vadd.f32 %v4700_v18, %v4574_v11  ;;  %v4298_v11 = vld [vmem:[#allocation2 + $0x50] sm:$0xe] }
 0x355   : > { %v4953_v51 = vadd.f32 %v4888_v13, %v4763_v17  ;;  %v3734_v59 = vrot.slane %v3657_v34, 1  ;;  %v3735_v3 = vrot.slane %v3658_v53, 1  ;;  %v3822_v35 = vunpack.c.l.bf16 %v3814_v28  ;;  %v8730_v34 = vld [vmem:[#allocation2 + $0x60] sm:$0xff]  }
 0x356   : > { %v3737_v8 = vrot.slane %v13045_v5, 1  ;;  %v3849_v54 = vmul.f32 %v12761_v46, %v14876_v52  ;;  %v5199_v16 = vpack.c.bf16 %v5180_v55, %v5179_v15  ;;  %v4954_v10 = vadd.f32 %v4890_v22, %v4764_v29 }
 0x357   : > { %v9400_v63 = vpop.eup %9399  ;;  %v4983_v2 = vmul.f32 %v14884_v56, %v4953_v51  ;;  %v13054_v36 = vmul.f32 %v14876_v52, %v13022_v4  ;;  %v3736_v48 = vsel %vm3705_vm5, %v3734_v59, %v3735_v3  ;;  %v3848_v43 = vmul.f32 %v14876_v52, %v3822_v35  ;;  %v13101_v35 = vld [vmem:[#allocation2 + $0x58] ss:$16 sps:$4 sm:$0xff]  }
 0x358   : > { %v9402_v14 = vpop.eup %9401  ;;  %v6115_v61 = vadd.f32 1.0, %v9400_v63  ;;  %v3738_v0 = vsel %vm3705_vm5, %v3735_v3, %v3737_v8  ;;  %8852 = vmatprep.mubr.msk.bf16.mxu1 %vm1830_vm1, %v5199_v16  ;;  %v4984_v49 = vmul.f32 %v14884_v56, %v4954_v10  ;;  %v3798_v42 = vadd.f32 %v3736_v48, %v3583_v21 }
 0x359   : > { %v6116_v46 = vadd.f32 1.0, %v9402_v14  ;;  %v13064_v58 = vadd.f32 %v14885_v41, %v4983_v2  ;;  %v3799_v60 = vadd.f32 %v3738_v0, %v3584_v44  ;;  %v3925_v25 = vrot.slane %v3848_v43, 2  ;;  %v4781_v2 = vld [vmem:[#allocation2 + $0x60] sm:$0xe] }
 0x35a   : > { %9403 = vrcp.f32 %v6115_v61  ;;  %v3926_v1 = vrot.slane %v3849_v54, 2  ;;  %v13067_v27 = vadd.f32 %v14885_v41, %v4984_v49  ;;  %v3928_v57 = vrot.slane %v13054_v36, 2 }
 0x35b   : > { %9405 = vrcp.f32 %v6116_v46  ;;  %v8321_v62 = vmul.f32 -1.442695, %v13064_v58  ;;  %v13073_v26 = vunpack.c.h.bf16 %v13011_v50  ;;  %v4068_v21 = vmul.f32 %v12863_v47, %v14877_v32 }
 0x35c   : > { %v3927_v30 = vsel %vm3896_vm7, %v3925_v25, %v3926_v1  ;;  %v4069_v44 = vmul.f32 %v12869_v7, %v14877_v32  ;;  %v8322_v45 = vmul.f32 -1.442695, %v13067_v27  ;;  %v3929_v20 = vsel %vm3896_vm7, %v3926_v1, %v3928_v57 }
 0x35d   : > { %9407 = vpow2.f32 %v8321_v62  ;;  %v3989_v37 = vadd.f32 %v3927_v30, %v3798_v42  ;;  %v3990_v6 = vadd.f32 %v3929_v20, %v3799_v60  ;;  %v4142_v50 = vmul.f32 %v12863_v47, %v14878_v33 }
 0x35e   : > { %v4143_v17 = vmul.f32 %v12869_v7, %v14878_v33  ;;  %v13089_v13 = vmul.f32 %v14878_v33, %v13073_v26  ;;  %9409 = vpow2.f32 %v8322_v45  ;;  %v4306_v28 = vunpack.c.l.bf16 %v4298_v11 }
 0x35f   : > { %v4092_v53 = vadd.f32 %v4068_v21, %v3989_v37  ;;  %v4333_v38 = vmul.f32 %v12869_v7, %v14879_v40  ;;  %v4093_v55 = vadd.f32 %v4069_v44, %v3990_v6  ;;  %v4218_v18 = vrot.slane %v4142_v50, 1 }
 0x360   : > { %v4219_v22 = vrot.slane %v4143_v17, 1  ;;  %v4221_v15 = vrot.slane %v13089_v13, 1  ;;  %v4332_v29 = vmul.f32 %v14879_v40, %v4306_v28  ;;  %v13097_v51 = vmul.f32 %v14879_v40, %v13073_v26 }
 0x361   : > { %v4409_v59 = vrot.slane %v4333_v38, 2  ;;  %v13099_v3 = vunpack.c.l.bf16 %v8730_v34  ;;  %v13107_v16 = vunpack.c.h.bf16 %v8730_v34  ;;  %v13110_v10 = vunpack.c.h.bf16 %v13101_v35 }
 0x362   : > { %v4220_v54 = vsel %vm3705_vm5, %v4218_v18, %v4219_v22  ;;  %v4222_v63 = vsel %vm3705_vm5, %v4219_v22, %v4221_v15  ;;  %v4408_v48 = vrot.slane %v4332_v29, 2  ;;  %v4411_v0 = vrot.slane %v13097_v51, 2 }
 0x363   : > { %v4282_v14 = vadd.f32 %v4220_v54, %v4092_v53  ;;  %v4283_v61 = vadd.f32 %v4222_v63, %v4093_v55  ;;  %v4551_v43 = vmul.f32 %v13099_v3, %v14881_v24  ;;  %v4552_v46 = vmul.f32 %v13107_v16, %v14881_v24 }
 0x364   : > { %v4625_v49 = vmul.f32 %v13099_v3, %v14882_v23  ;;  %v4626_v42 = vmul.f32 %v13107_v16, %v14882_v23  ;;  %v4410_v60 = vsel %vm3896_vm7, %v4408_v48, %v4409_v59  ;;  %v4412_v25 = vsel %vm3896_vm7, %v4409_v59, %v4411_v0  ;;  %v3623_v59 = vld [vmem:[#allocation2 + $0x4c] sm:$0x1] }
 0x365   : > { %v13127_v1 = vmul.f32 %v14882_v23, %v13110_v10  ;;  %v4789_v62 = vunpack.c.l.bf16 %v4781_v2  ;;  %v4472_v30 = vadd.f32 %v4410_v60, %v4282_v14  ;;  %v4473_v21 = vadd.f32 %v4412_v25, %v4283_v61 }
 0x366   : > { %v4701_v44 = vrot.slane %v4625_v49, 1  ;;  %v4702_v11 = vrot.slane %v4626_v42, 1  ;;  %v4816_v6 = vmul.f32 %v13107_v16, %v14883_v9  ;;  %v13135_v50 = vmul.f32 %v14883_v9, %v13110_v10 }
 0x367   : > { %v9404_v45 = vpop.eup %9403  ;;  %v4704_v20 = vrot.slane %v13127_v1, 1  ;;  %v4815_v37 = vmul.f32 %v14883_v9, %v4789_v62  ;;  %v4575_v53 = vadd.f32 %v4551_v43, %v4472_v30  ;;  %v4576_v28 = vadd.f32 %v4552_v46, %v4473_v21  ;;  %v3815_v46 = vld [vmem:[#allocation2 + $0x50] sm:$0xe] }
 0x368   : > { %v9406_v17 = vpop.eup %9405  ;;  %v6133_v34 = vmul.f32 %v9404_v45, %v12990_v19  ;;  %v4703_v38 = vsel %vm3705_vm5, %v4701_v44, %v4702_v11  ;;  %v4892_v29 = vrot.slane %v4816_v6, 2  ;;  %v4894_v14 = vrot.slane %v13135_v50, 2 }
 0x369   : > { %v6134_v55 = vmul.f32 %v9406_v17, %v12996_v39  ;;  %v4705_v18 = vsel %vm3705_vm5, %v4702_v11, %v4704_v20  ;;  %v4891_v22 = vrot.slane %v4815_v37, 2  ;;  %v4765_v63 = vadd.f32 %v4703_v38, %v4575_v53 }
 0x36a   : > { %v9408_v54 = vpop.eup %9407  ;;  %v4766_v2 = vadd.f32 %v4705_v18, %v4576_v28  ;;  %v3585_v19 = vmul.f32 %v14874_v12, %v13022_v4  ;;  %v3586_v39 = vmul.f32 %v12863_v47, %v14874_v12  ;;  %v4895_v42 = vsel %vm3896_vm7, %v4892_v29, %v4894_v14 }
 0x36b   : > { %v6137_v61 = vpack.c.bf16 %v6134_v55, %v6133_v34  ;;  %v5109_v48 = vadd.f32 1.0, %v9408_v54  ;;  %v4893_v43 = vsel %vm3896_vm7, %v4891_v22, %v4892_v29  ;;  %v9410_v49 = vpop.eup %9409  ;;  %v3631_v25 = vunpack.c.l.bf16 %v3623_v59  ;;  %v4108_v59 = vld [vmem:[#allocation2 + $0x5c] sm:$0x1] }
 0x36c   : > { %v4955_v60 = vadd.f32 %v4893_v43, %v4765_v63  ;;  %v3661_v62 = vmul.f32 %v12863_v47, %v14875_v31  ;;  %v5110_v4 = vadd.f32 1.0, %v9410_v49  ;;  %v4956_v30 = vadd.f32 %v4895_v42, %v4766_v2  ;;  %v4299_v42 = vld [vmem:[#allocation2 + $0x60] sm:$0xe] }
 0x36d   : > { %8879 = vmatmul.mubr.msk.bf16.gmra.mxu0 %vm1830_vm1, %v6137_v61  ;;  %9411 = vrcp.f32 %v5109_v48  ;;  %v13157_v21 = vmul.f32 %v12869_v7, %v14875_v31  ;;  %v3660_v11 = vmul.f32 %v14875_v31, %v3631_v25  ;;  %v3823_v37 = vunpack.c.l.bf16 %v3815_v46 }
 0x36e   : > { %v4985_v44 = vmul.f32 %v14884_v56, %v4955_v60  ;;  %v3741_v45 = vrot.slane %v3661_v62, 1  ;;  %9413 = vrcp.f32 %v5110_v4  ;;  %v4986_v6 = vmul.f32 %v14884_v56, %v4956_v30 }
 0x36f   : > { %v3742_v47 = vrot.slane %v13157_v21, 1  ;;  %v3851_v17 = vmul.f32 %v14876_v52, %v3631_v25  ;;  %v3739_v53 = vrot.slane %v3660_v11, 1  ;;  %v3852_v28 = vmul.f32 %v14876_v52, %v3823_v37 }
 0x370   : > { %v13165_v34 = vadd.f32 %v14885_v41, %v4985_v44  ;;  %v13170_v38 = vmul.f32 %v12869_v7, %v14876_v52  ;;  %v13173_v55 = vadd.f32 %v14885_v41, %v4986_v6  ;;  %v4070_v29 = vmul.f32 %v14877_v32, %v13073_v26 }
 0x371   : > { %v3743_v18 = vsel %vm3705_vm5, %v3741_v45, %v3742_v47  ;;  %v3930_v22 = vrot.slane %v3851_v17, 2  ;;  %v3740_v63 = vsel %vm3705_vm5, %v3737_v8, %v3739_v53  ;;  %v3932_v61 = vrot.slane %v3852_v28, 2 }
 0x372   : > { %v8323_v54 = vmul.f32 -1.442695, %v13165_v34  ;;  %v3801_v2 = vadd.f32 %v3743_v18, %v3586_v39  ;;  %v8324_v48 = vmul.f32 -1.442695, %v13173_v55  ;;  %v3800_v43 = vadd.f32 %v3740_v63, %v3585_v19 }
 0x373   : > { %v3931_v46 = vsel %vm3896_vm7, %v3928_v57, %v3930_v22  ;;  %v3933_v49 = vrot.slane %v13170_v38, 2  ;;  %v4071_v26 = vmul.f32 %v13099_v3, %v14877_v32  ;;  %v4116_v60 = vunpack.c.l.bf16 %v4108_v59  ;;  %v8731_v57 = vld [vmem:[#allocation2 + $0x70] sm:$0xff]   ;;  %v4591_v59 = vld [vmem:[#allocation2 + $0x6c] sm:$0x1] }
 0x374   : > { %9415 = vpow2.f32 %v8323_v54  ;;  %v4146_v5 = vmul.f32 %v13099_v3, %v14878_v33  ;;  %v3991_v19 = vadd.f32 %v3931_v46, %v3800_v43  ;;  %v13198_v36 = vmul.f32 %v13107_v16, %v14878_v33  ;;  %v4782_v43 = vld [vmem:[#allocation2 + $0x70] sm:$0xe] }
 0x375   : > { %9417 = vpow2.f32 %v8324_v48  ;;  %v3934_v8 = vsel %vm3896_vm7, %v3932_v61, %v3933_v49  ;;  %v4145_v25 = vmul.f32 %v14878_v33, %v4116_v60  ;;  %v4307_v4 = vunpack.c.l.bf16 %v4299_v42 }
 0x376   : > { %v3992_v39 = vadd.f32 %v3934_v8, %v3801_v2  ;;  %v4225_v62 = vrot.slane %v4146_v5, 1  ;;  %v4094_v30 = vadd.f32 %v4070_v29, %v3991_v19  ;;  %v4226_v44 = vrot.slane %v13198_v36, 1 }
 0x377   : > { %v4335_v11 = vmul.f32 %v14879_v40, %v4116_v60  ;;  %v13205_v45 = vmul.f32 %v13107_v16, %v14879_v40  ;;  %v4223_v6 = vrot.slane %v4145_v25, 1  ;;  %v4336_v17 = vmul.f32 %v14879_v40, %v4307_v4 }
 0x378   : > { %v4095_v37 = vadd.f32 %v4071_v26, %v3992_v39  ;;  %v13208_v53 = vunpack.c.l.bf16 %v8731_v57  ;;  %v4227_v28 = vsel %vm3705_vm5, %v4225_v62, %v4226_v44  ;;  %v13214_v29 = vunpack.c.h.bf16 %v8731_v57 }
 0x379   : > { %v4413_v18 = vrot.slane %v4335_v11, 2  ;;  %v4416_v22 = vrot.slane %v13205_v45, 2  ;;  %v4224_v63 = vsel %vm3705_vm5, %v4221_v15, %v4223_v6  ;;  %v4415_v61 = vrot.slane %v4336_v17, 2 }
 0x37a   : > { %v9412_v54 = vpop.eup %9411  ;;  %v4285_v2 = vadd.f32 %v4227_v28, %v4095_v37  ;;  %v4553_v48 = vmul.f32 %v14881_v24, %v13110_v10  ;;  %v4284_v42 = vadd.f32 %v4224_v63, %v4094_v30  ;;  %v4554_v60 = vmul.f32 %v13208_v53, %v14881_v24 }
 0x37b   : > { %v5181_v46 = vmul.f32 %v9412_v54, %v13064_v58  ;;  %v4414_v26 = vsel %vm3896_vm7, %v4411_v0, %v4413_v18  ;;  %v9414_v5 = vpop.eup %9413  ;;  %v4417_v13 = vsel %vm3896_vm7, %v4415_v61, %v4416_v22  ;;  %v4599_v15 = vunpack.c.l.bf16 %v4591_v59  ;;  %v3624_v18 = vld [vmem:[#allocation2 + $0x5c] sm:$0x1] }
 0x37c   : > { %v4629_v10 = vmul.f32 %v13208_v53, %v14882_v23  ;;  %v13234_v58 = vmul.f32 %v13214_v29, %v14882_v23  ;;  %v5182_v51 = vmul.f32 %v9414_v5, %v13067_v27  ;;  %v4474_v8 = vadd.f32 %v4414_v26, %v4284_v42 }
 0x37d   : > { %v4475_v0 = vadd.f32 %v4417_v13, %v4285_v2  ;;  %v4790_v19 = vunpack.c.l.bf16 %v4782_v43  ;;  %v4628_v57 = vmul.f32 %v14882_v23, %v4599_v15  ;;  %v4818_v62 = vmul.f32 %v14883_v9, %v4599_v15  ;;  %v4019_v15 = vld [vmem:[#allocation2 + $0x68] ss:$16 sps:$4 sm:$0xff]  }
 0x37e   : > { %v4708_v39 = vrot.slane %v4629_v10, 1  ;;  %v4709_v25 = vrot.slane %v13234_v58, 1  ;;  %v5200_v4 = vpack.c.bf16 %v5182_v51, %v5181_v46  ;;  %v4577_v30 = vadd.f32 %v4553_v48, %v4474_v8 }
 0x37f   : > { %v4578_v11 = vadd.f32 %v4554_v60, %v4475_v0  ;;  %v4819_v37 = vmul.f32 %v14883_v9, %v4790_v19  ;;  %v4706_v6 = vrot.slane %v4628_v57, 1  ;;  %v13246_v17 = vmul.f32 %v13214_v29, %v14883_v9 }
 0x380   : > { %v4710_v27 = vsel %vm3705_vm5, %v4708_v39, %v4709_v25  ;;  %v4896_v28 = vrot.slane %v4818_v62, 2  ;;  %8853 = vmatmul.mubr.msk.bf16.gmra.mxu1 %vm1830_vm1, %v5200_v4  ;;  %v3558_v2 = vunpack.c.l.bf16 %v13101_v35  ;;  %v3587_v61 = vmul.f32 %v12869_v7, %v14874_v12 }
 0x381   : > { %v9416_v59 = vpop.eup %9415  ;;  %v4768_v54 = vadd.f32 %v4710_v27, %v4578_v11  ;;  %v4898_v63 = vrot.slane %v4819_v37, 2  ;;  %v4707_v46 = vsel %vm3705_vm5, %v4704_v20, %v4706_v6  ;;  %v4899_v26 = vrot.slane %v13246_v17, 2 }
 0x382   : > { %v9418_v48 = vpop.eup %9417  ;;  %v5111_v43 = vadd.f32 1.0, %v9416_v59  ;;  %v4897_v42 = vsel %vm3896_vm7, %v4894_v14, %v4896_v28  ;;  %v4767_v5 = vadd.f32 %v4707_v46, %v4577_v30  ;;  %v3588_v13 = vmul.f32 %v14874_v12, %v3558_v2  ;;  %v4109_v30 = vld [vmem:[#allocation2 + $0x6c] sm:$0x1] }
 0x383   : > { %v5112_v60 = vadd.f32 1.0, %v9418_v48  ;;  %v3632_v35 = vunpack.c.l.bf16 %v3624_v18  ;;  %v4900_v7 = vsel %vm3896_vm7, %v4898_v63, %v4899_v26  ;;  %v3663_v1 = vmul.f32 %v14875_v31, %v3558_v2 }
 0x384   : > { %9419 = vrcp.f32 %v5111_v43  ;;  %v3854_v20 = vmul.f32 %v14876_v52, %v3558_v2  ;;  %v4957_v50 = vadd.f32 %v4897_v42, %v4767_v5  ;;  %v4958_v14 = vadd.f32 %v4900_v7, %v4768_v54  ;;  %v4592_v7 = vld [vmem:[#allocation2 + $0x7c] sm:$0x1] }
 0x385   : > { %9421 = vrcp.f32 %v5112_v60  ;;  %v3664_v10 = vmul.f32 %v14875_v31, %v3632_v35  ;;  %v3744_v51 = vrot.slane %v3663_v1, 1  ;;  %v3855_v8 = vmul.f32 %v14876_v52, %v3632_v35 }
 0x386   : > { %v3935_v0 = vrot.slane %v3854_v20, 2  ;;  %v4043_v19 = vunpack.c.l.bf16 %v4019_v15  ;;  %v4987_v57 = vmul.f32 %v14884_v56, %v4957_v50  ;;  %v4988_v39 = vmul.f32 %v14884_v56, %v4958_v14 }
 0x387   : > { %v3746_v62 = vrot.slane %v3664_v10, 1  ;;  %v4072_v4 = vmul.f32 %v13107_v16, %v14877_v32  ;;  %v3745_v11 = vsel %vm3705_vm5, %v3742_v47, %v3744_v51  ;;  %v3937_v6 = vrot.slane %v3855_v8, 2 }
 0x388   : > { %v3936_v37 = vsel %vm3896_vm7, %v3933_v49, %v3935_v0  ;;  %v4073_v27 = vmul.f32 %v14877_v32, %v4043_v19  ;;  %v13279_v28 = vadd.f32 %v14885_v41, %v4987_v57  ;;  %v13282_v18 = vadd.f32 %v14885_v41, %v4988_v39 }
 0x389   : > { %v3747_v59 = vsel %vm3705_vm5, %v3744_v51, %v3746_v62  ;;  %v3802_v54 = vadd.f32 %v3745_v11, %v3587_v61  ;;  %v3938_v21 = vsel %vm3896_vm7, %v3935_v0, %v3937_v6  ;;  %v4117_v47 = vunpack.c.l.bf16 %v4109_v30 }
 0x38a   : > { %v3803_v63 = vadd.f32 %v3747_v59, %v3588_v13  ;;  %v4148_v38 = vmul.f32 %v14878_v33, %v4043_v19  ;;  %v8325_v49 = vmul.f32 -1.442695, %v13279_v28  ;;  %v8326_v2 = vmul.f32 -1.442695, %v13282_v18 }
 0x38b   : > { %v3993_v48 = vadd.f32 %v3936_v37, %v3802_v54  ;;  %v4338_v43 = vmul.f32 %v14879_v40, %v4043_v19  ;;  %v4149_v42 = vmul.f32 %v14878_v33, %v4117_v47  ;;  %v4339_v5 = vmul.f32 %v14879_v40, %v4117_v47 }
 0x38c   : > { %v3994_v46 = vadd.f32 %v3938_v21, %v3803_v63  ;;  %v4228_v60 = vrot.slane %v4148_v38, 1  ;;  %9423 = vpow2.f32 %v8325_v49  ;;  %v4526_v35 = vunpack.c.h.bf16 %v4019_v15 }
 0x38d   : > { %v4096_v61 = vadd.f32 %v4072_v4, %v3993_v48  ;;  %v4418_v13 = vrot.slane %v4338_v43, 2  ;;  %9425 = vpow2.f32 %v8326_v2  ;;  %v4230_v50 = vrot.slane %v4149_v42, 1  ;;  %v3537_v4 = vld [vmem:[#allocation2 + $0x68] ss:$16 sps:$4 sm:$0xff]  }
 0x38e   : > { %v4097_v1 = vadd.f32 %v4073_v27, %v3994_v46  ;;  %v4229_v20 = vsel %vm3705_vm5, %v4226_v44, %v4228_v60  ;;  %v4420_v51 = vrot.slane %v4339_v5, 2  ;;  %v4555_v8 = vmul.f32 %v13214_v29, %v14881_v24  ;;  %v3816_v46 = vld [vmem:[#allocation2 + $0x60] sm:$0xe] }
 0x38f   : > { %v4286_v14 = vadd.f32 %v4229_v20, %v4096_v61  ;;  %v4419_v10 = vsel %vm3896_vm7, %v4416_v22, %v4418_v13  ;;  %v4231_v0 = vsel %vm3705_vm5, %v4228_v60, %v4230_v50  ;;  %v4556_v15 = vmul.f32 %v14881_v24, %v4526_v35 }
 0x390   : > { %v4600_v19 = vunpack.c.l.bf16 %v4592_v7  ;;  %v4631_v57 = vmul.f32 %v14882_v23, %v4526_v35  ;;  %v4287_v39 = vadd.f32 %v4231_v0, %v4097_v1  ;;  %v4421_v44 = vsel %vm3896_vm7, %v4418_v13, %v4420_v51 }
 0x391   : > { %v9420_v36 = vpop.eup %9419  ;;  %v4476_v62 = vadd.f32 %v4419_v10, %v4286_v14  ;;  %v4821_v45 = vmul.f32 %v14883_v9, %v4526_v35  ;;  %v13312_v49 = vunpack.c.l.bf16 %v3537_v4  ;;  %v3589_v58 = vmul.f32 %v13099_v3, %v14874_v12 }
 0x392   : > { %v9422_v22 = vpop.eup %9421  ;;  %v5183_v30 = vmul.f32 %v9420_v36, %v13165_v34  ;;  %v4632_v11 = vmul.f32 %v14882_v23, %v4600_v19  ;;  %v4711_v37 = vrot.slane %v4631_v57, 1  ;;  %v4822_v6 = vmul.f32 %v14883_v9, %v4600_v19 }
 0x393   : > { %v5184_v27 = vmul.f32 %v9422_v22, %v13173_v55  ;;  %v4477_v59 = vadd.f32 %v4421_v44, %v4287_v39  ;;  %v4579_v54 = vadd.f32 %v4555_v8, %v4476_v62  ;;  %v4901_v63 = vrot.slane %v4821_v45, 2 }
 0x394   : > { %v4712_v21 = vsel %vm3705_vm5, %v4709_v25, %v4711_v37  ;;  %v4713_v47 = vrot.slane %v4632_v11, 1  ;;  %v4903_v38 = vrot.slane %v4822_v6, 2  ;;  %v3590_v25 = vmul.f32 %v13107_v16, %v14874_v12 }
 0x395   : > { %v5201_v2 = vpack.c.bf16 %v5184_v27, %v5183_v30  ;;  %v4580_v34 = vadd.f32 %v4556_v15, %v4477_v59  ;;  %v4769_v48 = vadd.f32 %v4712_v21, %v4579_v54  ;;  %v4902_v43 = vsel %vm3896_vm7, %v4899_v26, %v4901_v63  ;;  %v4300_v59 = vld [vmem:[#allocation2 + $0x70] sm:$0xe] }
 0x396   : > { %v4714_v55 = vsel %vm3705_vm5, %v4711_v37, %v4713_v47  ;;  %v4904_v42 = vsel %vm3896_vm7, %v4901_v63, %v4903_v38  ;;  %v3665_v17 = vmul.f32 %v13099_v3, %v14875_v31  ;;  %v3666_v26 = vmul.f32 %v13107_v16, %v14875_v31 }
 0x397   : > { %8856 = vmatprep.mubr.msk.bf16.mxu1 %vm1830_vm1, %v5201_v2  ;;  %v4770_v60 = vadd.f32 %v4714_v55, %v4580_v34  ;;  %v4959_v5 = vadd.f32 %v4902_v43, %v4769_v48  ;;  %v13330_v61 = vmul.f32 %v14875_v31, %v13312_v49  ;;  %v3824_v13 = vunpack.c.l.bf16 %v3816_v46  ;;  %v8732_v46 = vld [vmem:[#allocation2 + $0x80] sm:$0xff]  }
 0x398   : > { %v3857_v35 = vmul.f32 %v13107_v16, %v14876_v52  ;;  %v13336_v7 = vmul.f32 %v14876_v52, %v13312_v49  ;;  %v3748_v50 = vrot.slane %v3665_v17, 1  ;;  %v3749_v3 = vrot.slane %v3666_v26, 1 }
 0x399   : > { %v4960_v1 = vadd.f32 %v4904_v42, %v4770_v60  ;;  %v4989_v20 = vmul.f32 %v14884_v56, %v4959_v5  ;;  %v9424_v14 = vpop.eup %9423  ;;  %v3751_v10 = vrot.slane %v13330_v61, 1  ;;  %v3856_v51 = vmul.f32 %v14876_v52, %v3824_v13  ;;  %v13381_v13 = vld [vmem:[#allocation2 + $0x78] ss:$16 sps:$4 sm:$0xff]  }
 0x39a   : > { %v3940_v8 = vrot.slane %v3857_v35, 2  ;;  %v3942_v0 = vrot.slane %v13336_v7, 2  ;;  %v9426_v15 = vpop.eup %9425  ;;  %v5113_v19 = vadd.f32 1.0, %v9424_v14  ;;  %v3750_v36 = vsel %vm3705_vm5, %v3748_v50, %v3749_v3 }
 0x39b   : > { %v4990_v16 = vmul.f32 %v14884_v56, %v4960_v1  ;;  %v13344_v57 = vadd.f32 %v14885_v41, %v4989_v20  ;;  %v5114_v39 = vadd.f32 1.0, %v9426_v15  ;;  %v3752_v44 = vsel %vm3705_vm5, %v3749_v3, %v3751_v10  ;;  %v4783_v15 = vld [vmem:[#allocation2 + $0x80] sm:$0xe] }
 0x39c   : > { %v3804_v62 = vadd.f32 %v3750_v36, %v3589_v58  ;;  %v3939_v45 = vrot.slane %v3856_v51, 2  ;;  %9427 = vrcp.f32 %v5113_v19  ;;  %v3805_v11 = vadd.f32 %v3752_v44, %v3590_v25 }
 0x39d   : > { %v13351_v22 = vadd.f32 %v14885_v41, %v4990_v16  ;;  %v8327_v30 = vmul.f32 -1.442695, %v13344_v57  ;;  %9429 = vrcp.f32 %v5114_v39  ;;  %v3943_v6 = vsel %vm3896_vm7, %v3940_v8, %v3942_v0 }
 0x39e   : > { %v3941_v37 = vsel %vm3896_vm7, %v3939_v45, %v3940_v8  ;;  %v13358_v27 = vunpack.c.h.bf16 %v3537_v4  ;;  %v3996_v21 = vadd.f32 %v3943_v6, %v3805_v11  ;;  %v4074_v47 = vmul.f32 %v13208_v53, %v14877_v32 }
 0x39f   : > { %9431 = vpow2.f32 %v8327_v30  ;;  %v8328_v54 = vmul.f32 -1.442695, %v13351_v22  ;;  %v3995_v63 = vadd.f32 %v3941_v37, %v3804_v62  ;;  %v4075_v38 = vmul.f32 %v13214_v29, %v14877_v32 }
 0x3a0   : > { %v4150_v2 = vmul.f32 %v13208_v53, %v14878_v33  ;;  %v4151_v34 = vmul.f32 %v13214_v29, %v14878_v33  ;;  %v13371_v4 = vmul.f32 %v14878_v33, %v13358_v27  ;;  %v4308_v48 = vunpack.c.l.bf16 %v4300_v59 }
 0x3a1   : > { %9433 = vpow2.f32 %v8328_v54  ;;  %v4341_v43 = vmul.f32 %v13214_v29, %v14879_v40  ;;  %v4098_v55 = vadd.f32 %v4074_v47, %v3995_v63  ;;  %v4099_v42 = vadd.f32 %v4075_v38, %v3996_v21 }
 0x3a2   : > { %v4232_v58 = vrot.slane %v4150_v2, 1  ;;  %v4233_v25 = vrot.slane %v4151_v34, 1  ;;  %v4235_v60 = vrot.slane %v13371_v4, 1  ;;  %v4340_v5 = vmul.f32 %v14879_v40, %v4308_v48 }
 0x3a3   : > { %v13379_v17 = vmul.f32 %v14879_v40, %v13358_v27  ;;  %v4423_v26 = vrot.slane %v4341_v43, 2  ;;  %v13384_v1 = vunpack.c.l.bf16 %v8732_v46  ;;  %v13386_v20 = vunpack.c.h.bf16 %v8732_v46  ;;  %v13411_v54 = vpop.f32.mrf.mxu0 }
 0x3a4   : > { %v4234_v35 = vsel %vm3705_vm5, %v4232_v58, %v4233_v25  ;;  %v13389_v50 = vunpack.c.h.bf16 %v13381_v13  ;;  %v4236_v3 = vsel %vm3705_vm5, %v4233_v25, %v4235_v60  ;;  %v4422_v51 = vrot.slane %v4340_v5, 2 }
 0x3a5   : > { %v4288_v14 = vadd.f32 %v4234_v35, %v4098_v55  ;;  %v4425_v8 = vrot.slane %v13379_v17, 2  ;;  %v4289_v19 = vadd.f32 %v4236_v3, %v4099_v42  ;;  %v4557_v16 = vmul.f32 %v13384_v1, %v14881_v24  ;;  %v3625_v55 = vld [vmem:[#allocation2 + $0x6c] sm:$0x1]  ;;  %v8872_v42 = vpop.f32.mrf.mxu0 }
 0x3a6   : > { %v4558_v36 = vmul.f32 %v13386_v20, %v14881_v24  ;;  %v4633_v39 = vmul.f32 %v13384_v1, %v14882_v23  ;;  %v4424_v44 = vsel %vm3896_vm7, %v4422_v51, %v4423_v26  ;;  %v4634_v45 = vmul.f32 %v13386_v20, %v14882_v23 }
 0x3a7   : > { %v4426_v62 = vsel %vm3896_vm7, %v4423_v26, %v4425_v8  ;;  %v13409_v30 = vmul.f32 %v14882_v23, %v13389_v50  ;;  %v4478_v11 = vadd.f32 %v4424_v44, %v4288_v14  ;;  %v4791_v59 = vunpack.c.l.bf16 %v4783_v15 }
 0x3a8   : > { %v4479_v37 = vadd.f32 %v4426_v62, %v4289_v19  ;;  %v4715_v6 = vrot.slane %v4633_v39, 1  ;;  %v4716_v63 = vrot.slane %v4634_v45, 1  ;;  %v4824_v47 = vmul.f32 %v13386_v20, %v14883_v9 }
 0x3a9   : > { %v4718_v21 = vrot.slane %v13409_v30, 1  ;;  %v13418_v38 = vmul.f32 %v14883_v9, %v13389_v50  ;;  %v9428_v2 = vpop.eup %9427  ;;  %v4581_v34 = vadd.f32 %v4557_v16, %v4478_v11  ;;  %v4823_v43 = vmul.f32 %v14883_v9, %v4791_v59  ;;  %v13429_v16 = vpop.f32.mrf.mxu0 }
 0x3aa   : > { %v4582_v48 = vadd.f32 %v4558_v36, %v4479_v37  ;;  %v3591_v46 = vmul.f32 %v14874_v12, %v13312_v49  ;;  %v9430_v58 = vpop.eup %9429  ;;  %v5185_v25 = vmul.f32 %v9428_v2, %v13279_v28  ;;  %v4717_v5 = vsel %vm3705_vm5, %v4715_v6, %v4716_v63  ;;  %v3817_v37 = vld [vmem:[#allocation2 + $0x70] sm:$0xe] }
 0x3ab   : > { %v4719_v26 = vsel %vm3705_vm5, %v4716_v63, %v4718_v21  ;;  %v4906_v35 = vrot.slane %v4824_v47, 2  ;;  %v5186_v14 = vmul.f32 %v9430_v58, %v13282_v18  ;;  %v4771_v51 = vadd.f32 %v4717_v5, %v4581_v34  ;;  %v8873_v6 = vpop.f32.mrf.mxu0 }
 0x3ac   : > { %v9432_v3 = vpop.eup %9431  ;;  %v4772_v15 = vadd.f32 %v4719_v26, %v4582_v48  ;;  %v4905_v19 = vrot.slane %v4823_v43, 2  ;;  %v4908_v36 = vrot.slane %v13418_v38, 2  ;;  %v3592_v28 = vmul.f32 %v13208_v53, %v14874_v12 }
 0x3ad   : > { %v5115_v49 = vadd.f32 1.0, %v9432_v3  ;;  %v3633_v39 = vunpack.c.l.bf16 %v3625_v55  ;;  %v5202_v62 = vpack.c.bf16 %v5186_v14, %v5185_v25  ;;  %v3669_v11 = vmul.f32 %v13208_v53, %v14875_v31 }
 0x3ae   : > { %v9434_v44 = vpop.eup %9433  ;;  %v4907_v45 = vsel %vm3896_vm7, %v4905_v19, %v4906_v35  ;;  %v13439_v18 = vmul.f32 %v13214_v29, %v14875_v31  ;;  %v4909_v63 = vsel %vm3896_vm7, %v4906_v35, %v4908_v36  ;;  %v3825_v55 = vunpack.c.l.bf16 %v3817_v37 }
 0x3af   : > { %v5116_v59 = vadd.f32 1.0, %v9434_v44  ;;  %9435 = vrcp.f32 %v5115_v49  ;;  %v4961_v47 = vadd.f32 %v4907_v45, %v4771_v51  ;;  %8857 = vmatmul.mubr.msk.bf16.gmra.mxu1 %vm1830_vm1, %v5202_v62  ;;  %v4962_v2 = vadd.f32 %v4909_v63, %v4772_v15  ;;  %v4110_v15 = vld [vmem:[#allocation2 + $0x7c] sm:$0x1] }
 0x3b0   : > { %v3668_v34 = vmul.f32 %v14875_v31, %v3633_v39  ;;  %v3755_v48 = vrot.slane %v3669_v11, 1  ;;  %v3756_v53 = vrot.slane %v13439_v18, 1  ;;  %v3859_v42 = vmul.f32 %v14876_v52, %v3633_v39 }
 0x3b1   : > { %9437 = vrcp.f32 %v5116_v59  ;;  %v4991_v43 = vmul.f32 %v14884_v56, %v4961_v47  ;;  %v4992_v58 = vmul.f32 %v14884_v56, %v4962_v2  ;;  %v13455_v26 = vmul.f32 %v13214_v29, %v14876_v52  ;;  %v4301_v59 = vld [vmem:[#allocation2 + $0x80] sm:$0xe] }
 0x3b2   : > { %v3753_v25 = vrot.slane %v3668_v34, 1  ;;  %v3757_v5 = vsel %vm3705_vm5, %v3755_v48, %v3756_v53  ;;  %v3860_v14 = vmul.f32 %v14876_v52, %v3825_v55  ;;  %v3944_v51 = vrot.slane %v3859_v42, 2 }
 0x3b3   : > { %v13458_v35 = vadd.f32 %v14885_v41, %v4991_v43  ;;  %v3807_v3 = vadd.f32 %v3757_v5, %v3592_v28  ;;  %v13462_v19 = vadd.f32 %v14885_v41, %v4992_v58  ;;  %v3947_v39 = vrot.slane %v13455_v26, 2 }
 0x3b4   : > { %v3754_v49 = vsel %vm3705_vm5, %v3751_v10, %v3753_v25  ;;  %v4076_v44 = vmul.f32 %v14877_v32, %v13358_v27  ;;  %v3945_v28 = vsel %vm3896_vm7, %v3942_v0, %v3944_v51  ;;  %v3946_v11 = vrot.slane %v3860_v14, 2  ;;  %v8733_v0 = vld [vmem:[#allocation2 + $0x90] sm:$0xff]  }
 0x3b5   : > { %v8329_v62 = vmul.f32 -1.442695, %v13458_v35  ;;  %v3806_v45 = vadd.f32 %v3754_v49, %v3591_v46  ;;  %v8330_v37 = vmul.f32 -1.442695, %v13462_v19  ;;  %v4077_v61 = vmul.f32 %v13384_v1, %v14877_v32 }
 0x3b6   : > { %v4118_v6 = vunpack.c.l.bf16 %v4110_v15  ;;  %v4154_v10 = vmul.f32 %v13384_v1, %v14878_v33  ;;  %v3948_v27 = vsel %vm3896_vm7, %v3946_v11, %v3947_v39  ;;  %v13484_v7 = vmul.f32 %v13386_v20, %v14878_v33  ;;  %v4593_v15 = vld [vmem:[#allocation2 + $0x8c] sm:$0x1]  ;;  %v4784_v11 = vld [vmem:[#allocation2 + $0x90] sm:$0xe] }
 0x3b7   : > { %9439 = vpow2.f32 %v8329_v62  ;;  %v3997_v46 = vadd.f32 %v3945_v28, %v3806_v45  ;;  %v3998_v63 = vadd.f32 %v3948_v27, %v3807_v3  ;;  %v4309_v48 = vunpack.c.l.bf16 %v4301_v59 }
 0x3b8   : > { %9441 = vpow2.f32 %v8330_v37  ;;  %v4153_v47 = vmul.f32 %v14878_v33, %v4118_v6  ;;  %v4239_v2 = vrot.slane %v4154_v10, 1  ;;  %v4240_v1 = vrot.slane %v13484_v7, 1 }
 0x3b9   : > { %v4100_v34 = vadd.f32 %v4076_v44, %v3997_v46  ;;  %v4343_v43 = vmul.f32 %v14879_v40, %v4118_v6  ;;  %v4101_v55 = vadd.f32 %v4077_v61, %v3998_v63  ;;  %v13491_v58 = vmul.f32 %v13386_v20, %v14879_v40 }
 0x3ba   : > { %v4237_v42 = vrot.slane %v4153_v47, 1  ;;  %v8639_v25 = vunpack.c.l.bf16 %v8733_v0  ;;  %v4241_v5 = vsel %vm3705_vm5, %v4239_v2, %v4240_v1  ;;  %v4344_v3 = vmul.f32 %v14879_v40, %v4309_v48 }
 0x3bb   : > { %v4427_v14 = vrot.slane %v4343_v43, 2  ;;  %v13497_v51 = vunpack.c.h.bf16 %v8733_v0  ;;  %v4291_v62 = vadd.f32 %v4241_v5, %v4101_v55  ;;  %v4430_v45 = vrot.slane %v13491_v58, 2 }
 0x3bc   : > { %v9436_v49 = vpop.eup %9435  ;;  %v4238_v44 = vsel %vm3705_vm5, %v4235_v60, %v4237_v42  ;;  %v4559_v28 = vmul.f32 %v14881_v24, %v13389_v50  ;;  %v4429_v10 = vrot.slane %v4344_v3, 2  ;;  %v4560_v4 = vmul.f32 %v8639_v25, %v14881_v24  ;;  %v3626_v42 = vld [vmem:[#allocation2 + $0x7c] sm:$0x1] }
 0x3bd   : > { %v5187_v37 = vmul.f32 %v9436_v49, %v13344_v57  ;;  %v4290_v61 = vadd.f32 %v4238_v44, %v4100_v34  ;;  %v4428_v6 = vsel %vm3896_vm7, %v4425_v8, %v4427_v14  ;;  %v4601_v27 = vunpack.c.l.bf16 %v4593_v15 }
 0x3be   : > { %v9438_v59 = vpop.eup %9437  ;;  %v4637_v60 = vmul.f32 %v8639_v25, %v14882_v23  ;;  %v13513_v46 = vmul.f32 %v13497_v51, %v14882_v23  ;;  %v4431_v57 = vsel %vm3896_vm7, %v4429_v10, %v4430_v45  ;;  %v4792_v0 = vunpack.c.l.bf16 %v4784_v11 }
 0x3bf   : > { %v5188_v50 = vmul.f32 %v9438_v59, %v13351_v22  ;;  %v4480_v17 = vadd.f32 %v4428_v6, %v4290_v61  ;;  %v4481_v8 = vadd.f32 %v4431_v57, %v4291_v62  ;;  %v4636_v63 = vmul.f32 %v14882_v23, %v4601_v27 }
 0x3c0   : > { %v4722_v47 = vrot.slane %v4637_v60, 1  ;;  %v4723_v2 = vrot.slane %v13513_v46, 1  ;;  %v4826_v43 = vmul.f32 %v14883_v9, %v4601_v27  ;;  %v4827_v55 = vmul.f32 %v14883_v9, %v4792_v0  ;;  %v4025_v60 = vld [vmem:[#allocation2 + $0x88] ss:$16 sps:$4 sm:$0xff]  }
 0x3c1   : > { %v5203_v34 = vpack.c.bf16 %v5188_v50, %v5187_v37  ;;  %v4583_v48 = vadd.f32 %v4559_v28, %v4480_v17  ;;  %v4584_v22 = vadd.f32 %v4560_v4, %v4481_v8  ;;  %v4720_v25 = vrot.slane %v4636_v63, 1 }
 0x3c2   : > { %v4724_v5 = vsel %vm3705_vm5, %v4722_v47, %v4723_v2  ;;  %v13528_v3 = vmul.f32 %v13497_v51, %v14883_v9  ;;  %v4910_v14 = vrot.slane %v4826_v43, 2  ;;  %v4912_v15 = vrot.slane %v4827_v55, 2 }
 0x3c3   : > { %8860 = vmatprep.mubr.msk.bf16.mxu1 %vm1830_vm1, %v5203_v34  ;;  %v3564_v49 = vunpack.c.l.bf16 %v13381_v13  ;;  %v3593_v44 = vmul.f32 %v13214_v29, %v14874_v12  ;;  %v4721_v28 = vsel %vm3705_vm5, %v4718_v21, %v4720_v25  ;;  %v4774_v11 = vadd.f32 %v4724_v5, %v4584_v22  ;;  %v4111_v34 = vld [vmem:[#allocation2 + $0x8c] sm:$0x1] }
 0x3c4   : > { %v9440_v62 = vpop.eup %9439  ;;  %v4913_v37 = vrot.slane %v13528_v3, 2  ;;  %v3634_v61 = vunpack.c.l.bf16 %v3626_v42  ;;  %v4773_v59 = vadd.f32 %v4721_v28, %v4583_v48  ;;  %v4911_v4 = vsel %vm3896_vm7, %v4908_v36, %v4910_v14  ;;  %v8846_v28 = vpop.f32.mrf.mxu1 }
 0x3c5   : > { %v9442_v6 = vpop.eup %9441  ;;  %v5117_v10 = vadd.f32 1.0, %v9440_v62  ;;  %v3594_v13 = vmul.f32 %v14874_v12, %v3564_v49  ;;  %v3671_v30 = vmul.f32 %v14875_v31, %v3564_v49  ;;  %v3862_v17 = vmul.f32 %v14876_v52, %v3564_v49 }
 0x3c6   : > { %v5118_v27 = vadd.f32 1.0, %v9442_v6  ;;  %v4914_v29 = vsel %vm3896_vm7, %v4912_v15, %v4913_v37  ;;  %v3672_v21 = vmul.f32 %v14875_v31, %v3634_v61  ;;  %v4963_v50 = vadd.f32 %v4911_v4, %v4773_v59 }
 0x3c7   : > { %9443 = vrcp.f32 %v5117_v10  ;;  %v4964_v57 = vadd.f32 %v4914_v29, %v4774_v11  ;;  %v3758_v38 = vrot.slane %v3671_v30, 1  ;;  %v3863_v12 = vmul.f32 %v14876_v52, %v3634_v61  ;;  %v4594_v61 = vld [vmem:[#allocation2 + $0x9c] sm:$0x1] }
 0x3c8   : > { %9445 = vrcp.f32 %v5118_v27  ;;  %v3760_v36 = vrot.slane %v3672_v21, 1  ;;  %v4993_v0 = vmul.f32 %v14884_v56, %v4963_v50  ;;  %v3949_v63 = vrot.slane %v3862_v17, 2  ;;  %v5280_v21 = vpop.f32.mrf.mxu1 }
 0x3c9   : > { %v4994_v8 = vmul.f32 %v14884_v56, %v4964_v57  ;;  %v4049_v47 = vunpack.c.l.bf16 %v4025_v60  ;;  %v3759_v31 = vsel %vm3705_vm5, %v3756_v53, %v3758_v38  ;;  %v3951_v43 = vrot.slane %v3863_v12, 2 }
 0x3ca   : > { %v3761_v48 = vsel %vm3705_vm5, %v3758_v38, %v3760_v36  ;;  %v4078_v55 = vmul.f32 %v13386_v20, %v14877_v32  ;;  %v13558_v42 = vadd.f32 %v14885_v41, %v4993_v0  ;;  %v3808_v22 = vadd.f32 %v3759_v31, %v3593_v44  ;;  %v14916_v0 = vld [vmem:[#allocation18_spill] sm:$0xff]  ;;  %v8847_v31 = vpop.f32.mrf.mxu1 }
 0x3cb   : > { %v13561_v52 = vadd.f32 %v14885_v41, %v4994_v8  ;;  %v3809_v25 = vadd.f32 %v3761_v48, %v3594_v13  ;;  %v3950_v18 = vsel %vm3896_vm7, %v3947_v39, %v3949_v63  ;;  %v3952_v53 = vsel %vm3896_vm7, %v3949_v63, %v3951_v43 }
 0x3cc   : > { %v4079_v5 = vmul.f32 %v14877_v32, %v4049_v47  ;;  %v4119_v14 = vunpack.c.l.bf16 %v4111_v34  ;;  %v8331_v15 = vmul.f32 -1.442695, %v13558_v42  ;;  %v3999_v49 = vadd.f32 %v3950_v18, %v3808_v22 }
 0x3cd   : > { %v8332_v20 = vmul.f32 -1.442695, %v13561_v52  ;;  %v4000_v62 = vadd.f32 %v3952_v53, %v3809_v25  ;;  %v4156_v11 = vmul.f32 %v14878_v33, %v4049_v47  ;;  %v4346_v26 = vmul.f32 %v14879_v40, %v4049_v47 }
 0x3ce   : > { %v4157_v44 = vmul.f32 %v14878_v33, %v4119_v14  ;;  %v4347_v39 = vmul.f32 %v14879_v40, %v4119_v14  ;;  %9447 = vpow2.f32 %v8331_v15  ;;  %v4102_v6 = vadd.f32 %v4078_v55, %v3999_v49  ;;  %v5283_v15 = vpop.f32.mrf.mxu1 }
 0x3cf   : > { %v4103_v32 = vadd.f32 %v4079_v5, %v4000_v62  ;;  %v4532_v10 = vunpack.c.h.bf16 %v4025_v60  ;;  %9449 = vpow2.f32 %v8332_v20  ;;  %v4242_v59 = vrot.slane %v4156_v11, 1 }
 0x3d0   : > { %v4244_v4 = vrot.slane %v4157_v44, 1  ;;  %v4432_v13 = vrot.slane %v4346_v26, 2  ;;  %v4434_v27 = vrot.slane %v4347_v39, 2  ;;  %v4561_v29 = vmul.f32 %v13497_v51, %v14881_v24 }
 0x3d1   : > { %v4562_v30 = vmul.f32 %v14881_v24, %v4532_v10  ;;  %v4602_v33 = vunpack.c.l.bf16 %v4594_v61  ;;  %v4243_v40 = vsel %vm3705_vm5, %v4240_v1, %v4242_v59  ;;  %v4639_v57 = vmul.f32 %v14882_v23, %v4532_v10 }
 0x3d2   : > { %v4245_v50 = vsel %vm3705_vm5, %v4242_v59, %v4244_v4  ;;  %v4433_v60 = vsel %vm3896_vm7, %v4430_v45, %v4432_v13  ;;  %v4292_v17 = vadd.f32 %v4243_v40, %v4102_v6  ;;  %v4435_v51 = vsel %vm3896_vm7, %v4432_v13, %v4434_v27 }
 0x3d3   : > { %v4293_v38 = vadd.f32 %v4245_v50, %v4103_v32  ;;  %v4640_v24 = vmul.f32 %v14882_v23, %v4602_v33  ;;  %v4725_v12 = vrot.slane %v4639_v57, 1  ;;  %v4829_v7 = vmul.f32 %v14883_v9, %v4532_v10 }
 0x3d4   : > { %v9444_v36 = vpop.eup %9443  ;;  %v4830_v1 = vmul.f32 %v14883_v9, %v4602_v33  ;;  %v6204_v8 = vmul.f32 %v14916_v0, %v13411_v54  ;;  %v4482_v63 = vadd.f32 %v4433_v60, %v4292_v17  ;;  %v14917_v54 = vld [vmem:[#allocation19_spill] sm:$0xff]  ;;  %v5383_v14 = vmul.f32 %v8846_v28, %v14916_v0 }
 0x3d5   : > { %v9446_v58 = vpop.eup %9445  ;;  %v5189_v45 = vmul.f32 %v9444_v36, %v13458_v35  ;;  %v4483_v47 = vadd.f32 %v4435_v51, %v4293_v38  ;;  %v4727_v34 = vrot.slane %v4640_v24, 1  ;;  %v4726_v23 = vsel %vm3705_vm5, %v4723_v2, %v4725_v12 }
 0x3d6   : > { %v5190_v48 = vmul.f32 %v9446_v58, %v13462_v19  ;;  %v4915_v43 = vrot.slane %v4829_v7, 2  ;;  %v4917_v55 = vrot.slane %v4830_v1, 2  ;;  %v4585_v22 = vadd.f32 %v4561_v29, %v4482_v63 }
 0x3d7   : > { %v4586_v9 = vadd.f32 %v4562_v30, %v4483_v47  ;;  %v4728_v25 = vsel %vm3705_vm5, %v4725_v12, %v4727_v34  ;;  %v13598_v18 = vadd.f32 %v14917_v54, %v6204_v8  ;;  %v5381_v20 = vmul.f32 %v14916_v0, %v5280_v21 }
 0x3d8   : > { %v5204_v35 = vpack.c.bf16 %v5190_v48, %v5189_v45  ;;  %v4916_v53 = vsel %vm3896_vm7, %v4913_v37, %v4915_v43  ;;  %v4918_v19 = vsel %vm3896_vm7, %v4915_v43, %v4917_v55  ;;  %v4775_v5 = vadd.f32 %v4726_v23, %v4585_v22 }
 0x3d9   : > { %v4776_v46 = vadd.f32 %v4728_v25, %v4586_v9  ;;  %v8406_v2 = vmul.f32 -1.442695, %v13598_v18  ;;  %v6205_v49 = vmul.f32 %v14916_v0, %v13429_v16  ;;  %v5384_v3 = vmul.f32 %v8847_v31, %v14916_v0 }
 0x3da   : > { %8861 = vmatmul.mubr.msk.bf16.gmra.mxu1 %vm1830_vm1, %v5204_v35  ;;  %v4965_v62 = vadd.f32 %v4916_v53, %v4775_v5  ;;  %v13612_v11 = vadd.f32 %v14917_v54, %v5383_v14  ;;  %v13615_v26 = vadd.f32 %v14917_v54, %v5381_v20  ;;  %v5382_v39 = vmul.f32 %v14916_v0, %v5283_v15 }
 0x3db   : > { %v4966_v37 = vadd.f32 %v4918_v19, %v4776_v46  ;;  %9451 = vpow2.f32 %v8406_v2  ;;  %v9448_v44 = vpop.eup %9447  ;;  %v13618_v28 = vadd.f32 %v14917_v54, %v6205_v49  ;;  %v13626_v13 = vadd.f32 %v14917_v54, %v5384_v3 }
 0x3dc   : > { %v9450_v61 = vpop.eup %9449  ;;  %v5119_v6 = vadd.f32 1.0, %v9448_v44  ;;  %v4995_v16 = vmul.f32 %v14884_v56, %v4965_v62  ;;  %v8351_v10 = vmul.f32 -1.442695, %v13612_v11  ;;  %v8349_v4 = vmul.f32 -1.442695, %v13615_v26 }
 0x3dd   : > { %v4996_v32 = vmul.f32 %v14884_v56, %v4966_v37  ;;  %v5120_v59 = vadd.f32 1.0, %v9450_v61  ;;  %v13635_v30 = vadd.f32 %v14917_v54, %v5382_v39  ;;  %v8407_v21 = vmul.f32 -1.442695, %v13618_v28 }
 0x3de   : > { %9453 = vrcp.f32 %v5119_v6  ;;  %v13629_v27 = vadd.f32 %v14885_v41, %v4995_v16  ;;  %v8352_v40 = vmul.f32 -1.442695, %v13626_v13  ;;  %vm6292_vm8 = vsmask.f32 256 }
 0x3df   : > { %v13632_v29 = vadd.f32 %v14885_v41, %v4996_v32  ;;  %9455 = vrcp.f32 %v5120_v59  ;;  %v8350_v50 = vmul.f32 -1.442695, %v13635_v30  ;;  %vm13662_vm9 = vmand %vm3444_vm4, %vm6292_vm8  ;;  %vm6325_vm10 = vsmask.f32 7938 }
 0x3e0   : > { %v8333_v56 = vmul.f32 -1.442695, %v13629_v27  ;;  %9457 = vpow2.f32 %v8351_v10  ;;  %vm13684_vm11 = vmand %vm2472_vm2, %vm6325_vm10 }
 0x3e1   : > { %v8334_v33 = vmul.f32 -1.442695, %v13632_v29  ;;  %9459 = vpow2.f32 %v8349_v4 }
 0x3e2   : > { %9461 = vpow2.f32 %v8333_v56 }
 0x3e3   : > { %9463 = vpow2.f32 %v8334_v33 }
 0x3e4   : > { %9465 = vpow2.f32 %v8407_v21 }
 0x3e5   : > { %9467 = vpow2.f32 %v8352_v40 }
 0x3e6   : > { %9469 = vpow2.f32 %v8350_v50 }
 0x3e8   : > { %v9452_v41 = vpop.eup %9451  ;;  %v6189_v57 = vpop.f32.mrf.mxu0 }
 0x3e9   : > { %v6234_v60 = vadd.f32 1.0, %v9452_v41  ;;  %v6206_v38 = vmul.f32 %v14916_v0, %v6189_v57 }
 0x3ea   : > { %v8876_v51 = vpop.f32.mrf.mxu0 }
 0x3eb   : > { %9471 = vrcp.f32 %v6234_v60  ;;  %v9454_v17 = vpop.eup %9453  ;;  %v13647_v31 = vadd.f32 %v14917_v54, %v6206_v38 }
 0x3ec   : > { %v9456_v24 = vpop.eup %9455  ;;  %v5191_v36 = vmul.f32 %v9454_v17, %v13558_v42  ;;  %v6192_v1 = vpop.f32.mrf.mxu0 }
 0x3ed   : > { %v9458_v12 = vpop.eup %9457  ;;  %v5192_v7 = vmul.f32 %v9456_v24, %v13561_v52  ;;  %v6207_v45 = vmul.f32 %v14916_v0, %v6192_v1  ;;  %v8408_v53 = vmul.f32 -1.442695, %v13647_v31 }
 0x3ee   : > { %v9460_v8 = vpop.eup %9459  ;;  %v5509_v58 = vadd.f32 1.0, %v9458_v12  ;;  %v8877_v48 = vpop.f32.mrf.mxu0 }
 0x3ef   : > { %v9462_v63 = vpop.eup %9461  ;;  %v5205_v47 = vpack.c.bf16 %v5192_v7, %v5191_v36  ;;  %v5507_v34 = vadd.f32 1.0, %v9460_v8  ;;  %v13650_v42 = vadd.f32 %v14917_v54, %v6207_v45 }
 0x3f0   : > { %v9464_v23 = vpop.eup %9463  ;;  %v5121_v43 = vadd.f32 1.0, %v9462_v63  ;;  %9473 = vrcp.f32 %v5509_v58 }
 0x3f1   : > { %v9466_v55 = vpop.eup %9465  ;;  %8864 = vmatprep.mubr.msk.bf16.mxu1 %vm1830_vm1, %v5205_v47  ;;  %v5122_v52 = vadd.f32 1.0, %v9464_v23  ;;  %9475 = vrcp.f32 %v5507_v34  ;;  %v8409_v5 = vmul.f32 -1.442695, %v13650_v42 }
 0x3f2   : > { %v9468_v22 = vpop.eup %9467  ;;  %9477 = vrcp.f32 %v5121_v43  ;;  %v6235_v9 = vadd.f32 1.0, %v9466_v55 }
 0x3f3   : > { %v9470_v25 = vpop.eup %9469  ;;  %9479 = vrcp.f32 %v5122_v52  ;;  %v5510_v35 = vadd.f32 1.0, %v9468_v22 }
 0x3f4   : > { %9481 = vrcp.f32 %v6235_v9  ;;  %v5508_v19 = vadd.f32 1.0, %v9470_v25 }
 0x3f5   : > { %9483 = vrcp.f32 %v5510_v35 }
 0x3f6   : > { %9485 = vrcp.f32 %v5508_v19 }
 0x3f7   : > { %9487 = vpow2.f32 %v8408_v53 }
 0x3f8   : > { %v9472_v46 = vpop.eup %9471  ;;  %9489 = vpow2.f32 %v8409_v5 }
 0x3f9   : > { %v6252_v2 = vmul.f32 %v9472_v46, %v13598_v18 }
 0x3fb   : > { %v8539_v14 = vpack.c.bf16 %v6252_v2, %v6252_v2 }
 0x3fd   : > { %6285 = vst.msk [vmem:[#allocation3 + $0x60] sm:$0xf] %vm2472_vm2, %v8539_v14  ;;  %v9474_v15 = vpop.eup %9473 }
 0x3fe   : > { %v9476_v20 = vpop.eup %9475  ;;  %v5581_v49 = vmul.f32 %v9474_v15, %v13612_v11 }
 0x3ff   : > { %v9478_v3 = vpop.eup %9477  ;;  %v5579_v62 = vmul.f32 %v9476_v20, %v13615_v26 }
 0x400   : > { %v9480_v37 = vpop.eup %9479  ;;  %v5193_v44 = vmul.f32 %v9478_v3, %v13629_v27  ;;  %v8517_v39 = vpack.c.bf16 %v5581_v49, %v5581_v49  ;;  %v8850_v32 = vpop.f32.mrf.mxu1 }
 0x401   : > { %v9482_v61 = vpop.eup %9481  ;;  %v5194_v6 = vmul.f32 %v9480_v37, %v13632_v29  ;;  %v8515_v16 = vpack.c.bf16 %v5579_v62, %v5579_v62  ;;  %v5387_v26 = vmul.f32 %v8850_v32, %v14916_v0 }
 0x402   : > { %v9484_v10 = vpop.eup %9483  ;;  %5709 = vst.msk [vmem:[#allocation3 + $0x8] sm:$0xf] %vm2472_vm2, %v8517_v39  ;;  %v6253_v11 = vmul.f32 %v9482_v61, %v13618_v28  ;;  %v5296_v56 = vpop.f32.mrf.mxu1 }
 0x403   : > { %v9486_v59 = vpop.eup %9485  ;;  %v5206_v4 = vpack.c.bf16 %v5194_v6, %v5193_v44  ;;  %5707 = vst.msk [vmem:[#allocation3] sm:$0xf] %vm2472_vm2, %v8515_v16  ;;  %v5582_v29 = vmul.f32 %v9484_v10, %v13626_v13  ;;  %v13675_v28 = vadd.f32 %v14917_v54, %v5387_v26  ;;  %v5385_v17 = vmul.f32 %v14916_v0, %v5296_v56 }
 0x404   : > { %v6318_v27 = vld [vmem:[#allocation3 + $0x60] sm:$0x1]  ;;  %v9488_v33 = vpop.eup %9487  ;;  %v8540_v40 = vpack.c.bf16 %v6253_v11, %v6253_v11  ;;  %v5580_v50 = vmul.f32 %v9486_v59, %v13635_v30  ;;  %v8851_v13 = vpop.f32.mrf.mxu1 }
 0x405   : > { %v6319_v21 = vsel %vm13662_vm9, 0, %v6318_v27  ;;  %v9490_v41 = vpop.eup %9489  ;;  %8865 = vmatmul.mubr.msk.bf16.gmra.mxu1 %vm1830_vm1, %v5206_v4  ;;  %v8518_v60 = vpack.c.bf16 %v5582_v29, %v5582_v29  ;;  %v6236_v57 = vadd.f32 1.0, %v9488_v33  ;;  %v8355_v51 = vmul.f32 -1.442695, %v13675_v28 }
 0x406   : > { %6320 = vst [vmem:[#allocation3 + $0x60] sm:$0x1] %v6319_v21  ;;  %6286 = vst.msk [vmem:[#allocation3 + $0x64] sm:$0xf] %vm2472_vm2, %v8540_v40  ;;  %v8516_v38 = vpack.c.bf16 %v5580_v50, %v5580_v50  ;;  %v6237_v24 = vadd.f32 1.0, %v9490_v41  ;;  %v5388_v30 = vmul.f32 %v8851_v13, %v14916_v0  ;;  %v5415_v12 = vadd.f32 %v14917_v54, %v5385_v17  ;;  %v5299_v7 = vpop.f32.mrf.mxu1 }
 0x407   : > { %5710 = vst.msk [vmem:[#allocation3 + $0xc] sm:$0xf] %vm2472_vm2, %v8518_v60  ;;  %9491 = vrcp.f32 %v6236_v57  ;;  %v5386_v8 = vmul.f32 %v14916_v0, %v5299_v7 }
 0x408   : > { %5708 = vst.msk [vmem:[#allocation3 + $0x4] sm:$0xf] %vm2472_vm2, %v8516_v38  ;;  %9493 = vpow2.f32 %v8355_v51  ;;  %v5418_v1 = vadd.f32 %v14917_v54, %v5388_v30  ;;  %v8353_v45 = vmul.f32 -1.442695, %v5415_v12 }
 0x409   : > { %v6327_v58 = vld [vmem:[#allocation3 + $0x8] sm:$0xf]  ;;  %9495 = vrcp.f32 %v6237_v24  ;;  %v5416_v48 = vadd.f32 %v14917_v54, %v5386_v8 }
 0x40a   : > { %v6328_v63 = vsel %vm13684_vm11, 0, %v6327_v58  ;;  %v6294_v47 = vld [vmem:[#allocation3] sm:$0x1]  ;;  %v8356_v34 = vmul.f32 -1.442695, %v5418_v1  ;;  %9497 = vpow2.f32 %v8353_v45 }
 0x40b   : > { %6329 = vst [vmem:[#allocation3 + $0x8] sm:$0xf] %v6328_v63  ;;  %v6295_v23 = vsel %vm13662_vm9, 0, %v6294_v47  ;;  %v8354_v43 = vmul.f32 -1.442695, %v5416_v48 }
 0x40c   : > { %6296 = vst [vmem:[#allocation3] sm:$0x1] %v6295_v23  ;;  %9499 = vpow2.f32 %v8356_v34 }
 0x40d   : > { %9501 = vpow2.f32 %v8354_v43 }
 0x40e   : > { %v6297_v55 = vld [vmem:[#allocation3 + $0xc] sm:$0x1] }
 0x40f   : > { %v6298_v52 = vsel %vm13662_vm9, 0, %v6297_v55 }
 0x410   : > { %6299 = vst [vmem:[#allocation3 + $0xc] sm:$0x1] %v6298_v52 }
 0x414   : > { %v9492_v22 = vpop.eup %9491 }
 0x415   : > { %v9494_v9 = vpop.eup %9493  ;;  %v6254_v25 = vmul.f32 %v9492_v22, %v13647_v31 }
 0x416   : > { %v9496_v35 = vpop.eup %9495  ;;  %v5513_v53 = vadd.f32 1.0, %v9494_v9 }
 0x417   : > { %v8541_v19 = vpack.c.bf16 %v6254_v25, %v6254_v25  ;;  %v6255_v5 = vmul.f32 %v9496_v35, %v13650_v42  ;;  %v9498_v46 = vpop.eup %9497 }
 0x418   : > { %9503 = vrcp.f32 %v5513_v53  ;;  %v5511_v14 = vadd.f32 1.0, %v9498_v46 }
 0x419   : > { %v9500_v2 = vpop.eup %9499  ;;  %6287 = vst.msk [vmem:[#allocation3 + $0x68] sm:$0xf] %vm2472_vm2, %v8541_v19  ;;  %v8542_v15 = vpack.c.bf16 %v6255_v5, %v6255_v5 }
 0x41a   : > { %v5514_v20 = vadd.f32 1.0, %v9500_v2  ;;  %v9502_v49 = vpop.eup %9501  ;;  %9505 = vrcp.f32 %v5511_v14 }
 0x41b   : > { %6288 = vst.msk [vmem:[#allocation3 + $0x6c] sm:$0xf] %vm2472_vm2, %v8542_v15  ;;  %v5512_v3 = vadd.f32 1.0, %v9502_v49 }
 0x41c   : > { %9507 = vrcp.f32 %v5514_v20 }
 0x41d   : > { %9509 = vrcp.f32 %v5512_v3 }
 0x420   : > { %v6351_v31 = vld [vmem:[#allocation3 + $0x68] sm:$0xf] }
 0x421   : > { %v6352_v62 = vsel %vm13684_vm11, 0, %v6351_v31 }
 0x422   : > { %6353 = vst [vmem:[#allocation3 + $0x68] sm:$0xf] %v6352_v62  ;;  %v6321_v42 = vld [vmem:[#allocation3 + $0x6c] sm:$0x1] }
 0x423   : > { %v6322_v37 = vsel %vm13662_vm9, 0, %v6321_v42 }
 0x424   : > { %6323 = vst [vmem:[#allocation3 + $0x6c] sm:$0x1] %v6322_v37 }
 0x425   : > { %v9504_v44 = vpop.eup %9503 }
 0x426   : > { %v5585_v39 = vmul.f32 %v9504_v44, %v13675_v28 }
 0x427   : > { %v9506_v61 = vpop.eup %9505 }
 0x428   : > { %v8521_v6 = vpack.c.bf16 %v5585_v39, %v5585_v39  ;;  %v5583_v32 = vmul.f32 %v9506_v61, %v5415_v12 }
 0x429   : > { %v9508_v16 = vpop.eup %9507 }
 0x42a   : > { %5713 = vst.msk [vmem:[#allocation3 + $0x18] sm:$0xf] %vm2472_vm2, %v8521_v6  ;;  %v5586_v10 = vmul.f32 %v9508_v16, %v5418_v1  ;;  %v9510_v11 = vpop.eup %9509  ;;  %v8519_v26 = vpack.c.bf16 %v5583_v32, %v5583_v32 }
 0x42b   : > { %v5584_v4 = vmul.f32 %v9510_v11, %v5416_v48 }
 0x42c   : > { %v8522_v59 = vpack.c.bf16 %v5586_v10, %v5586_v10  ;;  %5711 = vst.msk [vmem:[#allocation3 + $0x10] sm:$0xf] %vm2472_vm2, %v8519_v26 }
 0x42d   : > { %v6197_v27 = vpop.f32.mrf.mxu0  ;;  %v8520_v56 = vpack.c.bf16 %v5584_v4, %v5584_v4 }
 0x42e   : > { %v6208_v29 = vmul.f32 %v14916_v0, %v6197_v27  ;;  %5714 = vst.msk [vmem:[#allocation3 + $0x1c] sm:$0xf] %vm2472_vm2, %v8522_v59 }
 0x42f   : > { %v8880_v33 = vpop.f32.mrf.mxu0  ;;  %5712 = vst.msk [vmem:[#allocation3 + $0x14] sm:$0xf] %vm2472_vm2, %v8520_v56 }
 0x430   : > { %v6214_v21 = vadd.f32 %v14917_v54, %v6208_v29 }
 0x431   : > { %v6200_v40 = vpop.f32.mrf.mxu0  ;;  %v6300_v50 = vld [vmem:[#allocation3 + $0x18] sm:$0x1] }
 0x432   : > { %v8410_v28 = vmul.f32 -1.442695, %v6214_v21  ;;  %v6209_v41 = vmul.f32 %v14916_v0, %v6200_v40  ;;  %v6301_v60 = vsel %vm13662_vm9, 0, %v6300_v50 }
 0x433   : > { %v8881_v57 = vpop.f32.mrf.mxu0  ;;  %6302 = vst [vmem:[#allocation3 + $0x18] sm:$0x1] %v6301_v60 }
 0x434   : > { %9511 = vpow2.f32 %v8410_v28  ;;  %v6215_v17 = vadd.f32 %v14917_v54, %v6209_v41 }
 0x436   : > { %v8411_v13 = vmul.f32 -1.442695, %v6215_v17  ;;  %v6330_v38 = vld [vmem:[#allocation3 + $0x14] sm:$0xf] }
 0x437   : > { %v6331_v51 = vsel %vm13684_vm11, 0, %v6330_v38 }
 0x438   : > { %9513 = vpow2.f32 %v8411_v13  ;;  %6332 = vst [vmem:[#allocation3 + $0x14] sm:$0xf] %v6331_v51 }
 0x440   : > { %v8854_v30 = vpop.f32.mrf.mxu1 }
 0x441   : > { %v9512_v24 = vpop.eup %9511  ;;  %v5391_v7 = vmul.f32 %v8854_v30, %v14916_v0 }
 0x442   : > { %v6238_v12 = vadd.f32 1.0, %v9512_v24  ;;  %v5312_v1 = vpop.f32.mrf.mxu1 }
 0x443   : > { %v5421_v8 = vadd.f32 %v14917_v54, %v5391_v7  ;;  %v5389_v58 = vmul.f32 %v14916_v0, %v5312_v1 }
 0x444   : > { %9515 = vrcp.f32 %v6238_v12  ;;  %v8855_v63 = vpop.f32.mrf.mxu1 }
 0x445   : > { %v9514_v45 = vpop.eup %9513  ;;  %v8359_v47 = vmul.f32 -1.442695, %v5421_v8  ;;  %v5419_v34 = vadd.f32 %v14917_v54, %v5389_v58  ;;  %v5392_v23 = vmul.f32 %v8855_v63, %v14916_v0 }
 0x446   : > { %v6239_v48 = vadd.f32 1.0, %v9514_v45  ;;  %v5315_v43 = vpop.f32.mrf.mxu1 }
 0x447   : > { %9517 = vpow2.f32 %v8359_v47  ;;  %v8357_v55 = vmul.f32 -1.442695, %v5419_v34  ;;  %v5422_v52 = vadd.f32 %v14917_v54, %v5392_v23  ;;  %v5390_v22 = vmul.f32 %v14916_v0, %v5315_v43 }
 0x448   : > { %9519 = vrcp.f32 %v6239_v48 }
 0x449   : > { %9521 = vpow2.f32 %v8357_v55  ;;  %v8360_v9 = vmul.f32 -1.442695, %v5422_v52  ;;  %v5420_v25 = vadd.f32 %v14917_v54, %v5390_v22 }
 0x44b   : > { %9523 = vpow2.f32 %v8360_v9  ;;  %v8358_v35 = vmul.f32 -1.442695, %v5420_v25 }
 0x44d   : > { %9525 = vpow2.f32 %v8358_v35 }
 0x451   : > { %v9516_v53 = vpop.eup %9515 }
 0x452   : > { %v6256_v19 = vmul.f32 %v9516_v53, %v6214_v21 }
 0x454   : > { %v8543_v5 = vpack.c.bf16 %v6256_v19, %v6256_v19  ;;  %v9518_v46 = vpop.eup %9517 }
 0x455   : > { %v9520_v2 = vpop.eup %9519  ;;  %v5517_v14 = vadd.f32 1.0, %v9518_v46 }
 0x456   : > { %6289 = vst.msk [vmem:[#allocation3 + $0x70] sm:$0xf] %vm2472_vm2, %v8543_v5  ;;  %v9522_v15 = vpop.eup %9521  ;;  %v6257_v20 = vmul.f32 %v9520_v2, %v6215_v17 }
 0x457   : > { %9527 = vrcp.f32 %v5517_v14  ;;  %v5515_v49 = vadd.f32 1.0, %v9522_v15 }
 0x458   : > { %v9524_v3 = vpop.eup %9523  ;;  %v8544_v31 = vpack.c.bf16 %v6257_v20, %v6257_v20 }
 0x459   : > { %9529 = vrcp.f32 %v5515_v49  ;;  %v5518_v62 = vadd.f32 1.0, %v9524_v3 }
 0x45a   : > { %v9526_v42 = vpop.eup %9525  ;;  %6290 = vst.msk [vmem:[#allocation3 + $0x74] sm:$0xf] %vm2472_vm2, %v8544_v31 }
 0x45b   : > { %9531 = vrcp.f32 %v5518_v62  ;;  %v5516_v37 = vadd.f32 1.0, %v9526_v42 }
 0x45d   : > { %9533 = vrcp.f32 %v5516_v37 }
 0x461   : > { %v6354_v44 = vld [vmem:[#allocation3 + $0x74] sm:$0xf] }
 0x462   : > { %v6355_v39 = vsel %vm13684_vm11, 0, %v6354_v44 }
 0x463   : > { %6356 = vst [vmem:[#allocation3 + $0x74] sm:$0xf] %v6355_v39 }
 0x464   : > { %v9528_v61 = vpop.eup %9527 }
 0x465   : > { %v5589_v6 = vmul.f32 %v9528_v61, %v5421_v8 }
 0x466   : > { %v9530_v16 = vpop.eup %9529 }
 0x467   : > { %v8525_v32 = vpack.c.bf16 %v5589_v6, %v5589_v6  ;;  %v5587_v10 = vmul.f32 %v9530_v16, %v5419_v34 }
 0x468   : > { %v9532_v11 = vpop.eup %9531 }
 0x469   : > { %5717 = vst.msk [vmem:[#allocation3 + $0x28] sm:$0xf] %vm2472_vm2, %v8525_v32  ;;  %v8523_v26 = vpack.c.bf16 %v5587_v10, %v5587_v10  ;;  %v5590_v59 = vmul.f32 %v9532_v11, %v5422_v52 }
 0x46a   : > { %v9534_v4 = vpop.eup %9533 }
 0x46b   : > { %5715 = vst.msk [vmem:[#allocation3 + $0x20] sm:$0xf] %vm2472_vm2, %v8523_v26  ;;  %v8526_v27 = vpack.c.bf16 %v5590_v59, %v5590_v59  ;;  %v5588_v29 = vmul.f32 %v9534_v4, %v5420_v25 }
 0x46d   : > { %5718 = vst.msk [vmem:[#allocation3 + $0x2c] sm:$0xf] %vm2472_vm2, %v8526_v27  ;;  %v8524_v56 = vpack.c.bf16 %v5588_v29, %v5588_v29 }
 0x46f   : > { %5716 = vst.msk [vmem:[#allocation3 + $0x24] sm:$0xf] %vm2472_vm2, %v8524_v56  ;;  %v8858_v33 = vpop.f32.mrf.mxu1 }
 0x470   : > { %v5395_v21 = vmul.f32 %v8858_v33, %v14916_v0 }
 0x471   : > { %v5328_v40 = vpop.f32.mrf.mxu1 }
 0x472   : > { %v6333_v50 = vld [vmem:[#allocation3 + $0x20] sm:$0xf]  ;;  %v5425_v28 = vadd.f32 %v14917_v54, %v5395_v21  ;;  %v5393_v41 = vmul.f32 %v14916_v0, %v5328_v40 }
 0x473   : > { %v6334_v60 = vsel %vm13684_vm11, 0, %v6333_v50  ;;  %v8859_v57 = vpop.f32.mrf.mxu1 }
 0x474   : > { %6335 = vst [vmem:[#allocation3 + $0x20] sm:$0xf] %v6334_v60  ;;  %v6336_v17 = vld [vmem:[#allocation3 + $0x2c] sm:$0xf]  ;;  %v8363_v13 = vmul.f32 -1.442695, %v5425_v28  ;;  %v5423_v38 = vadd.f32 %v14917_v54, %v5393_v41  ;;  %v5396_v51 = vmul.f32 %v8859_v57, %v14916_v0 }
 0x475   : > { %v6337_v24 = vsel %vm13684_vm11, 0, %v6336_v17  ;;  %v5331_v30 = vpop.f32.mrf.mxu1 }
 0x476   : > { %6338 = vst [vmem:[#allocation3 + $0x2c] sm:$0xf] %v6337_v24  ;;  %v6303_v12 = vld [vmem:[#allocation3 + $0x24] sm:$0x1]  ;;  %9535 = vpow2.f32 %v8363_v13  ;;  %v8361_v7 = vmul.f32 -1.442695, %v5423_v38  ;;  %v5426_v1 = vadd.f32 %v14917_v54, %v5396_v51  ;;  %v5394_v8 = vmul.f32 %v14916_v0, %v5331_v30 }
 0x477   : > { %v6304_v58 = vsel %vm13662_vm9, 0, %v6303_v12 }
 0x478   : > { %6305 = vst [vmem:[#allocation3 + $0x24] sm:$0x1] %v6304_v58  ;;  %9537 = vpow2.f32 %v8361_v7  ;;  %v8364_v45 = vmul.f32 -1.442695, %v5426_v1  ;;  %v5424_v63 = vadd.f32 %v14917_v54, %v5394_v8 }
 0x47a   : > { %9539 = vpow2.f32 %v8364_v45  ;;  %v8362_v47 = vmul.f32 -1.442695, %v5424_v63 }
 0x47c   : > { %9541 = vpow2.f32 %v8362_v47 }
 0x483   : > { %v9536_v34 = vpop.eup %9535 }
 0x484   : > { %v5521_v48 = vadd.f32 1.0, %v9536_v34 }
 0x485   : > { %v9538_v23 = vpop.eup %9537 }
 0x486   : > { %9543 = vrcp.f32 %v5521_v48  ;;  %v5519_v43 = vadd.f32 1.0, %v9538_v23 }
 0x487   : > { %v9540_v55 = vpop.eup %9539 }
 0x488   : > { %9545 = vrcp.f32 %v5519_v43  ;;  %v5522_v52 = vadd.f32 1.0, %v9540_v55 }
 0x489   : > { %v9542_v22 = vpop.eup %9541 }
 0x48a   : > { %9547 = vrcp.f32 %v5522_v52  ;;  %v5520_v9 = vadd.f32 1.0, %v9542_v22 }
 0x48c   : > { %9549 = vrcp.f32 %v5520_v9 }
 0x493   : > { %v9544_v25 = vpop.eup %9543 }
 0x494   : > { %v5593_v35 = vmul.f32 %v9544_v25, %v5425_v28 }
 0x495   : > { %v9546_v53 = vpop.eup %9545 }
 0x496   : > { %v8529_v19 = vpack.c.bf16 %v5593_v35, %v5593_v35  ;;  %v5591_v5 = vmul.f32 %v9546_v53, %v5423_v38 }
 0x497   : > { %v9548_v46 = vpop.eup %9547 }
 0x498   : > { %5721 = vst.msk [vmem:[#allocation3 + $0x38] sm:$0xf] %vm2472_vm2, %v8529_v19  ;;  %v8527_v2 = vpack.c.bf16 %v5591_v5, %v5591_v5  ;;  %v5594_v14 = vmul.f32 %v9548_v46, %v5426_v1 }
 0x499   : > { %v9550_v15 = vpop.eup %9549 }
 0x49a   : > { %v8862_v20 = vpop.f32.mrf.mxu1  ;;  %5719 = vst.msk [vmem:[#allocation3 + $0x30] sm:$0xf] %vm2472_vm2, %v8527_v2  ;;  %v8530_v49 = vpack.c.bf16 %v5594_v14, %v5594_v14  ;;  %v5592_v3 = vmul.f32 %v9550_v15, %v5424_v63 }
 0x49b   : > { %v5399_v31 = vmul.f32 %v8862_v20, %v14916_v0 }
 0x49c   : > { %v5344_v62 = vpop.f32.mrf.mxu1  ;;  %5722 = vst.msk [vmem:[#allocation3 + $0x3c] sm:$0xf] %vm2472_vm2, %v8530_v49  ;;  %v8528_v42 = vpack.c.bf16 %v5592_v3, %v5592_v3 }
 0x49d   : > { %v5429_v37 = vadd.f32 %v14917_v54, %v5399_v31  ;;  %v5397_v44 = vmul.f32 %v14916_v0, %v5344_v62 }
 0x49e   : > { %v8863_v39 = vpop.f32.mrf.mxu1  ;;  %5720 = vst.msk [vmem:[#allocation3 + $0x34] sm:$0xf] %vm2472_vm2, %v8528_v42 }
 0x49f   : > { %v8367_v61 = vmul.f32 -1.442695, %v5429_v37  ;;  %v5427_v6 = vadd.f32 %v14917_v54, %v5397_v44  ;;  %v5400_v16 = vmul.f32 %v8863_v39, %v14916_v0  ;;  %v6339_v32 = vld [vmem:[#allocation3 + $0x38] sm:$0xf] }
 0x4a0   : > { %v5347_v10 = vpop.f32.mrf.mxu1  ;;  %v6340_v11 = vsel %vm13684_vm11, 0, %v6339_v32 }
 0x4a1   : > { %9551 = vpow2.f32 %v8367_v61  ;;  %v8365_v26 = vmul.f32 -1.442695, %v5427_v6  ;;  %v5430_v59 = vadd.f32 %v14917_v54, %v5400_v16  ;;  %6341 = vst [vmem:[#allocation3 + $0x38] sm:$0xf] %v6340_v11  ;;  %v6306_v4 = vld [vmem:[#allocation3 + $0x30] sm:$0x1]  ;;  %v5398_v27 = vmul.f32 %v14916_v0, %v5347_v10 }
 0x4a2   : > { %v6307_v29 = vsel %vm13662_vm9, 0, %v6306_v4 }
 0x4a3   : > { %9553 = vpow2.f32 %v8365_v26  ;;  %v8368_v56 = vmul.f32 -1.442695, %v5430_v59  ;;  %6308 = vst [vmem:[#allocation3 + $0x30] sm:$0x1] %v6307_v29  ;;  %v6309_v33 = vld [vmem:[#allocation3 + $0x3c] sm:$0x1]  ;;  %v5428_v21 = vadd.f32 %v14917_v54, %v5398_v27 }
 0x4a4   : > { %v6310_v40 = vsel %vm13662_vm9, 0, %v6309_v33 }
 0x4a5   : > { %9555 = vpow2.f32 %v8368_v56  ;;  %6311 = vst [vmem:[#allocation3 + $0x3c] sm:$0x1] %v6310_v40  ;;  %v8366_v50 = vmul.f32 -1.442695, %v5428_v21 }
 0x4a7   : > { %9557 = vpow2.f32 %v8366_v50 }
 0x4ae   : > { %v9552_v28 = vpop.eup %9551 }
 0x4af   : > { %v5525_v41 = vadd.f32 1.0, %v9552_v28 }
 0x4b0   : > { %v9554_v60 = vpop.eup %9553 }
 0x4b1   : > { %9559 = vrcp.f32 %v5525_v41  ;;  %v5523_v57 = vadd.f32 1.0, %v9554_v60 }
 0x4b2   : > { %v9556_v17 = vpop.eup %9555 }
 0x4b3   : > { %9561 = vrcp.f32 %v5523_v57  ;;  %v5526_v13 = vadd.f32 1.0, %v9556_v17 }
 0x4b4   : > { %v9558_v38 = vpop.eup %9557 }
 0x4b5   : > { %9563 = vrcp.f32 %v5526_v13  ;;  %v5524_v51 = vadd.f32 1.0, %v9558_v38 }
 0x4b7   : > { %9565 = vrcp.f32 %v5524_v51 }
 0x4be   : > { %v9560_v24 = vpop.eup %9559 }
 0x4bf   : > { %v5597_v30 = vmul.f32 %v9560_v24, %v5429_v37 }
 0x4c0   : > { %v9562_v12 = vpop.eup %9561 }
 0x4c1   : > { %v8533_v7 = vpack.c.bf16 %v5597_v30, %v5597_v30  ;;  %v5595_v1 = vmul.f32 %v9562_v12, %v5427_v6 }
 0x4c2   : > { %v9564_v8 = vpop.eup %9563 }
 0x4c3   : > { %5725 = vst.msk [vmem:[#allocation3 + $0x48] sm:$0xf] %vm2472_vm2, %v8533_v7  ;;  %v8531_v58 = vpack.c.bf16 %v5595_v1, %v5595_v1  ;;  %v5598_v45 = vmul.f32 %v9564_v8, %v5430_v59 }
 0x4c4   : > { %v9566_v63 = vpop.eup %9565 }
 0x4c5   : > { %5723 = vst.msk [vmem:[#allocation3 + $0x40] sm:$0xf] %vm2472_vm2, %v8531_v58  ;;  %v8534_v47 = vpack.c.bf16 %v5598_v45, %v5598_v45  ;;  %v5596_v34 = vmul.f32 %v9566_v63, %v5428_v21  ;;  %v8866_v48 = vpop.f32.mrf.mxu1 }
 0x4c6   : > { %v5403_v23 = vmul.f32 %v8866_v48, %v14916_v0 }
 0x4c7   : > { %5726 = vst.msk [vmem:[#allocation3 + $0x4c] sm:$0xf] %vm2472_vm2, %v8534_v47  ;;  %v8532_v43 = vpack.c.bf16 %v5596_v34, %v5596_v34  ;;  %v5360_v55 = vpop.f32.mrf.mxu1 }
 0x4c8   : > { %v5433_v52 = vadd.f32 %v14917_v54, %v5403_v23  ;;  %v5401_v22 = vmul.f32 %v14916_v0, %v5360_v55 }
 0x4c9   : > { %5724 = vst.msk [vmem:[#allocation3 + $0x44] sm:$0xf] %vm2472_vm2, %v8532_v43  ;;  %v8867_v25 = vpop.f32.mrf.mxu1 }
 0x4ca   : > { %v6312_v9 = vld [vmem:[#allocation3 + $0x48] sm:$0x1]  ;;  %v8371_v53 = vmul.f32 -1.442695, %v5433_v52  ;;  %v5431_v19 = vadd.f32 %v14917_v54, %v5401_v22  ;;  %v5404_v5 = vmul.f32 %v8867_v25, %v14916_v0 }
 0x4cb   : > { %v6313_v35 = vsel %vm13662_vm9, 0, %v6312_v9  ;;  %v5363_v46 = vpop.f32.mrf.mxu1 }
 0x4cc   : > { %6314 = vst [vmem:[#allocation3 + $0x48] sm:$0x1] %v6313_v35  ;;  %9567 = vpow2.f32 %v8371_v53  ;;  %v8369_v2 = vmul.f32 -1.442695, %v5431_v19  ;;  %v5434_v14 = vadd.f32 %v14917_v54, %v5404_v5  ;;  %v5402_v15 = vmul.f32 %v14916_v0, %v5363_v46 }
 0x4ce   : > { %9569 = vpow2.f32 %v8369_v2  ;;  %v8372_v20 = vmul.f32 -1.442695, %v5434_v14  ;;  %v5432_v49 = vadd.f32 %v14917_v54, %v5402_v15 }
 0x4d0   : > { %v6342_v3 = vld [vmem:[#allocation3 + $0x44] sm:$0xf]  ;;  %9571 = vpow2.f32 %v8372_v20  ;;  %v8370_v31 = vmul.f32 -1.442695, %v5432_v49 }
 0x4d1   : > { %v6343_v62 = vsel %vm13684_vm11, 0, %v6342_v3 }
 0x4d2   : > { %6344 = vst [vmem:[#allocation3 + $0x44] sm:$0xf] %v6343_v62  ;;  %9573 = vpow2.f32 %v8370_v31 }
 0x4d9   : > { %v9568_v42 = vpop.eup %9567 }
 0x4da   : > { %v5529_v37 = vadd.f32 1.0, %v9568_v42 }
 0x4db   : > { %v9570_v44 = vpop.eup %9569 }
 0x4dc   : > { %9575 = vrcp.f32 %v5529_v37  ;;  %v5527_v39 = vadd.f32 1.0, %v9570_v44 }
 0x4dd   : > { %v9572_v61 = vpop.eup %9571 }
 0x4de   : > { %9577 = vrcp.f32 %v5527_v39  ;;  %v5530_v0 = vadd.f32 1.0, %v9572_v61 }
 0x4df   : > { %v9574_v6 = vpop.eup %9573 }
 0x4e0   : > { %9579 = vrcp.f32 %v5530_v0  ;;  %v5528_v16 = vadd.f32 1.0, %v9574_v6 }
 0x4e2   : > { %9581 = vrcp.f32 %v5528_v16 }
 0x4e9   : > { %v9576_v54 = vpop.eup %9575 }
 0x4ea   : > { %v5601_v32 = vmul.f32 %v9576_v54, %v5433_v52 }
 0x4eb   : > { %v9578_v10 = vpop.eup %9577 }
 0x4ec   : > { %v8537_v11 = vpack.c.bf16 %v5601_v32, %v5601_v32  ;;  %v5599_v26 = vmul.f32 %v9578_v10, %v5431_v19 }
 0x4ed   : > { %v9580_v59 = vpop.eup %9579 }
 0x4ee   : > { %5729 = vst.msk [vmem:[#allocation3 + $0x58] sm:$0xf] %vm2472_vm2, %v8537_v11  ;;  %v8535_v4 = vpack.c.bf16 %v5599_v26, %v5599_v26  ;;  %v5602_v27 = vmul.f32 %v9580_v59, %v5434_v14 }
 0x4ef   : > { %v9582_v29 = vpop.eup %9581 }
 0x4f0   : > { %5727 = vst.msk [vmem:[#allocation3 + $0x50] sm:$0xf] %vm2472_vm2, %v8535_v4  ;;  %v8538_v56 = vpack.c.bf16 %v5602_v27, %v5602_v27  ;;  %v5600_v33 = vmul.f32 %v9582_v29, %v5432_v49 }
 0x4f2   : > { %5730 = vst.msk [vmem:[#allocation3 + $0x5c] sm:$0xf] %vm2472_vm2, %v8538_v56  ;;  %v8536_v21 = vpack.c.bf16 %v5600_v33, %v5600_v33 }
 0x4f4   : > { %5728 = vst.msk [vmem:[#allocation3 + $0x54] sm:$0xf] %vm2472_vm2, %v8536_v21 }
 0x4f7   : > { %v6345_v40 = vld [vmem:[#allocation3 + $0x50] sm:$0xf] }
 0x4f8   : > { %v6346_v50 = vsel %vm13684_vm11, 0, %v6345_v40 }
 0x4f9   : > { %6347 = vst [vmem:[#allocation3 + $0x50] sm:$0xf] %v6346_v50  ;;  %v6348_v28 = vld [vmem:[#allocation3 + $0x5c] sm:$0xf]  ;;  %6359 = sbr.rel (%p8298_p9) target bundleno = 1281 (0x501), region = 104 }
 0x4fa   : > { %v6349_v41 = vsel %vm13684_vm11, 0, %v6348_v28 }
 0x4fb   : > { %6350 = vst [vmem:[#allocation3 + $0x5c] sm:$0xf] %v6349_v41  ;;  %v6315_v60 = vld [vmem:[#allocation3 + $0x54] sm:$0x1] }
 0x4fc   : > { %v6316_v57 = vsel %vm13662_vm9, 0, %v6315_v60 }
 0x4fd   : > { %6317 = vst [vmem:[#allocation3 + $0x54] sm:$0x1] %v6316_v57 }
 0x4fe   : > { %v9694_v17 = vmov 0  }
 0x4ff   : > { %6360 = vst.msk [vmem:[#allocation3] sm:$0xf] %vm2472_vm2, %v9694_v17  ;;  %6361 = vst.msk [vmem:[#allocation3 + $0x4] sm:$0xf] %vm2472_vm2, %v9694_v17 }
 0x500   : > { %6362 = vst.msk [vmem:[#allocation3 + $0x8] sm:$0xf] %vm2472_vm2, %v9694_v17 }
 0x501 PF: > { %6365 = sbr.rel (%p12175_p10) target bundleno = 1289 (0x509), region = 108 }
 0x506   : > { %v9695_v36 = vmov 0  }
 0x507   : > { %6367 = vst.msk [vmem:[#allocation3 + $0x6c] sm:$0xf] %vm2472_vm2, %v9695_v36  ;;  %6368 = vst.msk [vmem:[#allocation3 + $0x70] sm:$0xf] %vm2472_vm2, %v9695_v36 }
 0x508   : > { %6369 = vst.msk [vmem:[#allocation3 + $0x74] sm:$0xf] %vm2472_vm2, %v9695_v36 }
 0x509 PF: > { %v8666_v18 = vld [vmem:[#allocation3] sm:$0xff]   ;;  %v6725_v38 = vld [vmem:[#allocation3 + $0xc] sm:$0xff]   ;;  %v8698_v1 = vld [vmem:[#allocation3 + $0x18] sm:$0xff]  }
 0x50a   : > { %v6582_v13 = vld [vmem:[#allocation3] sm:$0xe]  ;;  %v8667_v51 = vunpack.c.l.bf16 %v8666_v18  ;;  %v8668_v24 = vunpack.c.h.bf16 %v8666_v18  ;;  %v6741_v12 = vunpack.c.l.bf16 %v6725_v38  ;;  %v6937_v7 = vld [vmem:[#allocation3 + $0xc] sm:$0xe]  ;;  %v6742_v8 = vunpack.c.h.bf16 %v6725_v38  ;;  %v14923_v48 = vld [vmem:[#allocation21_spill] sm:$0xff] }
 0x50b   : > { %v6590_v30 = vunpack.c.l.bf16 %v6582_v13  ;;  %v6945_v58 = vunpack.c.l.bf16 %v6937_v7  ;;  %v13805_v45 = vunpack.c.l.bf16 %v8698_v1  ;;  %v13807_v63 = vunpack.c.h.bf16 %v8698_v1  ;;  %v14922_v47 = vld [vmem:[#allocation20_spill] sm:$0xff]  ;;  %v14924_v55 = vld [vmem:[#allocation22_spill] sm:$0xff]  ;;  %v14925_v9 = vld [vmem:[#allocation23_spill] sm:$0xff] }
 0x50c   : > { %v6408_v34 = vmul.f32 %v8667_v51, %v14922_v47  ;;  %v6462_v23 = vmul.f32 %v8667_v51, %v14923_v48  ;;  %v6463_v43 = vmul.f32 %v8668_v24, %v14923_v48  ;;  %v6605_v22 = vmul.f32 %v8668_v24, %v14924_v55  ;;  %v14926_v35 = vld [vmem:[#allocation24_spill] sm:$0xff]  ;;  %v14927_v14 = vld [vmem:[#allocation25_spill] sm:$0xff]  ;;  %v7292_v62 = vld [vmem:[#allocation3 + $0x18] sm:$0xe] }
 0x50d   : > { %v6604_v52 = vmul.f32 %v14924_v55, %v6590_v30  ;;  %v6763_v25 = vmul.f32 %v14925_v9, %v6741_v12  ;;  %v6817_v53 = vmul.f32 %v14926_v35, %v6741_v12  ;;  %v6818_v19 = vmul.f32 %v14926_v35, %v6742_v8  ;;  %v14928_v44 = vld [vmem:[#allocation26_spill] sm:$0xff]  ;;  %v14929_v61 = vld [vmem:[#allocation27_spill] sm:$0xff]  ;;  %v6440_v6 = vld [vmem:[#allocation3 + $0x8] sm:$0x1] }
 0x50e   : > { %v6510_v5 = vrot.slane %v6462_v23, 1  ;;  %v6511_v46 = vrot.slane %v6463_v43, 1  ;;  %v6959_v15 = vmul.f32 %v14927_v14, %v6945_v58  ;;  %v6653_v20 = vrot.slane %v6605_v22, 2  ;;  %v14930_v4 = vld [vmem:[#allocation28_spill] sm:$0xff]  ;;  %v6795_v29 = vld [vmem:[#allocation3 + $0x14] sm:$0x1] }
 0x50f   : > { %v6652_v2 = vrot.slane %v6604_v52, 2  ;;  %v6865_v49 = vrot.slane %v6817_v53, 1  ;;  %v6866_v3 = vrot.slane %v6818_v19, 1  ;;  %v6960_v31 = vmul.f32 %v14927_v14, %v6742_v8  ;;  %v7150_v50 = vld [vmem:[#allocation3 + $0x20] sm:$0x1]  ;;  %v6372_v52 = vld [vmem:[#allocation3 + $0xc] sm:$0xff]  }
 0x510   : > { %v6512_v42 = vsel %vm3705_vm5, %v6510_v5, %v6511_v46  ;;  %v7007_v37 = vrot.slane %v6959_v15, 2  ;;  %v7118_v39 = vmul.f32 %v13805_v45, %v14928_v44  ;;  %v7172_v0 = vmul.f32 %v13805_v45, %v14929_v61 }
 0x511   : > { %v6566_v16 = vadd.f32 %v6512_v42, %v6408_v34  ;;  %v6654_v54 = vsel %vm3896_vm7, %v6652_v2, %v6653_v20  ;;  %v6867_v32 = vsel %vm3705_vm5, %v6865_v49, %v6866_v3  ;;  %v7008_v10 = vrot.slane %v6960_v31, 2 }
 0x512   : > { %v7173_v11 = vmul.f32 %v13807_v63, %v14929_v61  ;;  %v7220_v26 = vrot.slane %v7172_v0, 1  ;;  %v7300_v59 = vunpack.c.l.bf16 %v7292_v62  ;;  %v7315_v27 = vmul.f32 %v13807_v63, %v14930_v4  ;;  %v6583_v0 = vld [vmem:[#allocation3 + $0xc] sm:$0xe] }
 0x513   : > { %v6708_v56 = vadd.f32 %v6654_v54, %v6566_v16  ;;  %v7009_v33 = vsel %vm3896_vm7, %v7007_v37, %v7008_v10  ;;  %v6409_v21 = vmul.f32 %v8668_v24, %v14922_v47  ;;  %v6448_v40 = vunpack.c.l.bf16 %v6440_v6 }
 0x514   : > { %v7221_v28 = vrot.slane %v7173_v11, 1  ;;  %v7314_v41 = vmul.f32 %v14930_v4, %v7300_v59  ;;  %v7363_v60 = vrot.slane %v7315_v27, 2  ;;  %v6764_v57 = vmul.f32 %v14925_v9, %v6742_v8  ;;  %v6938_v27 = vld [vmem:[#allocation3 + $0x18] sm:$0xe] }
 0x515   : > { %v6779_v17 = vadd.f32 %v6763_v25, %v6708_v56  ;;  %v6464_v36 = vmul.f32 %v14923_v48, %v6448_v40  ;;  %v6606_v18 = vmul.f32 %v14924_v55, %v6448_v40  ;;  %v6803_v13 = vunpack.c.l.bf16 %v6795_v29 }
 0x516   : > { %v7222_v38 = vsel %vm3705_vm5, %v7220_v26, %v7221_v28  ;;  %v7362_v51 = vrot.slane %v7314_v41, 2  ;;  %v7119_v24 = vmul.f32 %v13807_v63, %v14928_v44  ;;  %v7158_v30 = vunpack.c.l.bf16 %v7150_v50 }
 0x517   : > { %v6921_v12 = vadd.f32 %v6867_v32, %v6779_v17  ;;  %v6513_v7 = vrot.slane %v6464_v36, 1  ;;  %v6655_v1 = vrot.slane %v6606_v18, 2  ;;  %v6819_v58 = vmul.f32 %v14926_v35, %v6803_v13 }
 0x518   : > { %v7364_v8 = vsel %vm3896_vm7, %v7362_v51, %v7363_v60  ;;  %v6961_v34 = vmul.f32 %v14927_v14, %v6803_v13  ;;  %v7174_v23 = vmul.f32 %v14929_v61, %v7158_v30  ;;  %v7316_v43 = vmul.f32 %v14930_v4, %v7158_v30 }
 0x519   : > { %v7063_v22 = vadd.f32 %v7009_v33, %v6921_v12  ;;  %v6514_v25 = vsel %vm3705_vm5, %v6511_v46, %v6513_v7  ;;  %v6656_v53 = vsel %vm3896_vm7, %v6653_v20, %v6655_v1  ;;  %v6868_v19 = vrot.slane %v6819_v58, 1  ;;  %v14932_v7 = vld [vmem:[#allocation30_spill] sm:$0xff] }
 0x51a   : > { %v6567_v5 = vadd.f32 %v6514_v25, %v6409_v21  ;;  %v7010_v2 = vrot.slane %v6961_v34, 2  ;;  %v7223_v15 = vrot.slane %v7174_v23, 1  ;;  %v7365_v49 = vrot.slane %v7316_v43, 2  ;;  %v7293_v25 = vld [vmem:[#allocation3 + $0x24] sm:$0xe] }
 0x51b   : > { %v7134_v31 = vadd.f32 %v7118_v39, %v7063_v22  ;;  %v6869_v62 = vsel %vm3705_vm5, %v6866_v3, %v6868_v19  ;;  %v6388_v42 = vunpack.c.l.bf16 %v6372_v52  ;;  %v6389_v37 = vunpack.c.h.bf16 %v6372_v52 }
 0x51c   : > { %v6709_v6 = vadd.f32 %v6656_v53, %v6567_v5  ;;  %v7011_v16 = vsel %vm3896_vm7, %v7008_v10, %v7010_v2  ;;  %v7224_v54 = vsel %vm3705_vm5, %v7221_v28, %v7223_v15  ;;  %v7366_v46 = vsel %vm3896_vm7, %v7363_v60, %v7365_v49  ;;  %v7082_v60 = vld [vmem:[#allocation3 + $0x24] sm:$0xff]  }
 0x51d   : > { %v7276_v32 = vadd.f32 %v7222_v38, %v7134_v31  ;;  %v6410_v20 = vmul.f32 %v14922_v47, %v6388_v42  ;;  %v6465_v11 = vmul.f32 %v14923_v48, %v6388_v42  ;;  %v13853_v26 = vmul.f32 %v14923_v48, %v6389_v37 }
 0x51e   : > { %v6780_v39 = vadd.f32 %v6764_v57, %v6709_v6  ;;  %v6591_v3 = vunpack.c.l.bf16 %v6583_v0  ;;  %v13856_v59 = vmul.f32 %v14924_v55, %v6389_v37  ;;  %v6765_v10 = vmul.f32 %v13805_v45, %v14925_v9  ;;  %v14931_v57 = vld [vmem:[#allocation29_spill] sm:$0xff] }
 0x51f   : > { %v7418_v29 = vadd.f32 %v7364_v8, %v7276_v32  ;;  %v6515_v56 = vrot.slane %v6465_v11, 1  ;;  %v6516_v33 = vrot.slane %v13853_v26, 1  ;;  %v6820_v21 = vmul.f32 %v13805_v45, %v14926_v35 }
 0x520   : > { %v6922_v40 = vadd.f32 %v6869_v62, %v6780_v39  ;;  %v6607_v50 = vmul.f32 %v14924_v55, %v6591_v3  ;;  %v6658_v28 = vrot.slane %v13856_v59, 2  ;;  %v13867_v41 = vmul.f32 %v13807_v63, %v14926_v35  ;;  %v6441_v62 = vld [vmem:[#allocation3 + $0x14] sm:$0x1] }
 0x521   : > { %v7440_v17 = vmul.f32 %v14931_v57, %v7418_v29  ;;  %v6517_v36 = vsel %vm3705_vm5, %v6515_v56, %v6516_v33  ;;  %v6870_v18 = vrot.slane %v6820_v21, 1  ;;  %v6946_v13 = vunpack.c.l.bf16 %v6938_v27  ;;  %v6796_v29 = vld [vmem:[#allocation3 + $0x20] sm:$0x1]  ;;  %v7151_v56 = vld [vmem:[#allocation3 + $0x2c] sm:$0x1] }
 0x522   : > { %v7064_v38 = vadd.f32 %v7011_v16, %v6922_v40  ;;  %v6568_v51 = vadd.f32 %v6517_v36, %v6410_v20  ;;  %v6657_v30 = vrot.slane %v6607_v50, 2  ;;  %v6871_v12 = vrot.slane %v13867_v41, 1 }
 0x523   : > { %v13875_v1 = vadd.f32 %v14932_v7, %v7440_v17  ;;  %v6962_v58 = vmul.f32 %v14927_v14, %v6946_v13  ;;  %v13880_v8 = vmul.f32 %v13807_v63, %v14927_v14  ;;  %v7098_v34 = vunpack.c.l.bf16 %v7082_v60 }
 0x524   : > { %v7135_v23 = vadd.f32 %v7119_v24, %v7064_v38  ;;  %v6659_v43 = vsel %vm3896_vm7, %v6657_v30, %v6658_v28  ;;  %v6872_v52 = vsel %vm3705_vm5, %v6870_v18, %v6871_v12  ;;  %v7099_v22 = vunpack.c.h.bf16 %v7082_v60 }
 0x525   : > { %v8431_v53 = vmul.f32 -1.442695, %v13875_v1  ;;  %v6710_v19 = vadd.f32 %v6659_v43, %v6568_v51  ;;  %v7012_v5 = vrot.slane %v6962_v58, 2  ;;  %v7013_v2 = vrot.slane %v13880_v8, 2 }
 0x526   : > { %v7277_v15 = vadd.f32 %v7224_v54, %v7135_v23  ;;  %v7120_v49 = vmul.f32 %v14928_v44, %v7098_v34  ;;  %v7175_v24 = vmul.f32 %v14929_v61, %v7098_v34  ;;  %v7176_v31 = vmul.f32 %v14929_v61, %v7099_v22 }
 0x527   : > { %9583 = vpow2.f32 %v8431_v53  ;;  %v6781_v42 = vadd.f32 %v6765_v10, %v6710_v19  ;;  %v7014_v0 = vsel %vm3896_vm7, %v7012_v5, %v7013_v2  ;;  %v7301_v6 = vunpack.c.l.bf16 %v7293_v25 }
 0x528   : > { %v7419_v16 = vadd.f32 %v7366_v46, %v7277_v15  ;;  %v7225_v32 = vrot.slane %v7175_v24, 1  ;;  %v7226_v20 = vrot.slane %v7176_v31, 1  ;;  %v7318_v11 = vmul.f32 %v14930_v4, %v7099_v22 }
 0x529   : > { %v6923_v39 = vadd.f32 %v6872_v52, %v6781_v42  ;;  %v7317_v54 = vmul.f32 %v14930_v4, %v7301_v6  ;;  %v6411_v3 = vmul.f32 %v14922_v47, %v6389_v37  ;;  %v6449_v27 = vunpack.c.l.bf16 %v6441_v62  ;;  %v6729_v6 = vld [vmem:[#allocation3 + $0x24] sm:$0xff]  }
 0x52a   : > { %v7441_v21 = vmul.f32 %v14931_v57, %v7419_v16  ;;  %v7227_v10 = vsel %vm3705_vm5, %v7225_v32, %v7226_v20  ;;  %v7368_v40 = vrot.slane %v7318_v11, 2  ;;  %v6766_v46 = vmul.f32 %v13807_v63, %v14925_v9 }
 0x52b   : > { %v7065_v50 = vadd.f32 %v7014_v0, %v6923_v39  ;;  %v7367_v60 = vrot.slane %v7317_v54, 2  ;;  %v6467_v17 = vmul.f32 %v14923_v48, %v6449_v27  ;;  %v6609_v36 = vmul.f32 %v14924_v55, %v6449_v27  ;;  %v6584_v0 = vld [vmem:[#allocation3 + $0x18] sm:$0xe] }
 0x52c   : > { %v13904_v18 = vadd.f32 %v14932_v7, %v7441_v21  ;;  %v6804_v37 = vunpack.c.l.bf16 %v6796_v29  ;;  %v7121_v13 = vmul.f32 %v14928_v44, %v7099_v22  ;;  %v7159_v38 = vunpack.c.l.bf16 %v7151_v56 }
 0x52d   : > { %v7136_v51 = vadd.f32 %v7120_v49, %v7065_v50  ;;  %v7369_v30 = vsel %vm3896_vm7, %v7367_v60, %v7368_v40  ;;  %v6518_v58 = vrot.slane %v6467_v17, 1  ;;  %v6660_v8 = vrot.slane %v6609_v36, 2  ;;  %v8744_v36 = vld [vmem:[#allocation3 + $0x30] sm:$0xff]  }
 0x52e   : > { %v8432_v34 = vmul.f32 -1.442695, %v13904_v18  ;;  %v6822_v23 = vmul.f32 %v14926_v35, %v6804_v37  ;;  %v6964_v43 = vmul.f32 %v14927_v14, %v6804_v37  ;;  %v7177_v52 = vmul.f32 %v14929_v61, %v7159_v38 }
 0x52f   : > { %v7278_v25 = vadd.f32 %v7227_v10, %v7136_v51  ;;  %v6519_v53 = vsel %vm3705_vm5, %v6516_v33, %v6518_v58  ;;  %v6661_v22 = vsel %vm3896_vm7, %v6658_v28, %v6660_v8  ;;  %v7319_v19 = vmul.f32 %v14930_v4, %v7159_v38 }
 0x530   : > { %9585 = vpow2.f32 %v8432_v34  ;;  %v6569_v5 = vadd.f32 %v6519_v53, %v6411_v3  ;;  %v6873_v15 = vrot.slane %v6822_v23, 1  ;;  %v7015_v49 = vrot.slane %v6964_v43, 2  ;;  %v7294_v53 = vld [vmem:[#allocation3 + $0x30] sm:$0xe] }
 0x531   : > { %v7420_v24 = vadd.f32 %v7369_v30, %v7278_v25  ;;  %v7228_v31 = vrot.slane %v7177_v52, 1  ;;  %v7370_v62 = vrot.slane %v7319_v19, 2  ;;  %v6412_v42 = vmul.f32 %v13805_v45, %v14922_v47 }
 0x532   : > { %v6711_v26 = vadd.f32 %v6661_v22, %v6569_v5  ;;  %v6874_v59 = vsel %vm3705_vm5, %v6871_v12, %v6873_v15  ;;  %v7016_v33 = vsel %vm3896_vm7, %v7013_v2, %v7015_v49  ;;  %v6468_v28 = vmul.f32 %v13805_v45, %v14923_v48 }
 0x533   : > { %v7442_v16 = vmul.f32 %v14931_v57, %v7420_v24  ;;  %v7229_v32 = vsel %vm3705_vm5, %v7226_v20, %v7228_v31  ;;  %v7371_v11 = vsel %vm3896_vm7, %v7368_v40, %v7370_v62  ;;  %v13932_v39 = vmul.f32 %v13807_v63, %v14923_v48 }
 0x534   : > { %v9584_v54 = vpop.eup %9583  ;;  %v6782_v41 = vadd.f32 %v6766_v46, %v6711_v26  ;;  %v6520_v3 = vrot.slane %v6468_v28, 1  ;;  %v6592_v12 = vunpack.c.l.bf16 %v6584_v0  ;;  %v13936_v2 = vmul.f32 %v13807_v63, %v14924_v55  ;;  %v6939_v46 = vld [vmem:[#allocation3 + $0x24] sm:$0xe] }
 0x535   : > { %v7526_v45 = vadd.f32 1.0, %v9584_v54  ;;  %v13939_v27 = vadd.f32 %v14932_v7, %v7442_v16  ;;  %v6521_v20 = vrot.slane %v13932_v39, 1  ;;  %v6745_v29 = vunpack.c.l.bf16 %v6729_v6 }
 0x536   : > { %v6924_v56 = vadd.f32 %v6874_v59, %v6782_v41  ;;  %v6610_v21 = vmul.f32 %v14924_v55, %v6592_v12  ;;  %v6663_v10 = vrot.slane %v13936_v2, 2  ;;  %v6746_v40 = vunpack.c.h.bf16 %v6729_v6 }
 0x537   : > { %9587 = vrcp.f32 %v7526_v45  ;;  %v8433_v50 = vmul.f32 -1.442695, %v13939_v27  ;;  %v6522_v60 = vsel %vm3705_vm5, %v6520_v3, %v6521_v20  ;;  %v6767_v17 = vmul.f32 %v14925_v9, %v6745_v29  ;;  %v6797_v45 = vld [vmem:[#allocation3 + $0x2c] sm:$0x1] }
 0x538   : > { %v7066_v37 = vadd.f32 %v7016_v33, %v6924_v56  ;;  %v6570_v38 = vadd.f32 %v6522_v60, %v6412_v42  ;;  %v6662_v51 = vrot.slane %v6610_v21, 2  ;;  %v6823_v30 = vmul.f32 %v14926_v35, %v6745_v29 }
 0x539   : > { %9589 = vpow2.f32 %v8433_v50  ;;  %v13951_v58 = vmul.f32 %v14926_v35, %v6746_v40  ;;  %v6947_v8 = vunpack.c.l.bf16 %v6939_v46  ;;  %v13954_v34 = vmul.f32 %v14927_v14, %v6746_v40 }
 0x53a   : > { %v7137_v23 = vadd.f32 %v7121_v13, %v7066_v37  ;;  %v6664_v43 = vsel %vm3896_vm7, %v6662_v51, %v6663_v10  ;;  %v6875_v52 = vrot.slane %v6823_v30, 1  ;;  %v13959_v25 = vunpack.c.l.bf16 %v8744_v36 }
 0x53b   : > { %v6712_v22 = vadd.f32 %v6664_v43, %v6570_v38  ;;  %v6876_v19 = vrot.slane %v13951_v58, 1  ;;  %v6965_v5 = vmul.f32 %v14927_v14, %v6947_v8  ;;  %v7018_v15 = vrot.slane %v13954_v34, 2  ;;  %v7152_v34 = vld [vmem:[#allocation3 + $0x38] sm:$0x1]  ;;  %v8449_v43 = vld [vmem:[%s9988_s7 + $0x7b] sm:$0xff] }
 0x53c   : > { %v7279_v49 = vadd.f32 %v7229_v32, %v7137_v23  ;;  %v13964_v24 = vunpack.c.h.bf16 %v8744_v36  ;;  %v7122_v13 = vmul.f32 %v13959_v25, %v14928_v44  ;;  %v7178_v31 = vmul.f32 %v13959_v25, %v14929_v61  ;;  %v6442_v32 = vld [vmem:[#allocation3 + $0x20] sm:$0x1] }
 0x53d   : > { %v9586_v62 = vpop.eup %9585  ;;  %v6783_v42 = vadd.f32 %v6767_v17, %v6712_v22  ;;  %v6877_v0 = vsel %vm3705_vm5, %v6875_v52, %v6876_v19  ;;  %v7017_v26 = vrot.slane %v6965_v5, 2  ;;  %v7302_v59 = vunpack.c.l.bf16 %v7294_v53 }
 0x53e   : > { %v7527_v33 = vadd.f32 1.0, %v9586_v62  ;;  %v7421_v28 = vadd.f32 %v7371_v11, %v7279_v49  ;;  %v13975_v6 = vmul.f32 %v13964_v24, %v14929_v61  ;;  %v7230_v16 = vrot.slane %v7178_v31, 1 }
 0x53f   : > { %v6925_v54 = vadd.f32 %v6877_v0, %v6783_v42  ;;  %v7019_v41 = vsel %vm3896_vm7, %v7017_v26, %v7018_v15  ;;  %v7320_v3 = vmul.f32 %v14930_v4, %v7302_v59  ;;  %v13981_v12 = vmul.f32 %v13964_v24, %v14930_v4 }
 0x540   : > { %9591 = vrcp.f32 %v7527_v33  ;;  %v7443_v29 = vmul.f32 %v14931_v57, %v7421_v28  ;;  %v7231_v11 = vrot.slane %v13975_v6, 1  ;;  %v6413_v56 = vmul.f32 %v13807_v63, %v14922_v47 }
 0x541   : > { %v7067_v21 = vadd.f32 %v7019_v41, %v6925_v54  ;;  %v7372_v46 = vrot.slane %v7320_v3, 2  ;;  %v7373_v50 = vrot.slane %v13981_v12, 2  ;;  %v6450_v60 = vunpack.c.l.bf16 %v6442_v32  ;;  %v6585_v32 = vld [vmem:[#allocation3 + $0x24] sm:$0xe] }
 0x542   : > { %v13989_v17 = vadd.f32 %v14932_v7, %v7443_v29  ;;  %v7232_v36 = vsel %vm3705_vm5, %v7230_v16, %v7231_v11  ;;  %v6768_v37 = vmul.f32 %v14925_v9, %v6746_v40  ;;  %v6805_v38 = vunpack.c.l.bf16 %v6797_v45  ;;  %v6376_v16 = vld [vmem:[#allocation3 + $0x24] sm:$0xff]  }
 0x543   : > { %v7138_v51 = vadd.f32 %v7122_v13, %v7067_v21  ;;  %v7374_v30 = vsel %vm3896_vm7, %v7372_v46, %v7373_v50  ;;  %v6470_v8 = vmul.f32 %v14923_v48, %v6450_v60  ;;  %v6612_v63 = vmul.f32 %v14924_v55, %v6450_v60 }
 0x544   : > { %v9588_v23 = vpop.eup %9587  ;;  %v8434_v52 = vmul.f32 -1.442695, %v13989_v17  ;;  %v6825_v53 = vmul.f32 %v14926_v35, %v6805_v38  ;;  %v6967_v22 = vmul.f32 %v14927_v14, %v6805_v38  ;;  %v14002_v40 = vmul.f32 %v13964_v24, %v14928_v44 }
 0x545   : > { %v7574_v5 = vmul.f32 %v9588_v23, %v13875_v1  ;;  %v7280_v49 = vadd.f32 %v7232_v36, %v7138_v51  ;;  %v6523_v13 = vrot.slane %v6470_v8, 1  ;;  %v6665_v31 = vrot.slane %v6612_v63, 2  ;;  %v8450_v51 = vld [vmem:[%s9988_s7 + $0x83] sm:$0xff] }
 0x546   : > { %v9590_v62 = vpop.eup %9589  ;;  %9593 = vpow2.f32 %v8434_v52  ;;  %v6878_v42 = vrot.slane %v6825_v53, 1  ;;  %v7020_v0 = vrot.slane %v6967_v22, 2  ;;  %v7160_v26 = vunpack.c.l.bf16 %v7152_v34  ;;  %v6940_v53 = vld [vmem:[#allocation3 + $0x30] sm:$0xe] }
 0x547   : > { %v7609_v59 = vadd.f32 %v8449_v43, %v7574_v5  ;;  %v7528_v33 = vadd.f32 1.0, %v9590_v62  ;;  %v7422_v28 = vadd.f32 %v7374_v30, %v7280_v49  ;;  %v6524_v6 = vsel %vm3705_vm5, %v6521_v20, %v6523_v13  ;;  %v7295_v62 = vld [vmem:[#allocation3 + $0x3c] sm:$0xe] }
 0x548   : > { %v6571_v54 = vadd.f32 %v6524_v6, %v6413_v56  ;;  %v6666_v1 = vsel %vm3896_vm7, %v6663_v10, %v6665_v31  ;;  %v6879_v41 = vsel %vm3705_vm5, %v6876_v19, %v6878_v42  ;;  %v7021_v3 = vsel %vm3896_vm7, %v7018_v15, %v7020_v0 }
 0x549   : > { %7625 = vst.msk [vmem:[%s10018_s26] sm:$0xff] %vm1830_vm1, %v7609_v59  ;;  %9595 = vrcp.f32 %v7528_v33  ;;  %v7444_v39 = vmul.f32 %v14931_v57, %v7422_v28  ;;  %v7180_v20 = vmul.f32 %v14929_v61, %v7160_v26  ;;  %v7322_v12 = vmul.f32 %v14930_v4, %v7160_v26 }
 0x54a   : > { %v6713_v45 = vadd.f32 %v6666_v1, %v6571_v54  ;;  %v6392_v2 = vunpack.c.l.bf16 %v6376_v16  ;;  %v14020_v29 = vunpack.c.h.bf16 %v6376_v16  ;;  %v6593_v10 = vunpack.c.l.bf16 %v6585_v32 }
 0x54b   : > { %v14023_v58 = vadd.f32 %v14932_v7, %v7444_v39  ;;  %v7233_v19 = vrot.slane %v7180_v20, 1  ;;  %v7375_v15 = vrot.slane %v7322_v12, 2  ;;  %v6769_v56 = vmul.f32 %v13959_v25, %v14925_v9 }
 0x54c   : > { %v6784_v21 = vadd.f32 %v6768_v37, %v6713_v45  ;;  %v6414_v46 = vmul.f32 %v14922_v47, %v6392_v2  ;;  %v6471_v60 = vmul.f32 %v14923_v48, %v6392_v2  ;;  %v14031_v36 = vmul.f32 %v14923_v48, %v14020_v29 }
 0x54d   : > { %v9592_v38 = vpop.eup %9591  ;;  %v8435_v30 = vmul.f32 -1.442695, %v14023_v58  ;;  %v7234_v8 = vsel %vm3705_vm5, %v7231_v11, %v7233_v19  ;;  %v7376_v63 = vsel %vm3896_vm7, %v7373_v50, %v7375_v15  ;;  %v6613_v34 = vmul.f32 %v14924_v55, %v6593_v10  ;;  %v7086_v50 = vld [vmem:[#allocation3 + $0x3c] sm:$0xff]  }
 0x54e   : > { %v7575_v37 = vmul.f32 %v9592_v38, %v13904_v18  ;;  %v6926_v23 = vadd.f32 %v6879_v41, %v6784_v21  ;;  %v6525_v43 = vrot.slane %v6471_v60, 1  ;;  %v6526_v52 = vrot.slane %v14031_v36, 1  ;;  %v8451_v21 = vld [vmem:[%s9988_s7 + $0xa3] sm:$0xff] }
 0x54f   : > { %9597 = vpow2.f32 %v8435_v30  ;;  %v14042_v22 = vmul.f32 %v14924_v55, %v14020_v29  ;;  %v6667_v5 = vrot.slane %v6613_v34, 2  ;;  %v6826_v11 = vmul.f32 %v13959_v25, %v14926_v35 }
 0x550   : > { %v7610_v49 = vadd.f32 %v8450_v51, %v7575_v37  ;;  %v7068_v13 = vadd.f32 %v7021_v3, %v6926_v23  ;;  %v6527_v18 = vsel %vm3705_vm5, %v6525_v43, %v6526_v52  ;;  %v14051_v31 = vmul.f32 %v13964_v24, %v14926_v35  ;;  %v6443_v51 = vld [vmem:[#allocation3 + $0x2c] sm:$0x1] }
 0x551   : > { %v6572_v42 = vadd.f32 %v6527_v18, %v6414_v46  ;;  %v6668_v0 = vrot.slane %v14042_v22, 2  ;;  %v6880_v26 = vrot.slane %v6826_v11, 1  ;;  %v6948_v59 = vunpack.c.l.bf16 %v6940_v53 }
 0x552   : > { %7626 = vst.msk [vmem:[%s10018_s26 + $0x8] sm:$0xff] %vm1830_vm1, %v7610_v49  ;;  %v7139_v33 = vadd.f32 %v14002_v40, %v7068_v13  ;;  %v6881_v28 = vrot.slane %v14051_v31, 1  ;;  %v14060_v6 = vmul.f32 %v13964_v24, %v14927_v14  ;;  %v7102_v16 = vunpack.c.l.bf16 %v7086_v50 }
 0x553   : > { %v9594_v32 = vpop.eup %9593  ;;  %v6669_v54 = vsel %vm3896_vm7, %v6667_v5, %v6668_v0  ;;  %v6968_v1 = vmul.f32 %v14927_v14, %v6948_v59  ;;  %v7103_v41 = vunpack.c.h.bf16 %v7086_v50  ;;  %v7303_v3 = vunpack.c.l.bf16 %v7295_v62 }
 0x554   : > { %v7529_v39 = vadd.f32 1.0, %v9594_v32  ;;  %v7281_v20 = vadd.f32 %v7234_v8, %v7139_v33  ;;  %v6714_v40 = vadd.f32 %v6669_v54, %v6572_v42  ;;  %v6882_v12 = vsel %vm3705_vm5, %v6880_v26, %v6881_v28 }
 0x555   : > { %v7022_v45 = vrot.slane %v6968_v1, 2  ;;  %v7023_v2 = vrot.slane %v14060_v6, 2  ;;  %v7124_v10 = vmul.f32 %v14928_v44, %v7102_v16  ;;  %v7181_v19 = vmul.f32 %v14929_v61, %v7102_v16  ;;  %v7153_v6 = vld [vmem:[#allocation3 + $0x44] sm:$0x1] }
 0x556   : > { %v9596_v15 = vpop.eup %9595  ;;  %9599 = vrcp.f32 %v7529_v39  ;;  %v7423_v46 = vadd.f32 %v7376_v63, %v7281_v20  ;;  %v6785_v60 = vadd.f32 %v6769_v56, %v6714_v40  ;;  %v14074_v38 = vmul.f32 %v14929_v61, %v7103_v41  ;;  %v6798_v56 = vld [vmem:[#allocation3 + $0x38] sm:$0x1] }
 0x557   : > { %v7576_v30 = vmul.f32 %v9596_v15, %v13939_v27  ;;  %v7024_v8 = vsel %vm3896_vm7, %v7022_v45, %v7023_v2  ;;  %v7235_v34 = vrot.slane %v7181_v19, 1  ;;  %v7323_v37 = vmul.f32 %v14930_v4, %v7303_v3 }
 0x558   : > { %v7445_v23 = vmul.f32 %v14931_v57, %v7423_v46  ;;  %v6927_v43 = vadd.f32 %v6882_v12, %v6785_v60  ;;  %v7236_v53 = vrot.slane %v14074_v38, 1  ;;  %v7324_v63 = vmul.f32 %v14930_v4, %v7103_v41 }
 0x559   : > { %v7611_v5 = vadd.f32 %v8451_v21, %v7576_v30  ;;  %v7377_v11 = vrot.slane %v7323_v37, 2  ;;  %v6415_v50 = vmul.f32 %v14922_v47, %v14020_v29  ;;  %v6451_v27 = vunpack.c.l.bf16 %v6443_v51  ;;  %v6586_v51 = vld [vmem:[#allocation3 + $0x30] sm:$0xe] }
 0x55a   : > { %v14085_v49 = vadd.f32 %v14932_v7, %v7445_v23  ;;  %v7069_v13 = vadd.f32 %v7024_v8, %v6927_v43  ;;  %v7237_v18 = vsel %vm3705_vm5, %v7235_v34, %v7236_v53  ;;  %v7378_v62 = vrot.slane %v7324_v63, 2  ;;  %v8452_v43 = vld [vmem:[%s9988_s7 + $0xab] sm:$0xff] }
 0x55b   : > { %7627 = vst.msk [vmem:[%s10018_s26 + $0x10] sm:$0xff] %vm1830_vm1, %v7611_v5  ;;  %v6473_v42 = vmul.f32 %v14923_v48, %v6451_v27  ;;  %v6615_v26 = vmul.f32 %v14924_v55, %v6451_v27  ;;  %v6770_v59 = vmul.f32 %v13964_v24, %v14925_v9  ;;  %v6806_v33 = vunpack.c.l.bf16 %v6798_v56  ;;  %v6733_v5 = vld [vmem:[#allocation3 + $0x3c] sm:$0xff]  }
 0x55c   : > { %v9598_v29 = vpop.eup %9597  ;;  %v8436_v16 = vmul.f32 -1.442695, %v14085_v49  ;;  %v7140_v32 = vadd.f32 %v7124_v10, %v7069_v13  ;;  %v7379_v54 = vsel %vm3896_vm7, %v7377_v11, %v7378_v62  ;;  %v7125_v1 = vmul.f32 %v14928_v44, %v7103_v41 }
 0x55d   : > { %v7530_v3 = vadd.f32 1.0, %v9598_v29  ;;  %v6528_v39 = vrot.slane %v6473_v42, 1  ;;  %v6670_v20 = vrot.slane %v6615_v26, 2  ;;  %v6828_v40 = vmul.f32 %v14926_v35, %v6806_v33  ;;  %v6941_v29 = vld [vmem:[#allocation3 + $0x3c] sm:$0xe] }
 0x55e   : > { %9601 = vpow2.f32 %v8436_v16  ;;  %v7282_v12 = vadd.f32 %v7237_v18, %v7140_v32  ;;  %v6970_v45 = vmul.f32 %v14927_v14, %v6806_v33  ;;  %v7161_v19 = vunpack.c.l.bf16 %v7153_v6  ;;  %v8745_v32 = vld [vmem:[#allocation3 + $0x48] sm:$0xff]  }
 0x55f   : > { %9603 = vrcp.f32 %v7530_v3  ;;  %v6529_v15 = vsel %vm3705_vm5, %v6526_v52, %v6528_v39  ;;  %v6671_v10 = vsel %vm3896_vm7, %v6668_v0, %v6670_v20  ;;  %v6883_v41 = vrot.slane %v6828_v40, 1 }
 0x560   : > { %v7424_v21 = vadd.f32 %v7379_v54, %v7282_v12  ;;  %v6573_v46 = vadd.f32 %v6529_v15, %v6415_v50  ;;  %v7025_v60 = vrot.slane %v6970_v45, 2  ;;  %v7183_v38 = vmul.f32 %v14929_v61, %v7161_v19 }
 0x561   : > { %v6884_v30 = vsel %vm3705_vm5, %v6881_v28, %v6883_v41  ;;  %v7325_v36 = vmul.f32 %v14930_v4, %v7161_v19  ;;  %v6416_v52 = vmul.f32 %v13959_v25, %v14922_v47  ;;  %v6474_v22 = vmul.f32 %v13959_v25, %v14923_v48 }
 0x562   : > { %v7446_v0 = vmul.f32 %v14931_v57, %v7424_v21  ;;  %v6715_v8 = vadd.f32 %v6671_v10, %v6573_v46  ;;  %v7026_v34 = vsel %vm3896_vm7, %v7023_v2, %v7025_v60  ;;  %v7238_v37 = vrot.slane %v7183_v38, 1 }
 0x563   : > { %v9600_v23 = vpop.eup %9599  ;;  %v7380_v63 = vrot.slane %v7325_v36, 2  ;;  %v14119_v31 = vmul.f32 %v13964_v24, %v14923_v48  ;;  %v6530_v28 = vrot.slane %v6474_v22, 1  ;;  %v6594_v56 = vunpack.c.l.bf16 %v6586_v51  ;;  %v8453_v36 = vld [vmem:[%s9988_s7 + $0xcb] sm:$0xff] }
 0x564   : > { %v7577_v11 = vmul.f32 %v9600_v23, %v13989_v17  ;;  %v14123_v25 = vadd.f32 %v14932_v7, %v7446_v0  ;;  %v6786_v50 = vadd.f32 %v6770_v59, %v6715_v8  ;;  %v7239_v2 = vsel %vm3705_vm5, %v7236_v53, %v7238_v37  ;;  %v7296_v8 = vld [vmem:[#allocation3 + $0x48] sm:$0xe] }
 0x565   : > { %v7381_v27 = vsel %vm3896_vm7, %v7378_v62, %v7380_v63  ;;  %v6531_v13 = vrot.slane %v14119_v31, 1  ;;  %v6616_v18 = vmul.f32 %v14924_v55, %v6594_v56  ;;  %v14131_v42 = vmul.f32 %v13964_v24, %v14924_v55 }
 0x566   : > { %v7612_v26 = vadd.f32 %v8452_v43, %v7577_v11  ;;  %v8437_v17 = vmul.f32 -1.442695, %v14123_v25  ;;  %v6928_v33 = vadd.f32 %v6884_v30, %v6786_v50  ;;  %v6749_v6 = vunpack.c.l.bf16 %v6733_v5 }
 0x567   : > { %v6532_v53 = vsel %vm3705_vm5, %v6530_v28, %v6531_v13  ;;  %v6672_v59 = vrot.slane %v6616_v18, 2  ;;  %v6673_v62 = vrot.slane %v14131_v42, 2  ;;  %v6750_v16 = vunpack.c.h.bf16 %v6733_v5  ;;  %v6444_v5 = vld [vmem:[#allocation3 + $0x38] sm:$0x1] }
 0x568   : > { %7628 = vst.msk [vmem:[%s10018_s26 + $0x18] sm:$0xff] %vm1830_vm1, %v7612_v26  ;;  %9605 = vpow2.f32 %v8437_v17  ;;  %v7070_v54 = vadd.f32 %v7026_v34, %v6928_v33  ;;  %v6574_v3 = vadd.f32 %v6532_v53, %v6416_v52  ;;  %v6771_v39 = vmul.f32 %v14925_v9, %v6749_v6 }
 0x569   : > { %v6674_v20 = vsel %vm3896_vm7, %v6672_v59, %v6673_v62  ;;  %v6829_v40 = vmul.f32 %v14926_v35, %v6749_v6  ;;  %v14146_v12 = vmul.f32 %v14926_v35, %v6750_v16  ;;  %v6949_v45 = vunpack.c.l.bf16 %v6941_v29  ;;  %v6799_v59 = vld [vmem:[#allocation3 + $0x44] sm:$0x1] }
 0x56a   : > { %v7141_v19 = vadd.f32 %v7125_v1, %v7070_v54  ;;  %v6716_v15 = vadd.f32 %v6674_v20, %v6574_v3  ;;  %v14149_v10 = vmul.f32 %v14927_v14, %v6750_v16  ;;  %v14151_v41 = vunpack.c.l.bf16 %v8745_v32  ;;  %v7154_v20 = vld [vmem:[#allocation3 + $0x50] sm:$0x1] }
 0x56b   : > { %v9602_v21 = vpop.eup %9601  ;;  %v6885_v46 = vrot.slane %v6829_v40, 1  ;;  %v6886_v60 = vrot.slane %v14146_v12, 1  ;;  %v6971_v38 = vmul.f32 %v14927_v14, %v6949_v45  ;;  %v14155_v51 = vunpack.c.h.bf16 %v8745_v32 }
 0x56c   : > { %v9604_v30 = vpop.eup %9603  ;;  %v7531_v52 = vadd.f32 1.0, %v9602_v21  ;;  %v7283_v22 = vadd.f32 %v7239_v2, %v7141_v19  ;;  %v6787_v0 = vadd.f32 %v6771_v39, %v6716_v15  ;;  %v7028_v1 = vrot.slane %v14149_v10, 2 }
 0x56d   : > { %v7578_v34 = vmul.f32 %v9604_v30, %v14023_v58  ;;  %v6887_v37 = vsel %vm3705_vm5, %v6885_v46, %v6886_v60  ;;  %v7027_v23 = vrot.slane %v6971_v38, 2  ;;  %v7126_v43 = vmul.f32 %v14151_v41, %v14928_v44 }
 0x56e   : > { %9607 = vrcp.f32 %v7531_v52  ;;  %v7425_v63 = vadd.f32 %v7381_v27, %v7283_v22  ;;  %v6929_v28 = vadd.f32 %v6887_v37, %v6787_v0  ;;  %v7184_v56 = vmul.f32 %v14151_v41, %v14929_v61  ;;  %v6380_v37 = vld [vmem:[#allocation3 + $0x3c] sm:$0xff]  }
 0x56f   : > { %v7613_v11 = vadd.f32 %v8453_v36, %v7578_v34  ;;  %v7029_v58 = vsel %vm3896_vm7, %v7027_v23, %v7028_v1  ;;  %v7185_v50 = vmul.f32 %v14155_v51, %v14929_v61  ;;  %v7304_v2 = vunpack.c.l.bf16 %v7296_v8 }
 0x570   : > { %v7447_v18 = vmul.f32 %v14931_v57, %v7425_v63  ;;  %v7071_v26 = vadd.f32 %v7029_v58, %v6929_v28  ;;  %v7240_v17 = vrot.slane %v7184_v56, 1  ;;  %v7327_v27 = vmul.f32 %v14155_v51, %v14930_v4 }
 0x571   : > { %7629 = vst.msk [vmem:[%s10018_s26 + $0x20] sm:$0xff] %vm1830_vm1, %v7613_v11  ;;  %v7241_v33 = vrot.slane %v7185_v50, 1  ;;  %v7326_v6 = vmul.f32 %v14930_v4, %v7304_v2  ;;  %v6417_v29 = vmul.f32 %v13964_v24, %v14922_v47  ;;  %v6452_v53 = vunpack.c.l.bf16 %v6444_v5 }
 0x572   : > { %v14181_v32 = vadd.f32 %v14932_v7, %v7447_v18  ;;  %v7142_v54 = vadd.f32 %v7126_v43, %v7071_v26  ;;  %v7383_v3 = vrot.slane %v7327_v27, 2  ;;  %v6772_v39 = vmul.f32 %v14925_v9, %v6750_v16  ;;  %v6587_v26 = vld [vmem:[#allocation3 + $0x3c] sm:$0xe]  ;;  %v8454_v27 = vld [vmem:[%s9988_s7 + $0xd3] sm:$0xff] }
 0x573   : > { %v7242_v40 = vsel %vm3705_vm5, %v7240_v17, %v7241_v33  ;;  %v7382_v45 = vrot.slane %v7326_v6, 2  ;;  %v6476_v19 = vmul.f32 %v14923_v48, %v6452_v53  ;;  %v6618_v15 = vmul.f32 %v14924_v55, %v6452_v53 }
 0x574   : > { %v8438_v21 = vmul.f32 -1.442695, %v14181_v32  ;;  %v7284_v24 = vadd.f32 %v7242_v40, %v7142_v54  ;;  %v6807_v46 = vunpack.c.l.bf16 %v6799_v59  ;;  %v7127_v38 = vmul.f32 %v14155_v51, %v14928_v44 }
 0x575   : > { %v9606_v30 = vpop.eup %9605  ;;  %v7384_v36 = vsel %vm3896_vm7, %v7382_v45, %v7383_v3  ;;  %v6533_v52 = vrot.slane %v6476_v19, 1  ;;  %v6675_v16 = vrot.slane %v6618_v15, 2  ;;  %v7162_v22 = vunpack.c.l.bf16 %v7154_v20  ;;  %v6942_v45 = vld [vmem:[#allocation3 + $0x48] sm:$0xe] }
 0x576   : > { %v7532_v0 = vadd.f32 1.0, %v9606_v30  ;;  %9609 = vpow2.f32 %v8438_v21  ;;  %v7426_v8 = vadd.f32 %v7384_v36, %v7284_v24  ;;  %v6831_v34 = vmul.f32 %v14926_v35, %v6807_v46 }
 0x577   : > { %v6534_v23 = vsel %vm3705_vm5, %v6531_v13, %v6533_v52  ;;  %v6676_v43 = vsel %vm3896_vm7, %v6673_v62, %v6675_v16  ;;  %v6973_v63 = vmul.f32 %v14927_v14, %v6807_v46  ;;  %v7186_v28 = vmul.f32 %v14929_v61, %v7162_v22 }
 0x578   : > { %9611 = vrcp.f32 %v7532_v0  ;;  %v7448_v56 = vmul.f32 %v14931_v57, %v7426_v8  ;;  %v6575_v5 = vadd.f32 %v6534_v23, %v6417_v29  ;;  %v6888_v11 = vrot.slane %v6831_v34, 1 }
 0x579   : > { %v7030_v58 = vrot.slane %v6973_v63, 2  ;;  %v7243_v50 = vrot.slane %v7186_v28, 1  ;;  %v7328_v31 = vmul.f32 %v14930_v4, %v7162_v22  ;;  %v6396_v2 = vunpack.c.l.bf16 %v6380_v37 }
 0x57a   : > { %v14203_v13 = vadd.f32 %v14932_v7, %v7448_v56  ;;  %v6717_v42 = vadd.f32 %v6676_v43, %v6575_v5  ;;  %v6889_v62 = vsel %vm3705_vm5, %v6886_v60, %v6888_v11  ;;  %v14208_v18 = vunpack.c.h.bf16 %v6380_v37 }
 0x57b   : > { %v9608_v17 = vpop.eup %9607  ;;  %v7031_v6 = vsel %vm3896_vm7, %v7028_v1, %v7030_v58  ;;  %v7244_v29 = vsel %vm3705_vm5, %v7241_v33, %v7243_v50  ;;  %v7385_v53 = vrot.slane %v7328_v31, 2  ;;  %v6418_v59 = vmul.f32 %v14922_v47, %v6396_v2 }
 0x57c   : > { %v7579_v54 = vmul.f32 %v9608_v17, %v14085_v49  ;;  %v8439_v12 = vmul.f32 -1.442695, %v14203_v13  ;;  %v6788_v20 = vadd.f32 %v6772_v39, %v6717_v42  ;;  %v6477_v60 = vmul.f32 %v14923_v48, %v6396_v2  ;;  %v7090_v39 = vld [vmem:[#allocation3 + $0x54] sm:$0xff]  }
 0x57d   : > { %v7386_v40 = vsel %vm3896_vm7, %v7383_v3, %v7385_v53  ;;  %v14222_v10 = vmul.f32 %v14923_v48, %v14208_v18  ;;  %v6595_v1 = vunpack.c.l.bf16 %v6587_v26  ;;  %v14226_v33 = vmul.f32 %v14924_v55, %v14208_v18  ;;  %v7297_v42 = vld [vmem:[#allocation3 + $0x54] sm:$0xe] }
 0x57e   : > { %v7614_v19 = vadd.f32 %v8454_v27, %v7579_v54  ;;  %9613 = vpow2.f32 %v8439_v12  ;;  %v6930_v49 = vadd.f32 %v6889_v62, %v6788_v20  ;;  %v6535_v15 = vrot.slane %v6477_v60, 1  ;;  %v8455_v26 = vld [vmem:[%s9988_s7 + $0xf3] sm:$0xff]  ;;  %v6445_v12 = vld [vmem:[#allocation3 + $0x44] sm:$0x1] }
 0x57f   : > { %v6536_v21 = vrot.slane %v14222_v10, 1  ;;  %v6619_v24 = vmul.f32 %v14924_v55, %v6595_v1  ;;  %v6678_v3 = vrot.slane %v14226_v33, 2  ;;  %v6773_v46 = vmul.f32 %v14151_v41, %v14925_v9 }
 0x580   : > { %7630 = vst.msk [vmem:[%s10018_s26 + $0x28] sm:$0xff] %vm1830_vm1, %v7614_v19  ;;  %v7072_v30 = vadd.f32 %v7031_v6, %v6930_v49  ;;  %v6832_v36 = vmul.f32 %v14151_v41, %v14926_v35  ;;  %v14239_v52 = vmul.f32 %v14155_v51, %v14926_v35  ;;  %v6950_v16 = vunpack.c.l.bf16 %v6942_v45 }
 0x581   : > { %v6537_v22 = vsel %vm3705_vm5, %v6535_v15, %v6536_v21  ;;  %v6677_v0 = vrot.slane %v6619_v24, 2  ;;  %v14246_v8 = vmul.f32 %v14155_v51, %v14927_v14  ;;  %v7106_v34 = vunpack.c.l.bf16 %v7090_v39 }
 0x582   : > { %v7143_v37 = vadd.f32 %v7127_v38, %v7072_v30  ;;  %v6576_v23 = vadd.f32 %v6537_v22, %v6418_v59  ;;  %v6890_v43 = vrot.slane %v6832_v36, 1  ;;  %v6891_v63 = vrot.slane %v14239_v52, 1  ;;  %v8456_v52 = vld [vmem:[%s9988_s7 + $0xfb] sm:$0xff] }
 0x583   : > { %v9610_v28 = vpop.eup %9609  ;;  %v6679_v56 = vsel %vm3896_vm7, %v6677_v0, %v6678_v3  ;;  %v6974_v5 = vmul.f32 %v14927_v14, %v6950_v16  ;;  %v7033_v11 = vrot.slane %v14246_v8, 2  ;;  %v7107_v58 = vunpack.c.h.bf16 %v7090_v39 }
 0x584   : > { %v7533_v50 = vadd.f32 1.0, %v9610_v28  ;;  %v7285_v31 = vadd.f32 %v7244_v29, %v7143_v37  ;;  %v6718_v2 = vadd.f32 %v6679_v56, %v6576_v23  ;;  %v6892_v38 = vsel %vm3705_vm5, %v6890_v43, %v6891_v63  ;;  %v7155_v56 = vld [vmem:[#allocation3 + $0x5c] sm:$0x1] }
 0x585   : > { %v9612_v62 = vpop.eup %9611  ;;  %v7032_v17 = vrot.slane %v6974_v5, 2  ;;  %v7128_v27 = vmul.f32 %v14928_v44, %v7106_v34  ;;  %v7187_v6 = vmul.f32 %v14929_v61, %v7106_v34  ;;  %v14261_v53 = vmul.f32 %v14929_v61, %v7107_v58 }
 0x586   : > { %v7580_v59 = vmul.f32 %v9612_v62, %v14123_v25  ;;  %9615 = vrcp.f32 %v7533_v50  ;;  %v7427_v29 = vadd.f32 %v7386_v40, %v7285_v31  ;;  %v6789_v54 = vadd.f32 %v6773_v46, %v6718_v2  ;;  %v6800_v25 = vld [vmem:[#allocation3 + $0x50] sm:$0x1] }
 0x587   : > { %v7034_v20 = vsel %vm3896_vm7, %v7032_v17, %v7033_v11  ;;  %v7245_v60 = vrot.slane %v7187_v6, 1  ;;  %v7246_v1 = vrot.slane %v14261_v53, 1  ;;  %v7305_v45 = vunpack.c.l.bf16 %v7297_v42 }
 0x588   : > { %v7615_v19 = vadd.f32 %v8455_v26, %v7580_v59  ;;  %v7449_v49 = vmul.f32 %v14931_v57, %v7427_v29  ;;  %v6931_v15 = vadd.f32 %v6892_v38, %v6789_v54  ;;  %v7330_v39 = vmul.f32 %v14930_v4, %v7107_v58 }
 0x589   : > { %v7247_v40 = vsel %vm3705_vm5, %v7245_v60, %v7246_v1  ;;  %v7329_v24 = vmul.f32 %v14930_v4, %v7305_v45  ;;  %v6419_v46 = vmul.f32 %v14922_v47, %v14208_v18  ;;  %v6453_v30 = vunpack.c.l.bf16 %v6445_v12 }
 0x58a   : > { %7631 = vst.msk [vmem:[%s10018_s26 + $0x30] sm:$0xff] %vm1830_vm1, %v7615_v19  ;;  %v14277_v36 = vadd.f32 %v14932_v7, %v7449_v49  ;;  %v7073_v16 = vadd.f32 %v7034_v20, %v6931_v15  ;;  %v7388_v22 = vrot.slane %v7330_v39, 2  ;;  %v6774_v0 = vmul.f32 %v14155_v51, %v14925_v9  ;;  %v6588_v20 = vld [vmem:[#allocation3 + $0x48] sm:$0xe] }
 0x58b   : > { %v9614_v34 = vpop.eup %9613  ;;  %v7387_v37 = vrot.slane %v7329_v24, 2  ;;  %v6479_v23 = vmul.f32 %v14923_v48, %v6453_v30  ;;  %v6621_v43 = vmul.f32 %v14924_v55, %v6453_v30  ;;  %v6808_v28 = vunpack.c.l.bf16 %v6800_v25  ;;  %v6737_v24 = vld [vmem:[#allocation3 + $0x54] sm:$0xff]  }
 0x58c   : > { %v7534_v18 = vadd.f32 1.0, %v9614_v34  ;;  %v8440_v5 = vmul.f32 -1.442695, %v14277_v36  ;;  %v7144_v50 = vadd.f32 %v7128_v27, %v7073_v16  ;;  %v7129_v31 = vmul.f32 %v14928_v44, %v7107_v58 }
 0x58d   : > { %v7389_v2 = vsel %vm3896_vm7, %v7387_v37, %v7388_v22  ;;  %v6538_v38 = vrot.slane %v6479_v23, 1  ;;  %v6680_v42 = vrot.slane %v6621_v43, 2  ;;  %v6834_v62 = vmul.f32 %v14926_v35, %v6808_v28 }
 0x58e   : > { %9617 = vrcp.f32 %v7534_v18  ;;  %v7286_v26 = vadd.f32 %v7247_v40, %v7144_v50  ;;  %v6976_v17 = vmul.f32 %v14927_v14, %v6808_v28  ;;  %v7163_v6 = vunpack.c.l.bf16 %v7155_v56  ;;  %v6943_v56 = vld [vmem:[#allocation3 + $0x54] sm:$0xe] }
 0x58f   : > { %9619 = vpow2.f32 %v8440_v5  ;;  %v6539_v53 = vsel %vm3705_vm5, %v6536_v21, %v6538_v38  ;;  %v6681_v58 = vsel %vm3896_vm7, %v6678_v3, %v6680_v42  ;;  %v6893_v27 = vrot.slane %v6834_v62, 1  ;;  %v8746_v5 = vld [vmem:[#allocation3 + $0x60] sm:$0xff]  }
 0x590   : > { %v7428_v59 = vadd.f32 %v7389_v2, %v7286_v26  ;;  %v6577_v29 = vadd.f32 %v6539_v53, %v6419_v46  ;;  %v7035_v54 = vrot.slane %v6976_v17, 2  ;;  %v7189_v12 = vmul.f32 %v14929_v61, %v7163_v6 }
 0x591   : > { %v6894_v60 = vsel %vm3705_vm5, %v6891_v63, %v6893_v27  ;;  %v7331_v10 = vmul.f32 %v14930_v4, %v7163_v6  ;;  %v6420_v21 = vmul.f32 %v14151_v41, %v14922_v47  ;;  %v6480_v33 = vmul.f32 %v14151_v41, %v14923_v48 }
 0x592   : > { %v7450_v3 = vmul.f32 %v14931_v57, %v7428_v59  ;;  %v6719_v45 = vadd.f32 %v6681_v58, %v6577_v29  ;;  %v7036_v19 = vsel %vm3896_vm7, %v7033_v11, %v7035_v54  ;;  %v7248_v49 = vrot.slane %v7189_v12, 1  ;;  %v8457_v29 = vld [vmem:[%s9988_s7 + $0x11b] sm:$0xff] }
 0x593   : > { %v9616_v15 = vpop.eup %9615  ;;  %v7390_v39 = vrot.slane %v7331_v10, 2  ;;  %v14310_v63 = vmul.f32 %v14155_v51, %v14923_v48  ;;  %v6540_v25 = vrot.slane %v6480_v33, 1  ;;  %v6596_v40 = vunpack.c.l.bf16 %v6588_v20 }
 0x594   : > { %v7581_v41 = vmul.f32 %v9616_v15, %v14181_v32  ;;  %v14314_v46 = vadd.f32 %v14932_v7, %v7450_v3  ;;  %v6790_v30 = vadd.f32 %v6774_v0, %v6719_v45  ;;  %v7249_v8 = vsel %vm3705_vm5, %v7246_v1, %v7248_v49  ;;  %v7298_v45 = vld [vmem:[#allocation3 + $0x60] sm:$0xe] }
 0x595   : > { %v7391_v11 = vsel %vm3896_vm7, %v7388_v22, %v7390_v39  ;;  %v6541_v16 = vrot.slane %v14310_v63, 1  ;;  %v6622_v34 = vmul.f32 %v14924_v55, %v6596_v40  ;;  %v14322_v37 = vmul.f32 %v14155_v51, %v14924_v55 }
 0x596   : > { %v7616_v23 = vadd.f32 %v8456_v52, %v7581_v41  ;;  %v8441_v32 = vmul.f32 -1.442695, %v14314_v46  ;;  %v6932_v43 = vadd.f32 %v6894_v60, %v6790_v30  ;;  %v6753_v28 = vunpack.c.l.bf16 %v6737_v24 }
 0x597   : > { %v6542_v1 = vsel %vm3705_vm5, %v6540_v25, %v6541_v16  ;;  %v6682_v0 = vrot.slane %v6622_v34, 2  ;;  %v6683_v22 = vrot.slane %v14322_v37, 2  ;;  %v6754_v18 = vunpack.c.h.bf16 %v6737_v24  ;;  %v6446_v24 = vld [vmem:[#allocation3 + $0x50] sm:$0x1] }
 0x598   : > { %7632 = vst.msk [vmem:[%s10018_s26 + $0x38] sm:$0xff] %vm1830_vm1, %v7616_v23  ;;  %9621 = vpow2.f32 %v8441_v32  ;;  %v7074_v50 = vadd.f32 %v7036_v19, %v6932_v43  ;;  %v6578_v2 = vadd.f32 %v6542_v1, %v6420_v21  ;;  %v6775_v38 = vmul.f32 %v14925_v9, %v6753_v28 }
 0x599   : > { %v6684_v42 = vsel %vm3896_vm7, %v6682_v0, %v6683_v22  ;;  %v6835_v62 = vmul.f32 %v14926_v35, %v6753_v28  ;;  %v14337_v26 = vmul.f32 %v14926_v35, %v6754_v18  ;;  %v6951_v17 = vunpack.c.l.bf16 %v6943_v56  ;;  %v6801_v0 = vld [vmem:[#allocation3 + $0x5c] sm:$0x1] }
 0x59a   : > { %v7145_v6 = vadd.f32 %v7129_v31, %v7074_v50  ;;  %v6720_v53 = vadd.f32 %v6684_v42, %v6578_v2  ;;  %v14340_v58 = vmul.f32 %v14927_v14, %v6754_v18  ;;  %v14342_v27 = vunpack.c.l.bf16 %v8746_v5  ;;  %v7156_v42 = vld [vmem:[#allocation3 + $0x68] sm:$0x1] }
 0x59b   : > { %v9618_v59 = vpop.eup %9617  ;;  %v6895_v54 = vrot.slane %v6835_v62, 1  ;;  %v6896_v12 = vrot.slane %v14337_v26, 1  ;;  %v6977_v20 = vmul.f32 %v14927_v14, %v6951_v17  ;;  %v14347_v60 = vunpack.c.h.bf16 %v8746_v5 }
 0x59c   : > { %v9620_v10 = vpop.eup %9619  ;;  %v7582_v21 = vmul.f32 %v9618_v59, %v14203_v13  ;;  %v7287_v33 = vadd.f32 %v7249_v8, %v7145_v6  ;;  %v6791_v31 = vadd.f32 %v6775_v38, %v6720_v53  ;;  %v7038_v3 = vrot.slane %v14340_v58, 2 }
 0x59d   : > { %v7535_v19 = vadd.f32 1.0, %v9620_v10  ;;  %v6897_v49 = vsel %vm3705_vm5, %v6895_v54, %v6896_v12  ;;  %v7037_v15 = vrot.slane %v6977_v20, 2  ;;  %v7130_v52 = vmul.f32 %v14342_v27, %v14928_v44 }
 0x59e   : > { %v7617_v39 = vadd.f32 %v8457_v29, %v7582_v21  ;;  %v7429_v25 = vadd.f32 %v7391_v11, %v7287_v33  ;;  %v6933_v40 = vadd.f32 %v6897_v49, %v6791_v31  ;;  %v7190_v13 = vmul.f32 %v14342_v27, %v14929_v61  ;;  %v6384_v49 = vld [vmem:[#allocation3 + $0x54] sm:$0xff]  }
 0x59f   : > { %9623 = vrcp.f32 %v7535_v19  ;;  %v7039_v41 = vsel %vm3896_vm7, %v7037_v15, %v7038_v3  ;;  %v7191_v30 = vmul.f32 %v14347_v60, %v14929_v61  ;;  %v7306_v8 = vunpack.c.l.bf16 %v7298_v45 }
 0x5a0   : > { %7633 = vst.msk [vmem:[%s10018_s26 + $0x40] sm:$0xff] %vm1830_vm1, %v7617_v39  ;;  %v7451_v34 = vmul.f32 %v14931_v57, %v7429_v25  ;;  %v7075_v23 = vadd.f32 %v7039_v41, %v6933_v40  ;;  %v7250_v11 = vrot.slane %v7190_v13, 1  ;;  %v7333_v32 = vmul.f32 %v14347_v60, %v14930_v4 }
 0x5a1   : > { %v7251_v43 = vrot.slane %v7191_v30, 1  ;;  %v7332_v28 = vmul.f32 %v14930_v4, %v7306_v8  ;;  %v6421_v56 = vmul.f32 %v14155_v51, %v14922_v47  ;;  %v6454_v1 = vunpack.c.l.bf16 %v6446_v24 }
 0x5a2   : > { %v14372_v5 = vadd.f32 %v14932_v7, %v7451_v34  ;;  %v7146_v50 = vadd.f32 %v7130_v52, %v7075_v23  ;;  %v7393_v2 = vrot.slane %v7333_v32, 2  ;;  %v6776_v38 = vmul.f32 %v14925_v9, %v6754_v18  ;;  %v6589_v23 = vld [vmem:[#allocation3 + $0x54] sm:$0xe] }
 0x5a3   : > { %v7252_v62 = vsel %vm3705_vm5, %v7250_v11, %v7251_v43  ;;  %v7392_v17 = vrot.slane %v7332_v28, 2  ;;  %v6482_v6 = vmul.f32 %v14923_v48, %v6454_v1  ;;  %v6624_v53 = vmul.f32 %v14924_v55, %v6454_v1 }
 0x5a4   : > { %v8442_v59 = vmul.f32 -1.442695, %v14372_v5  ;;  %v7288_v51 = vadd.f32 %v7252_v62, %v7146_v50  ;;  %v6809_v29 = vunpack.c.l.bf16 %v6801_v0  ;;  %v7131_v54 = vmul.f32 %v14347_v60, %v14928_v44  ;;  %v8458_v0 = vld [vmem:[%s9988_s7 + $0x123] sm:$0xff] }
 0x5a5   : > { %v9622_v20 = vpop.eup %9621  ;;  %v7394_v10 = vsel %vm3896_vm7, %v7392_v17, %v7393_v2  ;;  %v6543_v21 = vrot.slane %v6482_v6, 1  ;;  %v6685_v18 = vrot.slane %v6624_v53, 2  ;;  %v7164_v33 = vunpack.c.l.bf16 %v7156_v42  ;;  %v6944_v53 = vld [vmem:[#allocation3 + $0x60] sm:$0xe] }
 0x5a6   : > { %v7536_v31 = vadd.f32 1.0, %v9622_v20  ;;  %9625 = vpow2.f32 %v8442_v59  ;;  %v7430_v45 = vadd.f32 %v7394_v10, %v7288_v51  ;;  %v6837_v19 = vmul.f32 %v14926_v35, %v6809_v29 }
 0x5a7   : > { %v6544_v15 = vsel %vm3705_vm5, %v6541_v16, %v6543_v21  ;;  %v6686_v52 = vsel %vm3896_vm7, %v6683_v22, %v6685_v18  ;;  %v6979_v39 = vmul.f32 %v14927_v14, %v6809_v29  ;;  %v7192_v25 = vmul.f32 %v14929_v61, %v7164_v33 }
 0x5a8   : > { %9627 = vrcp.f32 %v7536_v31  ;;  %v7452_v40 = vmul.f32 %v14931_v57, %v7430_v45  ;;  %v6579_v13 = vadd.f32 %v6544_v15, %v6421_v56  ;;  %v6898_v24 = vrot.slane %v6837_v19, 1 }
 0x5a9   : > { %v7040_v41 = vrot.slane %v6979_v39, 2  ;;  %v7253_v30 = vrot.slane %v7192_v25, 1  ;;  %v7334_v63 = vmul.f32 %v14930_v4, %v7164_v33  ;;  %v6400_v8 = vunpack.c.l.bf16 %v6384_v49 }
 0x5aa   : > { %v14394_v16 = vadd.f32 %v14932_v7, %v7452_v40  ;;  %v6721_v37 = vadd.f32 %v6686_v52, %v6579_v13  ;;  %v6899_v22 = vsel %vm3705_vm5, %v6896_v12, %v6898_v24  ;;  %v14399_v34 = vunpack.c.h.bf16 %v6384_v49 }
 0x5ab   : > { %v7041_v11 = vsel %vm3896_vm7, %v7038_v3, %v7040_v41  ;;  %v7254_v32 = vsel %vm3705_vm5, %v7251_v43, %v7253_v30  ;;  %v7395_v28 = vrot.slane %v7334_v63, 2  ;;  %v6422_v56 = vmul.f32 %v14922_v47, %v6400_v8 }
 0x5ac   : > { %v9624_v1 = vpop.eup %9623  ;;  %v8443_v50 = vmul.f32 -1.442695, %v14394_v16  ;;  %v6792_v42 = vadd.f32 %v6776_v38, %v6721_v37  ;;  %v6483_v26 = vmul.f32 %v14923_v48, %v6400_v8  ;;  %v14411_v12 = vmul.f32 %v14923_v48, %v14399_v34  ;;  %v7299_v8 = vld [vmem:[#allocation3 + $0x6c] sm:$0xe] }
 0x5ad   : > { %v7583_v58 = vmul.f32 %v9624_v1, %v14277_v36  ;;  %v7396_v3 = vsel %vm3896_vm7, %v7393_v2, %v7395_v28  ;;  %v6597_v62 = vunpack.c.l.bf16 %v6589_v23  ;;  %v14417_v43 = vmul.f32 %v14924_v55, %v14399_v34  ;;  %v7094_v2 = vld [vmem:[#allocation3 + $0x6c] sm:$0xff]  }
 0x5ae   : > { %9629 = vpow2.f32 %v8443_v50  ;;  %v6934_v17 = vadd.f32 %v6899_v22, %v6792_v42  ;;  %v6545_v6 = vrot.slane %v6483_v26, 1  ;;  %v6546_v38 = vrot.slane %v14411_v12, 1  ;;  %v8459_v22 = vld [vmem:[%s9988_s7 + $0x143] sm:$0xff]  ;;  %v6447_v50 = vld [vmem:[#allocation3 + $0x5c] sm:$0x1] }
 0x5af   : > { %v7618_v59 = vadd.f32 %v8458_v0, %v7583_v58  ;;  %v6625_v51 = vmul.f32 %v14924_v55, %v6597_v62  ;;  %v6688_v29 = vrot.slane %v14417_v43, 2  ;;  %v6777_v36 = vmul.f32 %v14342_v27, %v14925_v9 }
 0x5b0   : > { %v7076_v20 = vadd.f32 %v7041_v11, %v6934_v17  ;;  %v6547_v10 = vsel %vm3705_vm5, %v6545_v6, %v6546_v38  ;;  %v6838_v21 = vmul.f32 %v14342_v27, %v14926_v35  ;;  %v14431_v18 = vmul.f32 %v14347_v60, %v14926_v35 }
 0x5b1   : > { %7634 = vst.msk [vmem:[%s10018_s26 + $0x48] sm:$0xff] %vm1830_vm1, %v7618_v59  ;;  %v6580_v33 = vadd.f32 %v6547_v10, %v6422_v56  ;;  %v6687_v31 = vrot.slane %v6625_v51, 2  ;;  %v6952_v45 = vunpack.c.l.bf16 %v6944_v53  ;;  %v14437_v19 = vmul.f32 %v14347_v60, %v14927_v14  ;;  %v6802_v59 = vld [vmem:[#allocation3 + $0x68] sm:$0x1] }
 0x5b2   : > { %v7147_v49 = vadd.f32 %v7131_v54, %v7076_v20  ;;  %v6900_v15 = vrot.slane %v6838_v21, 1  ;;  %v6901_v52 = vrot.slane %v14431_v18, 1  ;;  %v7110_v39 = vunpack.c.l.bf16 %v7094_v2 }
 0x5b3   : > { %v9626_v27 = vpop.eup %9625  ;;  %v6689_v25 = vsel %vm3896_vm7, %v6687_v31, %v6688_v29  ;;  %v6980_v40 = vmul.f32 %v14927_v14, %v6952_v45  ;;  %v7043_v13 = vrot.slane %v14437_v19, 2  ;;  %v14445_v24 = vunpack.c.h.bf16 %v7094_v2  ;;  %v8461_v19 = vld [vmem:[%s9988_s7 + $0x16b] sm:$0xff] }
 0x5b4   : > { %v7537_v41 = vadd.f32 1.0, %v9626_v27  ;;  %v7289_v30 = vadd.f32 %v7254_v32, %v7147_v49  ;;  %v6722_v63 = vadd.f32 %v6689_v25, %v6580_v33  ;;  %v6902_v54 = vsel %vm3705_vm5, %v6900_v15, %v6901_v52  ;;  %v7157_v15 = vld [vmem:[#allocation3 + $0x74] sm:$0x1] }
 0x5b5   : > { %v9628_v37 = vpop.eup %9627  ;;  %v7042_v23 = vrot.slane %v6980_v40, 2  ;;  %v7132_v11 = vmul.f32 %v14928_v44, %v7110_v39  ;;  %v7193_v28 = vmul.f32 %v14929_v61, %v7110_v39  ;;  %v14455_v56 = vmul.f32 %v14929_v61, %v14445_v24 }
 0x5b6   : > { %v7584_v1 = vmul.f32 %v9628_v37, %v14314_v46  ;;  %9631 = vrcp.f32 %v7537_v41  ;;  %v7431_v32 = vadd.f32 %v7396_v3, %v7289_v30  ;;  %v6793_v0 = vadd.f32 %v6777_v36, %v6722_v63 }
 0x5b7   : > { %v7044_v42 = vsel %vm3896_vm7, %v7042_v23, %v7043_v13  ;;  %v7255_v26 = vrot.slane %v7193_v28, 1  ;;  %v7256_v58 = vrot.slane %v14455_v56, 1  ;;  %v7307_v62 = vunpack.c.l.bf16 %v7299_v8 }
 0x5b8   : > { %v7619_v17 = vadd.f32 %v8459_v22, %v7584_v1  ;;  %v7453_v6 = vmul.f32 %v14931_v57, %v7431_v32  ;;  %v6935_v53 = vadd.f32 %v6902_v54, %v6793_v0  ;;  %v7336_v46 = vmul.f32 %v14930_v4, %v14445_v24  ;;  %v8460_v1 = vld [vmem:[%s9988_s7 + $0x14b] sm:$0xff] }
 0x5b9   : > { %v7335_v3 = vmul.f32 %v14930_v4, %v7307_v62  ;;  %v6455_v51 = vunpack.c.l.bf16 %v6447_v50  ;;  %v7257_v20 = vsel %vm3705_vm5, %v7255_v26, %v7256_v58  ;;  %v6810_v49 = vunpack.c.l.bf16 %v6802_v59 }
 0x5ba   : > { %7635 = vst.msk [vmem:[%s10018_s26 + $0x50] sm:$0xff] %vm1830_vm1, %v7619_v17  ;;  %v14469_v36 = vadd.f32 %v14932_v7, %v7453_v6  ;;  %v7077_v2 = vadd.f32 %v7044_v42, %v6935_v53  ;;  %v7398_v10 = vrot.slane %v7336_v46, 2  ;;  %v6423_v40 = vmul.f32 %v14922_v47, %v14399_v34 }
 0x5bb   : > { %v9630_v21 = vpop.eup %9629  ;;  %v7397_v33 = vrot.slane %v7335_v3, 2  ;;  %v6485_v31 = vmul.f32 %v14923_v48, %v6455_v51  ;;  %v6627_v45 = vmul.f32 %v14924_v55, %v6455_v51  ;;  %v6840_v54 = vmul.f32 %v14926_v35, %v6810_v49 }
 0x5bc   : > { %v7538_v39 = vadd.f32 1.0, %v9630_v21  ;;  %v8444_v27 = vmul.f32 -1.442695, %v14469_v36  ;;  %v7148_v25 = vadd.f32 %v7132_v11, %v7077_v2  ;;  %v6982_v55 = vmul.f32 %v14927_v14, %v6810_v49 }
 0x5bd   : > { %v7399_v41 = vsel %vm3896_vm7, %v7397_v33, %v7398_v10  ;;  %v6548_v30 = vrot.slane %v6485_v31, 1  ;;  %v6690_v63 = vrot.slane %v6627_v45, 2  ;;  %v7165_v8 = vunpack.c.l.bf16 %v7157_v15  ;;  %v8463_v45 = vld [vmem:[%s9988_s7 + $0x193] sm:$0xff] }
 0x5be   : > { %9633 = vrcp.f32 %v7538_v39  ;;  %v7290_v48 = vadd.f32 %v7257_v20, %v7148_v25  ;;  %v6903_v34 = vrot.slane %v6840_v54, 1  ;;  %v6778_v35 = vmul.f32 %v14347_v60, %v14925_v9  ;;  %v8462_v20 = vld [vmem:[%s9988_s7 + $0x173] sm:$0xff]  ;;  %v8464_v39 = vld [vmem:[%s9988_s7 + $0x19b] sm:$0xff] }
 0x5bf   : > { %9635 = vpow2.f32 %v8444_v27  ;;  %v6549_v37 = vsel %vm3705_vm5, %v6546_v38, %v6548_v30  ;;  %v6691_v47 = vsel %vm3896_vm7, %v6688_v29, %v6690_v63  ;;  %v7045_v11 = vrot.slane %v6982_v55, 2 }
 0x5c0   : > { %v7432_v22 = vadd.f32 %v7399_v41, %v7290_v48  ;;  %v6581_v23 = vadd.f32 %v6549_v37, %v6423_v40  ;;  %v7195_v28 = vmul.f32 %v14929_v61, %v7165_v8  ;;  %v6904_v43 = vsel %vm3705_vm5, %v6901_v52, %v6903_v34 }
 0x5c1   : > { %v7337_v38 = vmul.f32 %v14930_v4, %v7165_v8  ;;  %v7046_v61 = vsel %vm3896_vm7, %v7043_v13, %v7045_v11  ;;  %v7133_v18 = vmul.f32 %v14928_v44, %v14445_v24 }
 0x5c2   : > { %v7454_v14 = vmul.f32 %v14931_v57, %v7432_v22  ;;  %v6723_v56 = vadd.f32 %v6691_v47, %v6581_v23  ;;  %v7258_v32 = vrot.slane %v7195_v28, 1 }
 0x5c3   : > { %v9632_v12 = vpop.eup %9631  ;;  %v7400_v52 = vrot.slane %v7337_v38, 2 }
 0x5c4   : > { %v7585_v29 = vmul.f32 %v9632_v12, %v14372_v5  ;;  %v7476_v9 = vadd.f32 %v14932_v7, %v7454_v14  ;;  %v6794_v60 = vadd.f32 %v6778_v35, %v6723_v56  ;;  %v7259_v5 = vsel %vm3705_vm5, %v7256_v58, %v7258_v32 }
 0x5c5   : > { %v7401_v13 = vsel %vm3896_vm7, %v7398_v10, %v7400_v52 }
 0x5c6   : > { %v7620_v0 = vadd.f32 %v8460_v1, %v7585_v29  ;;  %v8445_v50 = vmul.f32 -1.442695, %v7476_v9  ;;  %v6936_v42 = vadd.f32 %v6904_v43, %v6794_v60 }
 0x5c8   : > { %7636 = vst.msk [vmem:[%s10018_s26 + $0x58] sm:$0xff] %vm1830_vm1, %v7620_v0  ;;  %9637 = vpow2.f32 %v8445_v50  ;;  %v7078_v4 = vadd.f32 %v7046_v61, %v6936_v42 }
 0x5ca   : > { %v7149_v26 = vadd.f32 %v7133_v18, %v7078_v4 }
 0x5cb   : > { %v9634_v62 = vpop.eup %9633 }
 0x5cc   : > { %v9636_v17 = vpop.eup %9635  ;;  %v7586_v6 = vmul.f32 %v9634_v62, %v14394_v16  ;;  %v7291_v53 = vadd.f32 %v7259_v5, %v7149_v26 }
 0x5cd   : > { %v7539_v46 = vadd.f32 1.0, %v9636_v17 }
 0x5ce   : > { %v7621_v44 = vadd.f32 %v8461_v19, %v7586_v6  ;;  %v7433_v24 = vadd.f32 %v7401_v13, %v7291_v53 }
 0x5cf   : > { %9639 = vrcp.f32 %v7539_v46 }
 0x5d0   : > { %7637 = vst.msk [vmem:[%s10018_s26 + $0x60] sm:$0xff] %vm1830_vm1, %v7621_v44  ;;  %v7455_v58 = vmul.f32 %v14931_v57, %v7433_v24 }
 0x5d2   : > { %v7477_v59 = vadd.f32 %v14932_v7, %v7455_v58 }
 0x5d4   : > { %v8446_v3 = vmul.f32 -1.442695, %v7477_v59 }
 0x5d5   : > { %v9638_v51 = vpop.eup %9637 }
 0x5d6   : > { %v7540_v2 = vadd.f32 1.0, %v9638_v51  ;;  %9641 = vpow2.f32 %v8446_v3 }
 0x5d8   : > { %9643 = vrcp.f32 %v7540_v2 }
 0x5dc   : > { %v9640_v16 = vpop.eup %9639 }
 0x5dd   : > { %v7587_v10 = vmul.f32 %v9640_v16, %v14469_v36 }
 0x5df   : > { %v7622_v21 = vadd.f32 %v8462_v20, %v7587_v10 }
 0x5e1   : > { %7638 = vst.msk [vmem:[%s10018_s26 + $0x68] sm:$0xff] %vm1830_vm1, %v7622_v21 }
 0x5e3   : > { %v9642_v33 = vpop.eup %9641 }
 0x5e4   : > { %v7541_v31 = vadd.f32 1.0, %v9642_v33 }
 0x5e5   : > { %v9644_v57 = vpop.eup %9643 }
 0x5e6   : > { %v7588_v7 = vmul.f32 %v9644_v57, %v7476_v9  ;;  %9645 = vrcp.f32 %v7541_v31 }
 0x5e8   : > { %v7623_v49 = vadd.f32 %v8463_v45, %v7588_v7 }
 0x5ea   : > { %7639 = vst.msk [vmem:[%s10018_s26 + $0x70] sm:$0xff] %vm1830_vm1, %v7623_v49 }
 0x5f3   : > { %v9646_v15 = vpop.eup %9645 }
 0x5f4   : > { %v7589_v27 = vmul.f32 %v9646_v15, %v7477_v59 }
 0x5f6   : > { %v7624_v25 = vadd.f32 %v8464_v39, %v7589_v27 }
 0x5f8   : > { %7640 = vst.msk [vmem:[%s10018_s26 + $0x78] sm:$0xff] %vm1830_vm1, %v7624_v25 }
 0x5f9 PF: > { %s26_s25 = sadd.s32 1, %s9685_s25   ;;  %s14933_s30 = sld [smem:[#allocation4_spill]] }
 0x5fa   : > { %p23_p11 = scmp.ge.s32.totalorder %s26_s25, 6   ;;  %s14934_s20 = sld [smem:[#allocation5_spill]] }
 0x5fb   : > { %s14935_s21 = smov %s9677_s23  ;;  %s14936_s22 = smov %s9681_s24 }
 0x5fc   :  { %25 = sbr.rel (!%p23_p11) target bundleno = 8 (0x8), region = 157 }
 0x5ff   : > { %s14937_s23 = smov %s14933_s30 }
 0x600   : > { %s14938_s24 = smov %s14934_s20 }

</bundles_post_ra>
